<compile_context>
chip_gen: v7x
topology: tpu7x:2x2x1
jax: 0.10.0
libtpu: 0.0.40
codegen_flags: <defaults>
</compile_context>

<pallas_src>
import jax
import jax.numpy as jnp
import numpy as np
from jax.experimental import pallas as pl
from jax.experimental.pallas import tpu as pltpu


def _fused_deconv_prelu_kernel(x_ref, w_ref, b_ref, a_ref, o_ref, col_ref):
    # x_ref  : (1, 1, TD+2, H+2, WpC_pad)  bf16  lane-packed, halo-padded input tile
    # w_ref  : (9*WpC_pad, W*Cout)         bf16  banded, phase-fused weight
    # b_ref  : (1, W*Cout)                 f32   bias  (columns ordered (rd, rh, n, w, rw))
    # a_ref  : (1, W*Cout)                 f32   PReLU alpha (same column order)
    # o_ref  : (1, 1, TD*H, W*Cout)        bf16  flat output slab
    # col_ref: (TD*H, 9*WpC_pad)           bf16  VMEM im2col scratch
    _, _, TDp2, Hp, WpC_pad = x_ref.shape
    TD, H = TDp2 - 2, Hp - 2
    M = TD * H

    # im2col over the 9 (jd, jh) taps.  Each slab is (TD*H, WpC_pad) and lands at a
    # 128-aligned column offset t*WpC_pad -> unmasked lane-dense stores.  The jw taps are
    # folded into the banded weight, so no per-tap channel slivers.
    # (If H % 8 != 0 the (TD, H)->(M,) merge crosses sublane tiling: still correct,
    #  just slower; test shapes keep H a multiple of 8.)
    for jd in range(3):
        for jh in range(3):
            t = jd * 3 + jh
            slab = x_ref[0, 0, jd:jd + TD, jh:jh + H, :]          # (TD, H, WpC_pad)
            col_ref[:, t * WpC_pad:(t + 1) * WpC_pad] = slab.reshape(M, WpC_pad)

    # Single fused MXU matmul (bf16 operands, f32 accumulate) + bias + per-channel PReLU.
    acc = jnp.dot(col_ref[...], w_ref[...], preferred_element_type=jnp.float32)
    acc = acc + b_ref[...]
    out = jnp.where(acc >= 0, acc, a_ref[...] * acc)
    o_ref[0, 0] = out.astype(o_ref.dtype)                         # lane-dense bf16 store


def prepare_srblock3d(deconv_w, deconv_b, prelu_a, W):
    """One-time parameter preparation (hoist out of the per-call path).

    deconv_w: (Cin, n, 6, 6, 6) ConvTranspose3d weight; deconv_b / prelu_a: (n,).
    W: input spatial width (the banding is width-specific).
    Returns (w_fused bf16, bias_row f32, alpha_row f32)."""
    Cin, n = deconv_w.shape[0], deconv_w.shape[1]
    up = 2
    Cout = (up ** 3) * n
    Wp = W + 2
    WpC = Wp * Cin
    WpC_pad = ((WpC + 127) // 128) * 128                          # lane-align the packed width
    WCout = W * Cout

    # Phase decomposition of ConvTranspose3d(k=6, s=2, p=2):
    #   out[2q+r] = sum_{j in 0..2} x[q + j - 1] * K[2*(2-j) + r]   per spatial axis.
    j = jnp.arange(3)
    r = jnp.arange(2)
    kidx = 2 * (2 - j)[:, None] + r[None, :]                      # (3, 2)
    Kf = deconv_w[:, :, kidx]                                     # (Ci, n, jd, rd, kh, kw)
    Kf = Kf[:, :, :, :, kidx]                                     # (Ci, n, jd, rd, jh, rh, kw)
    Kf = Kf[:, :, :, :, :, :, kidx]                               # (Ci, n, jd, rd, jh, rh, jw, rw)
    # Output columns ordered (rd, rh, n, w, rw) -> shuffle-friendly epilogue.
    Kph = jnp.transpose(Kf, (2, 4, 6, 0, 3, 5, 1, 7))             # (jd, jh, jw, Ci, rd, rh, n, rw)

    # Band the jw taps along W: B[.., w_in, c, .., w_out, rw] = Kph[.., jw=w_in-w_out, ..].
    w_in = jnp.arange(Wp)[:, None]
    w_out = jnp.arange(W)[None, :]
    jw = w_in - w_out                                             # (Wp, W)
    valid = (jw >= 0) & (jw <= 2)
    g = Kph[:, :, jnp.clip(jw, 0, 2)]                             # (jd, jh, Wp, W, Ci, rd, rh, n, rw)
    g = jnp.where(valid[None, None, :, :, None, None, None, None, None], g, 0.0)
    g = jnp.transpose(g, (0, 1, 2, 4, 5, 6, 7, 3, 8))             # (jd, jh, w_in, Ci, rd, rh, n, w_out, rw)
    g = g.reshape(3, 3, WpC, WCout)
    g = jnp.pad(g, ((0, 0), (0, 0), (0, WpC_pad - WpC), (0, 0)))  # zero rows for the lane pad
    w_fused = g.reshape(9 * WpC_pad, WCout).astype(jnp.bfloat16)

    bias_row = jnp.broadcast_to(deconv_b[None, None, :, None, None],
                                (2, 2, n, W, 2)).reshape(1, WCout).astype(jnp.float32)
    alpha_row = jnp.broadcast_to(prelu_a[None, None, :, None, None],
                                 (2, 2, n, W, 2)).reshape(1, WCout).astype(jnp.float32)
    return w_fused, bias_row, alpha_row


def srblock3d_forward(x, params, out_dtype=jnp.bfloat16):
    """x: (N, Cin, D, H, W) f32; params from prepare_srblock3d.

    Returns PReLU(ConvTranspose3d(k=6, s=2, p=2)(x)) as (N, n, 2D, 2H, 2W).
    Note: emitted in bf16 by default (review: output is the dominant HBM stream);
    pass out_dtype=jnp.float32 to exactly match the PyTorch module's dtype."""
    w_fused, bias_row, alpha_row = params
    N, Cin, D, H, W = x.shape
    up = 2
    WCout = w_fused.shape[1]
    n = WCout // ((up ** 3) * W)
    Hp, Wp = H + 2, W + 2
    WpC = Wp * Cin
    WpC_pad = w_fused.shape[0] // 9

    # --- D tiling: target M = TD*H ~ 256-512; pad D so any D works (no TD=1 fallback).
    M_TARGET = 512
    TD = max(1, min(D, M_TARGET // max(1, H)))
    if N == 1:
        TD = min(TD, max(1, (D + 1) // 2))      # keep >= 2 grid programs (megacore / 2-TC v7x)
    ND = pl.cdiv(D, TD)
    D_pad = ND * TD
    M = TD * H

    # --- Lane-packed, halo-padded, lane-aligned input tiles: (N, ND, TD+2, H+2, WpC_pad) bf16.
    # The input is up^3 * Cout/Cin times smaller than the output, so this prep is cheap.
    x_cl = jnp.transpose(x, (0, 2, 3, 4, 1))                      # NDHWC
    xpad = jnp.pad(x_cl, ((0, 0), (1, 1), (1, 1), (1, 1), (0, 0)))
    xpad = xpad.reshape(N, D + 2, Hp, WpC)
    xpad = jnp.pad(xpad, ((0, 0), (0, D_pad - D), (0, 0), (0, WpC_pad - WpC)))
    xpad = xpad.astype(jnp.bfloat16)
    # TODO(synk): halo windows are duplicated here ((TD+2)/TD over-read); a manual-DMA
    # (memory_space=pl.ANY) version would avoid it but is not worth it at these tile sizes.
    x_tiles = jnp.stack([xpad[:, t * TD:t * TD + TD + 2] for t in range(ND)], axis=1)

    flops = 2 * N * D_pad * H * (9 * WpC_pad) * WCout             # performed (banded) flops
    bytes_accessed = (x_tiles.size * 2 + w_fused.size * 2
                      + (bias_row.size + alpha_row.size) * 4
                      + N * ND * M * WCout * 2)

    # Per-tile VMEM (test shapes): col 0.6 MB + weight 2.4 MB x2 + out 0.5 MB x2 + x 83 KB x2
    # ~ 6.7 MB: fits the 16/32 MiB scoped defaults on all generations.
    # TODO(synk): for production W / n, add a WCout grid axis + block-band W so the banded
    # weight and output block stay bounded on v7x's 64 MiB VMEM.
    y = pl.pallas_call(
        _fused_deconv_prelu_kernel,
        out_shape=jax.ShapeDtypeStruct((N, ND, M, WCout), jnp.bfloat16),
        grid_spec=pltpu.PrefetchScalarGridSpec(
            num_scalar_prefetch=0,
            grid=(N, ND),
            in_specs=[
                pl.BlockSpec((1, 1, TD + 2, Hp, WpC_pad), lambda b, t: (b, t, 0, 0, 0)),
                pl.BlockSpec((9 * WpC_pad, WCout), lambda b, t: (0, 0)),
                pl.BlockSpec((1, WCout), lambda b, t: (0, 0)),
                pl.BlockSpec((1, WCout), lambda b, t: (0, 0)),
            ],
            out_specs=pl.BlockSpec((1, 1, M, WCout), lambda b, t: (b, t, 0, 0)),
            scratch_shapes=[pltpu.VMEM((M, 9 * WpC_pad), jnp.bfloat16)],
        ),
        compiler_params=pltpu.CompilerParams(
            dimension_semantics=("parallel", "parallel")),
        cost_estimate=pl.CostEstimate(flops=flops, transcendentals=0,
                                      bytes_accessed=bytes_accessed),
    )(x_tiles, w_fused, bias_row, alpha_row)

    # --- Pixel-shuffle back to NCDHW.  Columns are (rd, rh, n, w, rw): the permute's
    # inner run is the contiguous (w, rw) pair, so this is near-streaming bandwidth.
    y = y.reshape(N, D_pad, H, WCout)[:, :D]                      # drop D padding
    y = y.reshape(N, D, H, up, up, n, W, up)                      # (N, D, H, rd, rh, n, W, rw)
    y = jnp.transpose(y, (0, 5, 1, 3, 2, 4, 6, 7))                # (N, n, D, rd, H, rh, W, rw)
    return y.reshape(N, n, up * D, up * H, up * W).astype(out_dtype)


def srblock3d_deconv_prelu(x, deconv_w, deconv_b, prelu_a, out_dtype=jnp.bfloat16):
    """Convenience one-shot wrapper (prefer caching prepare_srblock3d for repeated calls)."""
    params = prepare_srblock3d(deconv_w, deconv_b, prelu_a, x.shape[-1])
    return srblock3d_forward(x, params, out_dtype=out_dtype)


def _reference(x, deconv_w, deconv_b, prelu_a):
    """Pure-JAX ConvTranspose3d(k=6, s=2, p=2) + PReLU reference (NCDHW, f32, high precision)."""
    k = deconv_w.shape[2]
    Wc = jnp.flip(deconv_w, axis=(2, 3, 4))
    Wc = jnp.transpose(Wc, (1, 0, 2, 3, 4))                       # OIDHW
    y = jax.lax.conv_general_dilated(
        x, Wc, window_strides=(1, 1, 1),
        padding=[(k - 1 - 2,) * 2] * 3,
        lhs_dilation=(2, 2, 2),
        dimension_numbers=("NCDHW", "OIDHW", "NCDHW"),
        precision=jax.lax.Precision.HIGHEST)
    y = y + deconv_b[None, :, None, None, None]
    a = prelu_a[None, :, None, None, None]
    return jnp.where(y >= 0, y, a * y)


if __name__ == "__main__":
    key = jax.random.PRNGKey(0)
    k1, k2, k3, k4 = jax.random.split(key, 4)

    N, Cin, n = 2, 4, 8
    D = H = W = 16

    x = jax.random.normal(k1, (N, Cin, D, H, W), jnp.float32)
    # Deterministic synthetic parameters (ConvTranspose3d weight layout is (in_c, n, 6,6,6)).
    # TODO(synk): original module applies deconvICNR re-init; plain normal(0, 0.02) used here.
    deconv_w = 0.02 * jax.random.normal(k2, (Cin, n, 6, 6, 6), jnp.float32)
    deconv_b = 0.02 * jax.random.normal(k3, (n,), jnp.float32)
    prelu_a = 0.25 + 0.05 * jax.random.normal(k4, (n,), jnp.float32)

    # Weight prep hoisted out of the per-call path; forward jitted with params closed over.
    params = prepare_srblock3d(deconv_w, deconv_b, prelu_a, W)
    fwd = jax.jit(lambda xv: srblock3d_forward(xv, params))

    out = jax.block_until_ready(fwd(x))
    assert out.shape == (N, n, 2 * D, 2 * H, 2 * W), out.shape

    ref = _reference(x, deconv_w, deconv_b, prelu_a)
    # Tolerances account for bf16 MXU operands + bf16 output (f32 accumulation in-kernel).
    np.testing.assert_allclose(np.asarray(out, dtype=np.float32), np.asarray(ref),
                               rtol=2e-2, atol=2e-2)

    print("KERNEL_OK")
</pallas_src>

<mosaic_0001>
module attributes {stable_mosaic.version = 11 : i64} {
  func.func @_fused_deconv_prelu_kernel(%arg0: i32, %arg1: i32, %arg2: memref<1x1x18x18x128xbf16, #tpu.memory_space<vmem>>, %arg3: memref<1152x1024xbf16, #tpu.memory_space<vmem>>, %arg4: memref<1x1024xf32, #tpu.memory_space<vmem>>, %arg5: memref<1x1024xf32, #tpu.memory_space<vmem>>, %arg6: memref<1x1x256x1024xbf16, #tpu.memory_space<vmem>>, %arg7: memref<256x1152xbf16, #tpu.memory_space<vmem>>) attributes {dimension_semantics = [#tpu.dimension_semantics<parallel>, #tpu.dimension_semantics<parallel>], iteration_bounds = array<i64: 2, 1>, scalar_prefetch = 0 : i64, scratch_operands = 1 : i64, tpu.core_type = #tpu.core_type<tc>, window_params = [{transform_indices = @transform_0, window_bounds = array<i64: 1, 1, 18, 18, 128>}, {pipeline_mode = #tpu.pipeline_mode<synchronous>, transform_indices = @transform_1, window_bounds = array<i64: 1152, 1024>}, {pipeline_mode = #tpu.pipeline_mode<synchronous>, transform_indices = @transform_2, window_bounds = array<i64: 1, 1024>}, {pipeline_mode = #tpu.pipeline_mode<synchronous>, transform_indices = @transform_3, window_bounds = array<i64: 1, 1024>}, {transform_indices = @transform_4, window_bounds = array<i64: 1, 1, 256, 1024>}]} {
    %c0 = arith.constant 0 : index
    %c0_0 = arith.constant 0 : index
    %c0_1 = arith.constant 0 : index
    %c0_2 = arith.constant 0 : index
    %c0_3 = arith.constant 0 : index
    %0 = vector.load %arg2[%c0, %c0_0, %c0_1, %c0_2, %c0_3] : memref<1x1x18x18x128xbf16, #tpu.memory_space<vmem>>, vector<1x1x16x16x128xbf16>
    %1 = vector.shape_cast %0 : vector<1x1x16x16x128xbf16> to vector<16x16x128xbf16>
    %2 = vector.shape_cast %1 : vector<16x16x128xbf16> to vector<256x128xbf16>
    %c0_4 = arith.constant 0 : index
    %c0_5 = arith.constant 0 : index
    %3 = vector.load %arg7[%c0_4, %c0_5] : memref<256x1152xbf16, #tpu.memory_space<vmem>>, vector<256x128xbf16>
    tpu.vector_store %arg7[%c0_4, %c0_5], %2 {strides = array<i32>} : memref<256x1152xbf16, #tpu.memory_space<vmem>>, vector<256x128xbf16>,
    %c0_6 = arith.constant 0 : index
    %c0_7 = arith.constant 0 : index
    %c0_8 = arith.constant 0 : index
    %c1 = arith.constant 1 : index
    %c0_9 = arith.constant 0 : index
    %4 = vector.load %arg2[%c0_6, %c0_7, %c0_8, %c1, %c0_9] : memref<1x1x18x18x128xbf16, #tpu.memory_space<vmem>>, vector<1x1x16x16x128xbf16>
    %5 = vector.shape_cast %4 : vector<1x1x16x16x128xbf16> to vector<16x16x128xbf16>
    %6 = vector.shape_cast %5 : vector<16x16x128xbf16> to vector<256x128xbf16>
    %c0_10 = arith.constant 0 : index
    %c128 = arith.constant 128 : index
    %7 = vector.load %arg7[%c0_10, %c128] : memref<256x1152xbf16, #tpu.memory_space<vmem>>, vector<256x128xbf16>
    tpu.vector_store %arg7[%c0_10, %c128], %6 {strides = array<i32>} : memref<256x1152xbf16, #tpu.memory_space<vmem>>, vector<256x128xbf16>,
    %c0_11 = arith.constant 0 : index
    %c0_12 = arith.constant 0 : index
    %c0_13 = arith.constant 0 : index
    %c2 = arith.constant 2 : index
    %c0_14 = arith.constant 0 : index
    %8 = vector.load %arg2[%c0_11, %c0_12, %c0_13, %c2, %c0_14] : memref<1x1x18x18x128xbf16, #tpu.memory_space<vmem>>, vector<1x1x16x16x128xbf16>
    %9 = vector.shape_cast %8 : vector<1x1x16x16x128xbf16> to vector<16x16x128xbf16>
    %10 = vector.shape_cast %9 : vector<16x16x128xbf16> to vector<256x128xbf16>
    %c0_15 = arith.constant 0 : index
    %c256 = arith.constant 256 : index
    %11 = vector.load %arg7[%c0_15, %c256] : memref<256x1152xbf16, #tpu.memory_space<vmem>>, vector<256x128xbf16>
    tpu.vector_store %arg7[%c0_15, %c256], %10 {strides = array<i32>} : memref<256x1152xbf16, #tpu.memory_space<vmem>>, vector<256x128xbf16>,
    %c0_16 = arith.constant 0 : index
    %c0_17 = arith.constant 0 : index
    %c1_18 = arith.constant 1 : index
    %c0_19 = arith.constant 0 : index
    %c0_20 = arith.constant 0 : index
    %12 = vector.load %arg2[%c0_16, %c0_17, %c1_18, %c0_19, %c0_20] : memref<1x1x18x18x128xbf16, #tpu.memory_space<vmem>>, vector<1x1x16x16x128xbf16>
    %13 = vector.shape_cast %12 : vector<1x1x16x16x128xbf16> to vector<16x16x128xbf16>
    %14 = vector.shape_cast %13 : vector<16x16x128xbf16> to vector<256x128xbf16>
    %c0_21 = arith.constant 0 : index
    %c384 = arith.constant 384 : index
    %15 = vector.load %arg7[%c0_21, %c384] : memref<256x1152xbf16, #tpu.memory_space<vmem>>, vector<256x128xbf16>
    tpu.vector_store %arg7[%c0_21, %c384], %14 {strides = array<i32>} : memref<256x1152xbf16, #tpu.memory_space<vmem>>, vector<256x128xbf16>,
    %c0_22 = arith.constant 0 : index
    %c0_23 = arith.constant 0 : index
    %c1_24 = arith.constant 1 : index
    %c1_25 = arith.constant 1 : index
    %c0_26 = arith.constant 0 : index
    %16 = vector.load %arg2[%c0_22, %c0_23, %c1_24, %c1_25, %c0_26] : memref<1x1x18x18x128xbf16, #tpu.memory_space<vmem>>, vector<1x1x16x16x128xbf16>
    %17 = vector.shape_cast %16 : vector<1x1x16x16x128xbf16> to vector<16x16x128xbf16>
    %18 = vector.shape_cast %17 : vector<16x16x128xbf16> to vector<256x128xbf16>
    %c0_27 = arith.constant 0 : index
    %c512 = arith.constant 512 : index
    %19 = vector.load %arg7[%c0_27, %c512] : memref<256x1152xbf16, #tpu.memory_space<vmem>>, vector<256x128xbf16>
    tpu.vector_store %arg7[%c0_27, %c512], %18 {strides = array<i32>} : memref<256x1152xbf16, #tpu.memory_space<vmem>>, vector<256x128xbf16>,
    %c0_28 = arith.constant 0 : index
    %c0_29 = arith.constant 0 : index
    %c1_30 = arith.constant 1 : index
    %c2_31 = arith.constant 2 : index
    %c0_32 = arith.constant 0 : index
    %20 = vector.load %arg2[%c0_28, %c0_29, %c1_30, %c2_31, %c0_32] : memref<1x1x18x18x128xbf16, #tpu.memory_space<vmem>>, vector<1x1x16x16x128xbf16>
    %21 = vector.shape_cast %20 : vector<1x1x16x16x128xbf16> to vector<16x16x128xbf16>
    %22 = vector.shape_cast %21 : vector<16x16x128xbf16> to vector<256x128xbf16>
    %c0_33 = arith.constant 0 : index
    %c640 = arith.constant 640 : index
    %23 = vector.load %arg7[%c0_33, %c640] : memref<256x1152xbf16, #tpu.memory_space<vmem>>, vector<256x128xbf16>
    tpu.vector_store %arg7[%c0_33, %c640], %22 {strides = array<i32>} : memref<256x1152xbf16, #tpu.memory_space<vmem>>, vector<256x128xbf16>,
    %c0_34 = arith.constant 0 : index
    %c0_35 = arith.constant 0 : index
    %c2_36 = arith.constant 2 : index
    %c0_37 = arith.constant 0 : index
    %c0_38 = arith.constant 0 : index
    %24 = vector.load %arg2[%c0_34, %c0_35, %c2_36, %c0_37, %c0_38] : memref<1x1x18x18x128xbf16, #tpu.memory_space<vmem>>, vector<1x1x16x16x128xbf16>
    %25 = vector.shape_cast %24 : vector<1x1x16x16x128xbf16> to vector<16x16x128xbf16>
    %26 = vector.shape_cast %25 : vector<16x16x128xbf16> to vector<256x128xbf16>
    %c0_39 = arith.constant 0 : index
    %c768 = arith.constant 768 : index
    %27 = vector.load %arg7[%c0_39, %c768] : memref<256x1152xbf16, #tpu.memory_space<vmem>>, vector<256x128xbf16>
    tpu.vector_store %arg7[%c0_39, %c768], %26 {strides = array<i32>} : memref<256x1152xbf16, #tpu.memory_space<vmem>>, vector<256x128xbf16>,
    %c0_40 = arith.constant 0 : index
    %c0_41 = arith.constant 0 : index
    %c2_42 = arith.constant 2 : index
    %c1_43 = arith.constant 1 : index
    %c0_44 = arith.constant 0 : index
    %28 = vector.load %arg2[%c0_40, %c0_41, %c2_42, %c1_43, %c0_44] : memref<1x1x18x18x128xbf16, #tpu.memory_space<vmem>>, vector<1x1x16x16x128xbf16>
    %29 = vector.shape_cast %28 : vector<1x1x16x16x128xbf16> to vector<16x16x128xbf16>
    %30 = vector.shape_cast %29 : vector<16x16x128xbf16> to vector<256x128xbf16>
    %c0_45 = arith.constant 0 : index
    %c896 = arith.constant 896 : index
    %31 = vector.load %arg7[%c0_45, %c896] : memref<256x1152xbf16, #tpu.memory_space<vmem>>, vector<256x128xbf16>
    tpu.vector_store %arg7[%c0_45, %c896], %30 {strides = array<i32>} : memref<256x1152xbf16, #tpu.memory_space<vmem>>, vector<256x128xbf16>,
    %c0_46 = arith.constant 0 : index
    %c0_47 = arith.constant 0 : index
    %c2_48 = arith.constant 2 : index
    %c2_49 = arith.constant 2 : index
    %c0_50 = arith.constant 0 : index
    %32 = vector.load %arg2[%c0_46, %c0_47, %c2_48, %c2_49, %c0_50] : memref<1x1x18x18x128xbf16, #tpu.memory_space<vmem>>, vector<1x1x16x16x128xbf16>
    %33 = vector.shape_cast %32 : vector<1x1x16x16x128xbf16> to vector<16x16x128xbf16>
    %34 = vector.shape_cast %33 : vector<16x16x128xbf16> to vector<256x128xbf16>
    %c0_51 = arith.constant 0 : index
    %c1024 = arith.constant 1024 : index
    %35 = vector.load %arg7[%c0_51, %c1024] : memref<256x1152xbf16, #tpu.memory_space<vmem>>, vector<256x128xbf16>
    tpu.vector_store %arg7[%c0_51, %c1024], %34 {strides = array<i32>} : memref<256x1152xbf16, #tpu.memory_space<vmem>>, vector<256x128xbf16>,
    %c0_52 = arith.constant 0 : index
    %c0_53 = arith.constant 0 : index
    %36 = vector.load %arg7[%c0_52, %c0_53] : memref<256x1152xbf16, #tpu.memory_space<vmem>>, vector<256x1152xbf16>
    %c0_54 = arith.constant 0 : index
    %c0_55 = arith.constant 0 : index
    %37 = vector.load %arg3[%c0_54, %c0_55] : memref<1152x1024xbf16, #tpu.memory_space<vmem>>, vector<1152x1024xbf16>
    %cst = arith.constant dense<0.000000e+00> : vector<256x1024xf32>
    %38 = tpu.matmul %36, %37, %cst {dimension_numbers = #tpu.dot_dimension_numbers<[1], [0], [0], [1], [0, 0, 1, 1], [], []>} : vector<256x1152xbf16>, vector<1152x1024xbf16>, vector<256x1024xf32> -> vector<256x1024xf32>
    %c0_56 = arith.constant 0 : index
    %c0_57 = arith.constant 0 : index
    %39 = vector.load %arg4[%c0_56, %c0_57] : memref<1x1024xf32, #tpu.memory_space<vmem>>, vector<1x1024xf32>
    %40 = vector.broadcast %39 : vector<1x1024xf32> to vector<256x1024xf32>
    %41 = arith.addf %38, %40 : vector<256x1024xf32>
    %cst_58 = arith.constant 0.000000e+00 : f32
    %42 = vector.broadcast %cst_58 : f32 to vector<256x1024xf32>
    %43 = arith.cmpf oge, %41, %42 : vector<256x1024xf32>
    %c0_59 = arith.constant 0 : index
    %c0_60 = arith.constant 0 : index
    %44 = vector.load %arg5[%c0_59, %c0_60] : memref<1x1024xf32, #tpu.memory_space<vmem>>, vector<1x1024xf32>
    %45 = vector.broadcast %44 : vector<1x1024xf32> to vector<256x1024xf32>
    %46 = arith.mulf %45, %41 : vector<256x1024xf32>
    %47 = arith.select %43, %41, %46 : vector<256x1024xi1>, vector<256x1024xf32>
    %48 = arith.truncf %47 : vector<256x1024xf32> to vector<256x1024xbf16>
    %c0_61 = arith.constant 0 : index
    %c0_62 = arith.constant 0 : index
    %c0_63 = arith.constant 0 : index
    %c0_64 = arith.constant 0 : index
    %49 = vector.load %arg6[%c0_61, %c0_62, %c0_63, %c0_64] : memref<1x1x256x1024xbf16, #tpu.memory_space<vmem>>, vector<1x1x256x1024xbf16>
    %50 = vector.shape_cast %49 : vector<1x1x256x1024xbf16> to vector<256x1024xbf16>
    %51 = vector.shape_cast %48 : vector<256x1024xbf16> to vector<1x1x256x1024xbf16>
    tpu.vector_store %arg6[%c0_61, %c0_62, %c0_63, %c0_64], %51 {strides = array<i32>} : memref<1x1x256x1024xbf16, #tpu.memory_space<vmem>>, vector<1x1x256x1024xbf16>,
    return
  }
  func.func @transform_0(%arg0: i32, %arg1: i32) -> (i32, i32, i32, i32, i32) {
    %c0_i32 = arith.constant 0 : i32
    %c0_i32_0 = arith.constant 0 : i32
    %c0_i32_1 = arith.constant 0 : i32
    %c0_i32_2 = arith.constant 0 : i32
    return %arg0, %arg1, %c0_i32, %c0_i32_0, %c0_i32_1 : i32, i32, i32, i32, i32
  }
  func.func @transform_1(%arg0: i32, %arg1: i32) -> (i32, i32) {
    %c0_i32 = arith.constant 0 : i32
    %c0_i32_0 = arith.constant 0 : i32
    %c0_i32_1 = arith.constant 0 : i32
    return %c0_i32, %c0_i32_0 : i32, i32
  }
  func.func @transform_2(%arg0: i32, %arg1: i32) -> (i32, i32) {
    %c0_i32 = arith.constant 0 : i32
    %c0_i32_0 = arith.constant 0 : i32
    %c0_i32_1 = arith.constant 0 : i32
    return %c0_i32, %c0_i32_0 : i32, i32
  }
  func.func @transform_3(%arg0: i32, %arg1: i32) -> (i32, i32) {
    %c0_i32 = arith.constant 0 : i32
    %c0_i32_0 = arith.constant 0 : i32
    %c0_i32_1 = arith.constant 0 : i32
    return %c0_i32, %c0_i32_0 : i32, i32
  }
  func.func @transform_4(%arg0: i32, %arg1: i32) -> (i32, i32, i32, i32) {
    %c0_i32 = arith.constant 0 : i32
    %c0_i32_0 = arith.constant 0 : i32
    %c0_i32_1 = arith.constant 0 : i32
    return %arg0, %arg1, %c0_i32, %c0_i32_0 : i32, i32, i32, i32
  }
}

</mosaic_0001>

<bundles_post_ra>
// kernel: _lambda_.1
= control target key start
LH: loop header
LB: loop body
LE: loop exit
PB: predicated region body
PF: predicated region fallthrough
CT: control target
= control target key end

     0   :  { %s15120_s15 = smov 0   ;;  %s15122_s16 = smov 0   ;;  %s20203_s0 = inlined_call_operand.vmem [shape: bf16[2,1,18,18,128], index: 0, kind: input, shape index: {}]   ;;  %s20204_s1 = inlined_call_operand.vmem [shape: bf16[1152,1024], index: 1, kind: input, shape index: {}]   ;;  %s20205_s2 = inlined_call_operand.vmem [shape: f32[1,1024], index: 2, kind: input, shape index: {}]   ;;  %s20206_s3 = inlined_call_operand.vmem [shape: f32[1,1024], index: 3, kind: input, shape index: {}]   ;;  %s20207_s4 = inlined_call_operand.vmem [shape: bf16[2,1,256,1024], index: 4, kind: output, shape index: {}]  }
   0x1   :  { %s15124_s17 = smov 0  }
   0x2 LB: > { %s26_s18 = sadd.s32 1, %s15088_s16  ;;  %p12379_p0 = scmp.ge.s32.totalorder %s15092_s17, 1  ;;  %s15092_s17 = sphi %s15124_s17, %s14_s17   ;;  %s15088_s16 = sphi %s15122_s16, %s20594_s16   ;;  %s15084_s15 = sphi %s15120_s15, %s20593_s15  }
   0x3   : > { %p28_p1 = scmp.ge.s32.totalorder %s26_s18, 2  ;;  %p182_p2 = scmp.lt.s32.totalorder %s15092_s17, 3 }
   0x5   : > { %s20596_s18 = smov (%p28_p1, %s26_s18), 0  ;;  %p183_p3 = pnand %p12379_p0, %p182_p2 }
   0x7   : > { %186 = sbr.rel (%p183_p3) target bundleno = 1608 (0x648), region = 36 }
   0xe   : > { %v3219_v0 = vld [vmem:[%s20204_s1] sm:$0xff]  ;;  %v3220_v2 = vld [vmem:[%s20204_s1 + $0x8] sm:$0xff]  ;;  %p216_p4 = scmp.lt.s32.totalorder %s15084_s15, 1  ;;  %vm427_vm0 = vsmask.f32 3328  ;;  %vm990_vm3 = vcmask 1042432  }
   0xf   : > { %v3223_v1 = vld [vmem:[%s20204_s1 + $0x20] sm:$0xff]  ;;  %v3224_v4 = vld [vmem:[%s20204_s1 + $0x28] sm:$0xff]  ;;  %vm428_vm1 = vsmask.f32 7440  ;;  %vm991_vm4 = vcmask 1046532  }
  0x10   : > { %v12832_v3 = vcombine.high %v3219_v0, %v3223_v1  ;;  %v12831_v5 = vcombine.low %v3219_v0, %v3223_v1  ;;  %v3227_v6 = vld [vmem:[%s20204_s1 + $0x40] sm:$0xff]  ;;  %v12834_v8 = vcombine.high %v3220_v2, %v3224_v4  ;;  %v12833_v9 = vcombine.low %v3220_v2, %v3224_v4  ;;  %v3228_v11 = vld [vmem:[%s20204_s1 + $0x48] sm:$0xff]  ;;  %s20598_s15 = smov (!%p216_p4, %s15084_s15), 1  ;;  %vm15263_vm2 = vmor %vm427_vm0, %vm428_vm1 }
  0x11   : > { %v3231_v7 = vld [vmem:[%s20204_s1 + $0x60] sm:$0xff]  ;;  %v3232_v12 = vld [vmem:[%s20204_s1 + $0x68] sm:$0xff]  ;;  %s14946_s19 = smul.u32 216, %s20598_s15  ;;  %vm15898_vm5 = vmor %vm990_vm3, %vm991_vm4  ;;  %s13537_s13 = sshll.u32 %s20598_s15, 10 }
  0x12   : > { %v12840_v10 = vcombine.high %v3227_v6, %v3231_v7  ;;  %v3235_v13 = vld [vmem:[%s20204_s1 + $0x80] sm:$0xff]  ;;  %6717 = vmatprep.subr.bf16.mxu0 %v12832_v3  ;;  %v12842_v14 = vcombine.high %v3228_v11, %v3232_v12  ;;  %v3236_v16 = vld [vmem:[%s20204_s1 + $0x88] sm:$0xff]  ;;  %7682 = vmatprep.subr.bf16.mxu1 %v12834_v8  ;;  %v12839_v18 = vcombine.low %v3227_v6, %v3231_v7 }
  0x13   : > { %v3239_v15 = vld [vmem:[%s20204_s1 + $0xa0] sm:$0xff]  ;;  %v3240_v17 = vld [vmem:[%s20204_s1 + $0xa8] sm:$0xff]  ;;  %6718 = vmatpush1.bf16.msra.mxu0 %v12831_v5  ;;  %7683 = vmatpush1.bf16.msra.mxu1 %v12833_v9  ;;  %v12841_v19 = vcombine.low %v3228_v11, %v3232_v12  ;;  %s15226_s30 = scalar_lea.vmem %s20203_s0, %s14946_s19  ;;  %s18491_s19 = scalar_lea.vmem %s20207_s4, %s13537_s13 }
  0x14   : > { %6719 = vmatprep.subr.bf16.mxu0 %v12840_v10  ;;  %v12848_v20 = vcombine.high %v3235_v13, %v3239_v15  ;;  %7684 = vmatprep.subr.bf16.mxu1 %v12842_v14  ;;  %v12850_v21 = vcombine.high %v3236_v16, %v3240_v17  ;;  %v3243_v22 = vld [vmem:[%s20204_s1 + $0xc0] sm:$0xff]  ;;  %v3244_v24 = vld [vmem:[%s20204_s1 + $0xc8] sm:$0xff]  ;;  %v12847_v26 = vcombine.low %v3235_v13, %v3239_v15 }
  0x15   : > { %v3247_v23 = vld [vmem:[%s20204_s1 + $0xe0] sm:$0xff]  ;;  %v3248_v25 = vld [vmem:[%s20204_s1 + $0xe8] sm:$0xff]  ;;  %v12849_v27 = vcombine.low %v3236_v16, %v3240_v17 }
  0x16   : > { %v12856_v28 = vcombine.high %v3243_v22, %v3247_v23  ;;  %v12858_v29 = vcombine.high %v3244_v24, %v3248_v25  ;;  %v3251_v30 = vld [vmem:[%s20204_s1 + $0x100] sm:$0xff]  ;;  %v3252_v32 = vld [vmem:[%s20204_s1 + $0x108] sm:$0xff]  ;;  %v12855_v34 = vcombine.low %v3243_v22, %v3247_v23  ;;  %v12857_v35 = vcombine.low %v3244_v24, %v3248_v25 }
  0x17   : > { %6720 = vmatpush1.bf16.msra.mxu0 %v12839_v18  ;;  %7685 = vmatpush1.bf16.msra.mxu1 %v12841_v19  ;;  %v3255_v31 = vld [vmem:[%s20204_s1 + $0x120] sm:$0xff]  ;;  %v3256_v33 = vld [vmem:[%s20204_s1 + $0x128] sm:$0xff] }
  0x18   : > { %6721 = vmatprep.subr.bf16.mxu0 %v12848_v20  ;;  %7686 = vmatprep.subr.bf16.mxu1 %v12850_v21  ;;  %v12864_v36 = vcombine.high %v3251_v30, %v3255_v31  ;;  %v12866_v37 = vcombine.high %v3252_v32, %v3256_v33  ;;  %v3259_v38 = vld [vmem:[%s20204_s1 + $0x140] sm:$0xff]  ;;  %v3260_v40 = vld [vmem:[%s20204_s1 + $0x148] sm:$0xff]  ;;  %v12863_v42 = vcombine.low %v3251_v30, %v3255_v31 }
  0x19   : > { %v3263_v39 = vld [vmem:[%s20204_s1 + $0x160] sm:$0xff]  ;;  %v3264_v41 = vld [vmem:[%s20204_s1 + $0x168] sm:$0xff]  ;;  %v12865_v43 = vcombine.low %v3252_v32, %v3256_v33 }
  0x1a   : > { %v12872_v44 = vcombine.high %v3259_v38, %v3263_v39  ;;  %v12874_v45 = vcombine.high %v3260_v40, %v3264_v41  ;;  %v3267_v46 = vld [vmem:[%s20204_s1 + $0x180] sm:$0xff]  ;;  %v3268_v48 = vld [vmem:[%s20204_s1 + $0x188] sm:$0xff]  ;;  %v12871_v50 = vcombine.low %v3259_v38, %v3263_v39  ;;  %v12873_v53 = vcombine.low %v3260_v40, %v3264_v41 }
  0x1b   : > { %6722 = vmatpush1.bf16.msra.mxu0 %v12847_v26  ;;  %7687 = vmatpush1.bf16.msra.mxu1 %v12849_v27  ;;  %v3271_v47 = vld [vmem:[%s20204_s1 + $0x1a0] sm:$0xff]  ;;  %v3272_v49 = vld [vmem:[%s20204_s1 + $0x1a8] sm:$0xff] }
  0x1c   : > { %6723 = vmatprep.subr.bf16.mxu0 %v12856_v28  ;;  %7688 = vmatprep.subr.bf16.mxu1 %v12858_v29  ;;  %v3275_v51 = vld [vmem:[%s20204_s1 + $0x1c0] sm:$0xff]  ;;  %v12880_v54 = vcombine.high %v3267_v46, %v3271_v47  ;;  %v3276_v55 = vld [vmem:[%s20204_s1 + $0x1c8] sm:$0xff]  ;;  %v12882_v58 = vcombine.high %v3268_v48, %v3272_v49  ;;  %v12879_v2 = vcombine.low %v3267_v46, %v3271_v47 }
  0x1d   : > { %v3279_v52 = vld [vmem:[%s20204_s1 + $0x1e0] sm:$0xff]  ;;  %v381_v59 = vld [vmem:[%s15226_s30 + $0x8] sm:$0x1]  ;;  %v12881_v5 = vcombine.low %v3268_v48, %v3272_v49 }
  0x1e   : > { %v379_v56 = vld [vmem:[%s15226_s30] sm:$0xf]  ;;  %v380_v57 = vld [vmem:[%s15226_s30 + $0x4] sm:$0xf]  ;;  %v3280_v62 = vld [vmem:[%s20204_s1 + $0x1e8] sm:$0xff]  ;;  %v450_v1 = vshll.u32 %v381_v59, 16  ;;  %v12888_v6 = vcombine.high %v3275_v51, %v3279_v52  ;;  %v12887_v18 = vcombine.low %v3275_v51, %v3279_v52 }
  0x1f   : > { %6724 = vmatpush1.bf16.msra.mxu0 %v12855_v34  ;;  %7689 = vmatpush1.bf16.msra.mxu1 %v12857_v35  ;;  %v431_v60 = vshrl.u32 %v379_v56, 16  ;;  %v434_v61 = vshll.u32 %v379_v56, 16  ;;  %v440_v63 = vshll.u32 %v380_v57, 16  ;;  %v444_v0 = vshrl.u32 %v380_v57, 16  ;;  %v3283_v7 = vld [vmem:[%s20204_s1 + $0x200] sm:$0xff]  ;;  %v3284_v12 = vld [vmem:[%s20204_s1 + $0x208] sm:$0xff] }
  0x20   : > { %6725 = vmatprep.subr.bf16.mxu0 %v12864_v36  ;;  %7690 = vmatprep.subr.bf16.mxu1 %v12866_v37  ;;  %v12890_v10 = vcombine.high %v3276_v55, %v3280_v62  ;;  %v3287_v11 = vld [vmem:[%s20204_s1 + $0x220] sm:$0xff]  ;;  %v3288_v14 = vld [vmem:[%s20204_s1 + $0x228] sm:$0xff]  ;;  %v452_v17 = vrot.slane %v450_v1, 5  ;;  %v12889_v20 = vcombine.low %v3276_v55, %v3280_v62  ;;  %v383_v56 = vld [vmem:[%s15226_s30 + $0x10] sm:$0xf] }
  0x21   : > { %v433_v3 = vrot.slane %v431_v60, 4  ;;  %v436_v4 = vrot.slane %v434_v61, 5  ;;  %v442_v8 = vrot.slane %v440_v63, 5  ;;  %v446_v9 = vrot.slane %v444_v0, 4  ;;  %v3291_v24 = vld [vmem:[%s20204_s1 + $0x240] sm:$0xff]  ;;  %v3292_v26 = vld [vmem:[%s20204_s1 + $0x248] sm:$0xff] }
  0x22   : > { %v12896_v21 = vcombine.high %v3283_v7, %v3287_v11  ;;  %v12898_v23 = vcombine.high %v3284_v12, %v3288_v14  ;;  %v3295_v25 = vld [vmem:[%s20204_s1 + $0x260] sm:$0xff]  ;;  %v3296_v28 = vld [vmem:[%s20204_s1 + $0x268] sm:$0xff]  ;;  %v12895_v30 = vcombine.low %v3283_v7, %v3287_v11  ;;  %v12897_v32 = vcombine.low %v3284_v12, %v3288_v14  ;;  %v386_v7 = vld [vmem:[%s15226_s30 + $0x1c] sm:$0xf] }
  0x23   : > { %6726 = vmatpush1.bf16.msra.mxu0 %v12863_v42  ;;  %7691 = vmatpush1.bf16.msra.mxu1 %v12865_v43  ;;  %v437_v13 = vor.u32 %v436_v4, %v433_v3  ;;  %v447_v16 = vor.u32 %v446_v9, %v442_v8  ;;  %v12904_v33 = vcombine.high %v3291_v24, %v3295_v25  ;;  %v3299_v35 = vld [vmem:[%s20204_s1 + $0x280] sm:$0xff]  ;;  %v3300_v37 = vld [vmem:[%s20204_s1 + $0x288] sm:$0xff]  ;;  %v464_v3 = vshll.u32 %v383_v56, 16 }
  0x24   : > { %6727 = vmatprep.subr.bf16.mxu0 %v12872_v44  ;;  %7692 = vmatprep.subr.bf16.mxu1 %v12874_v45  ;;  %v12906_v34 = vcombine.high %v3292_v26, %v3296_v28  ;;  %v3303_v36 = vld [vmem:[%s20204_s1 + $0x2a0] sm:$0xff]  ;;  %v3304_v38 = vld [vmem:[%s20204_s1 + $0x2a8] sm:$0xff]  ;;  %v12903_v39 = vcombine.low %v3291_v24, %v3295_v25  ;;  %v12905_v40 = vcombine.low %v3292_v26, %v3296_v28  ;;  %v468_v4 = vshrl.u32 %v383_v56, 16 }
  0x25   : > { %v438_v19 = vrot.slane %v437_v13, 4  ;;  %v448_v22 = vrot.slane %v447_v16, 4  ;;  %v12912_v41 = vcombine.high %v3299_v35, %v3303_v36  ;;  %v12914_v42 = vcombine.high %v3300_v37, %v3304_v38  ;;  %v3307_v43 = vld [vmem:[%s20204_s1 + $0x2c0] sm:$0xff]  ;;  %v3308_v45 = vld [vmem:[%s20204_s1 + $0x2c8] sm:$0xff] }
  0x26   : > { %v3311_v44 = vld [vmem:[%s20204_s1 + $0x2e0] sm:$0xff]  ;;  %v3312_v46 = vld [vmem:[%s20204_s1 + $0x2e8] sm:$0xff]  ;;  %v12911_v47 = vcombine.low %v3299_v35, %v3303_v36  ;;  %v12913_v48 = vcombine.low %v3300_v37, %v3304_v38  ;;  %v492_v24 = vshrl.u32 %v386_v7, 16 }
  0x27   : > { %6728 = vmatpush1.bf16.msra.mxu0 %v12871_v50  ;;  %7693 = vmatpush1.bf16.msra.mxu1 %v12873_v53  ;;  %v443_v27 = vsel %vm15263_vm2, %v438_v19, %v442_v8  ;;  %v453_v29 = vsel %vm15263_vm2, %v448_v22, %v452_v17  ;;  %v12920_v49 = vcombine.high %v3307_v43, %v3311_v44  ;;  %v3315_v50 = vld [vmem:[%s20204_s1 + $0x300] sm:$0xff]  ;;  %v3316_v53 = vld [vmem:[%s20204_s1 + $0x308] sm:$0xff]  ;;  %v470_v19 = vrot.slane %v468_v4, 4 }
  0x28   : > { %6729 = vmatprep.subr.bf16.mxu0 %v12880_v54  ;;  %7694 = vmatprep.subr.bf16.mxu1 %v12882_v58  ;;  %v15283_v31 = vcombine.low %v443_v27, %v453_v29  ;;  %v12922_v51 = vcombine.high %v3308_v45, %v3312_v46  ;;  %v3319_v52 = vld [vmem:[%s20204_s1 + $0x320] sm:$0xff]  ;;  %v3320_v54 = vld [vmem:[%s20204_s1 + $0x328] sm:$0xff]  ;;  %v12919_v57 = vcombine.low %v3307_v43, %v3311_v44 }
  0x29   : > { %v382_v55 = vld [vmem:[%s15226_s30 + $0xc] sm:$0xf]  ;;  %v12921_v58 = vcombine.low %v3308_v45, %v3312_v46  ;;  %v12928_v59 = vcombine.high %v3315_v50, %v3319_v52  ;;  %v12930_v60 = vcombine.high %v3316_v53, %v3320_v54  ;;  %v3323_v61 = vld [vmem:[%s20204_s1 + $0x340] sm:$0xff]  ;;  %v12929_v8 = vcombine.low %v3316_v53, %v3320_v54 }
  0x2a   : > { %6749 = vmatprep.mubr.bf16.mxu0 %v15283_v31  ;;  %7714 = vmatprep.mubr.bf16.mxu1 %v15283_v31  ;;  %v3327_v62 = vld [vmem:[%s20204_s1 + $0x360] sm:$0xff]  ;;  %v3324_v63 = vld [vmem:[%s20204_s1 + $0x348] sm:$0xff]  ;;  %v455_v1 = vshrl.u32 %v382_v55, 16 }
  0x2b   : > { %6730 = vmatpush1.bf16.msra.mxu0 %v12879_v2  ;;  %7695 = vmatpush1.bf16.msra.mxu1 %v12881_v5  ;;  %v3328_v0 = vld [vmem:[%s20204_s1 + $0x368] sm:$0xff]  ;;  %v458_v2 = vshll.u32 %v382_v55, 16  ;;  %v385_v5 = vld [vmem:[%s15226_s30 + $0x18] sm:$0xf]  ;;  %v12936_v9 = vcombine.high %v3323_v61, %v3327_v62  ;;  %v3331_v11 = vld [vmem:[%s20204_s1 + $0x380] sm:$0xff]  ;;  %v12935_v25 = vcombine.low %v3323_v61, %v3327_v62 }
  0x2c   : > { %6731 = vmatprep.subr.bf16.mxu0 %v12888_v6  ;;  %7696 = vmatprep.subr.bf16.mxu1 %v12890_v10  ;;  %v12927_v6 = vcombine.low %v3315_v50, %v3319_v52  ;;  %v12938_v10 = vcombine.high %v3324_v63, %v3328_v0  ;;  %v3335_v12 = vld [vmem:[%s20204_s1 + $0x3a0] sm:$0xff]  ;;  %v3332_v13 = vld [vmem:[%s20204_s1 + $0x388] sm:$0xff]  ;;  %v457_v16 = vrot.slane %v455_v1, 4  ;;  %v482_v22 = vshll.u32 %v385_v5, 16 }
  0x2d   : > { %v3336_v14 = vld [vmem:[%s20204_s1 + $0x3a8] sm:$0xff]  ;;  %v460_v17 = vrot.slane %v458_v2, 5  ;;  %v12937_v26 = vcombine.low %v3324_v63, %v3328_v0  ;;  %v12944_v27 = vcombine.high %v3331_v11, %v3335_v12  ;;  %v3339_v29 = vld [vmem:[%s20204_s1 + $0x3c0] sm:$0xff] }
  0x2e   : > { %v12946_v28 = vcombine.high %v3332_v13, %v3336_v14  ;;  %v3340_v35 = vld [vmem:[%s20204_s1 + $0x3c8] sm:$0xff]  ;;  %v484_v38 = vrot.slane %v482_v22, 5  ;;  %v387_v43 = vld [vmem:[%s15226_s30 + $0x20] sm:$0x1]  ;;  %v12945_v44 = vcombine.low %v3332_v13, %v3336_v14  ;;  %v388_v46 = vld [vmem:[%s15226_s30 + $0x24] sm:$0xf] }
  0x2f   : > { %6732 = vmatpush1.bf16.msra.mxu0 %v12887_v18  ;;  %7697 = vmatpush1.bf16.msra.mxu1 %v12889_v20  ;;  %v15351_v18 = vrot.slane %v464_v3, 5  ;;  %v384_v20 = vld [vmem:[%s15226_s30 + $0x14] sm:$0x1]  ;;  %v3344_v36 = vld [vmem:[%s20204_s1 + $0x3e8] sm:$0xff]  ;;  %v14972_v0 = vld [vmem:[%s15226_s30] sm:$0xff]  }
  0x30   : > { %6733 = vmatprep.subr.bf16.mxu0 %v12896_v21  ;;  %7698 = vmatprep.subr.bf16.mxu1 %v12898_v23  ;;  %v479_v21 = vshrl.u32 %v385_v5, 16  ;;  %v488_v23 = vshll.u32 %v386_v7, 16  ;;  %v3348_v54 = vld [vmem:[%s20204_s1 + $0x408] sm:$0xff]  ;;  %v12953_v63 = vcombine.low %v3340_v35, %v3344_v36  ;;  %v3355_v2 = vld [vmem:[%s20204_s1 + $0x440] sm:$0xff] }
  0x31   : > { %v3352_v55 = vld [vmem:[%s20204_s1 + $0x428] sm:$0xff]  ;;  %v3359_v3 = vld [vmem:[%s20204_s1 + $0x460] sm:$0xff] }
  0x32   : > { %v481_v37 = vrot.slane %v479_v21, 4  ;;  %v12962_v4 = vcombine.high %v3348_v54, %v3352_v55  ;;  %v3356_v7 = vld [vmem:[%s20204_s1 + $0x448] sm:$0xff]  ;;  %v15410_v13 = vld [vmem:[%s20204_s1 + $0x480] sm:$0xff]  ;;  %v12961_v21 = vcombine.low %v3348_v54, %v3352_v55 }
  0x33   : > { %6734 = vmatpush1.bf16.msra.mxu0 %v12895_v30  ;;  %7699 = vmatpush1.bf16.msra.mxu1 %v12897_v32  ;;  %v3343_v30 = vld [vmem:[%s20204_s1 + $0x3e0] sm:$0xff]  ;;  %v461_v32 = vor.u32 %v460_v17, %v457_v16  ;;  %v390_v16 = vld [vmem:[%s15226_s30 + $0x2c] sm:$0x1] }
  0x34   : > { %6735 = vmatprep.subr.bf16.mxu0 %v12904_v33  ;;  %7700 = vmatprep.subr.bf16.mxu1 %v12906_v34  ;;  %v471_v33 = vor.u32 %v470_v19, %v15351_v18  ;;  %v474_v34 = vshll.u32 %v384_v20, 16  ;;  %v12952_v45 = vcombine.high %v3339_v29, %v3343_v30  ;;  %v12951_v53 = vcombine.low %v3339_v29, %v3343_v30  ;;  %v15415_v14 = vld [vmem:[%s20204_s1 + $0x4a0] sm:$0xff] }
  0x35   : > { %v462_v50 = vrot.slane %v461_v32, 4  ;;  %v485_v56 = vor.u32 %v484_v38, %v481_v37  ;;  %v12976_v32 = vcombine.high %v15410_v13, %v15415_v14  ;;  %v14973_v38 = vld [vmem:[%s15226_s30 + $0xc] sm:$0xff]   ;;  %v395_v54 = vld [vmem:[%s15226_s30 + $0x40] sm:$0xf] }
  0x36   : > { %v476_v52 = vrot.slane %v474_v34, 5  ;;  %v522_v34 = vshll.u32 %v390_v16, 16 }
  0x37   : > { %6736 = vmatpush1.bf16.msra.mxu0 %v12903_v39  ;;  %7701 = vmatpush1.bf16.msra.mxu1 %v12905_v40  ;;  %v15367_v39 = vrot.slane %v488_v23, 5  ;;  %v494_v40 = vrot.slane %v492_v24, 4  ;;  %v467_v5 = vsel %vm15263_vm2, %v462_v50, %v15351_v18  ;;  %v12967_v23 = vcombine.low %v3355_v2, %v3359_v3 }
  0x38   : > { %6737 = vmatprep.subr.bf16.mxu0 %v12912_v41  ;;  %7702 = vmatprep.subr.bf16.mxu1 %v12914_v42  ;;  %v12943_v41 = vcombine.low %v3331_v11, %v3335_v12  ;;  %v15372_v42 = vld [vmem:[%s20204_s1 + $0x400] sm:$0xff]  ;;  %v12968_v24 = vcombine.high %v3355_v2, %v3359_v3  ;;  %v560_v3 = vshll.u32 %v395_v54, 16 }
  0x39   : > { %v15477_v2 = vld [vmem:[%s20204_s1 + $0x520] sm:$0xff] }
  0x3b   : > { %6738 = vmatpush1.bf16.msra.mxu0 %v12911_v47  ;;  %7703 = vmatpush1.bf16.msra.mxu1 %v12913_v48  ;;  %v389_v47 = vld [vmem:[%s15226_s30 + $0x28] sm:$0xf]  ;;  %v12954_v48 = vcombine.high %v3340_v35, %v3344_v36 }
  0x3c   : > { %6739 = vmatprep.subr.bf16.mxu0 %v12920_v49  ;;  %7704 = vmatprep.subr.bf16.mxu1 %v12922_v51  ;;  %v3351_v49 = vld [vmem:[%s20204_s1 + $0x420] sm:$0xff]  ;;  %v472_v51 = vrot.slane %v471_v33, 4  ;;  %v512_v61 = vshll.u32 %v389_v47, 16  ;;  %v516_v62 = vshrl.u32 %v389_v47, 16  ;;  %v3368_v33 = vld [vmem:[%s20204_s1 + $0x4a8] sm:$0xff]  ;;  %v524_v47 = vrot.slane %v522_v34, 5 }
  0x3d   : > { %v12960_v1 = vcombine.high %v15372_v42, %v3351_v49 }
  0x3e   : > { %v15418_v19 = vrot.slane %v512_v61, 5  ;;  %v518_v20 = vrot.slane %v516_v62, 4  ;;  %v393_v61 = vld [vmem:[%s15226_s30 + $0x38] sm:$0x1] }
  0x3f   : > { %6740 = vmatpush1.bf16.msra.mxu0 %v12919_v57  ;;  %7705 = vmatpush1.bf16.msra.mxu1 %v12921_v58  ;;  %v495_v57 = vor.u32 %v494_v40, %v15367_v39  ;;  %v498_v58 = vshll.u32 %v387_v43, 16 }
  0x40   : > { %6741 = vmatprep.subr.bf16.mxu0 %v12928_v59  ;;  %7706 = vmatprep.subr.bf16.mxu1 %v12930_v60  ;;  %v503_v59 = vshrl.u32 %v388_v46, 16  ;;  %v506_v60 = vshll.u32 %v388_v46, 16  ;;  %v519_v37 = vor.u32 %v518_v20, %v15418_v19  ;;  %v15453_v46 = vld [vmem:[%s20204_s1 + $0x4c8] sm:$0xff]  ;;  %v3387_v20 = vld [vmem:[%s20204_s1 + $0x540] sm:$0xff] }
  0x41   : > { %v496_v11 = vrot.slane %v495_v57, 4  ;;  %v500_v12 = vrot.slane %v498_v58, 5 }
  0x42   : > { %v505_v17 = vrot.slane %v503_v59, 4  ;;  %v508_v18 = vrot.slane %v506_v60, 5 }
  0x43   : > { %6742 = vmatpush1.bf16.msra.mxu0 %v12927_v6  ;;  %7707 = vmatpush1.bf16.msra.mxu1 %v12929_v8  ;;  %v477_v6 = vsel %vm15263_vm2, %v472_v51, %v476_v52  ;;  %v12959_v8 = vcombine.low %v15372_v42, %v3351_v49  ;;  %v501_v35 = vsel %vm15263_vm2, %v496_v11, %v500_v12  ;;  %v394_v49 = vld [vmem:[%s15226_s30 + $0x3c] sm:$0xf] }
  0x44   : > { %6743 = vmatprep.subr.bf16.mxu0 %v12936_v9  ;;  %7708 = vmatprep.subr.bf16.mxu1 %v12938_v10  ;;  %v3360_v9 = vld [vmem:[%s20204_s1 + $0x468] sm:$0xff]  ;;  %v486_v10 = vrot.slane %v485_v56, 4  ;;  %v15420_v22 = vcombine.low %v467_v5, %v477_v6  ;;  %v509_v36 = vor.u32 %v508_v18, %v505_v17  ;;  %v12975_v51 = vcombine.low %v15410_v13, %v15415_v14  ;;  %v396_v17 = vld [vmem:[%s15226_s30 + $0x44] sm:$0x1] }
  0x45   : > { %v12970_v29 = vcombine.high %v3356_v7, %v3360_v9  ;;  %v551_v62 = vshrl.u32 %v394_v49, 16  ;;  %v546_v13 = vshll.u32 %v393_v61, 16  ;;  %v15543_v61 = vld [vmem:[%s20204_s1 + $0x5c0] sm:$0xff] }
  0x46   : > { %v491_v30 = vsel %vm15263_vm2, %v486_v10, %v15367_v39  ;;  %v510_v52 = vrot.slane %v509_v36, 4 }
  0x47   : > { %6744 = vmatpush1.bf16.msra.mxu0 %v12935_v25  ;;  %7709 = vmatpush1.bf16.msra.mxu1 %v12937_v26  ;;  %v12969_v25 = vcombine.low %v3356_v7, %v3360_v9  ;;  %v15425_v26 = vld [vmem:[%s20204_s1 + $0x488] sm:$0xff]  ;;  %v15459_v50 = vcombine.low %v491_v30, %v501_v35  ;;  %v14974_v9 = vld [vmem:[%s15226_s30 + $0x18] sm:$0xff]   ;;  %v553_v18 = vrot.slane %v551_v62, 4 }
  0x48   : > { %6745 = vmatprep.subr.bf16.mxu0 %v12944_v27  ;;  %7710 = vmatprep.subr.bf16.mxu1 %v12946_v28  ;;  %v391_v27 = vld [vmem:[%s15226_s30 + $0x30] sm:$0xf]  ;;  %v392_v28 = vld [vmem:[%s15226_s30 + $0x34] sm:$0xf]  ;;  %v12978_v43 = vcombine.high %v15425_v26, %v3368_v33  ;;  %v12977_v59 = vcombine.low %v15425_v26, %v3368_v33  ;;  %v515_v5 = vsel %vm15263_vm2, %v510_v52, %v15418_v19  ;;  %v3380_v7 = vld [vmem:[%s20204_s1 + $0x508] sm:$0xff]  ;;  %v548_v33 = vrot.slane %v546_v13, 5 }
  0x49   : > { %v527_v39 = vshrl.u32 %v391_v27, 16  ;;  %v530_v40 = vshll.u32 %v391_v27, 16  ;;  %v540_v42 = vshrl.u32 %v392_v28, 16  ;;  %v3388_v27 = vld [vmem:[%s20204_s1 + $0x548] sm:$0xff] }
  0x4a   : > { %v398_v35 = vld [vmem:[%s15226_s30 + $0x4c] sm:$0xf] }
  0x4b   : > { %6746 = vmatpush1.bf16.msra.mxu0 %v12943_v41  ;;  %7711 = vmatpush1.bf16.msra.mxu1 %v12945_v44  ;;  %v536_v41 = vshll.u32 %v392_v28, 16  ;;  %v3371_v44 = vld [vmem:[%s20204_s1 + $0x4c0] sm:$0xff]  ;;  %v529_v55 = vrot.slane %v527_v39, 4  ;;  %v532_v56 = vrot.slane %v530_v40, 5  ;;  %v542_v58 = vrot.slane %v540_v42, 4  ;;  %v3392_v28 = vld [vmem:[%s20204_s1 + $0x568] sm:$0xff] }
  0x4c   : > { %6747 = vmatprep.subr.bf16.mxu0 %v12952_v45  ;;  %7712 = vmatprep.subr.bf16.mxu1 %v12954_v48  ;;  %v3375_v45 = vld [vmem:[%s20204_s1 + $0x4e0] sm:$0xff]  ;;  %v3376_v48 = vld [vmem:[%s20204_s1 + $0x4e8] sm:$0xff] }
  0x4d   : > { %v15464_v57 = vrot.slane %v536_v41, 5  ;;  %v12984_v60 = vcombine.high %v3371_v44, %v3375_v45  ;;  %v12983_v6 = vcombine.low %v3371_v44, %v3375_v45  ;;  %v533_v11 = vor.u32 %v532_v56, %v529_v55  ;;  %v3395_v44 = vld [vmem:[%s20204_s1 + $0x580] sm:$0xff] }
  0x4e   : > { %v12985_v14 = vcombine.low %v15453_v46, %v3376_v48  ;;  %v13002_v41 = vcombine.high %v3388_v27, %v3392_v28  ;;  %v3399_v45 = vld [vmem:[%s20204_s1 + $0x5a0] sm:$0xff] }
  0x4f   : > { %6748 = vmatpush1.bf16.msra.mxu0 %v12951_v53  ;;  %7713 = vmatpush1.bf16.msra.mxu1 %v12953_v63  ;;  %v520_v53 = vrot.slane %v519_v37, 4  ;;  %v554_v63 = vshll.u32 %v394_v49, 16  ;;  %v543_v12 = vor.u32 %v542_v58, %v15464_v57  ;;  %v534_v30 = vrot.slane %v533_v11, 4  ;;  %v3400_v49 = vld [vmem:[%s20204_s1 + $0x5a8] sm:$0xff] }
  0x50   : > { %6910 = vmatprep.subr.bf16.mxu0 %v12960_v1  ;;  %7875 = vmatprep.subr.bf16.mxu1 %v12962_v4  ;;  %v15472_v1 = vld [vmem:[%s20204_s1 + $0x500] sm:$0xff]  ;;  %v564_v4 = vshrl.u32 %v395_v54, 16  ;;  %v13001_v58 = vcombine.low %v3388_v27, %v3392_v28  ;;  %v14976_v27 = vld [vmem:[%s15226_s30 + $0x30] sm:$0xff]  }
  0x51   : > { %v525_v10 = vsel %vm15263_vm2, %v520_v53, %v524_v47  ;;  %v12992_v16 = vcombine.high %v15472_v1, %v15477_v2  ;;  %v556_v19 = vrot.slane %v554_v63, 5  ;;  %v12991_v34 = vcombine.low %v15472_v1, %v15477_v2  ;;  %v14975_v54 = vld [vmem:[%s15226_s30 + $0x24] sm:$0xff]  }
  0x52   : > { %6750 = vmatmul.mubr.bf16.vlgmr.msra.gmra.mrb[0].mxu0 %v14972_v0  ;;  %7715 = vmatmul.mubr.bf16.vlgmr.msra.gmra.mrb[0].mxu1 %v14972_v0  ;;  %v12986_v0 = vcombine.high %v15453_v46, %v3376_v48  ;;  %v15506_v26 = vcombine.low %v515_v5, %v525_v10  ;;  %v584_v46 = vshll.u32 %v398_v35, 16  ;;  %v588_v47 = vshrl.u32 %v398_v35, 16  ;;  %v3396_v48 = vld [vmem:[%s20204_s1 + $0x588] sm:$0xff]  ;;  %v3407_v1 = vld [vmem:[%s20204_s1 + $0x5e0] sm:$0xff]  ;;  %v401_v10 = vld [vmem:[%s15226_s30 + $0x58] sm:$0xf] }
  0x53   : > { %6911 = vmatpush1.bf16.msra.mxu0 %v12959_v8  ;;  %7876 = vmatpush1.bf16.msra.mxu1 %v12961_v21  ;;  %v3384_v8 = vld [vmem:[%s20204_s1 + $0x528] sm:$0xff]  ;;  %v3391_v21 = vld [vmem:[%s20204_s1 + $0x560] sm:$0xff]  ;;  %v557_v37 = vor.u32 %v556_v19, %v553_v18  ;;  %v13016_v11 = vcombine.high %v15543_v61, %v3407_v1  ;;  %v608_v28 = vshll.u32 %v401_v10, 16 }
  0x54   : > { %6759 = vmatprep.mubr.bf16.mxu0 %v15420_v22  ;;  %7724 = vmatprep.mubr.bf16.mxu1 %v15420_v22  ;;  %v12993_v36 = vcombine.low %v3380_v7, %v3384_v8  ;;  %v13000_v39 = vcombine.high %v3387_v20, %v3391_v21  ;;  %v12999_v53 = vcombine.low %v3387_v20, %v3391_v21  ;;  %v3404_v2 = vld [vmem:[%s20204_s1 + $0x5c8] sm:$0xff]  ;;  %v15556_v5 = vrot.slane %v584_v46, 5  ;;  %v3415_v18 = vld [vmem:[%s20204_s1 + $0x620] sm:$0xff] }
  0x55   : > { %6912 = vmatprep.subr.bf16.mxu0 %v12968_v24  ;;  %7877 = vmatprep.subr.bf16.mxu1 %v12970_v29  ;;  %v15504_v24 = vrot.slane %v560_v3, 5  ;;  %v397_v29 = vld [vmem:[%s15226_s30 + $0x48] sm:$0xf]  ;;  %v558_v55 = vrot.slane %v557_v37, 4 }
  0x56   : > { %v575_v42 = vshrl.u32 %v397_v29, 16  ;;  %v3408_v3 = vld [vmem:[%s20204_s1 + $0x5e8] sm:$0xff] }
  0x57   : > { %6913 = vmatpush1.bf16.msra.mxu0 %v12967_v23  ;;  %7878 = vmatpush1.bf16.msra.mxu1 %v12969_v25  ;;  %v12994_v23 = vcombine.high %v3380_v7, %v3384_v8  ;;  %v566_v25 = vrot.slane %v564_v4, 4  ;;  %v13007_v7 = vcombine.low %v3395_v44, %v3399_v45  ;;  %v400_v8 = vld [vmem:[%s15226_s30 + $0x54] sm:$0xf]  ;;  %v3424_v46 = vld [vmem:[%s20204_s1 + $0x668] sm:$0xff] }
  0x58   : > { %6914 = vmatprep.subr.bf16.mxu0 %v12976_v32  ;;  %7879 = vmatprep.subr.bf16.mxu1 %v12978_v43  ;;  %v544_v32 = vrot.slane %v543_v12, 4  ;;  %v578_v43 = vshll.u32 %v397_v29, 16  ;;  %v577_v62 = vrot.slane %v575_v42, 4  ;;  %v563_v12 = vsel %vm15263_vm2, %v558_v55, %v15504_v24 }
  0x59   : > { %v567_v40 = vor.u32 %v566_v25, %v15504_v24  ;;  %v599_v21 = vshrl.u32 %v400_v8, 16  ;;  %v3412_v24 = vld [vmem:[%s20204_s1 + $0x608] sm:$0xff]  ;;  %v612_v29 = vshrl.u32 %v401_v10, 16 }
  0x5a   : > { %6760 = vmatmul.mubr.bf16.gmra.mrb[4].mxu0 %v14973_v38  ;;  %7725 = vmatmul.mubr.bf16.gmra.mrb[4].mxu1 %v14973_v38  ;;  %v570_v38 = vshll.u32 %v396_v17, 16  ;;  %v549_v52 = vsel %vm15263_vm2, %v544_v32, %v548_v33  ;;  %v580_v63 = vrot.slane %v578_v43, 5  ;;  %v15569_v17 = vld [vmem:[%s20204_s1 + $0x600] sm:$0xff]  ;;  %v3416_v25 = vld [vmem:[%s20204_s1 + $0x628] sm:$0xff]  ;;  %v13017_v32 = vcombine.low %v3404_v2, %v3408_v3 }
  0x5b   : > { %6769 = vmatprep.mubr.bf16.mxu0 %v15459_v50  ;;  %7734 = vmatprep.mubr.bf16.mxu1 %v15459_v50  ;;  %v403_v33 = vld [vmem:[%s15226_s30 + $0x60] sm:$0xf]  ;;  %v13024_v35 = vcombine.high %v15569_v17, %v3415_v18  ;;  %v601_v43 = vrot.slane %v599_v21, 4  ;;  %v13025_v55 = vcombine.low %v3412_v24, %v3416_v25  ;;  %v406_v10 = vld [vmem:[%s15226_s30 + $0x6c] sm:$0xf] }
  0x5c   : > { %6915 = vmatpush1.bf16.msra.mxu0 %v12975_v51  ;;  %7880 = vmatpush1.bf16.msra.mxu1 %v12977_v59  ;;  %v539_v51 = vsel %vm15263_vm2, %v534_v30, %v15464_v57  ;;  %v572_v56 = vrot.slane %v570_v38, 5  ;;  %v399_v59 = vld [vmem:[%s15226_s30 + $0x50] sm:$0x1]  ;;  %v568_v57 = vrot.slane %v567_v40, 4  ;;  %v581_v19 = vor.u32 %v580_v63, %v577_v62  ;;  %v3423_v40 = vld [vmem:[%s20204_s1 + $0x660] sm:$0xff] }
  0x5d   : > { %6916 = vmatprep.subr.bf16.mxu0 %v12984_v60  ;;  %7881 = vmatprep.subr.bf16.mxu1 %v12986_v0  ;;  %v13008_v60 = vcombine.high %v3395_v44, %v3399_v45  ;;  %v13010_v0 = vcombine.high %v3396_v48, %v3400_v49  ;;  %v15554_v4 = vcombine.low %v539_v51, %v549_v52  ;;  %v15599_v45 = vld [vmem:[%s20204_s1 + $0x648] sm:$0xff]  ;;  %v623_v51 = vshrl.u32 %v403_v33, 16 }
  0x5e   : > { %v573_v13 = vsel %vm15263_vm2, %v568_v57, %v572_v56  ;;  %v13015_v30 = vcombine.low %v15543_v61, %v3407_v1  ;;  %v13026_v38 = vcombine.high %v3412_v24, %v3416_v25  ;;  %v13023_v52 = vcombine.low %v15569_v17, %v3415_v18  ;;  %v15617_v61 = vld [vmem:[%s20204_s1 + $0x6a0] sm:$0xff]  ;;  %v15633_v1 = vld [vmem:[%s20204_s1 + $0x6a8] sm:$0xff]  ;;  %v407_v17 = vld [vmem:[%s15226_s30 + $0x70] sm:$0xf] }
  0x5f   : > { %v3440_v24 = vld [vmem:[%s20204_s1 + $0x6e8] sm:$0xff]  ;;  %v15673_v25 = vld [vmem:[%s20204_s1 + $0x800] sm:$0xff] }
  0x60   : > { %6917 = vmatpush1.bf16.msra.mxu0 %v12983_v6  ;;  %7882 = vmatpush1.bf16.msra.mxu1 %v12985_v14  ;;  %v590_v6 = vrot.slane %v588_v47, 4  ;;  %v594_v14 = vshll.u32 %v399_v59, 16  ;;  %v402_v47 = vld [vmem:[%s15226_s30 + $0x5c] sm:$0x1] }
  0x61   : > { %6918 = vmatprep.subr.bf16.mxu0 %v12992_v16  ;;  %7883 = vmatprep.subr.bf16.mxu1 %v12994_v23  ;;  %v13018_v16 = vcombine.high %v3404_v2, %v3408_v3  ;;  %v602_v23 = vshll.u32 %v400_v8, 16  ;;  %v618_v63 = vshll.u32 %v402_v47, 16  ;;  %v15639_v8 = vrot.slane %v623_v51, 4  ;;  %v15713_v47 = vld [vmem:[%s20204_s1 + $0x708] sm:$0xff] }
  0x62   : > { %6770 = vmatmul.mubr.bf16.gmra.mrb[8].mxu0 %v14974_v9  ;;  %7735 = vmatmul.mubr.bf16.gmra.mrb[8].mxu1 %v14974_v9  ;;  %v13009_v9 = vcombine.low %v3396_v48, %v3400_v49  ;;  %v591_v20 = vor.u32 %v590_v6, %v15556_v5  ;;  %v596_v37 = vrot.slane %v594_v14, 5  ;;  %v15605_v48 = vrot.slane %v608_v28, 5 }
  0x63   : > { %6779 = vmatprep.mubr.bf16.mxu0 %v15506_v26  ;;  %7744 = vmatprep.mubr.bf16.mxu1 %v15506_v26  ;;  %v604_v44 = vrot.slane %v602_v23, 5  ;;  %v614_v49 = vrot.slane %v612_v29, 4  ;;  %v620_v23 = vrot.slane %v618_v63, 5  ;;  %v15740_v63 = vld [vmem:[%s20204_s1 + $0x740] sm:$0xff] }
  0x64   : > { %6919 = vmatpush1.bf16.msra.mxu0 %v12991_v34  ;;  %7884 = vmatpush1.bf16.msra.mxu1 %v12993_v36  ;;  %v404_v34 = vld [vmem:[%s15226_s30 + $0x64] sm:$0xf]  ;;  %v15588_v36 = vcombine.low %v563_v12, %v573_v13  ;;  %v592_v42 = vrot.slane %v591_v20, 4  ;;  %v15663_v20 = vld [vmem:[%s20204_s1 + $0x6c8] sm:$0xff] }
  0x65   : > { %6920 = vmatprep.subr.bf16.mxu0 %v13000_v39  ;;  %7885 = vmatprep.subr.bf16.mxu1 %v13002_v41  ;;  %v3419_v39 = vld [vmem:[%s20204_s1 + $0x640] sm:$0xff]  ;;  %v582_v41 = vrot.slane %v581_v19, 4  ;;  %v636_v59 = vshrl.u32 %v404_v34, 16  ;;  %v605_v2 = vor.u32 %v604_v44, %v601_v43  ;;  %v615_v3 = vor.u32 %v614_v49, %v15605_v48  ;;  %v15718_v49 = vld [vmem:[%s20204_s1 + $0x728] sm:$0xff] }
  0x66   : > { %v13032_v56 = vcombine.high %v3419_v39, %v3423_v40  ;;  %v597_v62 = vsel %vm15263_vm2, %v592_v42, %v596_v37  ;;  %v13031_v6 = vcombine.low %v3419_v39, %v3423_v40  ;;  %v15650_v13 = vld [vmem:[%s20204_s1 + $0x6c0] sm:$0xff]  ;;  %v650_v37 = vshll.u32 %v406_v10, 16 }
  0x67   : > { %v587_v57 = vsel %vm15263_vm2, %v582_v41, %v15556_v5  ;;  %v405_v5 = vld [vmem:[%s15226_s30 + $0x68] sm:$0x1]  ;;  %v3439_v19 = vld [vmem:[%s20204_s1 + $0x6e0] sm:$0xff]  ;;  %v616_v28 = vrot.slane %v615_v3, 4  ;;  %v13050_v42 = vcombine.high %v15663_v20, %v3440_v24 }
  0x68   : > { %6921 = vmatpush1.bf16.msra.mxu0 %v12999_v53  ;;  %7886 = vmatpush1.bf16.msra.mxu1 %v13001_v58  ;;  %v626_v53 = vshll.u32 %v403_v33, 16  ;;  %v15611_v58 = vld [vmem:[%s20204_s1 + $0x680] sm:$0xff]  ;;  %v15665_v21 = vcombine.low %v587_v57, %v597_v62  ;;  %v642_v29 = vshll.u32 %v405_v5, 16  ;;  %v15685_v33 = vld [vmem:[%s20204_s1 + $0x808] sm:$0xff]  ;;  %v13048_v39 = vcombine.high %v15650_v13, %v3439_v19  ;;  %v409_v57 = vld [vmem:[%s15226_s30 + $0x78] sm:$0xf] }
  0x69   : > { %6922 = vmatprep.subr.bf16.mxu0 %v13008_v60  ;;  %7887 = vmatprep.subr.bf16.mxu1 %v13010_v0  ;;  %v13034_v60 = vcombine.high %v15599_v45, %v3424_v46  ;;  %v15628_v0 = vld [vmem:[%s20204_s1 + $0x688] sm:$0xff]  ;;  %v13040_v12 = vcombine.high %v15611_v58, %v15617_v61  ;;  %v15702_v43 = vld [vmem:[%s20204_s1 + $0x700] sm:$0xff]  ;;  %v13049_v62 = vcombine.low %v15663_v20, %v3440_v24  ;;  %v674_v20 = vshll.u32 %v409_v57, 16 }
  0x6a   : > { %6780 = vmatmul.mubr.bf16.gmra.mrb[12].mxu0 %v14975_v54  ;;  %7745 = vmatmul.mubr.bf16.gmra.mrb[12].mxu1 %v14975_v54  ;;  %v632_v54 = vshll.u32 %v404_v34, 16  ;;  %v13042_v18 = vcombine.high %v15628_v0, %v15633_v1  ;;  %v15690_v34 = vld [vmem:[%s20204_s1 + $0x828] sm:$0xff]  ;;  %v15707_v44 = vld [vmem:[%s20204_s1 + $0x720] sm:$0xff] }
  0x6b   : > { %6789 = vmatprep.mubr.bf16.mxu0 %v15554_v4  ;;  %7754 = vmatprep.mubr.bf16.mxu1 %v15554_v4  ;;  %v3459_v24 = vld [vmem:[%s20204_s1 + $0x780] sm:$0xff] }
  0x6c   : > { %6923 = vmatpush1.bf16.msra.mxu0 %v13007_v7  ;;  %7888 = vmatpush1.bf16.msra.mxu1 %v13009_v9  ;;  %v14977_v7 = vld [vmem:[%s15226_s30 + $0x3c] sm:$0xff]   ;;  %v15641_v9 = vrot.slane %v626_v53, 5  ;;  %v15652_v14 = vrot.slane %v632_v54, 5  ;;  %v621_v54 = vsel %vm15263_vm2, %v616_v28, %v620_v23 }
  0x6d   : > { %6924 = vmatprep.subr.bf16.mxu0 %v13016_v11  ;;  %7889 = vmatprep.subr.bf16.mxu1 %v13018_v16  ;;  %v13033_v11 = vcombine.low %v15599_v45, %v3424_v46  ;;  %v638_v16 = vrot.slane %v636_v59, 4  ;;  %v656_v45 = vshll.u32 %v407_v17, 16  ;;  %v660_v46 = vshrl.u32 %v407_v17, 16  ;;  %v14978_v59 = vld [vmem:[%s15226_s30 + $0x48] sm:$0xff]  }
  0x6e   : > { %v629_v40 = vor.u32 %v15641_v9, %v15639_v8  ;;  %v3452_v8 = vld [vmem:[%s20204_s1 + $0x748] sm:$0xff] }
  0x6f   : > { %v639_v41 = vor.u32 %v638_v16, %v15652_v14  ;;  %v3456_v9 = vld [vmem:[%s20204_s1 + $0x768] sm:$0xff]  ;;  %v13057_v16 = vcombine.low %v15713_v47, %v15718_v49 }
  0x70   : > { %6925 = vmatpush1.bf16.msra.mxu0 %v13015_v30  ;;  %7890 = vmatpush1.bf16.msra.mxu1 %v13017_v32  ;;  %v13039_v30 = vcombine.low %v15611_v58, %v15617_v61  ;;  %v15680_v32 = vld [vmem:[%s20204_s1 + $0x820] sm:$0xff]  ;;  %v13047_v58 = vcombine.low %v15650_v13, %v3439_v19  ;;  %v652_v61 = vrot.slane %v650_v37, 5  ;;  %v671_v19 = vshrl.u32 %v409_v57, 16  ;;  %v3464_v37 = vld [vmem:[%s20204_s1 + $0x7a8] sm:$0xff] }
  0x71   : > { %6926 = vmatprep.subr.bf16.mxu0 %v13024_v35  ;;  %7891 = vmatprep.subr.bf16.mxu1 %v13026_v38  ;;  %v647_v35 = vshrl.u32 %v406_v10, 16  ;;  %v13041_v38 = vcombine.low %v15628_v0, %v15633_v1  ;;  %v13087_v51 = vcombine.low %v15673_v25, %v15680_v32  ;;  %v630_v0 = vrot.slane %v629_v40, 4  ;;  %v410_v10 = vld [vmem:[%s15226_s30 + $0x7c] sm:$0xf]  ;;  %v3468_v57 = vld [vmem:[%s20204_s1 + $0x7c8] sm:$0xff] }
  0x72   : > { %6790 = vmatmul.mubr.bf16.gmra.mrb[16].mxu0 %v14976_v27  ;;  %7755 = vmatmul.mubr.bf16.gmra.mrb[16].mxu1 %v14976_v27  ;;  %v606_v27 = vrot.slane %v605_v2, 4  ;;  %v13058_v1 = vcombine.high %v15713_v47, %v15718_v49  ;;  %v3455_v2 = vld [vmem:[%s20204_s1 + $0x760] sm:$0xff]  ;;  %v640_v5 = vrot.slane %v639_v41, 4  ;;  %v13066_v23 = vcombine.high %v3452_v8, %v3456_v9 }
  0x73   : > { %6799 = vmatprep.mubr.bf16.mxu0 %v15588_v36  ;;  %7764 = vmatprep.mubr.bf16.mxu1 %v15588_v36  ;;  %v13064_v17 = vcombine.high %v15740_v63, %v3455_v2  ;;  %v13063_v40 = vcombine.low %v15740_v63, %v3455_v2  ;;  %v673_v49 = vrot.slane %v671_v19, 4 }
  0x74   : > { %6927 = vmatpush1.bf16.msra.mxu0 %v13023_v52  ;;  %7892 = vmatpush1.bf16.msra.mxu1 %v13025_v55  ;;  %v13089_v52 = vcombine.low %v15685_v33, %v15690_v34  ;;  %v611_v53 = vsel %vm15263_vm2, %v606_v27, %v15605_v48  ;;  %v644_v55 = vrot.slane %v642_v29, 5  ;;  %v13056_v48 = vcombine.high %v15702_v43, %v15707_v44  ;;  %v3463_v27 = vld [vmem:[%s20204_s1 + $0x7a0] sm:$0xff] }
  0x75   : > { %6928 = vmatprep.subr.bf16.mxu0 %v13032_v56  ;;  %7893 = vmatprep.subr.bf16.mxu1 %v13034_v60  ;;  %v408_v56 = vld [vmem:[%s15226_s30 + $0x74] sm:$0x1]  ;;  %v649_v60 = vrot.slane %v647_v35, 4  ;;  %v15747_v3 = vcombine.low %v611_v53, %v621_v54  ;;  %v680_v29 = vshll.u32 %v410_v10, 16  ;;  %v3460_v35 = vld [vmem:[%s20204_s1 + $0x788] sm:$0xff]  ;;  %v676_v53 = vrot.slane %v674_v20, 5 }
  0x76   : > { %v666_v13 = vshll.u32 %v408_v56, 16  ;;  %v13074_v54 = vcombine.high %v3460_v35, %v3464_v37  ;;  %v3471_v56 = vld [vmem:[%s20204_s1 + $0x7e0] sm:$0xff]  ;;  %v13073_v2 = vcombine.low %v3460_v35, %v3464_v37 }
  0x78   : > { %6929 = vmatpush1.bf16.msra.mxu0 %v13031_v6  ;;  %7894 = vmatpush1.bf16.msra.mxu1 %v13033_v11  ;;  %v15749_v6 = vrot.slane %v656_v45, 5  ;;  %v13055_v11 = vcombine.low %v15702_v43, %v15707_v44  ;;  %v411_v43 = vld [vmem:[%s15226_s30 + $0x80] sm:$0x1]  ;;  %v413_v44 = vld [vmem:[%s15226_s30 + $0x88] sm:$0xf]  ;;  %v13065_v45 = vcombine.low %v3452_v8, %v3456_v9 }
  0x79   : > { %6930 = vmatprep.subr.bf16.mxu0 %v13040_v12  ;;  %7895 = vmatprep.subr.bf16.mxu1 %v13042_v18  ;;  %v653_v12 = vor.u32 %v652_v61, %v649_v60  ;;  %v635_v18 = vsel %vm15263_vm2, %v630_v0, %v15652_v14  ;;  %v645_v14 = vsel %vm15263_vm2, %v640_v5, %v644_v55  ;;  %v3467_v55 = vld [vmem:[%s20204_s1 + $0x7c0] sm:$0xff]  ;;  %v704_v63 = vshll.u32 %v413_v44, 16 }
  0x7a   : > { %6800 = vmatmul.mubr.bf16.gmra.mrb[20].mxu0 %v14977_v7  ;;  %7765 = vmatmul.mubr.bf16.gmra.mrb[20].mxu1 %v14977_v7  ;;  %v662_v7 = vrot.slane %v660_v46, 4  ;;  %v13072_v46 = vcombine.high %v3459_v24, %v3463_v27  ;;  %v15788_v47 = vcombine.low %v635_v18, %v645_v14  ;;  %v708_v0 = vshrl.u32 %v413_v44, 16 }
  0x7b   : > { %6809 = vmatprep.mubr.bf16.mxu0 %v15665_v21  ;;  %7774 = vmatprep.mubr.bf16.mxu1 %v15665_v21  ;;  %v654_v41 = vrot.slane %v653_v12, 4  ;;  %v13080_v5 = vcombine.high %v3467_v55, %v3471_v56  ;;  %v690_v8 = vshll.u32 %v411_v43, 16  ;;  %v15814_v19 = vrot.slane %v704_v63, 5 }
  0x7c   : > { %6931 = vmatpush1.bf16.msra.mxu0 %v13039_v30  ;;  %7896 = vmatpush1.bf16.msra.mxu1 %v13041_v38  ;;  %v663_v28 = vor.u32 %v662_v7, %v15749_v6  ;;  %v684_v30 = vshrl.u32 %v410_v10, 16  ;;  %v14979_v38 = vld [vmem:[%s15226_s30 + $0x54] sm:$0xff]   ;;  %v677_v7 = vor.u32 %v676_v53, %v673_v49  ;;  %v710_v20 = vrot.slane %v708_v0, 4 }
  0x7d   : > { %6932 = vmatprep.subr.bf16.mxu0 %v13048_v39  ;;  %7897 = vmatprep.subr.bf16.mxu1 %v13050_v42  ;;  %v412_v39 = vld [vmem:[%s15226_s30 + $0x84] sm:$0xf]  ;;  %v668_v42 = vrot.slane %v666_v13, 5  ;;  %v659_v10 = vsel %vm15263_vm2, %v654_v41, %v15749_v6  ;;  %v13088_v14 = vcombine.high %v15673_v25, %v15680_v32  ;;  %v15966_v25 = vld [vmem:[%s20204_s1 + $0xc28] sm:$0xff] }
  0x7e   : > { %v686_v60 = vrot.slane %v684_v30, 4  ;;  %v695_v61 = vshrl.u32 %v412_v39, 16  ;;  %v13090_v30 = vcombine.high %v15685_v33, %v15690_v34  ;;  %v3499_v33 = vld [vmem:[%s20204_s1 + $0x8c0] sm:$0xff] }
  0x7f   : > { %v3503_v34 = vld [vmem:[%s20204_s1 + $0x8e0] sm:$0xff] }
  0x80   : > { %6933 = vmatpush1.bf16.msra.mxu0 %v13047_v58  ;;  %7898 = vmatpush1.bf16.msra.mxu1 %v13049_v62  ;;  %v664_v58 = vrot.slane %v663_v28, 4  ;;  %v3472_v62 = vld [vmem:[%s20204_s1 + $0x7e8] sm:$0xff]  ;;  %v697_v13 = vrot.slane %v695_v61, 4  ;;  %v678_v28 = vrot.slane %v677_v7, 4 }
  0x81   : > { %6934 = vmatprep.subr.bf16.mxu0 %v13056_v48  ;;  %7899 = vmatprep.subr.bf16.mxu1 %v13058_v1  ;;  %v698_v48 = vshll.u32 %v412_v39, 16  ;;  %v13071_v1 = vcombine.low %v3459_v24, %v3463_v27  ;;  %v13082_v9 = vcombine.high %v3468_v57, %v3472_v62  ;;  %v415_v24 = vld [vmem:[%s15226_s30 + $0x90] sm:$0xf]  ;;  %v416_v27 = vld [vmem:[%s15226_s30 + $0x94] sm:$0xf]  ;;  %v13081_v6 = vcombine.low %v3468_v57, %v3472_v62 }
  0x82   : > { %6810 = vmatmul.mubr.bf16.gmra.mrb[24].mxu0 %v14978_v59  ;;  %7775 = vmatmul.mubr.bf16.gmra.mrb[24].mxu1 %v14978_v59  ;;  %v15796_v59 = vrot.slane %v680_v29, 5  ;;  %v692_v29 = vrot.slane %v690_v8, 5  ;;  %v719_v41 = vshrl.u32 %v415_v24, 16  ;;  %v728_v43 = vshll.u32 %v416_v27, 16  ;;  %v419_v57 = vld [vmem:[%s15226_s30 + $0xa0] sm:$0xf] }
  0x83   : > { %6819 = vmatprep.mubr.bf16.mxu0 %v15747_v3  ;;  %7784 = vmatprep.mubr.bf16.mxu1 %v15747_v3  ;;  %v700_v18 = vrot.slane %v698_v48, 5  ;;  %v732_v44 = vshrl.u32 %v416_v27, 16 }
  0x84   : > { %6935 = vmatpush1.bf16.msra.mxu0 %v13055_v11  ;;  %7900 = vmatpush1.bf16.msra.mxu1 %v13057_v16  ;;  %v669_v11 = vsel %vm15263_vm2, %v664_v58, %v668_v42  ;;  %v687_v12 = vor.u32 %v686_v60, %v15796_v59  ;;  %v14980_v16 = vld [vmem:[%s15226_s30 + $0x60] sm:$0xff]   ;;  %v722_v42 = vshll.u32 %v415_v24, 16  ;;  %v683_v49 = vsel %vm15263_vm2, %v678_v28, %v15796_v59 }
  0x85   : > { %6936 = vmatprep.subr.bf16.mxu0 %v13064_v17  ;;  %7901 = vmatprep.subr.bf16.mxu1 %v13066_v23  ;;  %v414_v17 = vld [vmem:[%s15226_s30 + $0x8c] sm:$0x1]  ;;  %v13079_v23 = vcombine.low %v3467_v55, %v3471_v56  ;;  %v15822_v35 = vcombine.low %v659_v10, %v669_v11  ;;  %v701_v39 = vor.u32 %v700_v18, %v697_v13  ;;  %v721_v60 = vrot.slane %v719_v41, 4  ;;  %v420_v59 = vld [vmem:[%s15226_s30 + $0xa4] sm:$0x1]  ;;  %v14982_v11 = vld [vmem:[%s15226_s30 + $0x78] sm:$0xff]  }
  0x86   : > { %v688_v37 = vrot.slane %v687_v12, 4  ;;  %v14981_v55 = vld [vmem:[%s15226_s30 + $0x6c] sm:$0xff]   ;;  %v724_v61 = vrot.slane %v722_v42, 5  ;;  %v730_v62 = vrot.slane %v728_v43, 5  ;;  %v734_v48 = vrot.slane %v732_v44, 4  ;;  %v14983_v42 = vld [vmem:[%s15226_s30 + $0x84] sm:$0xff]  }
  0x87   : > { %v702_v56 = vrot.slane %v701_v39, 4  ;;  %v756_v10 = vshrl.u32 %v419_v57, 16  ;;  %v421_v18 = vld [vmem:[%s15226_s30 + $0xa8] sm:$0xf] }
  0x88   : > { %6937 = vmatpush1.bf16.msra.mxu0 %v13063_v40  ;;  %7902 = vmatpush1.bf16.msra.mxu1 %v13065_v45  ;;  %v711_v40 = vor.u32 %v710_v20, %v15814_v19  ;;  %v417_v45 = vld [vmem:[%s15226_s30 + $0x98] sm:$0x1]  ;;  %v693_v53 = vsel %vm15263_vm2, %v688_v37, %v692_v29  ;;  %v725_v7 = vor.u32 %v724_v61, %v721_v60  ;;  %v767_v28 = vshrl.u32 %v421_v18, 16 }
  0x89   : > { %6938 = vmatprep.subr.bf16.mxu0 %v13072_v46  ;;  %7903 = vmatprep.subr.bf16.mxu1 %v13074_v54  ;;  %v418_v46 = vld [vmem:[%s15226_s30 + $0x9c] sm:$0xf]  ;;  %v738_v63 = vshll.u32 %v417_v45, 16  ;;  %v735_v8 = vor.u32 %v734_v48, %v730_v62  ;;  %v770_v37 = vshll.u32 %v421_v18, 16  ;;  %v423_v45 = vld [vmem:[%s15226_s30 + $0xb0] sm:$0x1] }
  0x8a   : > { %6820 = vmatmul.mubr.bf16.gmra.mrb[28].mxu0 %v14979_v38  ;;  %7785 = vmatmul.mubr.bf16.gmra.mrb[28].mxu1 %v14979_v38  ;;  %v714_v38 = vshll.u32 %v414_v17, 16  ;;  %v712_v58 = vrot.slane %v711_v40, 4  ;;  %v743_v0 = vshrl.u32 %v418_v46, 16  ;;  %v726_v13 = vrot.slane %v725_v7, 4  ;;  %v425_v60 = vld [vmem:[%s15226_s30 + $0xb8] sm:$0xf] }
  0x8b   : > { %6829 = vmatprep.mubr.bf16.mxu0 %v15788_v47  ;;  %7794 = vmatprep.mubr.bf16.mxu1 %v15788_v47  ;;  %v762_v17 = vshll.u32 %v420_v59, 16  ;;  %v736_v20 = vrot.slane %v735_v8, 4  ;;  %v786_v61 = vshll.u32 %v423_v45, 16  ;;  %v14984_v7 = vld [vmem:[%s15226_s30 + $0x90] sm:$0xff]   ;;  %v896_v45 = vld [vmem:[%s15226_s30 + $0x8] sm:$0x1] }
  0x8c   : > { %6939 = vmatpush1.bf16.msra.mxu0 %v13071_v1  ;;  %7904 = vmatpush1.bf16.msra.mxu1 %v13073_v2  ;;  %v716_v54 = vrot.slane %v714_v38, 5  ;;  %v15836_v1 = vcombine.low %v683_v49, %v693_v53  ;;  %v746_v2 = vshll.u32 %v418_v46, 16  ;;  %v731_v38 = vsel %vm15263_vm2, %v726_v13, %v730_v62  ;;  %v424_v49 = vld [vmem:[%s15226_s30 + $0xb4] sm:$0xf]  ;;  %v426_v13 = vld [vmem:[%s15226_s30 + $0xbc] sm:$0x1] }
  0x8d   : > { %6940 = vmatprep.subr.bf16.mxu0 %v13080_v5  ;;  %7905 = vmatprep.subr.bf16.mxu1 %v13082_v9  ;;  %v752_v5 = vshll.u32 %v419_v57, 16  ;;  %v707_v9 = vsel %vm15263_vm2, %v702_v56, %v15814_v19  ;;  %v422_v19 = vld [vmem:[%s15226_s30 + $0xac] sm:$0xf]  ;;  %v764_v44 = vrot.slane %v762_v17, 5  ;;  %v769_v46 = vrot.slane %v767_v28, 4 }
  0x8e   : > { %v717_v12 = vsel %vm15263_vm2, %v712_v58, %v716_v54  ;;  %v748_v24 = vrot.slane %v746_v2, 5  ;;  %v776_v40 = vshll.u32 %v422_v19, 16  ;;  %v780_v41 = vshrl.u32 %v422_v19, 16  ;;  %v14985_v19 = vld [vmem:[%s15226_s30 + $0x9c] sm:$0xff]  }
  0x8f   : > { %v754_v27 = vrot.slane %v752_v5, 5  ;;  %v794_v59 = vshll.u32 %v424_v49, 16  ;;  %v800_v2 = vshll.u32 %v425_v60, 16  ;;  %v804_v5 = vshrl.u32 %v425_v60, 16  ;;  %v898_v60 = vld [vmem:[%s15226_s30 + $0x10] sm:$0xf] }
  0x90   : > { %6941 = vmatpush1.bf16.msra.mxu0 %v13079_v23  ;;  %7906 = vmatpush1.bf16.msra.mxu1 %v13081_v6  ;;  %v745_v23 = vrot.slane %v743_v0, 4  ;;  %v15848_v6 = vcombine.low %v707_v9, %v717_v12  ;;  %v778_v56 = vrot.slane %v776_v40, 5  ;;  %v782_v58 = vrot.slane %v780_v41, 4  ;;  %v14986_v40 = vld [vmem:[%s15226_s30 + $0xa8] sm:$0xff]  }
  0x91   : > { %7103 = vmatprep.subr.bf16.mxu0 %v13088_v14  ;;  %8068 = vmatprep.subr.bf16.mxu1 %v13090_v30  ;;  %v758_v14 = vrot.slane %v756_v10, 4  ;;  %v788_v10 = vrot.slane %v786_v61, 5  ;;  %v802_v17 = vrot.slane %v800_v2, 5  ;;  %v806_v18 = vrot.slane %v804_v5, 4  ;;  %v3487_v2 = vld [vmem:[%s20204_s1 + $0x860] sm:$0xff] }
  0x92   : > { %6830 = vmatmul.mubr.bf16.gmra.mrb[32].mxu0 %v14980_v16  ;;  %7795 = vmatmul.mubr.bf16.gmra.mrb[32].mxu1 %v14980_v16  ;;  %v740_v16 = vrot.slane %v738_v63, 5  ;;  %v749_v29 = vor.u32 %v748_v24, %v745_v23  ;;  %v791_v63 = vshrl.u32 %v424_v49, 16  ;;  %v783_v0 = vor.u32 %v782_v58, %v778_v56  ;;  %v14988_v49 = vld [vmem:[%s15226_s30 + $0xc] sm:$0xff]  }
  0x93   : > { %6839 = vmatprep.mubr.bf16.mxu0 %v15822_v35  ;;  %7804 = vmatprep.mubr.bf16.mxu1 %v15822_v35  ;;  %v759_v30 = vor.u32 %v758_v14, %v754_v27  ;;  %v807_v14 = vor.u32 %v806_v18, %v802_v17  ;;  %v3495_v18 = vld [vmem:[%s20204_s1 + $0x8a0] sm:$0xff]  ;;  %v3361_v58 = vld [vmem:[%s20204_s1 + $0x470] sm:$0xff] }
  0x94   : > { %v741_v39 = vsel %vm15263_vm2, %v736_v20, %v740_v16  ;;  %v750_v43 = vrot.slane %v749_v29, 4  ;;  %v784_v12 = vrot.slane %v783_v0, 4  ;;  %v796_v16 = vrot.slane %v794_v59, 5  ;;  %v3483_v59 = vld [vmem:[%s20204_s1 + $0x840] sm:$0xff] }
  0x95   : > { %v15860_v53 = vcombine.low %v731_v38, %v741_v39  ;;  %v760_v54 = vrot.slane %v759_v30, 4  ;;  %v810_v20 = vshll.u32 %v426_v13, 16  ;;  %v808_v30 = vrot.slane %v807_v14, 4  ;;  %v901_v13 = vld [vmem:[%s15226_s30 + $0x1c] sm:$0xf]  ;;  %v15941_v14 = vld [vmem:[%s20204_s1 + $0xc00] sm:$0xff] }
  0x96   : > { %v755_v57 = vsel %vm15263_vm2, %v750_v43, %v754_v27  ;;  %v789_v24 = vsel %vm15263_vm2, %v784_v12, %v788_v10  ;;  %v3484_v10 = vld [vmem:[%s20204_s1 + $0x848] sm:$0xff]  ;;  %v14989_v12 = vld [vmem:[%s15226_s30 + $0x18] sm:$0xff]  }
  0x97   : > { %v765_v62 = vsel %vm15263_vm2, %v760_v54, %v764_v44  ;;  %v894_v44 = vld [vmem:[%s15226_s30] sm:$0xe] }
  0x98   : > { %v15870_v8 = vcombine.low %v755_v57, %v765_v62  ;;  %v12415_v54 = vrot.slane %v894_v44, 9  ;;  %v1002_v62 = vrot.slane %v898_v60, 5 }
  0x9a   : > { %6840 = vmatmul.mubr.bf16.gmra.mrb[36].mxu0 %v14981_v55  ;;  %7805 = vmatmul.mubr.bf16.gmra.mrb[36].mxu1 %v14981_v55  ;;  %v772_v55 = vrot.slane %v770_v37, 5  ;;  %v812_v37 = vrot.slane %v810_v20, 5  ;;  %v3492_v20 = vld [vmem:[%s20204_s1 + $0x888] sm:$0xff] }
  0x9b   : > { %6849 = vmatprep.mubr.bf16.mxu0 %v15836_v1  ;;  %7814 = vmatprep.mubr.bf16.mxu1 %v15836_v1 }
  0x9c   : > { %v773_v48 = vor.u32 %v772_v55, %v769_v46  ;;  %v813_v39 = vsel %vm15263_vm2, %v808_v30, %v812_v37  ;;  %v14987_v46 = vld [vmem:[%s15226_s30 + $0xb4] sm:$0xff]   ;;  %v1009_v37 = vrot.slane %v901_v13, 5  ;;  %v13111_v13 = vcombine.low %v3499_v33, %v3503_v34 }
  0x9e   : > { %v774_v9 = vrot.slane %v773_v48, 4  ;;  %v897_v48 = vld [vmem:[%s15226_s30 + $0xc] sm:$0xe] }
  0x9f   : > { %v12416_v5 = vrot.slane %v897_v48, 9 }
  0xa0   : > { %v779_v23 = vsel %vm15263_vm2, %v774_v9, %v778_v56  ;;  %v998_v56 = vrot.slane %v896_v45, 5 }
  0xa1   : > { %v15880_v28 = vcombine.low %v779_v23, %v789_v24  ;;  %v13095_v23 = vcombine.low %v3483_v59, %v3487_v2 }
  0xa2   : > { %6850 = vmatmul.mubr.bf16.gmra.mrb[40].mxu0 %v14982_v11  ;;  %7815 = vmatmul.mubr.bf16.gmra.mrb[40].mxu1 %v14982_v11  ;;  %v793_v11 = vrot.slane %v791_v63, 4  ;;  %v899_v63 = vld [vmem:[%s15226_s30 + $0x14] sm:$0x1] }
  0xa3   : > { %6859 = vmatprep.mubr.bf16.mxu0 %v15848_v6  ;;  %7824 = vmatprep.mubr.bf16.mxu1 %v15848_v6  ;;  %v1005_v9 = vrot.slane %v899_v63, 5  ;;  %v3507_v63 = vld [vmem:[%s20204_s1 + $0x900] sm:$0xff] }
  0xa4   : > { %v797_v27 = vor.u32 %v796_v16, %v793_v11  ;;  %v3488_v11 = vld [vmem:[%s20204_s1 + $0x868] sm:$0xff]  ;;  %v13096_v16 = vcombine.high %v3483_v59, %v3487_v2  ;;  %v3511_v59 = vld [vmem:[%s20204_s1 + $0x920] sm:$0xff] }
  0xa5   : > { %v13098_v24 = vcombine.high %v3484_v10, %v3488_v11  ;;  %v13097_v32 = vcombine.low %v3484_v10, %v3488_v11  ;;  %v3512_v10 = vld [vmem:[%s20204_s1 + $0x928] sm:$0xff]  ;;  %v903_v11 = vld [vmem:[%s15226_s30 + $0x24] sm:$0xe] }
  0xa6   : > { %v798_v29 = vrot.slane %v797_v27, 4  ;;  %v3496_v27 = vld [vmem:[%s20204_s1 + $0x8a8] sm:$0xff] }
  0xa7   : > { %v13106_v44 = vcombine.high %v3492_v20, %v3496_v27 }
  0xa8   : > { %v803_v38 = vsel %vm15263_vm2, %v798_v29, %v802_v17  ;;  %v3491_v17 = vld [vmem:[%s20204_s1 + $0x880] sm:$0xff]  ;;  %v1003_v29 = vsel %vm15898_vm5, %v12416_v5, %v1002_v62 }
  0xa9   : > { %v15889_v41 = vcombine.low %v803_v38, %v813_v39  ;;  %v15961_v39 = vld [vmem:[%s20204_s1 + $0xc08] sm:$0xff]  ;;  %v13103_v60 = vcombine.low %v3491_v17, %v3495_v18 }
  0xaa   : > { %6860 = vmatmul.mubr.bf16.gmra.mrb[44].mxu0 %v14983_v42  ;;  %7825 = vmatmul.mubr.bf16.gmra.mrb[44].mxu1 %v14983_v42  ;;  %v895_v42 = vld [vmem:[%s15226_s30 + $0x4] sm:$0xf] }
  0xab   : > { %6869 = vmatprep.mubr.bf16.mxu0 %v15860_v53  ;;  %7834 = vmatprep.mubr.bf16.mxu1 %v15860_v53  ;;  %v995_v43 = vrot.slane %v895_v42, 5  ;;  %v13104_v42 = vcombine.high %v3491_v17, %v3495_v18  ;;  %v13120_v17 = vcombine.high %v3507_v63, %v3511_v59 }
  0xad   : > { %v997_v55 = vrot.slane %v995_v43, 4  ;;  %v996_v61 = vsel %vm15898_vm5, %v12415_v54, %v995_v43 }
  0xaf   : > { %v999_v57 = vsel %vm15898_vm5, %v997_v55, %v998_v56  ;;  %v3500_v55 = vld [vmem:[%s20204_s1 + $0x8c8] sm:$0xff] }
  0xb0   : > { %v15909_v0 = vcombine.low %v996_v61, %v999_v57  ;;  %v3504_v56 = vld [vmem:[%s20204_s1 + $0x8e8] sm:$0xff]  ;;  %v13105_v57 = vcombine.low %v3492_v20, %v3496_v27  ;;  %v14991_v27 = vld [vmem:[%s15226_s30 + $0x30] sm:$0xff]  }
  0xb1   : > { %v904_v61 = vld [vmem:[%s15226_s30 + $0x28] sm:$0xf]  ;;  %v13114_v48 = vcombine.high %v3500_v55, %v3504_v56 }
  0xb2   : > { %6870 = vmatmul.mubr.bf16.gmra.mrb[48].mxu0 %v14984_v7  ;;  %7835 = vmatmul.mubr.bf16.gmra.mrb[48].mxu1 %v14984_v7  ;;  %v1004_v7 = vrot.slane %v1002_v62, 4  ;;  %v13112_v62 = vcombine.high %v3499_v33, %v3503_v34 }
  0xb3   : > { %6879 = vmatprep.mubr.bf16.mxu0 %v15870_v8  ;;  %7844 = vmatprep.mubr.bf16.mxu1 %v15870_v8 }
  0xb4   : > { %v1006_v30 = vsel %vm15898_vm5, %v1004_v7, %v1005_v9  ;;  %v1016_v7 = vrot.slane %v904_v61, 5  ;;  %v3508_v9 = vld [vmem:[%s20204_s1 + $0x908] sm:$0xff]  ;;  %v906_v61 = vld [vmem:[%s15226_s30 + $0x30] sm:$0xe] }
  0xb5   : > { %v15975_v45 = vcombine.low %v1003_v29, %v1006_v30  ;;  %v13122_v20 = vcombine.high %v3508_v9, %v3512_v10  ;;  %v12418_v29 = vrot.slane %v903_v11, 9 }
  0xb6   : > { %v1018_v30 = vrot.slane %v1016_v7, 4 }
  0xb7   : > { %20383 = vst [vmem:[#allocation3_spill] sm:$0xff] %v15975_v45 }
  0xba   : > { %6880 = vmatmul.mubr.bf16.gmra.mrb[52].mxu0 %v14985_v19  ;;  %7845 = vmatmul.mubr.bf16.gmra.mrb[52].mxu1 %v14985_v19  ;;  %v15946_v19 = vld [vmem:[%s20204_s1 + $0xc20] sm:$0xff] }
  0xbb   : > { %6889 = vmatprep.mubr.bf16.mxu0 %v15880_v28  ;;  %7854 = vmatprep.mubr.bf16.mxu1 %v15880_v28 }
  0xc2   : > { %6890 = vmatmul.mubr.bf16.gmra.mrb[56].mxu0 %v14986_v40  ;;  %7855 = vmatmul.mubr.bf16.gmra.mrb[56].mxu1 %v14986_v40  ;;  %v902_v40 = vld [vmem:[%s15226_s30 + $0x20] sm:$0x1] }
  0xc3   : > { %6899 = vmatprep.mubr.bf16.mxu0 %v15889_v41  ;;  %7864 = vmatprep.mubr.bf16.mxu1 %v15889_v41  ;;  %v1012_v54 = vrot.slane %v902_v40, 5  ;;  %v907_v40 = vld [vmem:[%s15226_s30 + $0x34] sm:$0xf] }
  0xca   : > { %6900 = vmatmul.mubr.bf16.gmra.mrb[60].mxu0 %v14987_v46  ;;  %7865 = vmatmul.mubr.bf16.gmra.mrb[60].mxu1 %v14987_v46 }
  0xcb   : > { %6942 = vmatprep.mubr.bf16.mxu0 %v14988_v49  ;;  %7907 = vmatprep.mubr.bf16.mxu1 %v14988_v49  ;;  %v1011_v49 = vrot.slane %v1009_v37, 4 }
  0xcd   : > { %v1013_v5 = vsel %vm15898_vm5, %v1011_v49, %v1012_v54  ;;  %v1017_v49 = vsel %vm15898_vm5, %v12418_v29, %v1016_v7  ;;  %v3535_v7 = vld [vmem:[%s20204_s1 + $0x9e0] sm:$0xff] }
  0xce   : > { %v3539_v29 = vld [vmem:[%s20204_s1 + $0xa00] sm:$0xff] }
  0xd2   : > { %6943 = vmatmul.mubr.bf16.vlgmr.msra.gmra.mrb[0].mxu0 %v15909_v0  ;;  %7908 = vmatmul.mubr.bf16.vlgmr.msra.gmra.mrb[0].mxu1 %v15909_v0 }
  0xd3   : > { %7104 = vmatpush1.bf16.msra.mxu0 %v13087_v51  ;;  %8069 = vmatpush1.bf16.msra.mxu1 %v13089_v52  ;;  %v900_v51 = vld [vmem:[%s15226_s30 + $0x18] sm:$0xe]  ;;  %v14990_v52 = vld [vmem:[%s15226_s30 + $0x24] sm:$0xff]  }
  0xd4   : > { %6952 = vmatprep.mubr.bf16.mxu0 %v14989_v12  ;;  %7917 = vmatprep.mubr.bf16.mxu1 %v14989_v12  ;;  %v12417_v46 = vrot.slane %v900_v51, 9  ;;  %v905_v12 = vld [vmem:[%s15226_s30 + $0x2c] sm:$0x1] }
  0xd5   : > { %7105 = vmatprep.subr.bf16.mxu0 %v13096_v16  ;;  %8070 = vmatprep.subr.bf16.mxu1 %v13098_v24  ;;  %v13113_v16 = vcombine.low %v3500_v55, %v3504_v56  ;;  %v3519_v24 = vld [vmem:[%s20204_s1 + $0x960] sm:$0xff]  ;;  %v3520_v51 = vld [vmem:[%s20204_s1 + $0x968] sm:$0xff]  ;;  %v1023_v55 = vrot.slane %v907_v40, 5 }
  0xd6   : > { %v1010_v2 = vsel %vm15898_vm5, %v12417_v46, %v1009_v37  ;;  %v1019_v37 = vrot.slane %v905_v12, 5  ;;  %v3527_v46 = vld [vmem:[%s20204_s1 + $0x9a0] sm:$0xff]  ;;  %v3524_v56 = vld [vmem:[%s20204_s1 + $0x988] sm:$0xff] }
  0xd7   : > { %7106 = vmatpush1.bf16.msra.mxu0 %v13095_v23  ;;  %8071 = vmatpush1.bf16.msra.mxu1 %v13097_v32  ;;  %v16011_v18 = vcombine.low %v1010_v2, %v1013_v5  ;;  %v3515_v23 = vld [vmem:[%s20204_s1 + $0x940] sm:$0xff]  ;;  %v3516_v32 = vld [vmem:[%s20204_s1 + $0x948] sm:$0xff]  ;;  %v1025_v11 = vrot.slane %v1023_v55, 4 }
  0xd8   : > { %7107 = vmatprep.subr.bf16.mxu0 %v13104_v42  ;;  %8072 = vmatprep.subr.bf16.mxu1 %v13106_v44  ;;  %v13119_v42 = vcombine.low %v3507_v63, %v3511_v59  ;;  %v13121_v44 = vcombine.low %v3508_v9, %v3512_v10  ;;  %v13128_v33 = vcombine.high %v3515_v23, %v3519_v24  ;;  %v3531_v5 = vld [vmem:[%s20204_s1 + $0x9c0] sm:$0xff]  ;;  %v12419_v10 = vrot.slane %v906_v61, 9  ;;  %v3540_v40 = vld [vmem:[%s20204_s1 + $0xa08] sm:$0xff] }
  0xd9   : > { %20384 = vst [vmem:[#allocation4_spill] sm:$0xff] %v16011_v18  ;;  %v13130_v34 = vcombine.high %v3516_v32, %v3520_v51  ;;  %v1020_v54 = vsel %vm15898_vm5, %v1018_v30, %v1019_v37  ;;  %v14992_v9 = vld [vmem:[%s15226_s30 + $0x3c] sm:$0xff]  }
  0xda   : > { %6953 = vmatmul.mubr.bf16.gmra.mrb[4].mxu0 %v15975_v45  ;;  %7918 = vmatmul.mubr.bf16.gmra.mrb[4].mxu1 %v15975_v45  ;;  %v16047_v59 = vcombine.low %v1017_v49, %v1020_v54  ;;  %v3543_v30 = vld [vmem:[%s20204_s1 + $0xa20] sm:$0xff]  ;;  %v1024_v37 = vsel %vm15898_vm5, %v12419_v10, %v1023_v55 }
  0xdb   : > { %6962 = vmatprep.mubr.bf16.mxu0 %v14990_v52  ;;  %7927 = vmatprep.mubr.bf16.mxu1 %v14990_v52  ;;  %v3523_v52 = vld [vmem:[%s20204_s1 + $0x980] sm:$0xff] }
  0xdc   : > { %7108 = vmatpush1.bf16.msra.mxu0 %v13103_v60  ;;  %8073 = vmatpush1.bf16.msra.mxu1 %v13105_v57  ;;  %v3528_v60 = vld [vmem:[%s20204_s1 + $0x9a8] sm:$0xff]  ;;  %v908_v57 = vld [vmem:[%s15226_s30 + $0x38] sm:$0x1]  ;;  %v13136_v63 = vcombine.high %v3523_v52, %v3527_v46  ;;  %20385 = vst [vmem:[#allocation5_spill] sm:$0xff] %v16047_v59  ;;  %v3547_v55 = vld [vmem:[%s20204_s1 + $0xa40] sm:$0xff] }
  0xdd   : > { %7109 = vmatprep.subr.bf16.mxu0 %v13112_v62  ;;  %8074 = vmatprep.subr.bf16.mxu1 %v13114_v48  ;;  %v13127_v62 = vcombine.low %v3515_v23, %v3519_v24  ;;  %v13129_v48 = vcombine.low %v3516_v32, %v3520_v51  ;;  %v13138_v2 = vcombine.high %v3524_v56, %v3528_v60  ;;  %v1026_v12 = vrot.slane %v908_v57, 5 }
  0xde   : > { %v13137_v23 = vcombine.low %v3524_v56, %v3528_v60  ;;  %v13144_v24 = vcombine.high %v3531_v5, %v3535_v7  ;;  %v3551_v56 = vld [vmem:[%s20204_s1 + $0xa60] sm:$0xff]  ;;  %v14993_v60 = vld [vmem:[%s15226_s30 + $0x48] sm:$0xff]  }
  0xdf   : > { %v1027_v32 = vsel %vm15898_vm5, %v1025_v11, %v1026_v12  ;;  %v3555_v11 = vld [vmem:[%s20204_s1 + $0xa80] sm:$0xff] }
  0xe0   : > { %7110 = vmatpush1.bf16.msra.mxu0 %v13111_v13  ;;  %8075 = vmatpush1.bf16.msra.mxu1 %v13113_v16  ;;  %v3532_v13 = vld [vmem:[%s20204_s1 + $0x9c8] sm:$0xff]  ;;  %v16083_v49 = vcombine.low %v1024_v37, %v1027_v32  ;;  %v3559_v12 = vld [vmem:[%s20204_s1 + $0xaa0] sm:$0xff] }
  0xe1   : > { %7111 = vmatprep.subr.bf16.mxu0 %v13120_v17  ;;  %8076 = vmatprep.subr.bf16.mxu1 %v13122_v20  ;;  %v3536_v16 = vld [vmem:[%s20204_s1 + $0x9e8] sm:$0xff]  ;;  %v910_v17 = vld [vmem:[%s15226_s30 + $0x40] sm:$0xf]  ;;  %v13135_v20 = vcombine.low %v3523_v52, %v3527_v46  ;;  %v13152_v46 = vcombine.high %v3539_v29, %v3543_v30  ;;  %v13168_v37 = vcombine.high %v3555_v11, %v3559_v12 }
  0xe2   : > { %6963 = vmatmul.mubr.bf16.gmra.mrb[8].mxu0 %v16011_v18  ;;  %7928 = vmatmul.mubr.bf16.gmra.mrb[8].mxu1 %v16011_v18  ;;  %v1030_v51 = vrot.slane %v910_v17, 5  ;;  %v13145_v52 = vcombine.low %v3532_v13, %v3536_v16  ;;  %20386 = vst [vmem:[#allocation6_spill] sm:$0xff] %v16083_v49 }
  0xe3   : > { %6972 = vmatprep.mubr.bf16.mxu0 %v14991_v27  ;;  %7937 = vmatprep.mubr.bf16.mxu1 %v14991_v27  ;;  %v13146_v27 = vcombine.high %v3532_v13, %v3536_v16 }
  0xe4   : > { %7112 = vmatpush1.bf16.msra.mxu0 %v13119_v42  ;;  %8077 = vmatpush1.bf16.msra.mxu1 %v13121_v44  ;;  %v3544_v42 = vld [vmem:[%s20204_s1 + $0xa28] sm:$0xff]  ;;  %v909_v44 = vld [vmem:[%s15226_s30 + $0x3c] sm:$0xe]  ;;  %v1032_v57 = vrot.slane %v1030_v51, 4 }
  0xe5   : > { %7113 = vmatprep.subr.bf16.mxu0 %v13128_v33  ;;  %8078 = vmatprep.subr.bf16.mxu1 %v13130_v34  ;;  %v911_v33 = vld [vmem:[%s15226_s30 + $0x44] sm:$0x1]  ;;  %v13143_v34 = vcombine.low %v3531_v5, %v3535_v7  ;;  %v13154_v54 = vcombine.high %v3540_v40, %v3544_v42  ;;  %v12420_v61 = vrot.slane %v909_v44, 9  ;;  %v13151_v5 = vcombine.low %v3539_v29, %v3543_v30  ;;  %v14994_v44 = vld [vmem:[%s15226_s30 + $0x54] sm:$0xff]  }
  0xe6   : > { %v13153_v7 = vcombine.low %v3540_v40, %v3544_v42  ;;  %v13159_v29 = vcombine.low %v3547_v55, %v3551_v56  ;;  %v3563_v40 = vld [vmem:[%s20204_s1 + $0xac0] sm:$0xff] }
  0xe7   : > { %v1031_v13 = vsel %vm15898_vm5, %v12420_v61, %v1030_v51  ;;  %v3567_v42 = vld [vmem:[%s20204_s1 + $0xae0] sm:$0xff] }
  0xe8   : > { %7114 = vmatpush1.bf16.msra.mxu0 %v13127_v62  ;;  %8079 = vmatpush1.bf16.msra.mxu1 %v13129_v48  ;;  %v1033_v62 = vrot.slane %v911_v33, 5  ;;  %v3548_v48 = vld [vmem:[%s20204_s1 + $0xa48] sm:$0xff]  ;;  %v13176_v61 = vcombine.high %v3563_v40, %v3567_v42 }
  0xe9   : > { %7115 = vmatprep.subr.bf16.mxu0 %v13136_v63  ;;  %8080 = vmatprep.subr.bf16.mxu1 %v13138_v2  ;;  %v3552_v63 = vld [vmem:[%s20204_s1 + $0xa68] sm:$0xff] }
  0xea   : > { %6973 = vmatmul.mubr.bf16.gmra.mrb[12].mxu0 %v16047_v59  ;;  %7938 = vmatmul.mubr.bf16.gmra.mrb[12].mxu1 %v16047_v59  ;;  %v913_v2 = vld [vmem:[%s15226_s30 + $0x4c] sm:$0xf]  ;;  %v13162_v10 = vcombine.high %v3548_v48, %v3552_v63  ;;  %v1034_v16 = vsel %vm15898_vm5, %v1032_v57, %v1033_v62  ;;  %v13161_v30 = vcombine.low %v3548_v48, %v3552_v63  ;;  %v3571_v62 = vld [vmem:[%s20204_s1 + $0xb00] sm:$0xff] }
  0xeb   : > { %6982 = vmatprep.mubr.bf16.mxu0 %v14992_v9  ;;  %7947 = vmatprep.mubr.bf16.mxu1 %v14992_v9  ;;  %v13160_v9 = vcombine.high %v3547_v55, %v3551_v56  ;;  %v1037_v17 = vrot.slane %v913_v2, 5  ;;  %v16119_v32 = vcombine.low %v1031_v13, %v1034_v16  ;;  %v916_v55 = vld [vmem:[%s15226_s30 + $0x58] sm:$0xf]  ;;  %v13167_v56 = vcombine.low %v3555_v11, %v3559_v12  ;;  %v3575_v48 = vld [vmem:[%s20204_s1 + $0xb20] sm:$0xff]  ;;  %v917_v11 = vld [vmem:[%s15226_s30 + $0x5c] sm:$0x1] }
  0xec   : > { %7116 = vmatpush1.bf16.msra.mxu0 %v13135_v20  ;;  %8081 = vmatpush1.bf16.msra.mxu1 %v13137_v23  ;;  %v3556_v20 = vld [vmem:[%s20204_s1 + $0xa88] sm:$0xff]  ;;  %v13175_v12 = vcombine.low %v3563_v40, %v3567_v42  ;;  %v13184_v16 = vcombine.high %v3571_v62, %v3575_v48  ;;  %v919_v42 = vld [vmem:[%s15226_s30 + $0x64] sm:$0xf] }
  0xed   : > { %7117 = vmatprep.subr.bf16.mxu0 %v13144_v24  ;;  %8082 = vmatprep.subr.bf16.mxu1 %v13146_v27  ;;  %v3560_v23 = vld [vmem:[%s20204_s1 + $0xaa8] sm:$0xff]  ;;  %v914_v27 = vld [vmem:[%s15226_s30 + $0x50] sm:$0x1]  ;;  %20387 = vst [vmem:[#allocation7_spill] sm:$0xff] %v16119_v32 }
  0xee   : > { %v912_v24 = vld [vmem:[%s15226_s30 + $0x48] sm:$0xe]  ;;  %v13170_v51 = vcombine.high %v3556_v20, %v3560_v23 }
  0xef   : > { %v12421_v33 = vrot.slane %v912_v24, 9  ;;  %v3583_v24 = vld [vmem:[%s20204_s1 + $0xb60] sm:$0xff]  ;;  %v3584_v40 = vld [vmem:[%s20204_s1 + $0xb68] sm:$0xff] }
  0xf0   : > { %7118 = vmatpush1.bf16.msra.mxu0 %v13143_v34  ;;  %8083 = vmatpush1.bf16.msra.mxu1 %v13145_v52  ;;  %v1039_v34 = vrot.slane %v1037_v17, 4  ;;  %v1040_v52 = vrot.slane %v914_v27, 5  ;;  %v14995_v27 = vld [vmem:[%s15226_s30 + $0x60] sm:$0xff]   ;;  %v16458_v59 = vld [vmem:[%s20204_s1 + $0x1028] sm:$0xff] }
  0xf1   : > { %7119 = vmatprep.subr.bf16.mxu0 %v13152_v46  ;;  %8084 = vmatprep.subr.bf16.mxu1 %v13154_v54  ;;  %v3564_v46 = vld [vmem:[%s20204_s1 + $0xac8] sm:$0xff]  ;;  %v1038_v63 = vsel %vm15898_vm5, %v12421_v33, %v1037_v17 }
  0xf2   : > { %6983 = vmatmul.mubr.bf16.gmra.mrb[16].mxu0 %v16083_v49  ;;  %7948 = vmatmul.mubr.bf16.gmra.mrb[16].mxu1 %v16083_v49  ;;  %v3568_v54 = vld [vmem:[%s20204_s1 + $0xae8] sm:$0xff]  ;;  %v1041_v2 = vsel %vm15898_vm5, %v1039_v34, %v1040_v52 }
  0xf3   : > { %6992 = vmatprep.mubr.bf16.mxu0 %v14993_v60  ;;  %7957 = vmatprep.mubr.bf16.mxu1 %v14993_v60  ;;  %v13169_v60 = vcombine.low %v3556_v20, %v3560_v23  ;;  %v13178_v57 = vcombine.high %v3564_v46, %v3568_v54  ;;  %v13177_v13 = vcombine.low %v3564_v46, %v3568_v54  ;;  %v3579_v23 = vld [vmem:[%s20204_s1 + $0xb40] sm:$0xff]  ;;  %v16453_v49 = vld [vmem:[%s20204_s1 + $0x1008] sm:$0xff] }
  0xf4   : > { %7120 = vmatpush1.bf16.msra.mxu0 %v13151_v5  ;;  %8085 = vmatpush1.bf16.msra.mxu1 %v13153_v7  ;;  %v1044_v5 = vrot.slane %v916_v55, 5  ;;  %v3572_v7 = vld [vmem:[%s20204_s1 + $0xb08] sm:$0xff]  ;;  %v16155_v17 = vcombine.low %v1038_v63, %v1041_v2  ;;  %v13192_v34 = vcombine.high %v3579_v23, %v3583_v24  ;;  %v3587_v46 = vld [vmem:[%s20204_s1 + $0xb80] sm:$0xff]  ;;  %v13191_v63 = vcombine.low %v3579_v23, %v3583_v24 }
  0xf5   : > { %7121 = vmatprep.subr.bf16.mxu0 %v13160_v9  ;;  %8086 = vmatprep.subr.bf16.mxu1 %v13162_v10  ;;  %v3576_v9 = vld [vmem:[%s20204_s1 + $0xb28] sm:$0xff]  ;;  %v915_v10 = vld [vmem:[%s15226_s30 + $0x54] sm:$0xe]  ;;  %v3591_v54 = vld [vmem:[%s20204_s1 + $0xba0] sm:$0xff] }
  0xf6   : > { %20388 = vst [vmem:[#allocation8_spill] sm:$0xff] %v16155_v17  ;;  %v13186_v20 = vcombine.high %v3572_v7, %v3576_v9  ;;  %v13185_v33 = vcombine.low %v3572_v7, %v3576_v9  ;;  %v3596_v23 = vld [vmem:[%s20204_s1 + $0xbc8] sm:$0xff] }
  0xf7   : > { %v3600_v24 = vld [vmem:[%s20204_s1 + $0xbe8] sm:$0xff] }
  0xf8   : > { %7122 = vmatpush1.bf16.msra.mxu0 %v13159_v29  ;;  %8087 = vmatpush1.bf16.msra.mxu1 %v13161_v30  ;;  %v12422_v29 = vrot.slane %v915_v10, 9  ;;  %v1046_v30 = vrot.slane %v1044_v5, 4  ;;  %v3595_v10 = vld [vmem:[%s20204_s1 + $0xbc0] sm:$0xff] }
  0xf9   : > { %7123 = vmatprep.subr.bf16.mxu0 %v13168_v37  ;;  %8088 = vmatprep.subr.bf16.mxu1 %v13170_v51  ;;  %v1047_v37 = vrot.slane %v917_v11, 5  ;;  %v3580_v51 = vld [vmem:[%s20204_s1 + $0xb48] sm:$0xff]  ;;  %v3599_v11 = vld [vmem:[%s20204_s1 + $0xbe0] sm:$0xff] }
  0xfa   : > { %6993 = vmatmul.mubr.bf16.gmra.mrb[20].mxu0 %v16119_v32  ;;  %7958 = vmatmul.mubr.bf16.gmra.mrb[20].mxu1 %v16119_v32  ;;  %v13194_v52 = vcombine.high %v3580_v51, %v3584_v40  ;;  %v1045_v55 = vsel %vm15898_vm5, %v12422_v29, %v1044_v5  ;;  %v13193_v2 = vcombine.low %v3580_v51, %v3584_v40  ;;  %v16437_v32 = vld [vmem:[%s20204_s1 + $0x1000] sm:$0xff] }
  0xfb   : > { %7002 = vmatprep.mubr.bf16.mxu0 %v14994_v44  ;;  %7967 = vmatprep.mubr.bf16.mxu1 %v14994_v44  ;;  %v13183_v44 = vcombine.low %v3571_v62, %v3575_v48  ;;  %v918_v62 = vld [vmem:[%s15226_s30 + $0x60] sm:$0xe]  ;;  %v920_v48 = vld [vmem:[%s15226_s30 + $0x68] sm:$0x1]  ;;  %v13200_v5 = vcombine.high %v3587_v46, %v3591_v54  ;;  %v13199_v29 = vcombine.low %v3587_v46, %v3591_v54 }
  0xfc   : > { %7124 = vmatpush1.bf16.msra.mxu0 %v13167_v56  ;;  %8089 = vmatpush1.bf16.msra.mxu1 %v13169_v60  ;;  %v1048_v56 = vsel %vm15898_vm5, %v1046_v30, %v1047_v37  ;;  %v1051_v60 = vrot.slane %v919_v42, 5  ;;  %v13208_v37 = vcombine.high %v3595_v10, %v3599_v11  ;;  %v13210_v51 = vcombine.high %v3596_v23, %v3600_v24 }
  0xfd   : > { %7125 = vmatprep.subr.bf16.mxu0 %v13176_v61  ;;  %8090 = vmatprep.subr.bf16.mxu1 %v13178_v57  ;;  %v3588_v61 = vld [vmem:[%s20204_s1 + $0xb88] sm:$0xff]  ;;  %v16191_v7 = vcombine.low %v1045_v55, %v1048_v56  ;;  %v13209_v46 = vcombine.low %v3596_v23, %v3600_v24  ;;  %v13216_v54 = vcombine.high %v15941_v14, %v15946_v19 }
  0xfe   : > { %v3592_v57 = vld [vmem:[%s20204_s1 + $0xba8] sm:$0xff]  ;;  %v13218_v56 = vcombine.high %v15961_v39, %v15966_v25 }
  0xff   : > { %20389 = vst [vmem:[#allocation9_spill] sm:$0xff] %v16191_v7  ;;  %v13202_v9 = vcombine.high %v3588_v61, %v3592_v57  ;;  %v13201_v30 = vcombine.low %v3588_v61, %v3592_v57  ;;  %v928_v23 = vld [vmem:[%s15226_s30 + $0x88] sm:$0xf] }
 0x100   : > { %7126 = vmatpush1.bf16.msra.mxu0 %v13175_v12  ;;  %8091 = vmatpush1.bf16.msra.mxu1 %v13177_v13  ;;  %v14996_v12 = vld [vmem:[%s15226_s30 + $0x6c] sm:$0xff]   ;;  %v12423_v13 = vrot.slane %v918_v62, 9 }
 0x101   : > { %7127 = vmatprep.subr.bf16.mxu0 %v13184_v16  ;;  %8092 = vmatprep.subr.bf16.mxu1 %v13186_v20  ;;  %v1053_v16 = vrot.slane %v1051_v60, 4  ;;  %v1054_v20 = vrot.slane %v920_v48, 5  ;;  %v925_v48 = vld [vmem:[%s15226_s30 + $0x7c] sm:$0xf] }
 0x102   : > { %7003 = vmatmul.mubr.bf16.gmra.mrb[24].mxu0 %v16155_v17  ;;  %7968 = vmatmul.mubr.bf16.gmra.mrb[24].mxu1 %v16155_v17  ;;  %v1052_v40 = vsel %vm15898_vm5, %v12423_v13, %v1051_v60  ;;  %v14997_v60 = vld [vmem:[%s15226_s30 + $0x78] sm:$0xff]  }
 0x103   : > { %7012 = vmatprep.mubr.bf16.mxu0 %v14995_v27  ;;  %7977 = vmatprep.mubr.bf16.mxu1 %v14995_v27  ;;  %v922_v27 = vld [vmem:[%s15226_s30 + $0x70] sm:$0xf]  ;;  %v1055_v42 = vsel %vm15898_vm5, %v1053_v16, %v1054_v20 }
 0x104   : > { %7128 = vmatpush1.bf16.msra.mxu0 %v13183_v44  ;;  %8093 = vmatpush1.bf16.msra.mxu1 %v13185_v33  ;;  %v1058_v44 = vrot.slane %v922_v27, 5  ;;  %v921_v33 = vld [vmem:[%s15226_s30 + $0x6c] sm:$0xe]  ;;  %v16217_v55 = vcombine.low %v1052_v40, %v1055_v42  ;;  %v14999_v40 = vld [vmem:[%s15226_s30 + $0x90] sm:$0xff]  }
 0x105   : > { %7129 = vmatprep.subr.bf16.mxu0 %v13192_v34  ;;  %8094 = vmatprep.subr.bf16.mxu1 %v13194_v52  ;;  %v923_v34 = vld [vmem:[%s15226_s30 + $0x74] sm:$0x1]  ;;  %v13207_v52 = vcombine.low %v3595_v10, %v3599_v11  ;;  %v12424_v61 = vrot.slane %v921_v33, 9  ;;  %v926_v10 = vld [vmem:[%s15226_s30 + $0x80] sm:$0x1] }
 0x106   : > { %20390 = vst [vmem:[#allocation10_spill] sm:$0xff] %v16217_v55  ;;  %v1060_v57 = vrot.slane %v1058_v44, 4  ;;  %v1061_v62 = vrot.slane %v923_v34, 5  ;;  %v1068_v20 = vrot.slane %v926_v10, 5  ;;  %v931_v34 = vld [vmem:[%s15226_s30 + $0x94] sm:$0xf] }
 0x108   : > { %7130 = vmatpush1.bf16.msra.mxu0 %v13191_v63  ;;  %8095 = vmatpush1.bf16.msra.mxu1 %v13193_v2  ;;  %v1059_v63 = vsel %vm15898_vm5, %v12424_v61, %v1058_v44  ;;  %v1062_v2 = vsel %vm15898_vm5, %v1060_v57, %v1061_v62  ;;  %v15000_v57 = vld [vmem:[%s15226_s30 + $0x9c] sm:$0xff]  }
 0x109   : > { %7131 = vmatprep.subr.bf16.mxu0 %v13200_v5  ;;  %8096 = vmatprep.subr.bf16.mxu1 %v13202_v9  ;;  %v1065_v5 = vrot.slane %v925_v48, 5  ;;  %v924_v9 = vld [vmem:[%s15226_s30 + $0x78] sm:$0xe]  ;;  %v16231_v11 = vcombine.low %v1059_v63, %v1062_v2  ;;  %v934_v2 = vld [vmem:[%s15226_s30 + $0xa0] sm:$0xf] }
 0x10a   : > { %7013 = vmatmul.mubr.bf16.gmra.mrb[28].mxu0 %v16191_v7  ;;  %7978 = vmatmul.mubr.bf16.gmra.mrb[28].mxu1 %v16191_v7  ;;  %v12425_v13 = vrot.slane %v924_v9, 9  ;;  %v1086_v10 = vrot.slane %v934_v2, 5 }
 0x10b   : > { %7022 = vmatprep.mubr.bf16.mxu0 %v14996_v12  ;;  %7987 = vmatprep.mubr.bf16.mxu1 %v14996_v12  ;;  %20391 = vst [vmem:[#allocation11_spill] sm:$0xff] %v16231_v11  ;;  %v14998_v12 = vld [vmem:[%s15226_s30 + $0x84] sm:$0xff]   ;;  %v1067_v16 = vrot.slane %v1065_v5, 4 }
 0x10c   : > { %7132 = vmatpush1.bf16.msra.mxu0 %v13199_v29  ;;  %8097 = vmatpush1.bf16.msra.mxu1 %v13201_v30  ;;  %v1066_v24 = vsel %vm15898_vm5, %v12425_v13, %v1065_v5  ;;  %v1072_v29 = vrot.slane %v928_v23, 5  ;;  %v927_v30 = vld [vmem:[%s15226_s30 + $0x84] sm:$0xe]  ;;  %v935_v13 = vld [vmem:[%s15226_s30 + $0xa4] sm:$0x1]  ;;  %v15001_v23 = vld [vmem:[%s15226_s30 + $0xa8] sm:$0xff]  }
 0x10d   : > { %7133 = vmatprep.subr.bf16.mxu0 %v13208_v37  ;;  %8098 = vmatprep.subr.bf16.mxu1 %v13210_v51  ;;  %v1069_v27 = vsel %vm15898_vm5, %v1067_v16, %v1068_v20  ;;  %v929_v37 = vld [vmem:[%s15226_s30 + $0x8c] sm:$0x1]  ;;  %v12426_v42 = vrot.slane %v927_v30, 9  ;;  %v936_v30 = vld [vmem:[%s15226_s30 + $0xa8] sm:$0xe] }
 0x10e   : > { %v16243_v51 = vcombine.low %v1066_v24, %v1069_v27  ;;  %v1074_v44 = vrot.slane %v1072_v29, 4  ;;  %v1075_v33 = vrot.slane %v929_v37, 5  ;;  %v937_v16 = vld [vmem:[%s15226_s30 + $0xac] sm:$0xf]  ;;  %v1088_v27 = vrot.slane %v1086_v10, 4 }
 0x10f   : > { %v1093_v37 = vrot.slane %v937_v16, 5 }
 0x110   : > { %7134 = vmatpush1.bf16.msra.mxu0 %v13207_v52  ;;  %8099 = vmatpush1.bf16.msra.mxu1 %v13209_v46  ;;  %20392 = vst [vmem:[#allocation12_spill] sm:$0xff] %v16243_v51  ;;  %v1073_v52 = vsel %vm15898_vm5, %v12426_v42, %v1072_v29  ;;  %v1076_v46 = vsel %vm15898_vm5, %v1074_v44, %v1075_v33  ;;  %v1089_v29 = vrot.slane %v935_v13, 5  ;;  %v12495_v42 = vld [vmem:[%s15226_s30 + $0xc] sm:$0xf] }
 0x111   : > { %7296 = vmatprep.subr.bf16.mxu0 %v13216_v54  ;;  %8261 = vmatprep.subr.bf16.mxu1 %v13218_v56  ;;  %v1079_v54 = vrot.slane %v931_v34, 5  ;;  %v930_v56 = vld [vmem:[%s15226_s30 + $0x90] sm:$0xe]  ;;  %v16255_v61 = vcombine.low %v1073_v52, %v1076_v46  ;;  %v12429_v34 = vrot.slane %v936_v30, 9  ;;  %v1095_v46 = vrot.slane %v1093_v37, 4 }
 0x112   : > { %7023 = vmatmul.mubr.bf16.gmra.mrb[32].mxu0 %v16217_v55  ;;  %7988 = vmatmul.mubr.bf16.gmra.mrb[32].mxu1 %v16217_v55  ;;  %v12427_v62 = vrot.slane %v930_v56, 9  ;;  %v1090_v33 = vsel %vm15898_vm5, %v1088_v27, %v1089_v29  ;;  %v12496_v52 = vld [vmem:[%s15226_s30 + $0x10] sm:$0xf]  ;;  %v1379_v56 = vshrl.u32 %v12495_v42, 16  ;;  %v12559_v29 = vld [vmem:[%s15226_s30 + $0xc] sm:$0xe] }
 0x113   : > { %7032 = vmatprep.mubr.bf16.mxu0 %v14997_v60  ;;  %7997 = vmatprep.mubr.bf16.mxu1 %v14997_v60  ;;  %v932_v60 = vld [vmem:[%s15226_s30 + $0x98] sm:$0x1]  ;;  %20393 = vst [vmem:[#allocation13_spill] sm:$0xff] %v16255_v61  ;;  %v1081_v48 = vrot.slane %v1079_v54, 4  ;;  %v1392_v2 = vshrl.u32 %v12496_v52, 16 }
 0x114   : > { %v1082_v63 = vrot.slane %v932_v60, 5  ;;  %v1080_v5 = vsel %vm15898_vm5, %v12427_v62, %v1079_v54  ;;  %v1382_v60 = vshll.u32 %v12495_v42, 16  ;;  %v1381_v13 = vrot.slane %v1379_v56, 4 }
 0x116   : > { %v1083_v9 = vsel %vm15898_vm5, %v1081_v48, %v1082_v63  ;;  %v12560_v48 = vld [vmem:[%s15226_s30 + $0x10] sm:$0xf]  ;;  %v1388_v63 = vshll.u32 %v12496_v52, 16  ;;  %v1384_v16 = vrot.slane %v1382_v60, 5  ;;  %v12563_v60 = vld [vmem:[%s15226_s30 + $0x1c] sm:$0xf] }
 0x117   : > { %v16268_v20 = vcombine.low %v1080_v5, %v1083_v9  ;;  %v15002_v5 = vld [vmem:[%s15226_s30 + $0xb4] sm:$0xff]   ;;  %v1094_v9 = vsel %vm15898_vm5, %v12429_v34, %v1093_v37  ;;  %v1940_v27 = vrot.slane %v12560_v48, 5  ;;  %v12499_v34 = vld [vmem:[%s15226_s30 + $0x1c] sm:$0xf] }
 0x118   : > { %v16294_v30 = vrot.slane %v1388_v63, 5  ;;  %v12498_v37 = vld [vmem:[%s15226_s30 + $0x18] sm:$0xf]  ;;  %v1385_v56 = vor.u32 %v1384_v16, %v1381_v13  ;;  %v1412_v38 = vshll.u32 %v12499_v34, 16  ;;  %v1416_v16 = vshrl.u32 %v12499_v34, 16 }
 0x119   : > { %20394 = vst [vmem:[#allocation14_spill] sm:$0xff] %v16268_v20  ;;  %v1942_v48 = vrot.slane %v1940_v27, 4  ;;  %v1403_v63 = vshrl.u32 %v12498_v37, 16  ;;  %v12562_v13 = vld [vmem:[%s15226_s30 + $0x18] sm:$0xe] }
 0x11a   : > { %7033 = vmatmul.mubr.bf16.gmra.mrb[36].mxu0 %v16231_v11  ;;  %7998 = vmatmul.mubr.bf16.gmra.mrb[36].mxu1 %v16231_v11  ;;  %v16319_v34 = vrot.slane %v1412_v38, 5 }
 0x11b   : > { %7042 = vmatprep.mubr.bf16.mxu0 %v14998_v12  ;;  %8007 = vmatprep.mubr.bf16.mxu1 %v14998_v12  ;;  %v933_v12 = vld [vmem:[%s15226_s30 + $0x9c] sm:$0xe] }
 0x11c   : > { %v12428_v24 = vrot.slane %v933_v12, 9 }
 0x11e   : > { %v1087_v44 = vsel %vm15898_vm5, %v12428_v24, %v1086_v10  ;;  %v941_v24 = vld [vmem:[%s15226_s30 + $0xbc] sm:$0x1] }
 0x11f   : > { %v16282_v62 = vcombine.low %v1087_v44, %v1090_v33  ;;  %v12561_v44 = vld [vmem:[%s15226_s30 + $0x14] sm:$0x1] }
 0x120   : > { %v12497_v33 = vld [vmem:[%s15226_s30 + $0x14] sm:$0x1]  ;;  %v1943_v43 = vrot.slane %v12561_v44, 5  ;;  %v12564_v44 = vld [vmem:[%s15226_s30 + $0x20] sm:$0x1] }
 0x121   : > { %20395 = vst [vmem:[#allocation15_spill] sm:$0xff] %v16282_v62 }
 0x122   : > { %7043 = vmatmul.mubr.bf16.gmra.mrb[40].mxu0 %v16243_v51  ;;  %8008 = vmatmul.mubr.bf16.gmra.mrb[40].mxu1 %v16243_v51 }
 0x123   : > { %7052 = vmatprep.mubr.bf16.mxu0 %v14999_v40  ;;  %8017 = vmatprep.mubr.bf16.mxu1 %v14999_v40  ;;  %v938_v40 = vld [vmem:[%s15226_s30 + $0xb0] sm:$0x1] }
 0x124   : > { %v1096_v54 = vrot.slane %v938_v40, 5  ;;  %v1394_v40 = vrot.slane %v1392_v2, 4  ;;  %v1406_v2 = vshll.u32 %v12498_v37, 16 }
 0x126   : > { %v1097_v10 = vsel %vm15898_vm5, %v1095_v46, %v1096_v54  ;;  %v1103_v54 = vrot.slane %v941_v24, 5  ;;  %v1386_v24 = vrot.slane %v1385_v56, 4 }
 0x127   : > { %v16298_v42 = vcombine.low %v1094_v9, %v1097_v10  ;;  %v1395_v9 = vor.u32 %v1394_v40, %v16294_v30  ;;  %v1398_v10 = vshll.u32 %v12497_v33, 16  ;;  %v1408_v40 = vrot.slane %v1406_v2, 5  ;;  %v12502_v33 = vld [vmem:[%s15226_s30 + $0x28] sm:$0xf] }
 0x128   : > { %v1418_v2 = vrot.slane %v1416_v16, 4  ;;  %v1436_v51 = vshll.u32 %v12502_v33, 16  ;;  %v1440_v11 = vshrl.u32 %v12502_v33, 16  ;;  %v16353_v33 = vld [vmem:[%s20204_s1 + $0xc60] sm:$0xff] }
 0x129   : > { %20396 = vst [vmem:[#allocation16_spill] sm:$0xff] %v16298_v42  ;;  %v1400_v56 = vrot.slane %v1398_v10, 5 }
 0x12a   : > { %7053 = vmatmul.mubr.bf16.gmra.mrb[44].mxu0 %v16255_v61  ;;  %8018 = vmatmul.mubr.bf16.gmra.mrb[44].mxu1 %v16255_v61  ;;  %v1405_v61 = vrot.slane %v1403_v63, 4  ;;  %v12500_v63 = vld [vmem:[%s15226_s30 + $0x20] sm:$0x1] }
 0x12b   : > { %7062 = vmatprep.mubr.bf16.mxu0 %v15000_v57  ;;  %8027 = vmatprep.mubr.bf16.mxu1 %v15000_v57  ;;  %v940_v57 = vld [vmem:[%s15226_s30 + $0xb8] sm:$0xf]  ;;  %v1422_v10 = vshll.u32 %v12500_v63, 16 }
 0x12c   : > { %v1100_v12 = vrot.slane %v940_v57, 5  ;;  %v12607_v57 = vrot.slane %v12559_v29, 9 }
 0x12e   : > { %v1102_v46 = vrot.slane %v1100_v12, 4  ;;  %v1941_v37 = vsel %vm15898_vm5, %v12607_v57, %v1940_v27  ;;  %v1950_v57 = vrot.slane %v12564_v44, 5  ;;  %v16339_v44 = vrot.slane %v1436_v51, 5  ;;  %v12565_v51 = vld [vmem:[%s15226_s30 + $0x24] sm:$0xe] }
 0x130   : > { %v1104_v29 = vsel %vm15898_vm5, %v1102_v46, %v1103_v54  ;;  %v12608_v46 = vrot.slane %v12562_v13, 9  ;;  %v12566_v13 = vld [vmem:[%s15226_s30 + $0x28] sm:$0xf] }
 0x132   : > { %7063 = vmatmul.mubr.bf16.gmra.mrb[48].mxu0 %v16268_v20  ;;  %8028 = vmatmul.mubr.bf16.gmra.mrb[48].mxu1 %v16268_v20  ;;  %v12501_v20 = vld [vmem:[%s15226_s30 + $0x24] sm:$0xf] }
 0x133   : > { %7072 = vmatprep.mubr.bf16.mxu0 %v15001_v23  ;;  %8037 = vmatprep.mubr.bf16.mxu1 %v15001_v23  ;;  %v939_v23 = vld [vmem:[%s15226_s30 + $0xb4] sm:$0xe]  ;;  %v1427_v27 = vshrl.u32 %v12501_v20, 16 }
 0x134   : > { %v12430_v52 = vrot.slane %v939_v23, 9 }
 0x135   : > { %v1429_v16 = vrot.slane %v1427_v27, 4  ;;  %v12505_v27 = vld [vmem:[%s15226_s30 + $0x34] sm:$0xf] }
 0x136   : > { %v1101_v23 = vsel %vm15898_vm5, %v12430_v52, %v1100_v12  ;;  %v1944_v12 = vsel %vm15898_vm5, %v1942_v48, %v1943_v43  ;;  %v1396_v52 = vrot.slane %v1395_v9, 4  ;;  %v1409_v43 = vor.u32 %v1408_v40, %v1405_v61  ;;  %v12504_v40 = vld [vmem:[%s15226_s30 + $0x30] sm:$0xf] }
 0x137   : > { %v16323_v48 = vcombine.low %v1101_v23, %v1104_v29  ;;  %v16325_v38 = vcombine.low %v1941_v37, %v1944_v12  ;;  %v1391_v9 = vsel %vm15263_vm2, %v1386_v24, %v16294_v30  ;;  %v1419_v29 = vor.u32 %v1418_v2, %v16319_v34  ;;  %v12503_v37 = vld [vmem:[%s15226_s30 + $0x2c] sm:$0x1]  ;;  %v16367_v2 = vld [vmem:[%s15226_s30 + $0x34] sm:$0xf] }
 0x138   : > { %v1442_v30 = vrot.slane %v1440_v11, 4  ;;  %v16341_v24 = vrot.slane %v1409_v43, 4  ;;  %v1954_v12 = vrot.slane %v12566_v13, 5  ;;  %v1451_v43 = vshrl.u32 %v12504_v40, 16 }
 0x139   : > { %20397 = vst [vmem:[#allocation17_spill] sm:$0xff] %v16323_v48  ;;  %20398 = vst [vmem:[#allocation18_spill] sm:$0xff] %v16325_v38  ;;  %v12609_v13 = vrot.slane %v12565_v51, 9  ;;  %v16395_v51 = vld [vmem:[%s20204_s1 + $0xc80] sm:$0xff] }
 0x13a   : > { %7073 = vmatmul.mubr.bf16.gmra.mrb[52].mxu0 %v16282_v62  ;;  %8038 = vmatmul.mubr.bf16.gmra.mrb[52].mxu1 %v16282_v62  ;;  %v15003_v62 = vld [vmem:[%s15226_s30 + $0xc0] sm:$0xff]   ;;  %v1443_v63 = vor.u32 %v1442_v30, %v16339_v44 }
 0x13b   : > { %7082 = vmatprep.mubr.bf16.mxu0 %v15002_v5  ;;  %8047 = vmatprep.mubr.bf16.mxu1 %v15002_v5  ;;  %v1947_v5 = vrot.slane %v12563_v60, 5  ;;  %v1430_v60 = vshll.u32 %v12501_v20, 16  ;;  %v1401_v20 = vsel %vm15263_vm2, %v1396_v52, %v1400_v56  ;;  %v12567_v56 = vld [vmem:[%s15226_s30 + $0x2c] sm:$0x1]  ;;  %v1955_v7 = vsel %vm15898_vm5, %v12609_v13, %v1954_v12 }
 0x13c   : > { %v16358_v11 = vcombine.low %v1391_v9, %v1401_v20  ;;  %v1415_v9 = vsel %vm15263_vm2, %v16341_v24, %v16319_v34  ;;  %v12568_v34 = vld [vmem:[%s15226_s30 + $0x30] sm:$0xe] }
 0x13d   : > { %v1949_v54 = vrot.slane %v1947_v5, 4  ;;  %v1432_v61 = vrot.slane %v1430_v60, 5  ;;  %v1420_v60 = vrot.slane %v1419_v29, 4  ;;  %v1460_v29 = vshll.u32 %v12505_v27, 16 }
 0x13e   : > { %20399 = vst [vmem:[#allocation19_spill] sm:$0xff] %v16358_v11 }
 0x13f   : > { %v1951_v23 = vsel %vm15898_vm5, %v1949_v54, %v1950_v57  ;;  %v1446_v54 = vshll.u32 %v12503_v37, 16  ;;  %v1424_v57 = vrot.slane %v1422_v10, 5  ;;  %v16383_v10 = vld [vmem:[%s20204_s1 + $0xc68] sm:$0xff]  ;;  %v1464_v37 = vshrl.u32 %v12505_v27, 16 }
 0x140   : > { %v16432_v13 = vrot.slane %v1460_v29, 5 }
 0x141   : > { %v16390_v20 = vrot.slane %v1446_v54, 5  ;;  %v1425_v27 = vsel %vm15263_vm2, %v1420_v60, %v1424_v57  ;;  %v16407_v54 = vrot.slane %v1443_v63, 4  ;;  %v16423_v60 = vld [vmem:[%s20204_s1 + $0xca8] sm:$0xff]  ;;  %v12610_v57 = vrot.slane %v12568_v34, 9 }
 0x142   : > { %7083 = vmatmul.mubr.bf16.gmra.mrb[56].mxu0 %v16298_v42  ;;  %8048 = vmatmul.mubr.bf16.gmra.mrb[56].mxu1 %v16298_v42  ;;  %v12507_v42 = vld [vmem:[%s15226_s30 + $0x3c] sm:$0xf]  ;;  %v1466_v17 = vrot.slane %v1464_v37, 4  ;;  %v16470_v18 = vcombine.low %v1415_v9, %v1425_v27  ;;  %v16486_v27 = vld [vmem:[%s20204_s1 + $0xcc0] sm:$0xff] }
 0x143   : > { %7092 = vmatprep.mubr.bf16.mxu0 %v15003_v62  ;;  %8057 = vmatprep.mubr.bf16.mxu1 %v15003_v62  ;;  %v1948_v62 = vsel %vm15898_vm5, %v12608_v46, %v1947_v5  ;;  %v16348_v5 = vld [vmem:[%s20204_s1 + $0xc40] sm:$0xff]  ;;  %v1433_v46 = vor.u32 %v1432_v61, %v1429_v16  ;;  %v1454_v16 = vshll.u32 %v12504_v40, 16  ;;  %v1956_v61 = vrot.slane %v1954_v12, 4 }
 0x144   : > { %v16360_v52 = vcombine.low %v1948_v62, %v1951_v23  ;;  %v16378_v62 = vld [vmem:[%s20204_s1 + $0xc48] sm:$0xff]  ;;  %v1957_v23 = vrot.slane %v12567_v56, 5  ;;  %v13224_v30 = vcombine.high %v16348_v5, %v16353_v33  ;;  %v16400_v40 = vld [vmem:[%s20204_s1 + $0xca0] sm:$0xff]  ;;  %v1961_v56 = vrot.slane %v16367_v2, 5  ;;  %20403 = vst [vmem:[#allocation21_spill] sm:$0xff] %v16470_v18 }
 0x145   : > { %v16388_v24 = vrot.slane %v1433_v46, 4  ;;  %v13225_v46 = vcombine.low %v16378_v62, %v16383_v10  ;;  %v13226_v55 = vcombine.high %v16378_v62, %v16383_v10  ;;  %v16418_v2 = vld [vmem:[%s20204_s1 + $0xc88] sm:$0xff]  ;;  %v1456_v63 = vrot.slane %v1454_v16, 5  ;;  %v12506_v10 = vld [vmem:[%s15226_s30 + $0x38] sm:$0x1]  ;;  %v16442_v16 = vld [vmem:[%s20204_s1 + $0x1020] sm:$0xff] }
 0x146   : > { %20400 = vst [vmem:[#allocation20_spill] sm:$0xff] %v16360_v52  ;;  %v1958_v62 = vsel %vm15898_vm5, %v1956_v61, %v1957_v23  ;;  %v13232_v12 = vcombine.high %v16395_v51, %v16400_v40  ;;  %v20401_v61 = vcombine.low %v15941_v14, %v15946_v19  ;;  %v1963_v23 = vrot.slane %v1961_v56, 4  ;;  %v16465_v19 = vld [vmem:[%s15226_s30 + $0x40] sm:$0xf] }
 0x147   : > { %v1475_v29 = vshrl.u32 %v12507_v42, 16  ;;  %v20402_v14 = vcombine.low %v15961_v39, %v15966_v25  ;;  %v13234_v45 = vcombine.high %v16418_v2, %v16423_v60  ;;  %v1470_v25 = vshll.u32 %v12506_v10, 16 }
 0x148   : > { %v13231_v9 = vcombine.low %v16395_v51, %v16400_v40  ;;  %v12573_v51 = vld [vmem:[%s15226_s30 + $0x44] sm:$0x1] }
 0x149   : > { %v1477_v40 = vrot.slane %v1475_v29, 4 }
 0x14a   : > { %7093 = vmatmul.mubr.bf16.gmra.mrb[60].mxu0 %v16323_v48  ;;  %8058 = vmatmul.mubr.bf16.gmra.mrb[60].mxu1 %v16323_v48  ;;  %v1453_v48 = vrot.slane %v1451_v43, 4  ;;  %v12508_v43 = vld [vmem:[%s15226_s30 + $0x40] sm:$0xf] }
 0x14b   : > { %7135 = vmatprep.mubr.bf16.mxu0 %v16325_v38  ;;  %8100 = vmatprep.mubr.bf16.mxu1 %v16325_v38  ;;  %v12570_v38 = vld [vmem:[%s15226_s30 + $0x38] sm:$0x1]  ;;  %v1488_v37 = vshrl.u32 %v12508_v43, 16 }
 0x14c   : > { %v1964_v34 = vrot.slane %v12570_v38, 5  ;;  %v1478_v38 = vshll.u32 %v12507_v42, 16  ;;  %v1457_v39 = vor.u32 %v1456_v63, %v1453_v48  ;;  %v1439_v42 = vsel %vm15263_vm2, %v16388_v24, %v16339_v44  ;;  %v16507_v24 = vld [vmem:[%s20204_s1 + $0xcc8] sm:$0xff] }
 0x14d   : > { %v1449_v48 = vsel %vm15263_vm2, %v16407_v54, %v16390_v20  ;;  %v1968_v20 = vrot.slane %v16465_v19, 5  ;;  %v13233_v63 = vcombine.low %v16418_v2, %v16423_v60  ;;  %v16541_v2 = vld [vmem:[%s20204_s1 + $0xd20] sm:$0xff]  ;;  %v12510_v60 = vld [vmem:[%s15226_s30 + $0x48] sm:$0xf] }
 0x14e   : > { %v1965_v44 = vsel %vm15898_vm5, %v1963_v23, %v1964_v34  ;;  %v16546_v29 = vcombine.low %v1439_v42, %v1449_v48 }
 0x14f   : > { %v1970_v19 = vrot.slane %v1968_v20, 4 }
 0x150   : > { %20406 = vst [vmem:[#allocation23_spill] sm:$0xff] %v16546_v29 }
 0x152   : > { %7136 = vmatmul.mubr.bf16.vlgmr.msra.gmra.mrb[0].mxu0 %v16358_v11  ;;  %8101 = vmatmul.mubr.bf16.vlgmr.msra.gmra.mrb[0].mxu1 %v16358_v11  ;;  %v1502_v11 = vshll.u32 %v12510_v60, 16 }
 0x153   : > { %7297 = vmatpush1.bf16.msra.mxu0 %v20401_v61  ;;  %8262 = vmatpush1.bf16.msra.mxu1 %v20402_v14  ;;  %v1484_v61 = vshll.u32 %v12508_v43, 16  ;;  %v16474_v14 = vcombine.low %v1955_v7, %v1958_v62  ;;  %v16491_v7 = vld [vmem:[%s20204_s1 + $0xce0] sm:$0xff]  ;;  %v16521_v43 = vrot.slane %v1457_v39, 4  ;;  %v16523_v62 = vrot.slane %v1470_v25, 5  ;;  %v16558_v39 = vld [vmem:[%s20204_s1 + $0xd28] sm:$0xff] }
 0x154   : > { %7145 = vmatprep.mubr.bf16.mxu0 %v16360_v52  ;;  %8110 = vmatprep.mubr.bf16.mxu1 %v16360_v52  ;;  %v13240_v10 = vcombine.high %v16486_v27, %v16491_v7  ;;  %v12511_v25 = vld [vmem:[%s15226_s30 + $0x4c] sm:$0xf]  ;;  %v13239_v42 = vcombine.low %v16486_v27, %v16491_v7 }
 0x155   : > { %7298 = vmatprep.subr.bf16.mxu0 %v13224_v30  ;;  %8263 = vmatprep.subr.bf16.mxu1 %v13226_v55  ;;  %20404 = vst [vmem:[#allocation22_spill] sm:$0xff] %v16474_v14  ;;  %v1467_v30 = vor.u32 %v1466_v17, %v16432_v13  ;;  %v20405_v55 = vcombine.low %v16348_v5, %v16353_v33  ;;  %v16512_v5 = vld [vmem:[%s20204_s1 + $0xce8] sm:$0xff]  ;;  %v12571_v33 = vld [vmem:[%s15226_s30 + $0x3c] sm:$0xe]  ;;  %v16517_v54 = vrot.slane %v1484_v61, 5  ;;  %v1508_v7 = vshll.u32 %v12511_v25, 16 }
 0x156   : > { %v1962_v17 = vsel %vm15898_vm5, %v12610_v57, %v1961_v56  ;;  %v1480_v56 = vrot.slane %v1478_v38, 5  ;;  %v1490_v57 = vrot.slane %v1488_v37, 4  ;;  %v13242_v23 = vcombine.high %v16507_v24, %v16512_v5  ;;  %v16553_v61 = vld [vmem:[%s20204_s1 + $0xd08] sm:$0xff] }
 0x157   : > { %7299 = vmatpush1.bf16.msra.mxu0 %v20405_v55  ;;  %8264 = vmatpush1.bf16.msra.mxu1 %v13225_v46  ;;  %v12509_v46 = vld [vmem:[%s15226_s30 + $0x44] sm:$0x1]  ;;  %v12611_v34 = vrot.slane %v12571_v33, 9  ;;  %v16548_v37 = vcombine.low %v1962_v17, %v1965_v44  ;;  %v1971_v38 = vrot.slane %v12573_v51, 5  ;;  %v16566_v17 = vld [vmem:[%s15226_s30 + $0x4c] sm:$0xf]  ;;  %v13241_v44 = vcombine.low %v16507_v24, %v16512_v5 }
 0x158   : > { %7300 = vmatprep.subr.bf16.mxu0 %v13232_v12  ;;  %8265 = vmatprep.subr.bf16.mxu1 %v13234_v45  ;;  %v16529_v12 = vrot.slane %v1467_v30, 4  ;;  %v16536_v45 = vld [vmem:[%s20204_s1 + $0xd00] sm:$0xff]  ;;  %v1481_v30 = vor.u32 %v1480_v56, %v1477_v40  ;;  %v1491_v55 = vor.u32 %v1490_v57, %v16517_v54  ;;  %v1494_v48 = vshll.u32 %v12509_v46, 16 }
 0x159   : > { %20407 = vst [vmem:[#allocation24_spill] sm:$0xff] %v16548_v37  ;;  %v13248_v33 = vcombine.high %v16536_v45, %v16541_v2  ;;  %v1499_v51 = vshrl.u32 %v12510_v60, 16  ;;  %v13250_v27 = vcombine.high %v16553_v61, %v16558_v39  ;;  %v1512_v40 = vshrl.u32 %v12511_v25, 16  ;;  %v16581_v24 = vld [vmem:[%s20204_s1 + $0xd40] sm:$0xff]  ;;  %v12576_v60 = vld [vmem:[%s15226_s30 + $0x50] sm:$0x1] }
 0x15a   : > { %7146 = vmatmul.mubr.bf16.gmra.mrb[4].mxu0 %v16470_v18  ;;  %8111 = vmatmul.mubr.bf16.gmra.mrb[4].mxu1 %v16470_v18  ;;  %v16586_v5 = vld [vmem:[%s20204_s1 + $0xd60] sm:$0xff]  ;;  %v1969_v56 = vsel %vm15898_vm5, %v12611_v34, %v1968_v20  ;;  %v1972_v57 = vsel %vm15898_vm5, %v1970_v19, %v1971_v38  ;;  %v16609_v20 = vrot.slane %v1491_v55, 4  ;;  %v16611_v46 = vrot.slane %v1494_v48, 5  ;;  %v12514_v55 = vld [vmem:[%s15226_s30 + $0x58] sm:$0xf] }
 0x15b   : > { %7155 = vmatprep.mubr.bf16.mxu0 %v16474_v14  ;;  %8120 = vmatprep.mubr.bf16.mxu1 %v16474_v14  ;;  %v13249_v34 = vcombine.low %v16553_v61, %v16558_v39  ;;  %v1501_v19 = vrot.slane %v1499_v51, 4  ;;  %v1504_v38 = vrot.slane %v1502_v11, 5  ;;  %v13256_v25 = vcombine.high %v16581_v24, %v16586_v5  ;;  %v16631_v11 = vld [vmem:[%s20204_s1 + $0xd80] sm:$0xff]  ;;  %v16648_v51 = vld [vmem:[%s20204_s1 + $0xd88] sm:$0xff] }
 0x15c   : > { %7301 = vmatpush1.bf16.msra.mxu0 %v13231_v9  ;;  %8266 = vmatpush1.bf16.msra.mxu1 %v13233_v63  ;;  %v1463_v9 = vsel %vm15263_vm2, %v16521_v43, %v16432_v13  ;;  %v1473_v13 = vsel %vm15263_vm2, %v16529_v12, %v16523_v62  ;;  %v1975_v63 = vrot.slane %v16566_v17, 5  ;;  %v16600_v43 = vld [vmem:[%s20204_s1 + $0xd48] sm:$0xff]  ;;  %v16607_v62 = vrot.slane %v1481_v30, 4  ;;  %v16636_v61 = vld [vmem:[%s20204_s1 + $0xda0] sm:$0xff] }
 0x15d   : > { %7302 = vmatprep.subr.bf16.mxu0 %v13240_v10  ;;  %8267 = vmatprep.subr.bf16.mxu1 %v13242_v23  ;;  %v16605_v10 = vld [vmem:[%s20204_s1 + $0xd68] sm:$0xff]  ;;  %v13247_v12 = vcombine.low %v16536_v45, %v16541_v2  ;;  %v16623_v30 = vrot.slane %v1508_v7, 5  ;;  %v1514_v45 = vrot.slane %v1512_v40, 4  ;;  %v16640_v39 = vcombine.low %v1463_v9, %v1473_v13  ;;  %v16659_v40 = vld [vmem:[%s15226_s30 + $0x58] sm:$0xf] }
 0x15e   : > { %v12574_v23 = vld [vmem:[%s15226_s30 + $0x48] sm:$0xe]  ;;  %v13258_v2 = vcombine.high %v16600_v43, %v16605_v10  ;;  %v16642_v48 = vcombine.low %v1969_v56, %v1972_v57  ;;  %v1978_v9 = vrot.slane %v12576_v60, 5  ;;  %v13255_v7 = vcombine.low %v16581_v24, %v16586_v5  ;;  %v16671_v5 = vld [vmem:[%s20204_s1 + $0xdc0] sm:$0xff] }
 0x15f   : > { %20408 = vst [vmem:[#allocation25_spill] sm:$0xff] %v16640_v39  ;;  %v12612_v17 = vrot.slane %v12574_v23, 9  ;;  %v13257_v57 = vcombine.low %v16600_v43, %v16605_v10  ;;  %v1532_v23 = vshll.u32 %v12514_v55, 16  ;;  %v13264_v14 = vcombine.high %v16631_v11, %v16636_v61  ;;  %v16676_v43 = vld [vmem:[%s20204_s1 + $0xde0] sm:$0xff] }
 0x160   : > { %7303 = vmatpush1.bf16.msra.mxu0 %v13239_v42  ;;  %8268 = vmatpush1.bf16.msra.mxu1 %v13241_v44  ;;  %v12513_v42 = vld [vmem:[%s15226_s30 + $0x54] sm:$0xf]  ;;  %20409 = vst [vmem:[#allocation26_spill] sm:$0xff] %v16642_v48  ;;  %v1977_v44 = vrot.slane %v1975_v63, 4  ;;  %v1515_v60 = vor.u32 %v1514_v45, %v16623_v30  ;;  %v1487_v10 = vsel %vm15263_vm2, %v16607_v62, %v16517_v54  ;;  %v12579_v45 = vld [vmem:[%s15226_s30 + $0x5c] sm:$0x1] }
 0x161   : > { %7304 = vmatprep.subr.bf16.mxu0 %v13248_v33  ;;  %8269 = vmatprep.subr.bf16.mxu1 %v13250_v27  ;;  %v12512_v33 = vld [vmem:[%s15226_s30 + $0x50] sm:$0x1]  ;;  %v16653_v27 = vld [vmem:[%s20204_s1 + $0xda8] sm:$0xff]  ;;  %v1523_v13 = vshrl.u32 %v12513_v42, 16  ;;  %v1526_v56 = vshll.u32 %v12513_v42, 16 }
 0x162   : > { %7156 = vmatmul.mubr.bf16.gmra.mrb[8].mxu0 %v16546_v29  ;;  %8121 = vmatmul.mubr.bf16.gmra.mrb[8].mxu1 %v16546_v29  ;;  %v1536_v29 = vshrl.u32 %v12514_v55, 16  ;;  %v13266_v24 = vcombine.high %v16648_v51, %v16653_v27  ;;  %v16697_v42 = vld [vmem:[%s20204_s1 + $0xde8] sm:$0xff]  ;;  %v1979_v54 = vsel %vm15898_vm5, %v1977_v44, %v1978_v9  ;;  %v12577_v62 = vld [vmem:[%s15226_s30 + $0x54] sm:$0xe]  ;;  %v16706_v55 = vrot.slane %v1532_v23, 5 }
 0x163   : > { %7165 = vmatprep.mubr.bf16.mxu0 %v16548_v37  ;;  %8130 = vmatprep.mubr.bf16.mxu1 %v16548_v37  ;;  %v1518_v37 = vshll.u32 %v12512_v33, 16  ;;  %v13265_v33 = vcombine.low %v16648_v51, %v16653_v27  ;;  %v13272_v44 = vcombine.high %v16671_v5, %v16676_v43  ;;  %v12613_v27 = vrot.slane %v12577_v62, 9 }
 0x164   : > { %7305 = vmatpush1.bf16.msra.mxu0 %v13247_v12  ;;  %8270 = vmatpush1.bf16.msra.mxu1 %v13249_v34  ;;  %v1505_v12 = vor.u32 %v1504_v38, %v1501_v19  ;;  %v1497_v34 = vsel %vm15263_vm2, %v16609_v20, %v16611_v46  ;;  %v1976_v19 = vsel %vm15898_vm5, %v12612_v17, %v1975_v63  ;;  %v1982_v38 = vrot.slane %v16659_v40, 5 }
 0x165   : > { %7306 = vmatprep.subr.bf16.mxu0 %v13256_v25  ;;  %8271 = vmatprep.subr.bf16.mxu1 %v13258_v2  ;;  %v16692_v25 = vld [vmem:[%s20204_s1 + $0xdc8] sm:$0xff]  ;;  %v1525_v20 = vrot.slane %v1523_v13, 4  ;;  %v1528_v46 = vrot.slane %v1526_v56, 5  ;;  %v13263_v63 = vcombine.low %v16631_v11, %v16636_v61  ;;  %v12515_v2 = vld [vmem:[%s15226_s30 + $0x5c] sm:$0x1]  ;;  %v1538_v17 = vrot.slane %v1536_v29, 4 }
 0x166   : > { %v16713_v9 = vrot.slane %v1505_v12, 4  ;;  %v16717_v11 = vrot.slane %v1518_v37, 5  ;;  %v13274_v29 = vcombine.high %v16692_v25, %v16697_v42  ;;  %v16729_v61 = vld [vmem:[%s20204_s1 + $0xe20] sm:$0xff]  ;;  %v16733_v37 = vcombine.low %v1487_v10, %v1497_v34  ;;  %v16741_v56 = vld [vmem:[%s20204_s1 + $0xe08] sm:$0xff] }
 0x167   : > { %v16735_v51 = vcombine.low %v1976_v19, %v1979_v54  ;;  %v1984_v40 = vrot.slane %v1982_v38, 4  ;;  %v12516_v13 = vld [vmem:[%s15226_s30 + $0x60] sm:$0xf]  ;;  %v1985_v23 = vrot.slane %v12579_v45, 5  ;;  %v1529_v12 = vor.u32 %v1528_v46, %v1525_v20  ;;  %v16762_v20 = vld [vmem:[%s15226_s30 + $0x64] sm:$0xf] }
 0x168   : > { %7307 = vmatpush1.bf16.msra.mxu0 %v13255_v7  ;;  %8272 = vmatpush1.bf16.msra.mxu1 %v13257_v57  ;;  %v16715_v7 = vrot.slane %v1515_v60, 4  ;;  %20410 = vst [vmem:[#allocation27_spill] sm:$0xff] %v16733_v37  ;;  %v16746_v57 = vld [vmem:[%s20204_s1 + $0xe28] sm:$0xff]  ;;  %v1542_v60 = vshll.u32 %v12515_v2, 16  ;;  %v13271_v10 = vcombine.low %v16671_v5, %v16676_v43  ;;  %v1539_v34 = vor.u32 %v1538_v17, %v16706_v55  ;;  %v16769_v43 = vld [vmem:[%s20204_s1 + $0xe40] sm:$0xff] }
 0x169   : > { %7308 = vmatprep.subr.bf16.mxu0 %v13264_v14  ;;  %8273 = vmatprep.subr.bf16.mxu1 %v13266_v24  ;;  %v16724_v14 = vld [vmem:[%s20204_s1 + $0xe00] sm:$0xff]  ;;  %20411 = vst [vmem:[#allocation28_spill] sm:$0xff] %v16735_v51  ;;  %v13273_v19 = vcombine.low %v16692_v25, %v16697_v42  ;;  %v1511_v62 = vsel %vm15263_vm2, %v16713_v9, %v16623_v30  ;;  %v1547_v46 = vshrl.u32 %v12516_v13, 16  ;;  %v16785_v17 = vld [vmem:[%s20204_s1 + $0xe48] sm:$0xff]  ;;  %v16794_v9 = vrot.slane %v1529_v12, 4 }
 0x16a   : > { %7166 = vmatmul.mubr.bf16.gmra.mrb[12].mxu0 %v16640_v39  ;;  %8131 = vmatmul.mubr.bf16.gmra.mrb[12].mxu1 %v16640_v39  ;;  %v12517_v24 = vld [vmem:[%s15226_s30 + $0x64] sm:$0xf]  ;;  %v13280_v54 = vcombine.high %v16724_v14, %v16729_v61  ;;  %v13282_v5 = vcombine.high %v16741_v56, %v16746_v57  ;;  %v1521_v30 = vsel %vm15263_vm2, %v16715_v7, %v16717_v11  ;;  %v16796_v7 = vrot.slane %v1542_v60, 5 }
 0x16b   : > { %7175 = vmatprep.mubr.bf16.mxu0 %v16642_v48  ;;  %8140 = vmatprep.mubr.bf16.mxu1 %v16642_v48  ;;  %v16774_v25 = vld [vmem:[%s20204_s1 + $0xe60] sm:$0xff]  ;;  %v1983_v42 = vsel %vm15898_vm5, %v12613_v27, %v1982_v38  ;;  %v1556_v45 = vshll.u32 %v12517_v24, 16  ;;  %v1560_v2 = vshrl.u32 %v12517_v24, 16  ;;  %v13279_v38 = vcombine.low %v16724_v14, %v16729_v61 }
 0x16c   : > { %7309 = vmatpush1.bf16.msra.mxu0 %v13263_v63  ;;  %8274 = vmatpush1.bf16.msra.mxu1 %v13265_v33  ;;  %v1550_v63 = vshll.u32 %v12516_v13, 16  ;;  %v16790_v33 = vld [vmem:[%s20204_s1 + $0xe68] sm:$0xff]  ;;  %v16800_v11 = vrot.slane %v1539_v34, 4  ;;  %v1989_v27 = vrot.slane %v16762_v20, 5  ;;  %v13281_v13 = vcombine.low %v16741_v56, %v16746_v57  ;;  %v16815_v61 = vld [vmem:[%s20204_s1 + $0xe80] sm:$0xff] }
 0x16d   : > { %7310 = vmatprep.subr.bf16.mxu0 %v13272_v44  ;;  %8275 = vmatprep.subr.bf16.mxu1 %v13274_v29  ;;  %v1986_v44 = vsel %vm15898_vm5, %v1984_v40, %v1985_v23  ;;  %v12580_v29 = vld [vmem:[%s15226_s30 + $0x60] sm:$0xe]  ;;  %v13288_v40 = vcombine.high %v16769_v43, %v16774_v25  ;;  %v12582_v23 = vld [vmem:[%s15226_s30 + $0x68] sm:$0x1]  ;;  %v1549_v12 = vrot.slane %v1547_v46, 4  ;;  %v13290_v14 = vcombine.high %v16785_v17, %v16790_v33 }
 0x16e   : > { %v1552_v60 = vrot.slane %v1550_v63, 5  ;;  %v16820_v56 = vld [vmem:[%s20204_s1 + $0xea0] sm:$0xff]  ;;  %v16824_v57 = vcombine.low %v1511_v62, %v1521_v30  ;;  %v16826_v24 = vrot.slane %v1556_v45, 5  ;;  %v12519_v34 = vld [vmem:[%s15226_s30 + $0x6c] sm:$0xf]  ;;  %v16840_v20 = vcombine.low %v1983_v42, %v1986_v44 }
 0x16f   : > { %v12614_v46 = vrot.slane %v12580_v29, 9  ;;  %v12518_v63 = vld [vmem:[%s15226_s30 + $0x68] sm:$0x1]  ;;  %v13287_v30 = vcombine.low %v16769_v43, %v16774_v25  ;;  %v1991_v45 = vrot.slane %v1989_v27, 4  ;;  %v13289_v42 = vcombine.low %v16785_v17, %v16790_v33  ;;  %v16862_v43 = vld [vmem:[%s20204_s1 + $0xec0] sm:$0xff] }
 0x170   : > { %7311 = vmatpush1.bf16.msra.mxu0 %v13271_v10  ;;  %8276 = vmatpush1.bf16.msra.mxu1 %v13273_v19  ;;  %20412 = vst [vmem:[#allocation29_spill] sm:$0xff] %v16824_v57  ;;  %v1562_v10 = vrot.slane %v1560_v2, 4  ;;  %v16832_v19 = vld [vmem:[%s20204_s1 + $0xe88] sm:$0xff]  ;;  %20413 = vst [vmem:[#allocation30_spill] sm:$0xff] %v16840_v20  ;;  %v1992_v2 = vrot.slane %v12582_v23, 5  ;;  %v13296_v44 = vcombine.high %v16815_v61, %v16820_v56  ;;  %v1571_v62 = vshrl.u32 %v12519_v34, 16 }
 0x171   : > { %7312 = vmatprep.subr.bf16.mxu0 %v13280_v54  ;;  %8277 = vmatprep.subr.bf16.mxu1 %v13282_v5  ;;  %v16837_v54 = vld [vmem:[%s20204_s1 + $0xea8] sm:$0xff]  ;;  %v16848_v5 = vld [vmem:[%s15226_s30 + $0x70] sm:$0xf]  ;;  %v1553_v29 = vor.u32 %v1552_v60, %v1549_v12  ;;  %v16867_v25 = vld [vmem:[%s20204_s1 + $0xee0] sm:$0xff]  ;;  %v1545_v17 = vsel %vm15263_vm2, %v16800_v11, %v16796_v7  ;;  %v1990_v60 = vsel %vm15898_vm5, %v12614_v46, %v1989_v27 }
 0x172   : > { %7176 = vmatmul.mubr.bf16.gmra.mrb[16].mxu0 %v16733_v37  ;;  %8141 = vmatmul.mubr.bf16.gmra.mrb[16].mxu1 %v16733_v37  ;;  %v12520_v37 = vld [vmem:[%s15226_s30 + $0x70] sm:$0xf]  ;;  %v1563_v33 = vor.u32 %v1562_v10, %v16826_v24  ;;  %v16878_v23 = vld [vmem:[%s20204_s1 + $0xec8] sm:$0xff]  ;;  %v13295_v11 = vcombine.low %v16815_v61, %v16820_v56  ;;  %v1993_v10 = vsel %vm15898_vm5, %v1991_v45, %v1992_v2  ;;  %v16902_v56 = vld [vmem:[%s20204_s1 + $0xf00] sm:$0xff] }
 0x173   : > { %7185 = vmatprep.mubr.bf16.mxu0 %v16735_v51  ;;  %8150 = vmatprep.mubr.bf16.mxu1 %v16735_v51  ;;  %v1574_v51 = vshll.u32 %v12519_v34, 16  ;;  %v3696_v12 = vld [vmem:[%s20204_s1 + $0xee8] sm:$0xff]  ;;  %v1580_v34 = vshll.u32 %v12520_v37, 16  ;;  %v1584_v7 = vshrl.u32 %v12520_v37, 16  ;;  %v13304_v48 = vcombine.high %v16862_v43, %v16867_v25 }
 0x174   : > { %7313 = vmatpush1.bf16.msra.mxu0 %v13279_v38  ;;  %8278 = vmatpush1.bf16.msra.mxu1 %v13281_v13  ;;  %v13298_v38 = vcombine.high %v16832_v19, %v16837_v54  ;;  %v1566_v13 = vshll.u32 %v12518_v63, 16  ;;  %v12585_v63 = vld [vmem:[%s15226_s30 + $0x74] sm:$0x1]  ;;  %v16896_v27 = vrot.slane %v1553_v29, 4  ;;  %v1573_v37 = vrot.slane %v1571_v62, 4  ;;  %v16914_v45 = vld [vmem:[%s20204_s1 + $0xf08] sm:$0xff] }
 0x175   : > { %7314 = vmatprep.subr.bf16.mxu0 %v13288_v40  ;;  %8279 = vmatprep.subr.bf16.mxu1 %v13290_v14  ;;  %v1996_v40 = vrot.slane %v16848_v5, 5  ;;  %v12583_v14 = vld [vmem:[%s15226_s30 + $0x6c] sm:$0xe]  ;;  %v13297_v5 = vcombine.low %v16832_v19, %v16837_v54  ;;  %v1576_v46 = vrot.slane %v1574_v51, 5  ;;  %v13306_v61 = vcombine.high %v16878_v23, %v3696_v12  ;;  %v16907_v19 = vld [vmem:[%s20204_s1 + $0xf20] sm:$0xff] }
 0x176   : > { %v1564_v54 = vrot.slane %v1563_v33, 4  ;;  %v1568_v51 = vrot.slane %v1566_v13, 5  ;;  %v12615_v62 = vrot.slane %v12583_v14, 9  ;;  %v16919_v2 = vld [vmem:[%s20204_s1 + $0xf28] sm:$0xff]  ;;  %v1586_v29 = vrot.slane %v1584_v7, 4 }
 0x177   : > { %v12521_v33 = vld [vmem:[%s15226_s30 + $0x74] sm:$0x1]  ;;  %v13305_v13 = vcombine.low %v16878_v23, %v3696_v12  ;;  %v13312_v14 = vcombine.high %v16902_v56, %v16907_v19  ;;  %v1577_v7 = vor.u32 %v1576_v46, %v1573_v37  ;;  %v12523_v12 = vld [vmem:[%s15226_s30 + $0x7c] sm:$0xf] }
 0x178   : > { %7315 = vmatpush1.bf16.msra.mxu0 %v13287_v30  ;;  %8280 = vmatpush1.bf16.msra.mxu1 %v13289_v42  ;;  %v1998_v30 = vrot.slane %v1996_v40, 4  ;;  %v1999_v42 = vrot.slane %v12585_v63, 5  ;;  %v1997_v23 = vsel %vm15898_vm5, %v12615_v62, %v1996_v40  ;;  %v16975_v37 = vld [vmem:[%s15226_s30 + $0x7c] sm:$0xf]  ;;  %v13311_v40 = vcombine.low %v16902_v56, %v16907_v19  ;;  %v16991_v19 = vld [vmem:[%s20204_s1 + $0xf80] sm:$0xff] }
 0x179   : > { %7316 = vmatprep.subr.bf16.mxu0 %v13296_v44  ;;  %8281 = vmatprep.subr.bf16.mxu1 %v13298_v38  ;;  %v16922_v44 = vrot.slane %v1580_v34, 5  ;;  %v13303_v38 = vcombine.low %v16862_v43, %v16867_v25  ;;  %v20414_v34 = vsel %vm15263_vm2, %v16794_v9, %v16706_v55  ;;  %v13314_v43 = vcombine.high %v16914_v45, %v16919_v2  ;;  %v16948_v25 = vld [vmem:[%s20204_s1 + $0xf60] sm:$0xff] }
 0x17a   : > { %7186 = vmatmul.mubr.bf16.gmra.mrb[20].mxu0 %v16824_v57  ;;  %8151 = vmatmul.mubr.bf16.gmra.mrb[20].mxu1 %v16824_v57  ;;  %v16935_v63 = vcombine.low %v20414_v34, %v1545_v17  ;;  %v16950_v55 = vcombine.low %v1990_v60, %v1993_v10  ;;  %v1559_v9 = vsel %vm15263_vm2, %v16896_v27, %v16826_v24  ;;  %v16969_v60 = vld [vmem:[%s20204_s1 + $0xf68] sm:$0xff]  ;;  %v1590_v27 = vshll.u32 %v12521_v33, 16 }
 0x17b   : > { %7195 = vmatprep.mubr.bf16.mxu0 %v16840_v20  ;;  %8160 = vmatprep.mubr.bf16.mxu1 %v16840_v20  ;;  %v1569_v17 = vsel %vm15263_vm2, %v1564_v54, %v1568_v51  ;;  %v2000_v24 = vsel %vm15898_vm5, %v1998_v30, %v1999_v42  ;;  %v1587_v10 = vor.u32 %v1586_v29, %v16922_v44  ;;  %v16984_v62 = vrot.slane %v1577_v7, 4  ;;  %v17011_v33 = vld [vmem:[%s20204_s1 + $0xfa8] sm:$0xff]  ;;  %v12586_v7 = vld [vmem:[%s15226_s30 + $0x78] sm:$0xe] }
 0x17c   : > { %7317 = vmatpush1.bf16.msra.mxu0 %v13295_v11  ;;  %8282 = vmatpush1.bf16.msra.mxu1 %v13297_v5  ;;  %20415 = vst [vmem:[#allocation31_spill] sm:$0xff] %v16935_v63  ;;  %v12522_v11 = vld [vmem:[%s15226_s30 + $0x78] sm:$0xf]  ;;  %20416 = vst [vmem:[#allocation32_spill] sm:$0xff] %v16950_v55  ;;  %v16964_v5 = vld [vmem:[%s20204_s1 + $0xf48] sm:$0xff]  ;;  %v13313_v54 = vcombine.low %v16914_v45, %v16919_v2  ;;  %v1604_v30 = vshll.u32 %v12523_v12, 16  ;;  %v17000_v2 = vcombine.low %v1559_v9, %v1569_v17 }
 0x17d   : > { %7318 = vmatprep.subr.bf16.mxu0 %v13304_v48  ;;  %8283 = vmatprep.subr.bf16.mxu1 %v13306_v61  ;;  %v16943_v48 = vld [vmem:[%s20204_s1 + $0xf40] sm:$0xff]  ;;  %v1595_v46 = vshrl.u32 %v12522_v11, 16  ;;  %v1598_v61 = vshll.u32 %v12522_v11, 16  ;;  %v1608_v42 = vshrl.u32 %v12523_v12, 16  ;;  %v13322_v56 = vcombine.high %v16964_v5, %v16969_v60 }
 0x17e   : > { %v13320_v51 = vcombine.high %v16943_v48, %v16948_v25  ;;  %v16996_v45 = vld [vmem:[%s20204_s1 + $0xfa0] sm:$0xff]  ;;  %20417 = vst [vmem:[#allocation33_spill] sm:$0xff] %v17000_v2  ;;  %v2003_v29 = vrot.slane %v16975_v37, 5  ;;  %v1592_v34 = vrot.slane %v1590_v27, 5  ;;  %v12526_v37 = vld [vmem:[%s15226_s30 + $0x88] sm:$0xf] }
 0x17f   : > { %v12525_v11 = vld [vmem:[%s15226_s30 + $0x84] sm:$0xf]  ;;  %v12588_v9 = vld [vmem:[%s15226_s30 + $0x80] sm:$0x1]  ;;  %v1597_v17 = vrot.slane %v1595_v46, 4  ;;  %v1600_v12 = vrot.slane %v1598_v61, 5 }
 0x180   : > { %7319 = vmatpush1.bf16.msra.mxu0 %v13303_v38  ;;  %8284 = vmatpush1.bf16.msra.mxu1 %v13305_v13  ;;  %v17006_v38 = vld [vmem:[%s20204_s1 + $0xf88] sm:$0xff]  ;;  %v17014_v13 = vcombine.low %v1997_v23, %v2000_v24  ;;  %v13328_v23 = vcombine.high %v16991_v19, %v16996_v45  ;;  %v1583_v24 = vsel %vm15263_vm2, %v16984_v62, %v16922_v44  ;;  %v2005_v46 = vrot.slane %v2003_v29, 4 }
 0x181   : > { %7320 = vmatprep.subr.bf16.mxu0 %v13312_v14  ;;  %8285 = vmatprep.subr.bf16.mxu1 %v13314_v43  ;;  %v1588_v14 = vrot.slane %v1587_v10, 4  ;;  %v13319_v43 = vcombine.low %v16943_v48, %v16948_v25  ;;  %v12524_v10 = vld [vmem:[%s15226_s30 + $0x80] sm:$0x1]  ;;  %v17031_v48 = vrot.slane %v1604_v30, 5  ;;  %v1610_v25 = vrot.slane %v1608_v42, 4 }
 0x182   : > { %7196 = vmatmul.mubr.bf16.gmra.mrb[24].mxu0 %v16935_v63  ;;  %8161 = vmatmul.mubr.bf16.gmra.mrb[24].mxu1 %v16935_v63  ;;  %20418 = vst [vmem:[#allocation34_spill] sm:$0xff] %v17014_v13  ;;  %v13330_v27 = vcombine.high %v17006_v38, %v17011_v33  ;;  %v1619_v61 = vshrl.u32 %v12525_v11, 16  ;;  %v1622_v44 = vshll.u32 %v12525_v11, 16  ;;  %v2006_v62 = vrot.slane %v12588_v9, 5  ;;  %v17048_v30 = vld [vmem:[%s15226_s30 + $0x88] sm:$0xf] }
 0x183   : > { %7205 = vmatprep.mubr.bf16.mxu0 %v16950_v55  ;;  %8170 = vmatprep.mubr.bf16.mxu1 %v16950_v55  ;;  %v13321_v55 = vcombine.low %v16964_v5, %v16969_v60  ;;  %v3723_v5 = vld [vmem:[%s20204_s1 + $0xfc0] sm:$0xff]  ;;  %v1628_v42 = vshll.u32 %v12526_v37, 16  ;;  %v1601_v63 = vor.u32 %v1600_v12, %v1597_v17  ;;  %v13329_v11 = vcombine.low %v17006_v38, %v17011_v33 }
 0x184   : > { %7321 = vmatpush1.bf16.msra.mxu0 %v13311_v40  ;;  %8286 = vmatpush1.bf16.msra.mxu1 %v13313_v54  ;;  %v3727_v60 = vld [vmem:[%s20204_s1 + $0xfe0] sm:$0xff]  ;;  %v12616_v40 = vrot.slane %v12586_v7, 9  ;;  %v3724_v54 = vld [vmem:[%s20204_s1 + $0xfc8] sm:$0xff]  ;;  %v13327_v7 = vcombine.low %v16991_v19, %v16996_v45  ;;  %v1593_v9 = vsel %vm15263_vm2, %v1588_v14, %v1592_v34  ;;  %v2010_v45 = vrot.slane %v17048_v30, 5 }
 0x185   : > { %7322 = vmatprep.subr.bf16.mxu0 %v13320_v51  ;;  %8287 = vmatprep.subr.bf16.mxu1 %v13322_v56  ;;  %v3728_v51 = vld [vmem:[%s20204_s1 + $0xfe8] sm:$0xff]  ;;  %v1632_v56 = vshrl.u32 %v12526_v37, 16  ;;  %v13336_v20 = vcombine.high %v3723_v5, %v3727_v60  ;;  %v1611_v37 = vor.u32 %v1610_v25, %v17031_v48  ;;  %v12589_v19 = vld [vmem:[%s15226_s30 + $0x84] sm:$0xe]  ;;  %v1621_v38 = vrot.slane %v1619_v61, 4 }
 0x186   : > { %v13338_v57 = vcombine.high %v3724_v54, %v3728_v51  ;;  %v1624_v33 = vrot.slane %v1622_v44, 5  ;;  %v2007_v14 = vsel %vm15898_vm5, %v2005_v46, %v2006_v62  ;;  %v12591_v34 = vld [vmem:[%s15226_s30 + $0x8c] sm:$0x1]  ;;  %v17068_v17 = vrot.slane %v1628_v42, 5  ;;  %v12593_v42 = vld [vmem:[%s15226_s30 + $0x94] sm:$0xf] }
 0x187   : > { %v1634_v12 = vrot.slane %v1632_v56, 4  ;;  %v1602_v25 = vrot.slane %v1601_v63, 4  ;;  %v13344_v61 = vcombine.high %v16437_v32, %v16442_v16  ;;  %v1612_v46 = vrot.slane %v1611_v37, 4  ;;  %v12529_v56 = vld [vmem:[%s15226_s30 + $0x94] sm:$0xf] }
 0x188   : > { %7323 = vmatpush1.bf16.msra.mxu0 %v13319_v43  ;;  %8288 = vmatpush1.bf16.msra.mxu1 %v13321_v55  ;;  %v1614_v43 = vshll.u32 %v12524_v10, 16  ;;  %v2004_v55 = vsel %vm15898_vm5, %v12616_v40, %v2003_v29  ;;  %v17070_v10 = vcombine.low %v1583_v24, %v1593_v9  ;;  %v12527_v29 = vld [vmem:[%s15226_s30 + $0x8c] sm:$0x1]  ;;  %v13337_v40 = vcombine.low %v3724_v54, %v3728_v51  ;;  %v12592_v9 = vld [vmem:[%s15226_s30 + $0x90] sm:$0xe] }
 0x189   : > { %7324 = vmatprep.subr.bf16.mxu0 %v13328_v23  ;;  %8289 = vmatprep.subr.bf16.mxu1 %v13330_v27  ;;  %v13335_v23 = vcombine.low %v3723_v5, %v3727_v60  ;;  %v12528_v27 = vld [vmem:[%s15226_s30 + $0x90] sm:$0xf]  ;;  %v12617_v62 = vrot.slane %v12589_v19, 9  ;;  %v13346_v5 = vcombine.high %v16453_v49, %v16458_v59  ;;  %v17078_v24 = vcombine.low %v2004_v55, %v2007_v14 }
 0x18a   : > { %7206 = vmatmul.mubr.bf16.gmra.mrb[28].mxu0 %v17000_v2  ;;  %8171 = vmatmul.mubr.bf16.gmra.mrb[28].mxu1 %v17000_v2  ;;  %20419 = vst [vmem:[#allocation35_spill] sm:$0xff] %v17070_v10  ;;  %v1616_v44 = vrot.slane %v1614_v43, 5  ;;  %v2012_v63 = vrot.slane %v2010_v45, 4  ;;  %v2013_v60 = vrot.slane %v12591_v34, 5  ;;  %v1625_v30 = vor.u32 %v1624_v33, %v1621_v38  ;;  %v12594_v33 = vld [vmem:[%s15226_s30 + $0x98] sm:$0x1] }
 0x18b   : > { %7215 = vmatprep.mubr.bf16.mxu0 %v17014_v13  ;;  %8180 = vmatprep.mubr.bf16.mxu1 %v17014_v13  ;;  %20420 = vst [vmem:[#allocation36_spill] sm:$0xff] %v17078_v24  ;;  %v1638_v54 = vshll.u32 %v12527_v29, 16  ;;  %v1643_v51 = vshrl.u32 %v12528_v27, 16  ;;  %v2017_v37 = vrot.slane %v12593_v42, 5  ;;  %v1652_v43 = vshll.u32 %v12529_v56, 16  ;;  %v15031_v2 = vld [vmem:[%s15226_s30 + $0x84] sm:$0xff]  }
 0x18c   : > { %7325 = vmatpush1.bf16.msra.mxu0 %v13327_v7  ;;  %8290 = vmatpush1.bf16.msra.mxu1 %v13329_v11  ;;  %v1646_v7 = vshll.u32 %v12528_v27, 16  ;;  %v1617_v11 = vsel %vm15263_vm2, %v1612_v46, %v1616_v44  ;;  %v1656_v55 = vshrl.u32 %v12529_v56, 16  ;;  %v2014_v19 = vsel %vm15898_vm5, %v2012_v63, %v2013_v60  ;;  %v12530_v27 = vld [vmem:[%s15226_s30 + $0x98] sm:$0x1]  ;;  %v12531_v44 = vld [vmem:[%s15226_s30 + $0x9c] sm:$0xf] }
 0x18d   : > { %7326 = vmatprep.subr.bf16.mxu0 %v13336_v20  ;;  %8291 = vmatprep.subr.bf16.mxu1 %v13338_v57  ;;  %v1635_v20 = vor.u32 %v1634_v12, %v17068_v17  ;;  %v1607_v57 = vsel %vm15263_vm2, %v1602_v25, %v17031_v48  ;;  %v2011_v48 = vsel %vm15898_vm5, %v12617_v62, %v2010_v45  ;;  %v1626_v38 = vrot.slane %v1625_v30, 4  ;;  %v12596_v42 = vld [vmem:[%s15226_s30 + $0xa0] sm:$0xf] }
 0x18e   : > { %v1640_v34 = vrot.slane %v1638_v54, 5  ;;  %v1645_v12 = vrot.slane %v1643_v51, 4  ;;  %v17098_v25 = vcombine.low %v1607_v57, %v1617_v11  ;;  %v12618_v29 = vrot.slane %v12592_v9, 9  ;;  %v12595_v9 = vld [vmem:[%s15226_s30 + $0x9c] sm:$0xe] }
 0x18f   : > { %v1636_v14 = vrot.slane %v1635_v20, 4  ;;  %v2020_v45 = vrot.slane %v12594_v33, 5  ;;  %v1658_v46 = vrot.slane %v1656_v55, 4  ;;  %v17104_v62 = vcombine.low %v2011_v48, %v2014_v19  ;;  %v12597_v48 = vld [vmem:[%s15226_s30 + $0xa4] sm:$0x1] }
 0x190   : > { %7327 = vmatpush1.bf16.msra.mxu0 %v13335_v23  ;;  %8292 = vmatpush1.bf16.msra.mxu1 %v13337_v40  ;;  %v1648_v23 = vrot.slane %v1646_v7, 5  ;;  %20421 = vst [vmem:[#allocation37_spill] sm:$0xff] %v17098_v25  ;;  %v2019_v40 = vrot.slane %v2017_v37, 4  ;;  %v1631_v63 = vsel %vm15263_vm2, %v1626_v38, %v17068_v17  ;;  %v2018_v56 = vsel %vm15898_vm5, %v12618_v29, %v2017_v37  ;;  %v12534_v19 = vld [vmem:[%s15226_s30 + $0xa8] sm:$0xf] }
 0x191   : > { %7489 = vmatprep.subr.bf16.mxu0 %v13344_v61  ;;  %8454 = vmatprep.subr.bf16.mxu1 %v13346_v5  ;;  %v17101_v61 = vrot.slane %v1652_v43, 5  ;;  %20422 = vst [vmem:[#allocation38_spill] sm:$0xff] %v17104_v62  ;;  %v12532_v5 = vld [vmem:[%s15226_s30 + $0xa0] sm:$0xf]  ;;  %v1641_v60 = vsel %vm15263_vm2, %v1636_v14, %v1640_v34  ;;  %v1662_v20 = vshll.u32 %v12530_v27, 16  ;;  %v1667_v54 = vshrl.u32 %v12531_v44, 16 }
 0x192   : > { %7216 = vmatmul.mubr.bf16.gmra.mrb[32].mxu0 %v17070_v10  ;;  %8181 = vmatmul.mubr.bf16.gmra.mrb[32].mxu1 %v17070_v10  ;;  %v1649_v30 = vor.u32 %v1648_v23, %v1645_v12  ;;  %v1670_v51 = vshll.u32 %v12531_v44, 16  ;;  %v2021_v7 = vsel %vm15898_vm5, %v2019_v40, %v2020_v45  ;;  %v1676_v57 = vshll.u32 %v12532_v5, 16  ;;  %v12535_v12 = vld [vmem:[%s15226_s30 + $0xac] sm:$0xf]  ;;  %v12533_v27 = vld [vmem:[%s15226_s30 + $0xa4] sm:$0x1] }
 0x193   : > { %7225 = vmatprep.mubr.bf16.mxu0 %v17078_v24  ;;  %8190 = vmatprep.mubr.bf16.mxu1 %v17078_v24  ;;  %v1659_v17 = vor.u32 %v1658_v46, %v17101_v61  ;;  %v1680_v11 = vshrl.u32 %v12532_v5, 16  ;;  %v2024_v37 = vrot.slane %v12596_v42, 5  ;;  %v17123_v43 = vcombine.low %v1631_v63, %v1641_v60  ;;  %v12599_v60 = vld [vmem:[%s15226_s30 + $0xac] sm:$0xf]  ;;  %v12690_v24 = vld [vmem:[%s15226_s30 + $0x24] sm:$0xf] }
 0x194   : > { %v1650_v55 = vrot.slane %v1649_v30, 4  ;;  %v17127_v38 = vcombine.low %v2018_v56, %v2021_v7  ;;  %v1664_v33 = vrot.slane %v1662_v20, 5  ;;  %v1669_v14 = vrot.slane %v1667_v54, 4 }
 0x195   : > { %20423 = vst [vmem:[#allocation39_spill] sm:$0xff] %v17123_v43  ;;  %v1672_v34 = vrot.slane %v1670_v51, 5  ;;  %v1660_v23 = vrot.slane %v1659_v17, 4  ;;  %v12619_v29 = vrot.slane %v12595_v9, 9  ;;  %v17131_v40 = vrot.slane %v1676_v57, 5 }
 0x196   : > { %20424 = vst [vmem:[#allocation40_spill] sm:$0xff] %v17127_v38  ;;  %v1682_v45 = vrot.slane %v1680_v11, 4  ;;  %v2026_v46 = vrot.slane %v2024_v37, 4  ;;  %v2027_v44 = vrot.slane %v12597_v48, 5  ;;  %v1691_v5 = vshrl.u32 %v12534_v19, 16 }
 0x197   : > { %v1694_v63 = vshll.u32 %v12534_v19, 16  ;;  %v1700_v30 = vshll.u32 %v12535_v12, 16  ;;  %v1704_v42 = vshrl.u32 %v12535_v12, 16  ;;  %v1673_v56 = vor.u32 %v1672_v34, %v1669_v14  ;;  %v12598_v11 = vld [vmem:[%s15226_s30 + $0xa8] sm:$0xe] }
 0x198   : > { %v1686_v20 = vshll.u32 %v12533_v27, 16  ;;  %v1655_v54 = vsel %vm15263_vm2, %v1650_v55, %v17101_v61  ;;  %v1665_v51 = vsel %vm15263_vm2, %v1660_v23, %v1664_v33  ;;  %v2025_v7 = vsel %vm15898_vm5, %v12619_v29, %v2024_v37  ;;  %v12600_v48 = vld [vmem:[%s15226_s30 + $0xb0] sm:$0x1]  ;;  %v12537_v12 = vld [vmem:[%s15226_s30 + $0xb4] sm:$0xf] }
 0x199   : > { %v1683_v17 = vor.u32 %v1682_v45, %v17131_v40  ;;  %v2028_v57 = vsel %vm15898_vm5, %v2026_v46, %v2027_v44  ;;  %v2031_v9 = vrot.slane %v12599_v60, 5  ;;  %v1693_v61 = vrot.slane %v1691_v5, 4  ;;  %v12536_v37 = vld [vmem:[%s15226_s30 + $0xb0] sm:$0x1]  ;;  %v12602_v46 = vld [vmem:[%s15226_s30 + $0xb8] sm:$0xf] }
 0x19a   : > { %7226 = vmatmul.mubr.bf16.gmra.mrb[36].mxu0 %v17098_v25  ;;  %8191 = vmatmul.mubr.bf16.gmra.mrb[36].mxu1 %v17098_v25  ;;  %v1696_v55 = vrot.slane %v1694_v63, 5  ;;  %v17151_v19 = vrot.slane %v1700_v30, 5  ;;  %v1706_v33 = vrot.slane %v1704_v42, 4  ;;  %v1674_v14 = vrot.slane %v1673_v56, 4  ;;  %v12538_v44 = vld [vmem:[%s15226_s30 + $0xb8] sm:$0xf] }
 0x19b   : > { %7235 = vmatprep.mubr.bf16.mxu0 %v17104_v62  ;;  %8200 = vmatprep.mubr.bf16.mxu1 %v17104_v62  ;;  %v1688_v34 = vrot.slane %v1686_v20, 5  ;;  %v17154_v23 = vcombine.low %v1655_v54, %v1665_v51  ;;  %v17156_v29 = vcombine.low %v2025_v7, %v2028_v57  ;;  %v1684_v27 = vrot.slane %v1683_v17, 4  ;;  %v12603_v17 = vld [vmem:[%s15226_s30 + $0xbc] sm:$0x1] }
 0x19c   : > { %v12620_v45 = vrot.slane %v12598_v11, 9  ;;  %v2033_v5 = vrot.slane %v2031_v9, 4  ;;  %v2034_v63 = vrot.slane %v12600_v48, 5  ;;  %v1697_v60 = vor.u32 %v1696_v55, %v1693_v61 }
 0x19d   : > { %20425 = vst [vmem:[#allocation41_spill] sm:$0xff] %v17154_v23  ;;  %20426 = vst [vmem:[#allocation42_spill] sm:$0xff] %v17156_v29  ;;  %v1707_v30 = vor.u32 %v1706_v33, %v17151_v19  ;;  %v1715_v42 = vshrl.u32 %v12537_v12, 16  ;;  %v1718_v56 = vshll.u32 %v12537_v12, 16  ;;  %v2038_v20 = vrot.slane %v12602_v46, 5 }
 0x19e   : > { %v1724_v62 = vshll.u32 %v12538_v44, 16  ;;  %v1728_v54 = vshrl.u32 %v12538_v44, 16  ;;  %v1679_v51 = vsel %vm15263_vm2, %v1674_v14, %v17131_v40  ;;  %v1689_v7 = vsel %vm15263_vm2, %v1684_v27, %v1688_v34  ;;  %v12540_v46 = vld [vmem:[%s15226_s30 + $0xc0] sm:$0xf] }
 0x19f   : > { %v2032_v57 = vsel %vm15898_vm5, %v12620_v45, %v2031_v9  ;;  %v2035_v11 = vsel %vm15898_vm5, %v2033_v5, %v2034_v63  ;;  %v1698_v61 = vrot.slane %v1697_v60, 4  ;;  %v1708_v55 = vrot.slane %v1707_v30, 4  ;;  %v12539_v45 = vld [vmem:[%s15226_s30 + $0xbc] sm:$0x1]  ;;  %v12541_v5 = vld [vmem:[%s15226_s30 + $0xc4] sm:$0xf] }
 0x1a0   : > { %v1720_v33 = vrot.slane %v1718_v56, 5  ;;  %v2040_v14 = vrot.slane %v2038_v20, 4  ;;  %v2041_v34 = vrot.slane %v12603_v17, 5  ;;  %v17176_v12 = vrot.slane %v1724_v62, 5  ;;  %v12687_v30 = vld [vmem:[%s15226_s30 + $0x18] sm:$0xf] }
 0x1a1   : > { %v1730_v27 = vrot.slane %v1728_v54, 4  ;;  %v17178_v9 = vcombine.low %v1679_v51, %v1689_v7  ;;  %v17182_v44 = vcombine.low %v2032_v57, %v2035_v11  ;;  %v1734_v54 = vshll.u32 %v12539_v45, 16  ;;  %v12688_v7 = vld [vmem:[%s15226_s30 + $0x1c] sm:$0xf] }
 0x1a2   : > { %7236 = vmatmul.mubr.bf16.gmra.mrb[40].mxu0 %v17123_v43  ;;  %8201 = vmatmul.mubr.bf16.gmra.mrb[40].mxu1 %v17123_v43  ;;  %v12601_v43 = vld [vmem:[%s15226_s30 + $0xb4] sm:$0xe]  ;;  %v1739_v51 = vshrl.u32 %v12540_v46, 16  ;;  %v1742_v17 = vshll.u32 %v12540_v46, 16  ;;  %v1748_v57 = vshll.u32 %v12541_v5, 16  ;;  %v1752_v11 = vshrl.u32 %v12541_v5, 16 }
 0x1a3   : > { %7245 = vmatprep.mubr.bf16.mxu0 %v17127_v38  ;;  %8210 = vmatprep.mubr.bf16.mxu1 %v17127_v38  ;;  %v1710_v38 = vshll.u32 %v12536_v37, 16  ;;  %v12621_v48 = vrot.slane %v12601_v43, 9  ;;  %v1717_v37 = vrot.slane %v1715_v42, 4  ;;  %20427 = vst [vmem:[#allocation43_spill] sm:$0xff] %v17178_v9  ;;  %20428 = vst [vmem:[#allocation44_spill] sm:$0xff] %v17182_v44  ;;  %v1703_v43 = vsel %vm15263_vm2, %v1698_v61, %v17151_v19 }
 0x1a4   : > { %v2042_v42 = vsel %vm15898_vm5, %v2040_v14, %v2041_v34  ;;  %v1731_v56 = vor.u32 %v1730_v27, %v17176_v12  ;;  %v12606_v61 = vld [vmem:[%s15226_s30 + $0xc8] sm:$0x1]  ;;  %v2337_v14 = vshrl.u32 %v12688_v7, 16  ;;  %v1736_v45 = vrot.slane %v1734_v54, 5 }
 0x1a5   : > { %v1712_v40 = vrot.slane %v1710_v38, 5  ;;  %v12605_v38 = vld [vmem:[%s15226_s30 + $0xc4] sm:$0xf]  ;;  %v2039_v62 = vsel %vm15898_vm5, %v12621_v48, %v2038_v20  ;;  %v1721_v60 = vor.u32 %v1720_v33, %v1717_v37  ;;  %v12604_v20 = vld [vmem:[%s15226_s30 + $0xc0] sm:$0xe]  ;;  %v2333_v33 = vshll.u32 %v12688_v7, 16 }
 0x1a6   : > { %v2045_v19 = vrot.slane %v12605_v38, 5  ;;  %v17206_v34 = vcombine.low %v2039_v62, %v2042_v42  ;;  %v1732_v27 = vrot.slane %v1731_v56, 4  ;;  %v1741_v46 = vrot.slane %v1739_v51, 4  ;;  %v12689_v7 = vld [vmem:[%s15226_s30 + $0x20] sm:$0x1] }
 0x1a7   : > { %v1713_v63 = vsel %vm15263_vm2, %v1708_v55, %v1712_v40  ;;  %v2324_v40 = vshrl.u32 %v12687_v30, 16  ;;  %v2327_v55 = vshll.u32 %v12687_v30, 16  ;;  %v1722_v37 = vrot.slane %v1721_v60, 4  ;;  %v12691_v51 = vld [vmem:[%s15226_s30 + $0x28] sm:$0xf] }
 0x1a8   : > { %v17204_v48 = vcombine.low %v1703_v43, %v1713_v63  ;;  %20430 = vst [vmem:[#allocation46_spill] sm:$0xff] %v17206_v34  ;;  %v12622_v38 = vrot.slane %v12604_v20, 9  ;;  %v2047_v5 = vrot.slane %v2045_v19, 4  ;;  %v1744_v30 = vrot.slane %v1742_v17, 5 }
 0x1a9   : > { %v2326_v43 = vrot.slane %v2324_v40, 4  ;;  %v2329_v63 = vrot.slane %v2327_v55, 5  ;;  %v2335_v60 = vrot.slane %v2333_v33, 5  ;;  %v2339_v25 = vrot.slane %v2337_v14, 4 }
 0x1aa   : > { %7246 = vmatmul.mubr.bf16.gmra.mrb[44].mxu0 %v17154_v23  ;;  %8211 = vmatmul.mubr.bf16.gmra.mrb[44].mxu1 %v17154_v23  ;;  %20429 = vst [vmem:[#allocation45_spill] sm:$0xff] %v17204_v48  ;;  %v12542_v23 = vld [vmem:[%s15226_s30 + $0xc8] sm:$0x1]  ;;  %v1727_v62 = vsel %vm15263_vm2, %v1722_v37, %v17176_v12  ;;  %v1737_v42 = vsel %vm15263_vm2, %v1732_v27, %v1736_v45  ;;  %v2348_v40 = vshrl.u32 %v12690_v24, 16  ;;  %v2357_v55 = vshll.u32 %v12691_v51, 16 }
 0x1ab   : > { %7255 = vmatprep.mubr.bf16.mxu0 %v17156_v29  ;;  %8220 = vmatprep.mubr.bf16.mxu1 %v17156_v29  ;;  %v1750_v29 = vrot.slane %v1748_v57, 5  ;;  %v2046_v56 = vsel %vm15898_vm5, %v12622_v38, %v2045_v19  ;;  %v1745_v54 = vor.u32 %v1744_v30, %v1741_v46  ;;  %v2330_v12 = vor.u32 %v2329_v63, %v2326_v43  ;;  %v12693_v27 = vld [vmem:[%s15226_s30 + $0x30] sm:$0xf]  ;;  %v12694_v46 = vld [vmem:[%s15226_s30 + $0x34] sm:$0xf] }
 0x1ac   : > { %v2340_v20 = vor.u32 %v2339_v25, %v2335_v60  ;;  %v2351_v19 = vshll.u32 %v12690_v24, 16  ;;  %v2361_v37 = vshrl.u32 %v12691_v51, 16  ;;  %v17225_v33 = vcombine.low %v1727_v62, %v1737_v42  ;;  %v12692_v62 = vld [vmem:[%s15226_s30 + $0x2c] sm:$0x1] }
 0x1ad   : > { %v1746_v14 = vrot.slane %v1745_v54, 4  ;;  %v2350_v30 = vrot.slane %v2348_v40, 4  ;;  %v2359_v43 = vrot.slane %v2357_v55, 5  ;;  %v2372_v24 = vshrl.u32 %v12693_v27, 16 }
 0x1ae   : > { %20431 = vst [vmem:[#allocation47_spill] sm:$0xff] %v17225_v33  ;;  %v2341_v38 = vrot.slane %v2340_v20, 4  ;;  %v2353_v25 = vrot.slane %v2351_v19, 5  ;;  %v2363_v63 = vrot.slane %v2361_v37, 4  ;;  %v2381_v42 = vshll.u32 %v12694_v46, 16 }
 0x1af   : > { %v2385_v54 = vshrl.u32 %v12694_v46, 16  ;;  %v2367_v20 = vshll.u32 %v12692_v62, 16 }
 0x1b1   : > { %v2387_v55 = vrot.slane %v2385_v54, 4 }
 0x1b2   : > { %7256 = vmatmul.mubr.bf16.gmra.mrb[48].mxu0 %v17178_v9  ;;  %8221 = vmatmul.mubr.bf16.gmra.mrb[48].mxu1 %v17178_v9  ;;  %v2048_v9 = vrot.slane %v12606_v61, 5  ;;  %v2343_v61 = vshll.u32 %v12689_v7, 16  ;;  %v2375_v7 = vshll.u32 %v12693_v27, 16  ;;  %v12696_v27 = vld [vmem:[%s15226_s30 + $0x3c] sm:$0xf] }
 0x1b3   : > { %7265 = vmatprep.mubr.bf16.mxu0 %v17182_v44  ;;  %8230 = vmatprep.mubr.bf16.mxu1 %v17182_v44  ;;  %v1754_v44 = vrot.slane %v1752_v11, 4  ;;  %v1758_v11 = vshll.u32 %v12542_v23, 16  ;;  %v2331_v23 = vrot.slane %v2330_v12, 4  ;;  %v2364_v12 = vor.u32 %v2363_v63, %v2359_v43 }
 0x1b4   : > { %v2049_v17 = vsel %vm15898_vm5, %v2047_v5, %v2048_v9  ;;  %v2345_v5 = vrot.slane %v2343_v61, 5  ;;  %v2374_v61 = vrot.slane %v2372_v24, 4  ;;  %v2377_v40 = vrot.slane %v2375_v7, 5  ;;  %v15004_v7 = vld [vmem:[%s15226_s30 + $0x18] sm:$0xff]  }
 0x1b5   : > { %v1755_v57 = vor.u32 %v1754_v44, %v1750_v29  ;;  %v17228_v45 = vcombine.low %v2046_v56, %v2049_v17  ;;  %v1760_v44 = vrot.slane %v1758_v11, 5  ;;  %v1751_v56 = vsel %vm15263_vm2, %v1746_v14, %v1750_v29  ;;  %v12695_v14 = vld [vmem:[%s15226_s30 + $0x38] sm:$0x1] }
 0x1b6   : > { %v2336_v17 = vsel %vm15263_vm2, %v2331_v23, %v2335_v60  ;;  %v2354_v11 = vor.u32 %v2353_v25, %v2350_v30  ;;  %v17246_v29 = vrot.slane %v2381_v42, 5  ;;  %v2369_v23 = vrot.slane %v2367_v20, 5  ;;  %v3744_v20 = vld [vmem:[%s20204_s1 + $0x1068] sm:$0xff] }
 0x1b7   : > { %20432 = vst [vmem:[#allocation48_spill] sm:$0xff] %v17228_v45  ;;  %v1756_v9 = vrot.slane %v1755_v57, 4  ;;  %v2346_v57 = vsel %vm15263_vm2, %v2341_v38, %v2345_v5  ;;  %v2378_v46 = vor.u32 %v2377_v40, %v2374_v61  ;;  %v2391_v5 = vshll.u32 %v12695_v14, 16 }
 0x1b8   : > { %v17248_v37 = vcombine.low %v2336_v17, %v2346_v57  ;;  %v2355_v60 = vrot.slane %v2354_v11, 4  ;;  %v2388_v38 = vor.u32 %v2387_v55, %v17246_v29  ;;  %v2396_v30 = vshrl.u32 %v12696_v27, 16  ;;  %v3739_v57 = vld [vmem:[%s20204_s1 + $0x1040] sm:$0xff] }
 0x1b9   : > { %v1761_v51 = vsel %vm15263_vm2, %v1756_v9, %v1760_v44  ;;  %v12697_v9 = vld [vmem:[%s15226_s30 + $0x40] sm:$0xf]  ;;  %v2365_v44 = vrot.slane %v2364_v12, 4  ;;  %v2399_v25 = vshll.u32 %v12696_v27, 16  ;;  %v2379_v54 = vrot.slane %v2378_v46, 4 }
 0x1ba   : > { %7266 = vmatmul.mubr.bf16.gmra.mrb[52].mxu0 %v17204_v48  ;;  %8231 = vmatmul.mubr.bf16.gmra.mrb[52].mxu1 %v17204_v48  ;;  %v17244_v19 = vcombine.low %v1751_v56, %v1761_v51  ;;  %20434 = vst [vmem:[#allocation50_spill] sm:$0xff] %v17248_v37  ;;  %v2405_v63 = vshll.u32 %v12697_v9, 16  ;;  %v2409_v24 = vshrl.u32 %v12697_v9, 16  ;;  %v2360_v62 = vsel %vm15263_vm2, %v2355_v60, %v2359_v43  ;;  %v12699_v56 = vld [vmem:[%s15226_s30 + $0x48] sm:$0xf]  ;;  %v3743_v11 = vld [vmem:[%s20204_s1 + $0x1060] sm:$0xff] }
 0x1bb   : > { %7275 = vmatprep.mubr.bf16.mxu0 %v17206_v34  ;;  %8240 = vmatprep.mubr.bf16.mxu1 %v17206_v34  ;;  %v2370_v42 = vsel %vm15263_vm2, %v2365_v44, %v2369_v23  ;;  %v2389_v51 = vrot.slane %v2388_v38, 4  ;;  %v2393_v17 = vrot.slane %v2391_v5, 5  ;;  %v12700_v12 = vld [vmem:[%s15226_s30 + $0x4c] sm:$0xf]  ;;  %v2398_v61 = vrot.slane %v2396_v30, 4  ;;  %v17285_v5 = vld [vmem:[%s20204_s1 + $0x1080] sm:$0xff] }
 0x1bc   : > { %20433 = vst [vmem:[#allocation49_spill] sm:$0xff] %v17244_v19  ;;  %v3740_v43 = vld [vmem:[%s20204_s1 + $0x1048] sm:$0xff]  ;;  %v2401_v40 = vrot.slane %v2399_v25, 5  ;;  %v17277_v55 = vrot.slane %v2405_v63, 5  ;;  %v2411_v14 = vrot.slane %v2409_v24, 4  ;;  %v17279_v27 = vcombine.low %v2360_v62, %v2370_v42  ;;  %v17290_v30 = vld [vmem:[%s20204_s1 + $0x10a0] sm:$0xff] }
 0x1bd   : > { %v12698_v9 = vld [vmem:[%s15226_s30 + $0x44] sm:$0x1]  ;;  %v2420_v60 = vshrl.u32 %v12699_v56, 16  ;;  %v2423_v44 = vshll.u32 %v12699_v56, 16  ;;  %v13352_v23 = vcombine.high %v3739_v57, %v3743_v11  ;;  %v2429_v46 = vshll.u32 %v12700_v12, 16  ;;  %v17300_v42 = vld [vmem:[%s20204_s1 + $0x1088] sm:$0xff] }
 0x1be   : > { %20435 = vst [vmem:[#allocation51_spill] sm:$0xff] %v17279_v27  ;;  %v2433_v38 = vshrl.u32 %v12700_v12, 16  ;;  %v2384_v25 = vsel %vm15263_vm2, %v2379_v54, %v17246_v29  ;;  %v2394_v63 = vsel %vm15263_vm2, %v2389_v51, %v2393_v17  ;;  %v13351_v24 = vcombine.low %v3739_v57, %v3743_v11  ;;  %v17305_v56 = vld [vmem:[%s20204_s1 + $0x10a8] sm:$0xff]  ;;  %v17314_v57 = vld [vmem:[%s20204_s1 + $0x10] sm:$0xff] }
 0x1bf   : > { %v13354_v62 = vcombine.high %v3740_v43, %v3744_v20  ;;  %v20436_v12 = vcombine.low %v16437_v32, %v16442_v16  ;;  %v13353_v29 = vcombine.low %v3740_v43, %v3744_v20  ;;  %v2402_v54 = vor.u32 %v2401_v40, %v2398_v61  ;;  %v17324_v32 = vld [vmem:[%s20204_s1 + $0x18] sm:$0xff] }
 0x1c0   : > { %v2412_v51 = vor.u32 %v2411_v14, %v17277_v55  ;;  %v2415_v17 = vshll.u32 %v12698_v9, 16  ;;  %v20437_v16 = vcombine.low %v16453_v49, %v16458_v59  ;;  %v2422_v11 = vrot.slane %v2420_v60, 4  ;;  %v17337_v40 = vld [vmem:[%s20204_s1 + $0x38] sm:$0xff]  ;;  %v15005_v59 = vld [vmem:[%s15226_s30 + $0x24] sm:$0xff]   ;;  %v12701_v49 = vld [vmem:[%s15226_s30 + $0x50] sm:$0x1] }
 0x1c1   : > { %v2425_v43 = vrot.slane %v2423_v44, 5  ;;  %v13360_v20 = vcombine.high %v17285_v5, %v17290_v30  ;;  %v17342_v14 = vrot.slane %v2429_v46, 5  ;;  %v2435_v9 = vrot.slane %v2433_v38, 4  ;;  %v3756_v44 = vld [vmem:[%s20204_s1 + $0x10c8] sm:$0xff] }
 0x1c2   : > { %7276 = vmatmul.mubr.bf16.gmra.mrb[56].mxu0 %v17225_v33  ;;  %8241 = vmatmul.mubr.bf16.gmra.mrb[56].mxu1 %v17225_v33  ;;  %v13362_v60 = vcombine.high %v17300_v42, %v17305_v56  ;;  %v17355_v61 = vcombine.low %v2384_v25, %v2394_v63  ;;  %v2403_v46 = vrot.slane %v2402_v54, 4  ;;  %v2417_v38 = vrot.slane %v2415_v17, 5 }
 0x1c3   : > { %7285 = vmatprep.mubr.bf16.mxu0 %v17228_v45  ;;  %8250 = vmatprep.mubr.bf16.mxu1 %v17228_v45  ;;  %v2439_v45 = vshll.u32 %v12701_v49, 16  ;;  %v13359_v25 = vcombine.low %v17285_v5, %v17290_v30  ;;  %v2436_v63 = vor.u32 %v2435_v9, %v17342_v14  ;;  %v3767_v5 = vld [vmem:[%s20204_s1 + $0x1120] sm:$0xff] }
 0x1c4   : > { %20438 = vst [vmem:[#allocation52_spill] sm:$0xff] %v17355_v61  ;;  %v2408_v30 = vsel %vm15263_vm2, %v2403_v46, %v17277_v55 }
 0x1ca   : > { %7286 = vmatmul.mubr.bf16.gmra.mrb[60].mxu0 %v17244_v19  ;;  %8251 = vmatmul.mubr.bf16.gmra.mrb[60].mxu1 %v17244_v19  ;;  %v2426_v19 = vor.u32 %v2425_v43, %v2422_v11  ;;  %v2441_v43 = vrot.slane %v2439_v45, 5  ;;  %v3771_v45 = vld [vmem:[%s20204_s1 + $0x1140] sm:$0xff] }
 0x1cb   : > { %7328 = vmatprep.mubr.bf16.mxu0 %v17248_v37  ;;  %8293 = vmatprep.mubr.bf16.mxu1 %v17248_v37  ;;  %v2413_v37 = vrot.slane %v2412_v51, 4  ;;  %v3763_v51 = vld [vmem:[%s20204_s1 + $0x1100] sm:$0xff] }
 0x1cc   : > { %v2427_v11 = vrot.slane %v2426_v19, 4  ;;  %v13376_v9 = vcombine.high %v3763_v51, %v3767_v5  ;;  %v3775_v19 = vld [vmem:[%s20204_s1 + $0x1160] sm:$0xff] }
 0x1d2   : > { %7329 = vmatmul.mubr.bf16.vlgmr.msra.gmra.mrb[0].mxu0 %v15004_v7  ;;  %8294 = vmatmul.mubr.bf16.vlgmr.msra.gmra.mrb[0].mxu1 %v15004_v7  ;;  %v17319_v7 = vld [vmem:[%s20204_s1 + $0x30] sm:$0xff] }
 0x1d3   : > { %7490 = vmatpush1.bf16.msra.mxu0 %v20436_v12  ;;  %8455 = vmatpush1.bf16.msra.mxu1 %v20437_v16  ;;  %v12702_v12 = vld [vmem:[%s15226_s30 + $0x54] sm:$0xf]  ;;  %v3755_v16 = vld [vmem:[%s20204_s1 + $0x10c0] sm:$0xff] }
 0x1d4   : > { %7338 = vmatprep.mubr.bf16.mxu0 %v17279_v27  ;;  %8303 = vmatprep.mubr.bf16.mxu1 %v17279_v27  ;;  %v12703_v27 = vld [vmem:[%s15226_s30 + $0x58] sm:$0xf]  ;;  %v2444_v54 = vshrl.u32 %v12702_v12, 16  ;;  %v2447_v33 = vshll.u32 %v12702_v12, 16 }
 0x1d5   : > { %7491 = vmatprep.subr.bf16.mxu0 %v13352_v23  ;;  %8456 = vmatprep.subr.bf16.mxu1 %v13354_v62  ;;  %v3759_v23 = vld [vmem:[%s20204_s1 + $0x10e0] sm:$0xff]  ;;  %v3760_v62 = vld [vmem:[%s20204_s1 + $0x10e8] sm:$0xff]  ;;  %v2453_v34 = vshll.u32 %v12703_v27, 16  ;;  %v2457_v48 = vshrl.u32 %v12703_v27, 16 }
 0x1d6   : > { %v13368_v17 = vcombine.high %v3755_v16, %v3759_v23  ;;  %v3764_v27 = vld [vmem:[%s20204_s1 + $0x1108] sm:$0xff]  ;;  %v2446_v55 = vrot.slane %v2444_v54, 4  ;;  %v13369_v49 = vcombine.low %v3756_v44, %v3760_v62  ;;  %v2449_v12 = vrot.slane %v2447_v33, 5 }
 0x1d7   : > { %7492 = vmatpush1.bf16.msra.mxu0 %v13351_v24  ;;  %8457 = vmatpush1.bf16.msra.mxu1 %v13353_v29  ;;  %v13361_v24 = vcombine.low %v17300_v42, %v17305_v56  ;;  %v13370_v29 = vcombine.high %v3756_v44, %v3760_v62  ;;  %v3768_v42 = vld [vmem:[%s20204_s1 + $0x1128] sm:$0xff]  ;;  %v2418_v56 = vsel %vm15263_vm2, %v2413_v37, %v2417_v38  ;;  %v17389_v46 = vrot.slane %v2453_v34, 5  ;;  %v12704_v44 = vld [vmem:[%s15226_s30 + $0x5c] sm:$0x1]  ;;  %v12706_v38 = vld [vmem:[%s15226_s30 + $0x64] sm:$0xf] }
 0x1d8   : > { %7493 = vmatprep.subr.bf16.mxu0 %v13360_v20  ;;  %8458 = vmatprep.subr.bf16.mxu1 %v13362_v60  ;;  %v13367_v20 = vcombine.low %v3755_v16, %v3759_v23  ;;  %v15006_v60 = vld [vmem:[%s15226_s30 + $0x30] sm:$0xff]   ;;  %v13378_v37 = vcombine.high %v3764_v27, %v3768_v42  ;;  %v17397_v16 = vcombine.low %v2408_v30, %v2418_v56  ;;  %v3772_v33 = vld [vmem:[%s20204_s1 + $0x1148] sm:$0xff]  ;;  %v12705_v23 = vld [vmem:[%s15226_s30 + $0x60] sm:$0xf]  ;;  %v2481_v56 = vshrl.u32 %v12706_v38, 16 }
 0x1d9   : > { %v2432_v34 = vsel %vm15263_vm2, %v2427_v11, %v17342_v14  ;;  %v13375_v62 = vcombine.low %v3763_v51, %v3767_v5  ;;  %v2450_v54 = vor.u32 %v2449_v12, %v2446_v55  ;;  %v3779_v14 = vld [vmem:[%s20204_s1 + $0x1180] sm:$0xff]  ;;  %v2468_v5 = vshrl.u32 %v12705_v23, 16  ;;  %v3784_v11 = vld [vmem:[%s20204_s1 + $0x11a8] sm:$0xff] }
 0x1da   : > { %7339 = vmatmul.mubr.bf16.gmra.mrb[4].mxu0 %v15005_v59  ;;  %8304 = vmatmul.mubr.bf16.gmra.mrb[4].mxu1 %v15005_v59  ;;  %v2437_v59 = vrot.slane %v2436_v63, 4  ;;  %20439 = vst [vmem:[#allocation53_spill] sm:$0xff] %v17397_v16  ;;  %v13377_v63 = vcombine.low %v3764_v27, %v3768_v42  ;;  %v3783_v51 = vld [vmem:[%s20204_s1 + $0x11a0] sm:$0xff]  ;;  %v2471_v27 = vshll.u32 %v12705_v23, 16  ;;  %v2477_v42 = vshll.u32 %v12706_v38, 16  ;;  %v3788_v23 = vld [vmem:[%s20204_s1 + $0x11c8] sm:$0xff] }
 0x1db   : > { %7348 = vmatprep.mubr.bf16.mxu0 %v17355_v61  ;;  %8313 = vmatprep.mubr.bf16.mxu1 %v17355_v61  ;;  %v2459_v61 = vrot.slane %v2457_v48, 4  ;;  %v3776_v48 = vld [vmem:[%s20204_s1 + $0x1168] sm:$0xff]  ;;  %v13392_v55 = vcombine.high %v3779_v14, %v3783_v51 }
 0x1dc   : > { %7494 = vmatpush1.bf16.msra.mxu0 %v13359_v25  ;;  %8459 = vmatpush1.bf16.msra.mxu1 %v13361_v24  ;;  %v2442_v25 = vsel %vm15263_vm2, %v2437_v59, %v2441_v43  ;;  %v13384_v24 = vcombine.high %v3771_v45, %v3775_v19  ;;  %v13386_v30 = vcombine.high %v3772_v33, %v3776_v48  ;;  %v3792_v38 = vld [vmem:[%s20204_s1 + $0x11e8] sm:$0xff] }
 0x1dd   : > { %7495 = vmatprep.subr.bf16.mxu0 %v13368_v17  ;;  %8460 = vmatprep.subr.bf16.mxu1 %v13370_v29  ;;  %v2460_v17 = vor.u32 %v2459_v61, %v17389_v46  ;;  %v2463_v29 = vshll.u32 %v12704_v44, 16  ;;  %v3780_v61 = vld [vmem:[%s20204_s1 + $0x1188] sm:$0xff]  ;;  %v13383_v43 = vcombine.low %v3771_v45, %v3775_v19  ;;  %v13385_v59 = vcombine.low %v3772_v33, %v3776_v48  ;;  %v3787_v44 = vld [vmem:[%s20204_s1 + $0x11c0] sm:$0xff] }
 0x1de   : > { %v3791_v45 = vld [vmem:[%s20204_s1 + $0x11e0] sm:$0xff]  ;;  %v2470_v19 = vrot.slane %v2468_v5, 4  ;;  %v2473_v33 = vrot.slane %v2471_v27, 5  ;;  %v17437_v48 = vrot.slane %v2477_v42, 5  ;;  %v13402_v5 = vcombine.high %v3788_v23, %v3792_v38 }
 0x1df   : > { %v2465_v12 = vrot.slane %v2463_v29, 5 }
 0x1e0   : > { %7496 = vmatpush1.bf16.msra.mxu0 %v13367_v20  ;;  %8461 = vmatpush1.bf16.msra.mxu1 %v13369_v49  ;;  %v17428_v20 = vcombine.low %v2432_v34, %v2442_v25  ;;  %v15007_v49 = vld [vmem:[%s15226_s30 + $0x3c] sm:$0xff]   ;;  %v2483_v34 = vrot.slane %v2481_v56, 4  ;;  %v12708_v25 = vld [vmem:[%s15226_s30 + $0x6c] sm:$0xf] }
 0x1e1   : > { %7497 = vmatprep.subr.bf16.mxu0 %v13376_v9  ;;  %8462 = vmatprep.subr.bf16.mxu1 %v13378_v37  ;;  %v2451_v9 = vrot.slane %v2450_v54, 4  ;;  %v13394_v37 = vcombine.high %v3780_v61, %v3784_v11  ;;  %v13393_v54 = vcombine.low %v3780_v61, %v3784_v11  ;;  %v2492_v42 = vshrl.u32 %v12708_v25, 16 }
 0x1e2   : > { %7349 = vmatmul.mubr.bf16.gmra.mrb[8].mxu0 %v15006_v60  ;;  %8314 = vmatmul.mubr.bf16.gmra.mrb[8].mxu1 %v15006_v60  ;;  %20440 = vst [vmem:[#allocation54_spill] sm:$0xff] %v17428_v20  ;;  %v2461_v60 = vrot.slane %v2460_v17, 4  ;;  %v13400_v17 = vcombine.high %v3787_v44, %v3791_v45  ;;  %v2495_v56 = vshll.u32 %v12708_v25, 16  ;;  %v13399_v11 = vcombine.low %v3787_v44, %v3791_v45 }
 0x1e3   : > { %7358 = vmatprep.mubr.bf16.mxu0 %v17397_v16  ;;  %8323 = vmatprep.mubr.bf16.mxu1 %v17397_v16  ;;  %v2456_v29 = vsel %vm15263_vm2, %v2451_v9, %v17389_v46  ;;  %v12712_v9 = vld [vmem:[%s15226_s30 + $0x7c] sm:$0xf]  ;;  %v2494_v44 = vrot.slane %v2492_v42, 4 }
 0x1e4   : > { %7498 = vmatpush1.bf16.msra.mxu0 %v13375_v62  ;;  %8463 = vmatpush1.bf16.msra.mxu1 %v13377_v63  ;;  %v12707_v62 = vld [vmem:[%s15226_s30 + $0x68] sm:$0x1]  ;;  %v13391_v63 = vcombine.low %v3779_v14, %v3783_v51  ;;  %v2474_v14 = vor.u32 %v2473_v33, %v2470_v19  ;;  %v2484_v51 = vor.u32 %v2483_v34, %v17437_v48  ;;  %v2497_v45 = vrot.slane %v2495_v56, 5  ;;  %v15009_v56 = vld [vmem:[%s15226_s30 + $0x54] sm:$0xff]  }
 0x1e5   : > { %7499 = vmatprep.subr.bf16.mxu0 %v13384_v24  ;;  %8464 = vmatprep.subr.bf16.mxu1 %v13386_v30  ;;  %v12709_v24 = vld [vmem:[%s15226_s30 + $0x70] sm:$0xf]  ;;  %v2466_v30 = vsel %vm15263_vm2, %v2461_v60, %v2465_v12  ;;  %v2487_v27 = vshll.u32 %v12707_v62, 16  ;;  %v12838_v60 = vcombine.high %v17324_v32, %v17337_v40 }
 0x1e6   : > { %v2501_v46 = vshll.u32 %v12709_v24, 16  ;;  %v2505_v61 = vshrl.u32 %v12709_v24, 16  ;;  %v17463_v12 = vcombine.low %v2456_v29, %v2466_v30  ;;  %v2485_v19 = vrot.slane %v2484_v51, 4 }
 0x1e7   : > { %v2489_v33 = vrot.slane %v2487_v27, 5  ;;  %v2529_v24 = vshrl.u32 %v12712_v9, 16  ;;  %v2498_v29 = vor.u32 %v2497_v45, %v2494_v44 }
 0x1e8   : > { %7500 = vmatpush1.bf16.msra.mxu0 %v13383_v43  ;;  %8465 = vmatpush1.bf16.msra.mxu1 %v13385_v59  ;;  %v13401_v43 = vcombine.low %v3788_v23, %v3792_v38  ;;  %v12836_v59 = vcombine.high %v17314_v57, %v17319_v7  ;;  %20441 = vst [vmem:[#allocation55_spill] sm:$0xff] %v17463_v12  ;;  %v2503_v34 = vrot.slane %v2501_v46, 5  ;;  %v2507_v23 = vrot.slane %v2505_v61, 4  ;;  %v12710_v38 = vld [vmem:[%s15226_s30 + $0x74] sm:$0x1] }
 0x1e9   : > { %7501 = vmatprep.subr.bf16.mxu0 %v13392_v55  ;;  %8466 = vmatprep.subr.bf16.mxu1 %v13394_v37  ;;  %v15008_v55 = vld [vmem:[%s15226_s30 + $0x48] sm:$0xff]   ;;  %v2475_v37 = vrot.slane %v2474_v14, 4  ;;  %v2531_v42 = vrot.slane %v2529_v24, 4  ;;  %v12713_v46 = vld [vmem:[%s15226_s30 + $0x80] sm:$0x1] }
 0x1ea   : > { %7359 = vmatmul.mubr.bf16.gmra.mrb[12].mxu0 %v15007_v49  ;;  %8324 = vmatmul.mubr.bf16.gmra.mrb[12].mxu1 %v15007_v49  ;;  %v12711_v49 = vld [vmem:[%s15226_s30 + $0x78] sm:$0xf]  ;;  %v2508_v30 = vor.u32 %v2507_v23, %v2503_v34 }
 0x1eb   : > { %7368 = vmatprep.mubr.bf16.mxu0 %v17428_v20  ;;  %8333 = vmatprep.mubr.bf16.mxu1 %v17428_v20  ;;  %v2516_v62 = vshrl.u32 %v12711_v49, 16  ;;  %v2519_v25 = vshll.u32 %v12711_v49, 16 }
 0x1ec   : > { %7502 = vmatpush1.bf16.msra.mxu0 %v13391_v63  ;;  %8467 = vmatpush1.bf16.msra.mxu1 %v13393_v54  ;;  %v2525_v63 = vshll.u32 %v12712_v9, 16  ;;  %v2480_v54 = vsel %vm15263_vm2, %v2475_v37, %v17437_v48  ;;  %v2509_v48 = vrot.slane %v2508_v30, 4 }
 0x1ed   : > { %7503 = vmatprep.subr.bf16.mxu0 %v13400_v17  ;;  %8468 = vmatprep.subr.bf16.mxu1 %v13402_v5  ;;  %v2490_v17 = vsel %vm15263_vm2, %v2485_v19, %v2489_v33  ;;  %v2511_v5 = vshll.u32 %v12710_v38, 16  ;;  %v2518_v14 = vrot.slane %v2516_v62, 4  ;;  %v2521_v51 = vrot.slane %v2519_v25, 5 }
 0x1ee   : > { %v2527_v27 = vrot.slane %v2525_v63, 5  ;;  %v17475_v61 = vcombine.low %v2480_v54, %v2490_v17  ;;  %v15010_v63 = vld [vmem:[%s15226_s30 + $0x60] sm:$0xff]  }
 0x1ef   : > { %v2522_v49 = vor.u32 %v2521_v51, %v2518_v14  ;;  %v12717_v14 = vld [vmem:[%s15226_s30 + $0x90] sm:$0xf]  ;;  %v12718_v51 = vld [vmem:[%s15226_s30 + $0x94] sm:$0xf] }
 0x1f0   : > { %7504 = vmatpush1.bf16.msra.mxu0 %v13399_v11  ;;  %8469 = vmatpush1.bf16.msra.mxu1 %v13401_v43  ;;  %20442 = vst [vmem:[#allocation56_spill] sm:$0xff] %v17475_v61  ;;  %v12714_v11 = vld [vmem:[%s15226_s30 + $0x84] sm:$0xf]  ;;  %v12715_v43 = vld [vmem:[%s15226_s30 + $0x88] sm:$0xf]  ;;  %v2532_v9 = vor.u32 %v2531_v42, %v2527_v27 }
 0x1f1   : > { %8647 = vmatprep.subr.bf16.mxu0 %v12836_v59  ;;  %9612 = vmatprep.subr.bf16.mxu1 %v12838_v60  ;;  %v2499_v59 = vrot.slane %v2498_v29, 4  ;;  %v2535_v60 = vshll.u32 %v12713_v46, 16  ;;  %v2540_v37 = vshrl.u32 %v12714_v11, 16  ;;  %v2543_v19 = vshll.u32 %v12714_v11, 16 }
 0x1f2   : > { %7369 = vmatmul.mubr.bf16.gmra.mrb[16].mxu0 %v15008_v55  ;;  %8334 = vmatmul.mubr.bf16.gmra.mrb[16].mxu1 %v15008_v55  ;;  %v2513_v55 = vrot.slane %v2511_v5, 5  ;;  %v2549_v33 = vshll.u32 %v12715_v43, 16  ;;  %v2553_v44 = vshrl.u32 %v12715_v43, 16  ;;  %v2523_v38 = vrot.slane %v2522_v49, 4  ;;  %v12716_v5 = vld [vmem:[%s15226_s30 + $0x8c] sm:$0x1] }
 0x1f3   : > { %7378 = vmatprep.mubr.bf16.mxu0 %v17463_v12  ;;  %8343 = vmatprep.mubr.bf16.mxu1 %v17463_v12  ;;  %v2504_v45 = vsel %vm15263_vm2, %v2499_v59, %v2503_v34  ;;  %v2533_v62 = vrot.slane %v2532_v9, 4  ;;  %v2537_v25 = vrot.slane %v2535_v60, 5  ;;  %v2542_v24 = vrot.slane %v2540_v37, 4 }
 0x1f4   : > { %v2514_v23 = vsel %vm15263_vm2, %v2509_v48, %v2513_v55  ;;  %v2545_v54 = vrot.slane %v2543_v19, 5  ;;  %v2551_v17 = vrot.slane %v2549_v33, 5  ;;  %v2555_v29 = vrot.slane %v2553_v44, 4 }
 0x1f5   : > { %v17486_v30 = vcombine.low %v2504_v45, %v2514_v23  ;;  %v2528_v34 = vsel %vm15263_vm2, %v2523_v38, %v2527_v27  ;;  %v2538_v42 = vsel %vm15263_vm2, %v2533_v62, %v2537_v25  ;;  %v2559_v11 = vshll.u32 %v12716_v5, 16  ;;  %v15011_v27 = vld [vmem:[%s15226_s30 + $0x6c] sm:$0xff]   ;;  %v12719_v23 = vld [vmem:[%s15226_s30 + $0x98] sm:$0x1]  ;;  %v12720_v38 = vld [vmem:[%s15226_s30 + $0x9c] sm:$0xf] }
 0x1f6   : > { %v2556_v46 = vor.u32 %v2555_v29, %v2551_v17  ;;  %v2564_v43 = vshrl.u32 %v12717_v14, 16  ;;  %v2567_v59 = vshll.u32 %v12717_v14, 16  ;;  %v2573_v48 = vshll.u32 %v12718_v51, 16  ;;  %v12721_v62 = vld [vmem:[%s15226_s30 + $0xa0] sm:$0xf] }
 0x1f7   : > { %20443 = vst [vmem:[#allocation57_spill] sm:$0xff] %v17486_v30  ;;  %v2577_v55 = vshrl.u32 %v12718_v51, 16  ;;  %v17498_v49 = vcombine.low %v2528_v34, %v2538_v42  ;;  %v2561_v37 = vrot.slane %v2559_v11, 5  ;;  %v2583_v29 = vshll.u32 %v12719_v23, 16  ;;  %v15012_v42 = vld [vmem:[%s15226_s30 + $0x78] sm:$0xff]  }
 0x1f8   : > { %v2557_v60 = vrot.slane %v2556_v46, 4  ;;  %v2566_v19 = vrot.slane %v2564_v43, 4  ;;  %v2569_v33 = vrot.slane %v2567_v59, 5  ;;  %v2575_v44 = vrot.slane %v2573_v48, 5  ;;  %v12724_v46 = vld [vmem:[%s15226_s30 + $0xac] sm:$0xf] }
 0x1f9   : > { %20444 = vst [vmem:[#allocation58_spill] sm:$0xff] %v17498_v49  ;;  %v2579_v45 = vrot.slane %v2577_v55, 4  ;;  %v2588_v5 = vshrl.u32 %v12720_v38, 16  ;;  %v2591_v14 = vshll.u32 %v12720_v38, 16  ;;  %v2597_v51 = vshll.u32 %v12721_v62, 16 }
 0x1fa   : > { %7379 = vmatmul.mubr.bf16.gmra.mrb[20].mxu0 %v15009_v56  ;;  %8344 = vmatmul.mubr.bf16.gmra.mrb[20].mxu1 %v15009_v56  ;;  %v2546_v56 = vor.u32 %v2545_v54, %v2542_v24  ;;  %v2570_v24 = vor.u32 %v2569_v33, %v2566_v19  ;;  %v2601_v34 = vshrl.u32 %v12721_v62, 16  ;;  %v2585_v59 = vrot.slane %v2583_v29, 5 }
 0x1fb   : > { %7388 = vmatprep.mubr.bf16.mxu0 %v17475_v61  ;;  %8353 = vmatprep.mubr.bf16.mxu1 %v17475_v61  ;;  %v2580_v54 = vor.u32 %v2579_v45, %v2575_v44  ;;  %v2590_v48 = vrot.slane %v2588_v5, 4  ;;  %v2593_v55 = vrot.slane %v2591_v14, 5  ;;  %v2621_v33 = vshll.u32 %v12724_v46, 16  ;;  %v15013_v14 = vld [vmem:[%s15226_s30 + $0x84] sm:$0xff]  }
 0x1fc   : > { %v2547_v9 = vrot.slane %v2546_v56, 4  ;;  %v12723_v56 = vld [vmem:[%s15226_s30 + $0xa8] sm:$0xf]  ;;  %v2571_v11 = vrot.slane %v2570_v24, 4  ;;  %v2625_v45 = vshrl.u32 %v12724_v46, 16 }
 0x1fd   : > { %v2581_v43 = vrot.slane %v2580_v54, 4  ;;  %v2615_v19 = vshll.u32 %v12723_v56, 16  ;;  %v2594_v62 = vor.u32 %v2593_v55, %v2590_v48  ;;  %v2623_v29 = vrot.slane %v2621_v33, 5 }
 0x1fe   : > { %v2552_v25 = vsel %vm15263_vm2, %v2547_v9, %v2551_v17  ;;  %v2603_v9 = vrot.slane %v2601_v34, 4  ;;  %v2576_v23 = vsel %vm15263_vm2, %v2571_v11, %v2575_v44  ;;  %v2627_v5 = vrot.slane %v2625_v45, 4 }
 0x1ff   : > { %v2586_v38 = vsel %vm15263_vm2, %v2581_v43, %v2585_v59  ;;  %v2617_v54 = vrot.slane %v2615_v19, 5  ;;  %v2595_v46 = vrot.slane %v2594_v62, 4 }
 0x200   : > { %v17523_v34 = vcombine.low %v2576_v23, %v2586_v38  ;;  %v15014_v23 = vld [vmem:[%s15226_s30 + $0x90] sm:$0xff]  }
 0x202   : > { %7389 = vmatmul.mubr.bf16.gmra.mrb[24].mxu0 %v15010_v63  ;;  %8354 = vmatmul.mubr.bf16.gmra.mrb[24].mxu1 %v15010_v63  ;;  %v2562_v63 = vsel %vm15263_vm2, %v2557_v60, %v2561_v37  ;;  %v12722_v60 = vld [vmem:[%s15226_s30 + $0xa4] sm:$0x1]  ;;  %v2612_v37 = vshrl.u32 %v12723_v56, 16  ;;  %20446 = vst [vmem:[#allocation60_spill] sm:$0xff] %v17523_v34  ;;  %v12727_v56 = vld [vmem:[%s15226_s30 + $0xb8] sm:$0xf] }
 0x203   : > { %7398 = vmatprep.mubr.bf16.mxu0 %v17486_v30  ;;  %8363 = vmatprep.mubr.bf16.mxu1 %v17486_v30  ;;  %v17512_v17 = vcombine.low %v2552_v25, %v2562_v63  ;;  %v2607_v63 = vshll.u32 %v12722_v60, 16  ;;  %v2645_v55 = vshll.u32 %v12727_v56, 16 }
 0x204   : > { %v2614_v24 = vrot.slane %v2612_v37, 4 }
 0x205   : > { %20445 = vst [vmem:[#allocation59_spill] sm:$0xff] %v17512_v17  ;;  %v2609_v11 = vrot.slane %v2607_v63, 5 }
 0x20a   : > { %7399 = vmatmul.mubr.bf16.gmra.mrb[28].mxu0 %v15011_v27  ;;  %8364 = vmatmul.mubr.bf16.gmra.mrb[28].mxu1 %v15011_v27  ;;  %v2599_v27 = vrot.slane %v2597_v51, 5  ;;  %v12725_v51 = vld [vmem:[%s15226_s30 + $0xb0] sm:$0x1] }
 0x20b   : > { %7408 = vmatprep.mubr.bf16.mxu0 %v17498_v49  ;;  %8373 = vmatprep.mubr.bf16.mxu1 %v17498_v49  ;;  %v2628_v49 = vor.u32 %v2627_v5, %v2623_v29  ;;  %v2631_v43 = vshll.u32 %v12725_v51, 16  ;;  %v12729_v5 = vld [vmem:[%s15226_s30 + $0xc0] sm:$0xf] }
 0x20c   : > { %v2604_v25 = vor.u32 %v2603_v9, %v2599_v27  ;;  %v2649_v9 = vshrl.u32 %v12727_v56, 16  ;;  %v2600_v60 = vsel %vm15263_vm2, %v2595_v46, %v2599_v27  ;;  %v2660_v56 = vshrl.u32 %v12729_v5, 16 }
 0x20d   : > { %v2629_v33 = vrot.slane %v2628_v49, 4  ;;  %v2633_v45 = vrot.slane %v2631_v43, 5  ;;  %v2663_v46 = vshll.u32 %v12729_v5, 16 }
 0x20e   : > { %v2605_v44 = vrot.slane %v2604_v25, 4  ;;  %v2647_v25 = vrot.slane %v2645_v55, 5  ;;  %v2651_v63 = vrot.slane %v2649_v9, 4  ;;  %v2662_v9 = vrot.slane %v2660_v56, 4 }
 0x210   : > { %v2610_v37 = vsel %vm15263_vm2, %v2605_v44, %v2609_v11  ;;  %v2652_v51 = vor.u32 %v2651_v63, %v2647_v25 }
 0x212   : > { %7409 = vmatmul.mubr.bf16.gmra.mrb[32].mxu0 %v15012_v42  ;;  %8374 = vmatmul.mubr.bf16.gmra.mrb[32].mxu1 %v15012_v42  ;;  %v12726_v42 = vld [vmem:[%s15226_s30 + $0xb4] sm:$0xf] }
 0x213   : > { %7418 = vmatprep.mubr.bf16.mxu0 %v17512_v17  ;;  %8383 = vmatprep.mubr.bf16.mxu1 %v17512_v17  ;;  %v2618_v17 = vor.u32 %v2617_v54, %v2614_v24  ;;  %v2636_v59 = vshrl.u32 %v12726_v42, 16  ;;  %v2639_v48 = vshll.u32 %v12726_v42, 16  ;;  %v17534_v24 = vcombine.low %v2600_v60, %v2610_v37  ;;  %v12728_v54 = vld [vmem:[%s15226_s30 + $0xbc] sm:$0x1] }
 0x214   : > { %v2655_v42 = vshll.u32 %v12728_v54, 16  ;;  %v2665_v60 = vrot.slane %v2663_v46, 5 }
 0x215   : > { %v2619_v19 = vrot.slane %v2618_v17, 4  ;;  %v2638_v38 = vrot.slane %v2636_v59, 4  ;;  %v2641_v62 = vrot.slane %v2639_v48, 5  ;;  %20447 = vst [vmem:[#allocation61_spill] sm:$0xff] %v17534_v24  ;;  %v2634_v17 = vsel %vm15263_vm2, %v2629_v33, %v2633_v45  ;;  %v12731_v33 = vld [vmem:[%s15226_s30 + $0xc8] sm:$0x1] }
 0x216   : > { %v2653_v48 = vrot.slane %v2652_v51, 4  ;;  %v2657_v55 = vrot.slane %v2655_v42, 5  ;;  %v12732_v45 = vld [vmem:[%s15226_s30 + $0xcc] sm:$0xf]  ;;  %v2666_v63 = vor.u32 %v2665_v60, %v2662_v9  ;;  %v2679_v5 = vshll.u32 %v12731_v33, 16 }
 0x217   : > { %v2624_v27 = vsel %vm15263_vm2, %v2619_v19, %v2623_v29  ;;  %v2642_v49 = vor.u32 %v2641_v62, %v2638_v38  ;;  %v15015_v29 = vld [vmem:[%s15226_s30 + $0x9c] sm:$0xff]   ;;  %v15016_v51 = vld [vmem:[%s15226_s30 + $0xa8] sm:$0xff]  }
 0x218   : > { %v17546_v43 = vcombine.low %v2624_v27, %v2634_v17  ;;  %v2658_v62 = vsel %vm15263_vm2, %v2653_v48, %v2657_v55  ;;  %v2687_v27 = vshll.u32 %v12732_v45, 16  ;;  %v2681_v46 = vrot.slane %v2679_v5, 5  ;;  %v12734_v48 = vld [vmem:[%s15226_s30 + $0xd4] sm:$0x1]  ;;  %v15018_v5 = vld [vmem:[%s15226_s30 + $0xc0] sm:$0xff]  }
 0x219   : > { %v2643_v59 = vrot.slane %v2642_v49, 4  ;;  %v2703_v33 = vshll.u32 %v12734_v48, 16  ;;  %v12754_v48 = vld [vmem:[%s15226_s30 + $0x24] sm:$0xe] }
 0x21a   : > { %7419 = vmatmul.mubr.bf16.gmra.mrb[36].mxu0 %v15013_v14  ;;  %8384 = vmatmul.mubr.bf16.gmra.mrb[36].mxu1 %v15013_v14  ;;  %v12730_v14 = vld [vmem:[%s15226_s30 + $0xc4] sm:$0xf]  ;;  %20448 = vst [vmem:[#allocation62_spill] sm:$0xff] %v17546_v43 }
 0x21b   : > { %7428 = vmatprep.mubr.bf16.mxu0 %v17523_v34  ;;  %8393 = vmatprep.mubr.bf16.mxu1 %v17523_v34  ;;  %v2669_v44 = vshll.u32 %v12730_v14, 16  ;;  %v2673_v11 = vshrl.u32 %v12730_v14, 16  ;;  %v2648_v38 = vsel %vm15263_vm2, %v2643_v59, %v2647_v25  ;;  %v2684_v14 = vshrl.u32 %v12732_v45, 16  ;;  %v15017_v45 = vld [vmem:[%s15226_s30 + $0xb4] sm:$0xff]  }
 0x21c   : > { %v17558_v42 = vcombine.low %v2648_v38, %v2658_v62  ;;  %v2667_v25 = vrot.slane %v2666_v63, 4  ;;  %v2705_v63 = vrot.slane %v2703_v33, 5  ;;  %v3229_v33 = vld [vmem:[%s20204_s1 + $0x50] sm:$0xff] }
 0x21d   : > { %v2671_v37 = vrot.slane %v2669_v44, 5  ;;  %v2675_v19 = vrot.slane %v2673_v11, 4  ;;  %v2686_v44 = vrot.slane %v2684_v14, 4  ;;  %v2689_v11 = vrot.slane %v2687_v27, 5  ;;  %v12752_v27 = vld [vmem:[%s15226_s30 + $0x1c] sm:$0xf] }
 0x21e   : > { %20449 = vst [vmem:[#allocation63_spill] sm:$0xff] %v17558_v42 }
 0x21f   : > { %v2676_v54 = vor.u32 %v2675_v19, %v2671_v37  ;;  %v2672_v55 = vsel %vm15263_vm2, %v2667_v25, %v2671_v37  ;;  %v2690_v60 = vor.u32 %v2689_v11, %v2686_v44  ;;  %v15019_v25 = vld [vmem:[%s15226_s30 + $0xcc] sm:$0xff]   ;;  %v12755_v44 = vld [vmem:[%s15226_s30 + $0x28] sm:$0xf]  ;;  %v20302_v11 = vmov 0  }
 0x221   : > { %v2677_v56 = vrot.slane %v2676_v54, 4  ;;  %v2691_v38 = vrot.slane %v2690_v60, 4 }
 0x222   : > { %7429 = vmatmul.mubr.bf16.gmra.mrb[40].mxu0 %v15014_v23  ;;  %8394 = vmatmul.mubr.bf16.gmra.mrb[40].mxu1 %v15014_v23  ;;  %v12733_v23 = vld [vmem:[%s15226_s30 + $0xd0] sm:$0xf] }
 0x223   : > { %7438 = vmatprep.mubr.bf16.mxu0 %v17534_v24  ;;  %8403 = vmatprep.mubr.bf16.mxu1 %v17534_v24  ;;  %v2693_v17 = vshll.u32 %v12733_v23, 16  ;;  %v2697_v49 = vshrl.u32 %v12733_v23, 16  ;;  %v2682_v9 = vsel %vm15263_vm2, %v2677_v56, %v2681_v46 }
 0x224   : > { %v17568_v23 = vcombine.low %v2672_v55, %v2682_v9  ;;  %v2892_v55 = vrot.slane %v12755_v44, 5  ;;  %v12756_v9 = vld [vmem:[%s15226_s30 + $0x2c] sm:$0x1]  ;;  %v20453_v44 = vcombine.low %v17314_v57, %v17319_v7  ;;  %v20454_v57 = vcombine.low %v17324_v32, %v17337_v40  ;;  %v3245_v32 = vld [vmem:[%s20204_s1 + $0xd0] sm:$0xff] }
 0x225   : > { %v2699_v59 = vrot.slane %v2697_v49, 4  ;;  %v12751_v49 = vld [vmem:[%s15226_s30 + $0x18] sm:$0xe]  ;;  %v3249_v40 = vld [vmem:[%s20204_s1 + $0xf0] sm:$0xff] }
 0x226   : > { %20450 = vst [vmem:[#allocation64_spill] sm:$0xff] %v17568_v23  ;;  %v12799_v56 = vrot.slane %v12751_v49, 9  ;;  %v3238_v49 = vld [vmem:[%s20204_s1 + $0x98] sm:$0xff] }
 0x22a   : > { %7439 = vmatmul.mubr.bf16.gmra.mrb[44].mxu0 %v15015_v29  ;;  %8404 = vmatmul.mubr.bf16.gmra.mrb[44].mxu1 %v15015_v29  ;;  %v2695_v29 = vrot.slane %v2693_v17, 5  ;;  %v2885_v17 = vrot.slane %v12752_v27, 5  ;;  %v3237_v27 = vld [vmem:[%s20204_s1 + $0x90] sm:$0xff] }
 0x22b   : > { %7448 = vmatprep.mubr.bf16.mxu0 %v17546_v43  ;;  %8413 = vmatprep.mubr.bf16.mxu1 %v17546_v43 }
 0x22c   : > { %v2700_v19 = vor.u32 %v2699_v59, %v2695_v29  ;;  %v2696_v37 = vsel %vm15263_vm2, %v2691_v38, %v2695_v29  ;;  %v2887_v15 = vrot.slane %v2885_v17, 4  ;;  %v2886_v29 = vsel %vm15898_vm5, %v12799_v56, %v2885_v17  ;;  %v3241_v17 = vld [vmem:[%s20204_s1 + $0xb0] sm:$0xff]  ;;  %v3242_v56 = vld [vmem:[%s20204_s1 + $0xb8] sm:$0xff] }
 0x22d   : > { %v2894_v38 = vrot.slane %v2892_v55, 4 }
 0x22e   : > { %v2701_v62 = vrot.slane %v2700_v19, 4  ;;  %v12800_v19 = vrot.slane %v12754_v48, 9 }
 0x230   : > { %v2706_v54 = vsel %vm15263_vm2, %v2701_v62, %v2705_v63  ;;  %v2895_v62 = vrot.slane %v12756_v9, 5  ;;  %v3230_v63 = vld [vmem:[%s20204_s1 + $0x58] sm:$0xff] }
 0x231   : > { %v17577_v14 = vcombine.low %v2696_v37, %v2706_v54  ;;  %v3234_v37 = vld [vmem:[%s20204_s1 + $0x78] sm:$0xff]  ;;  %v12758_v54 = vld [vmem:[%s15226_s30 + $0x34] sm:$0xf] }
 0x232   : > { %7449 = vmatmul.mubr.bf16.gmra.mrb[48].mxu0 %v15016_v51  ;;  %8414 = vmatmul.mubr.bf16.gmra.mrb[48].mxu1 %v15016_v51  ;;  %v12753_v51 = vld [vmem:[%s15226_s30 + $0x20] sm:$0x1]  ;;  %v2899_v48 = vrot.slane %v12758_v54, 5  ;;  %v17645_v9 = vld [vmem:[%s20204_s1 + $0x418] sm:$0xff]  ;;  %v12845_v7 = vcombine.low %v3230_v63, %v3234_v37  ;;  %v12854_v54 = vcombine.high %v3238_v49, %v3242_v56 }
 0x233   : > { %7458 = vmatprep.mubr.bf16.mxu0 %v17558_v42  ;;  %8423 = vmatprep.mubr.bf16.mxu1 %v17558_v42  ;;  %20451 = vst [vmem:[#allocation65_spill] sm:$0xff] %v17577_v14  ;;  %v2888_v46 = vrot.slane %v12753_v51, 5  ;;  %v2893_v51 = vsel %vm15898_vm5, %v12800_v19, %v2892_v55  ;;  %v17650_v19 = vld [vmem:[%s20204_s1 + $0x438] sm:$0xff]  ;;  %v3257_v55 = vld [vmem:[%s20204_s1 + $0x130] sm:$0xff] }
 0x235   : > { %v2889_v59 = vsel %vm15898_vm5, %v2887_v15, %v2888_v46  ;;  %v17627_v15 = vld [vmem:[%s20204_s1 + $0x410] sm:$0xff] }
 0x236   : > { %v17594_v60 = vcombine.low %v2886_v29, %v2889_v59  ;;  %v17632_v46 = vld [vmem:[%s20204_s1 + $0x430] sm:$0xff]  ;;  %v2896_v29 = vsel %vm15898_vm5, %v2894_v38, %v2895_v62  ;;  %v12852_v38 = vcombine.high %v3237_v27, %v3241_v17  ;;  %v12853_v62 = vcombine.low %v3238_v49, %v3242_v56  ;;  %v3254_v56 = vld [vmem:[%s20204_s1 + $0x118] sm:$0xff] }
 0x238   : > { %20452 = vst [vmem:[#allocation66_spill] sm:$0xff] %v17594_v60 }
 0x23a   : > { %7459 = vmatmul.mubr.bf16.gmra.mrb[52].mxu0 %v15017_v45  ;;  %8424 = vmatmul.mubr.bf16.gmra.mrb[52].mxu1 %v15017_v45  ;;  %v3233_v45 = vld [vmem:[%s20204_s1 + $0x70] sm:$0xff] }
 0x23b   : > { %7468 = vmatprep.mubr.bf16.mxu0 %v17568_v23  ;;  %8433 = vmatprep.mubr.bf16.mxu1 %v17568_v23  ;;  %v12843_v59 = vcombine.low %v3229_v33, %v3233_v45 }
 0x242   : > { %7469 = vmatmul.mubr.bf16.gmra.mrb[56].mxu0 %v15018_v5  ;;  %8434 = vmatmul.mubr.bf16.gmra.mrb[56].mxu1 %v15018_v5  ;;  %v12844_v5 = vcombine.high %v3229_v33, %v3233_v45  ;;  %v12757_v33 = vld [vmem:[%s15226_s30 + $0x30] sm:$0xe]  ;;  %v12759_v45 = vld [vmem:[%s15226_s30 + $0x38] sm:$0x1] }
 0x243   : > { %7478 = vmatprep.mubr.bf16.mxu0 %v17577_v14  ;;  %8443 = vmatprep.mubr.bf16.mxu1 %v17577_v14 }
 0x24a   : > { %7479 = vmatmul.mubr.bf16.gmra.mrb[60].mxu0 %v15019_v25  ;;  %8444 = vmatmul.mubr.bf16.gmra.mrb[60].mxu1 %v15019_v25  ;;  %v12846_v25 = vcombine.high %v3230_v63, %v3234_v37  ;;  %v12801_v63 = vrot.slane %v12757_v33, 9  ;;  %v2901_v37 = vrot.slane %v2899_v48, 4 }
 0x24b   : > { %7521 = vmatprep.mubr.bf16.mxu0 %v20302_v11  ;;  %8486 = vmatprep.mubr.bf16.mxu1 %v20302_v11 }
 0x252   : > { %7522 = vmatmul.mubr.bf16.vlgmr.msra.gmra.mrb[0].mxu0 %v17594_v60  ;;  %8487 = vmatmul.mubr.bf16.vlgmr.msra.gmra.mrb[0].mxu1 %v17594_v60 }
 0x253   : > { %8648 = vmatpush1.bf16.msra.mxu0 %v20453_v44  ;;  %9613 = vmatpush1.bf16.msra.mxu1 %v20454_v57  ;;  %v17661_v44 = vcombine.low %v2893_v51, %v2896_v29  ;;  %v2902_v57 = vrot.slane %v12759_v45, 5  ;;  %v3250_v51 = vld [vmem:[%s20204_s1 + $0xf8] sm:$0xff]  ;;  %v12761_v29 = vld [vmem:[%s15226_s30 + $0x40] sm:$0xf]  ;;  %v3253_v45 = vld [vmem:[%s20204_s1 + $0x110] sm:$0xff] }
 0x254   : > { %7531 = vmatprep.mubr.bf16.mxu0 %v20302_v11  ;;  %8496 = vmatprep.mubr.bf16.mxu1 %v20302_v11  ;;  %v2906_v49 = vrot.slane %v12761_v29, 5  ;;  %v3261_v29 = vld [vmem:[%s20204_s1 + $0x150] sm:$0xff] }
 0x255   : > { %8649 = vmatprep.subr.bf16.mxu0 %v12844_v5  ;;  %20455 = vst [vmem:[#allocation67_spill] sm:$0xff] %v17661_v44  ;;  %9614 = vmatprep.subr.bf16.mxu1 %v12846_v25  ;;  %v3246_v5 = vld [vmem:[%s20204_s1 + $0xd8] sm:$0xff]  ;;  %v12851_v25 = vcombine.low %v3237_v27, %v3241_v17  ;;  %v2900_v27 = vsel %vm15898_vm5, %v12801_v63, %v2899_v48 }
 0x256   : > { %v12862_v33 = vcombine.high %v3246_v5, %v3250_v51  ;;  %v2903_v17 = vsel %vm15898_vm5, %v2901_v37, %v2902_v57  ;;  %v12861_v48 = vcombine.low %v3246_v5, %v3250_v51  ;;  %v12868_v63 = vcombine.high %v3253_v45, %v3257_v55  ;;  %v12764_v5 = vld [vmem:[%s15226_s30 + $0x4c] sm:$0xf] }
 0x257   : > { %8650 = vmatpush1.bf16.msra.mxu0 %v12843_v59  ;;  %9615 = vmatpush1.bf16.msra.mxu1 %v12845_v7  ;;  %v12860_v59 = vcombine.high %v3245_v32, %v3249_v40  ;;  %v3258_v7 = vld [vmem:[%s20204_s1 + $0x138] sm:$0xff]  ;;  %v17698_v37 = vcombine.low %v2900_v27, %v2903_v17  ;;  %v2908_v60 = vrot.slane %v2906_v49, 4  ;;  %v12867_v51 = vcombine.low %v3253_v45, %v3257_v55  ;;  %v3269_v17 = vld [vmem:[%s20204_s1 + $0x190] sm:$0xff] }
 0x258   : > { %8651 = vmatprep.subr.bf16.mxu0 %v12852_v38  ;;  %9616 = vmatprep.subr.bf16.mxu1 %v12854_v54  ;;  %v12760_v38 = vld [vmem:[%s15226_s30 + $0x3c] sm:$0xe]  ;;  %v12762_v54 = vld [vmem:[%s15226_s30 + $0x44] sm:$0x1]  ;;  %v12870_v57 = vcombine.high %v3254_v56, %v3258_v7  ;;  %v20457_v55 = vmov 0  }
 0x259   : > { %20456 = vst [vmem:[#allocation68_spill] sm:$0xff] %v17698_v37 }
 0x25a   : > { %7532 = vmatmul.mubr.bf16.gmra.mrb[4].mxu0 %v17661_v44  ;;  %8497 = vmatmul.mubr.bf16.gmra.mrb[4].mxu1 %v17661_v44  ;;  %v12859_v44 = vcombine.low %v3245_v32, %v3249_v40  ;;  %v2909_v32 = vrot.slane %v12762_v54, 5  ;;  %v3266_v40 = vld [vmem:[%s20204_s1 + $0x178] sm:$0xff] }
 0x25b   : > { %7541 = vmatprep.mubr.bf16.mxu0 %v20302_v11  ;;  %8506 = vmatprep.mubr.bf16.mxu1 %v20302_v11  ;;  %v12802_v11 = vrot.slane %v12760_v38, 9  ;;  %v3270_v38 = vld [vmem:[%s20204_s1 + $0x198] sm:$0xff] }
 0x25c   : > { %8652 = vmatpush1.bf16.msra.mxu0 %v12851_v25  ;;  %9617 = vmatpush1.bf16.msra.mxu1 %v12853_v62  ;;  %v3265_v25 = vld [vmem:[%s20204_s1 + $0x170] sm:$0xff]  ;;  %v3262_v62 = vld [vmem:[%s20204_s1 + $0x158] sm:$0xff] }
 0x25d   : > { %8653 = vmatprep.subr.bf16.mxu0 %v12860_v59  ;;  %9618 = vmatprep.subr.bf16.mxu1 %v12862_v33  ;;  %v12869_v59 = vcombine.low %v3254_v56, %v3258_v7  ;;  %v12876_v33 = vcombine.high %v3261_v29, %v3265_v25  ;;  %v12878_v27 = vcombine.high %v3262_v62, %v3266_v40  ;;  %v2913_v7 = vrot.slane %v12764_v5, 5  ;;  %v3274_v54 = vld [vmem:[%s20204_s1 + $0x1b8] sm:$0xff]  ;;  %v3277_v5 = vld [vmem:[%s20204_s1 + $0x1d0] sm:$0xff] }
 0x25e   : > { %v2907_v45 = vsel %vm15898_vm5, %v12802_v11, %v2906_v49  ;;  %v2910_v56 = vsel %vm15898_vm5, %v2908_v60, %v2909_v32  ;;  %v12877_v11 = vcombine.low %v3262_v62, %v3266_v40  ;;  %v12886_v32 = vcombine.high %v3270_v38, %v3274_v54  ;;  %v12767_v62 = vld [vmem:[%s15226_s30 + $0x58] sm:$0xf] }
 0x25f   : > { %v17735_v49 = vcombine.low %v2907_v45, %v2910_v56  ;;  %v3285_v45 = vld [vmem:[%s20204_s1 + $0x210] sm:$0xff] }
 0x260   : > { %8654 = vmatpush1.bf16.msra.mxu0 %v12859_v44  ;;  %9619 = vmatpush1.bf16.msra.mxu1 %v12861_v48  ;;  %v3273_v44 = vld [vmem:[%s20204_s1 + $0x1b0] sm:$0xff]  ;;  %v12763_v48 = vld [vmem:[%s15226_s30 + $0x48] sm:$0xe] }
 0x261   : > { %8655 = vmatprep.subr.bf16.mxu0 %v12868_v63  ;;  %9620 = vmatprep.subr.bf16.mxu1 %v12870_v57  ;;  %v12765_v63 = vld [vmem:[%s15226_s30 + $0x50] sm:$0x1]  ;;  %v12875_v57 = vcombine.low %v3261_v29, %v3265_v25  ;;  %v12884_v60 = vcombine.high %v3269_v17, %v3273_v44  ;;  %20458 = vst [vmem:[#allocation69_spill] sm:$0xff] %v17735_v49  ;;  %v12803_v14 = vrot.slane %v12763_v48, 9  ;;  %v3278_v29 = vld [vmem:[%s20204_s1 + $0x1d8] sm:$0xff] }
 0x262   : > { %7542 = vmatmul.mubr.bf16.gmra.mrb[8].mxu0 %v17698_v37  ;;  %8507 = vmatmul.mubr.bf16.gmra.mrb[8].mxu1 %v17698_v37  ;;  %v3281_v37 = vld [vmem:[%s20204_s1 + $0x1f0] sm:$0xff]  ;;  %v2916_v23 = vrot.slane %v12765_v63, 5  ;;  %v3282_v25 = vld [vmem:[%s20204_s1 + $0x1f8] sm:$0xff]  ;;  %v12883_v40 = vcombine.low %v3269_v17, %v3273_v44 }
 0x263   : > { %7551 = vmatprep.mubr.bf16.mxu0 %v20457_v55  ;;  %8516 = vmatprep.mubr.bf16.mxu1 %v20457_v55  ;;  %v3289_v56 = vld [vmem:[%s20204_s1 + $0x230] sm:$0xff]  ;;  %v2914_v17 = vsel %vm15898_vm5, %v12803_v14, %v2913_v7  ;;  %v3290_v48 = vld [vmem:[%s20204_s1 + $0x238] sm:$0xff]  ;;  %v12893_v14 = vcombine.low %v3278_v29, %v3282_v25 }
 0x264   : > { %8656 = vmatpush1.bf16.msra.mxu0 %v12867_v51  ;;  %9621 = vmatpush1.bf16.msra.mxu1 %v12869_v59  ;;  %v2915_v51 = vrot.slane %v2913_v7, 4  ;;  %v12885_v59 = vcombine.low %v3270_v38, %v3274_v54  ;;  %v2920_v38 = vrot.slane %v12767_v62, 5  ;;  %v3286_v54 = vld [vmem:[%s20204_s1 + $0x218] sm:$0xff]  ;;  %v12766_v63 = vld [vmem:[%s15226_s30 + $0x54] sm:$0xe] }
 0x265   : > { %8657 = vmatprep.subr.bf16.mxu0 %v12876_v33  ;;  %9622 = vmatprep.subr.bf16.mxu1 %v12878_v27  ;;  %v12892_v33 = vcombine.high %v3277_v5, %v3281_v37  ;;  %v12894_v27 = vcombine.high %v3278_v29, %v3282_v25  ;;  %v12804_v62 = vrot.slane %v12766_v63, 9  ;;  %v12770_v29 = vld [vmem:[%s15226_s30 + $0x64] sm:$0xf]  ;;  %v12899_v25 = vcombine.low %v3285_v45, %v3289_v56  ;;  %v3306_v63 = vld [vmem:[%s20204_s1 + $0x2b8] sm:$0xff] }
 0x266   : > { %v2917_v44 = vsel %vm15898_vm5, %v2915_v51, %v2916_v23  ;;  %v12900_v23 = vcombine.high %v3285_v45, %v3289_v56  ;;  %v3297_v51 = vld [vmem:[%s20204_s1 + $0x270] sm:$0xff] }
 0x267   : > { %v17772_v7 = vcombine.low %v2914_v17, %v2917_v44  ;;  %v3301_v17 = vld [vmem:[%s20204_s1 + $0x290] sm:$0xff]  ;;  %v2921_v45 = vsel %vm15898_vm5, %v12804_v62, %v2920_v38 }
 0x268   : > { %8658 = vmatpush1.bf16.msra.mxu0 %v12875_v57  ;;  %9623 = vmatpush1.bf16.msra.mxu1 %v12877_v11  ;;  %v12768_v57 = vld [vmem:[%s15226_s30 + $0x5c] sm:$0x1]  ;;  %v12891_v11 = vcombine.low %v3277_v5, %v3281_v37  ;;  %v3305_v44 = vld [vmem:[%s20204_s1 + $0x2b0] sm:$0xff] }
 0x269   : > { %8659 = vmatprep.subr.bf16.mxu0 %v12884_v60  ;;  %9624 = vmatprep.subr.bf16.mxu1 %v12886_v32  ;;  %20459 = vst [vmem:[#allocation70_spill] sm:$0xff] %v17772_v7  ;;  %v12902_v60 = vcombine.high %v3286_v54, %v3290_v48  ;;  %v3293_v32 = vld [vmem:[%s20204_s1 + $0x250] sm:$0xff]  ;;  %v3294_v37 = vld [vmem:[%s20204_s1 + $0x258] sm:$0xff] }
 0x26a   : > { %7552 = vmatmul.mubr.bf16.gmra.mrb[12].mxu0 %v17735_v49  ;;  %8517 = vmatmul.mubr.bf16.gmra.mrb[12].mxu1 %v17735_v49  ;;  %v2923_v49 = vrot.slane %v12768_v57, 5  ;;  %v3298_v5 = vld [vmem:[%s20204_s1 + $0x278] sm:$0xff]  ;;  %v12769_v57 = vld [vmem:[%s15226_s30 + $0x60] sm:$0xe]  ;;  %v3309_v62 = vld [vmem:[%s20204_s1 + $0x2d0] sm:$0xff] }
 0x26b   : > { %7561 = vmatprep.mubr.bf16.mxu0 %v20457_v55  ;;  %8526 = vmatprep.mubr.bf16.mxu1 %v20457_v55 }
 0x26c   : > { %8660 = vmatpush1.bf16.msra.mxu0 %v12883_v40  ;;  %9625 = vmatpush1.bf16.msra.mxu1 %v12885_v59  ;;  %v2922_v40 = vrot.slane %v2920_v38, 4  ;;  %v12901_v59 = vcombine.low %v3286_v54, %v3290_v48  ;;  %v2927_v54 = vrot.slane %v12770_v29, 5  ;;  %v3302_v48 = vld [vmem:[%s20204_s1 + $0x298] sm:$0xff]  ;;  %v12909_v38 = vcombine.low %v3294_v37, %v3298_v5 }
 0x26d   : > { %8661 = vmatprep.subr.bf16.mxu0 %v12892_v33  ;;  %9626 = vmatprep.subr.bf16.mxu1 %v12894_v27  ;;  %v12908_v33 = vcombine.high %v3293_v32, %v3297_v51  ;;  %v12910_v27 = vcombine.high %v3294_v37, %v3298_v5  ;;  %v12805_v29 = vrot.slane %v12769_v57, 9  ;;  %v12773_v37 = vld [vmem:[%s15226_s30 + $0x70] sm:$0xf]  ;;  %v12915_v5 = vcombine.low %v3301_v17, %v3305_v44  ;;  %v3322_v57 = vld [vmem:[%s20204_s1 + $0x338] sm:$0xff] }
 0x26e   : > { %v2924_v56 = vsel %vm15898_vm5, %v2922_v40, %v2923_v49  ;;  %v12916_v49 = vcombine.high %v3301_v17, %v3305_v44  ;;  %v3313_v40 = vld [vmem:[%s20204_s1 + $0x2f0] sm:$0xff] }
 0x26f   : > { %v2928_v17 = vsel %vm15898_vm5, %v12805_v29, %v2927_v54  ;;  %v3325_v29 = vld [vmem:[%s20204_s1 + $0x350] sm:$0xff] }
 0x270   : > { %8662 = vmatpush1.bf16.msra.mxu0 %v12891_v11  ;;  %9627 = vmatpush1.bf16.msra.mxu1 %v12893_v14  ;;  %v12771_v11 = vld [vmem:[%s15226_s30 + $0x68] sm:$0x1]  ;;  %v12907_v14 = vcombine.low %v3293_v32, %v3297_v51  ;;  %v3310_v32 = vld [vmem:[%s20204_s1 + $0x2d8] sm:$0xff] }
 0x271   : > { %8663 = vmatprep.subr.bf16.mxu0 %v12900_v23  ;;  %9628 = vmatprep.subr.bf16.mxu1 %v12902_v60  ;;  %v17809_v23 = vcombine.low %v2921_v45, %v2924_v56  ;;  %v12918_v60 = vcombine.high %v3302_v48, %v3306_v63  ;;  %v3314_v51 = vld [vmem:[%s20204_s1 + $0x2f8] sm:$0xff]  ;;  %v3317_v45 = vld [vmem:[%s20204_s1 + $0x310] sm:$0xff] }
 0x272   : > { %7562 = vmatmul.mubr.bf16.gmra.mrb[16].mxu0 %v17772_v7  ;;  %8527 = vmatmul.mubr.bf16.gmra.mrb[16].mxu1 %v17772_v7  ;;  %v2930_v7 = vrot.slane %v12771_v11, 5  ;;  %v3321_v56 = vld [vmem:[%s20204_s1 + $0x330] sm:$0xff]  ;;  %v12772_v11 = vld [vmem:[%s15226_s30 + $0x6c] sm:$0xe] }
 0x273   : > { %7571 = vmatprep.mubr.bf16.mxu0 %v20457_v55  ;;  %8536 = vmatprep.mubr.bf16.mxu1 %v20457_v55  ;;  %20460 = vst [vmem:[#allocation71_spill] sm:$0xff] %v17809_v23 }
 0x274   : > { %8664 = vmatpush1.bf16.msra.mxu0 %v12899_v25  ;;  %9629 = vmatpush1.bf16.msra.mxu1 %v12901_v59  ;;  %v2929_v25 = vrot.slane %v2927_v54, 4  ;;  %v12917_v59 = vcombine.low %v3302_v48, %v3306_v63  ;;  %v2934_v48 = vrot.slane %v12773_v37, 5  ;;  %v3318_v63 = vld [vmem:[%s20204_s1 + $0x318] sm:$0xff]  ;;  %v12925_v54 = vcombine.low %v3310_v32, %v3314_v51 }
 0x275   : > { %8665 = vmatprep.subr.bf16.mxu0 %v12908_v33  ;;  %9630 = vmatprep.subr.bf16.mxu1 %v12910_v27  ;;  %v12924_v33 = vcombine.high %v3309_v62, %v3313_v40  ;;  %v12926_v27 = vcombine.high %v3310_v32, %v3314_v51  ;;  %v12806_v37 = vrot.slane %v12772_v11, 9  ;;  %v12776_v32 = vld [vmem:[%s15226_s30 + $0x7c] sm:$0xf]  ;;  %v12931_v51 = vcombine.low %v3317_v45, %v3321_v56 }
 0x276   : > { %v2931_v44 = vsel %vm15898_vm5, %v2929_v25, %v2930_v7  ;;  %v12932_v7 = vcombine.high %v3317_v45, %v3321_v56  ;;  %v3329_v25 = vld [vmem:[%s20204_s1 + $0x370] sm:$0xff]  ;;  %v3338_v11 = vld [vmem:[%s20204_s1 + $0x3b8] sm:$0xff] }
 0x277   : > { %v2935_v45 = vsel %vm15898_vm5, %v12806_v37, %v2934_v48  ;;  %v3341_v37 = vld [vmem:[%s20204_s1 + $0x3d0] sm:$0xff] }
 0x278   : > { %8666 = vmatpush1.bf16.msra.mxu0 %v12907_v14  ;;  %9631 = vmatpush1.bf16.msra.mxu1 %v12909_v38  ;;  %v12774_v14 = vld [vmem:[%s15226_s30 + $0x74] sm:$0x1]  ;;  %v12923_v38 = vcombine.low %v3309_v62, %v3313_v40  ;;  %v3326_v62 = vld [vmem:[%s20204_s1 + $0x358] sm:$0xff] }
 0x279   : > { %8667 = vmatprep.subr.bf16.mxu0 %v12916_v49  ;;  %9632 = vmatprep.subr.bf16.mxu1 %v12918_v60  ;;  %v17846_v49 = vcombine.low %v2928_v17, %v2931_v44  ;;  %v12934_v60 = vcombine.high %v3318_v63, %v3322_v57  ;;  %v3330_v40 = vld [vmem:[%s20204_s1 + $0x378] sm:$0xff]  ;;  %v3333_v17 = vld [vmem:[%s20204_s1 + $0x390] sm:$0xff] }
 0x27a   : > { %7572 = vmatmul.mubr.bf16.gmra.mrb[20].mxu0 %v17809_v23  ;;  %8537 = vmatmul.mubr.bf16.gmra.mrb[20].mxu1 %v17809_v23  ;;  %v2937_v23 = vrot.slane %v12774_v14, 5  ;;  %v3337_v44 = vld [vmem:[%s20204_s1 + $0x3b0] sm:$0xff]  ;;  %v12775_v14 = vld [vmem:[%s15226_s30 + $0x78] sm:$0xe] }
 0x27b   : > { %7581 = vmatprep.mubr.bf16.mxu0 %v20457_v55  ;;  %8546 = vmatprep.mubr.bf16.mxu1 %v20457_v55  ;;  %20461 = vst [vmem:[#allocation72_spill] sm:$0xff] %v17846_v49 }
 0x27c   : > { %8668 = vmatpush1.bf16.msra.mxu0 %v12915_v5  ;;  %9633 = vmatpush1.bf16.msra.mxu1 %v12917_v59  ;;  %v2936_v5 = vrot.slane %v2934_v48, 4  ;;  %v12933_v59 = vcombine.low %v3318_v63, %v3322_v57  ;;  %v2941_v63 = vrot.slane %v12776_v32, 5  ;;  %v3334_v57 = vld [vmem:[%s20204_s1 + $0x398] sm:$0xff]  ;;  %v12941_v48 = vcombine.low %v3326_v62, %v3330_v40 }
 0x27d   : > { %8669 = vmatprep.subr.bf16.mxu0 %v12924_v33  ;;  %9634 = vmatprep.subr.bf16.mxu1 %v12926_v27  ;;  %v12940_v33 = vcombine.high %v3325_v29, %v3329_v25  ;;  %v12942_v27 = vcombine.high %v3326_v62, %v3330_v40  ;;  %v12807_v32 = vrot.slane %v12775_v14, 9  ;;  %v12779_v62 = vld [vmem:[%s15226_s30 + $0x88] sm:$0xf]  ;;  %v12947_v40 = vcombine.low %v3333_v17, %v3337_v44 }
 0x27e   : > { %v2938_v56 = vsel %vm15898_vm5, %v2936_v5, %v2937_v23  ;;  %v12948_v23 = vcombine.high %v3333_v17, %v3337_v44  ;;  %v3345_v5 = vld [vmem:[%s20204_s1 + $0x3f0] sm:$0xff]  ;;  %v2948_v14 = vrot.slane %v12779_v62, 5  ;;  %v12778_v17 = vld [vmem:[%s15226_s30 + $0x84] sm:$0xe]  ;;  %v12780_v44 = vld [vmem:[%s15226_s30 + $0x8c] sm:$0x1] }
 0x280   : > { %8670 = vmatpush1.bf16.msra.mxu0 %v12923_v38  ;;  %9635 = vmatpush1.bf16.msra.mxu1 %v12925_v54  ;;  %v12777_v38 = vld [vmem:[%s15226_s30 + $0x80] sm:$0x1]  ;;  %v12939_v54 = vcombine.low %v3325_v29, %v3329_v25  ;;  %v3342_v29 = vld [vmem:[%s20204_s1 + $0x3d8] sm:$0xff] }
 0x281   : > { %8671 = vmatprep.subr.bf16.mxu0 %v12932_v7  ;;  %9636 = vmatprep.subr.bf16.mxu1 %v12934_v60  ;;  %v17883_v7 = vcombine.low %v2935_v45, %v2938_v56  ;;  %v12950_v60 = vcombine.high %v3334_v57, %v3338_v11  ;;  %v3346_v25 = vld [vmem:[%s20204_s1 + $0x3f8] sm:$0xff]  ;;  %v2942_v45 = vsel %vm15898_vm5, %v12807_v32, %v2941_v63 }
 0x282   : > { %7582 = vmatmul.mubr.bf16.gmra.mrb[24].mxu0 %v17846_v49  ;;  %8547 = vmatmul.mubr.bf16.gmra.mrb[24].mxu1 %v17846_v49  ;;  %v2944_v49 = vrot.slane %v12777_v38, 5  ;;  %v12964_v38 = vcombine.high %v17627_v15, %v17632_v46 }
 0x283   : > { %7591 = vmatprep.mubr.bf16.mxu0 %v20457_v55  ;;  %8556 = vmatprep.mubr.bf16.mxu1 %v20457_v55  ;;  %20462 = vst [vmem:[#allocation73_spill] sm:$0xff] %v17883_v7 }
 0x284   : > { %8672 = vmatpush1.bf16.msra.mxu0 %v12931_v51  ;;  %9637 = vmatpush1.bf16.msra.mxu1 %v12933_v59  ;;  %v2943_v51 = vrot.slane %v2941_v63, 4  ;;  %v12949_v59 = vcombine.low %v3334_v57, %v3338_v11  ;;  %v12955_v57 = vcombine.low %v3341_v37, %v3345_v5  ;;  %v12957_v11 = vcombine.low %v3342_v29, %v3346_v25 }
 0x285   : > { %8673 = vmatprep.subr.bf16.mxu0 %v12940_v33  ;;  %9638 = vmatprep.subr.bf16.mxu1 %v12942_v27  ;;  %v12956_v33 = vcombine.high %v3341_v37, %v3345_v5  ;;  %v12958_v27 = vcombine.high %v3342_v29, %v3346_v25  ;;  %v12808_v63 = vrot.slane %v12778_v17, 9  ;;  %v12783_v29 = vld [vmem:[%s15226_s30 + $0x98] sm:$0x1]  ;;  %v12786_v17 = vld [vmem:[%s15226_s30 + $0xa4] sm:$0x1] }
 0x286   : > { %v2945_v56 = vsel %vm15898_vm5, %v2943_v51, %v2944_v49  ;;  %v12966_v49 = vcombine.high %v17645_v9, %v17650_v19  ;;  %v12781_v51 = vld [vmem:[%s15226_s30 + $0x90] sm:$0xe] }
 0x287   : > { %v2949_v37 = vsel %vm15898_vm5, %v12808_v63, %v2948_v14  ;;  %v12809_v62 = vrot.slane %v12781_v51, 9 }
 0x288   : > { %8674 = vmatpush1.bf16.msra.mxu0 %v12939_v54  ;;  %9639 = vmatpush1.bf16.msra.mxu1 %v12941_v48  ;;  %v17910_v54 = vcombine.low %v2942_v45, %v2945_v56  ;;  %v2950_v48 = vrot.slane %v2948_v14, 4  ;;  %v12784_v14 = vld [vmem:[%s15226_s30 + $0x9c] sm:$0xe] }
 0x289   : > { %8675 = vmatprep.subr.bf16.mxu0 %v12948_v23  ;;  %9640 = vmatprep.subr.bf16.mxu1 %v12950_v60  ;;  %v2951_v23 = vrot.slane %v12780_v44, 5  ;;  %v12782_v60 = vld [vmem:[%s15226_s30 + $0x94] sm:$0xf] }
 0x28a   : > { %7592 = vmatmul.mubr.bf16.gmra.mrb[28].mxu0 %v17883_v7  ;;  %8557 = vmatmul.mubr.bf16.gmra.mrb[28].mxu1 %v17883_v7  ;;  %20463 = vst [vmem:[#allocation74_spill] sm:$0xff] %v17910_v54  ;;  %v2955_v32 = vrot.slane %v12782_v60, 5  ;;  %v12787_v60 = vld [vmem:[%s15226_s30 + $0xa8] sm:$0xe] }
 0x28b   : > { %7601 = vmatprep.mubr.bf16.mxu0 %v20457_v55  ;;  %8566 = vmatprep.mubr.bf16.mxu1 %v20457_v55  ;;  %v2952_v5 = vsel %vm15898_vm5, %v2950_v48, %v2951_v23 }
 0x28c   : > { %8676 = vmatpush1.bf16.msra.mxu0 %v12947_v40  ;;  %9641 = vmatpush1.bf16.msra.mxu1 %v12949_v59  ;;  %v17925_v25 = vcombine.low %v2949_v37, %v2952_v5  ;;  %v2957_v40 = vrot.slane %v2955_v32, 4  ;;  %v2958_v59 = vrot.slane %v12783_v29, 5  ;;  %v12789_v37 = vld [vmem:[%s15226_s30 + $0xb0] sm:$0x1] }
 0x28d   : > { %8677 = vmatprep.subr.bf16.mxu0 %v12956_v33  ;;  %9642 = vmatprep.subr.bf16.mxu1 %v12958_v27  ;;  %v12785_v33 = vld [vmem:[%s15226_s30 + $0xa0] sm:$0xf]  ;;  %v2956_v27 = vsel %vm15898_vm5, %v12809_v62, %v2955_v32  ;;  %v12811_v32 = vrot.slane %v12787_v60, 9  ;;  %v2972_v29 = vrot.slane %v12789_v37, 5  ;;  %v12791_v62 = vld [vmem:[%s15226_s30 + $0xb8] sm:$0xf] }
 0x28e   : > { %20464 = vst [vmem:[#allocation75_spill] sm:$0xff] %v17925_v25  ;;  %v2959_v45 = vsel %vm15898_vm5, %v2957_v40, %v2958_v59  ;;  %v2962_v56 = vrot.slane %v12785_v33, 5  ;;  %v2976_v33 = vrot.slane %v12791_v62, 5 }
 0x28f   : > { %v17938_v44 = vcombine.low %v2956_v27, %v2959_v45  ;;  %v12790_v27 = vld [vmem:[%s15226_s30 + $0xb4] sm:$0xe]  ;;  %v12792_v45 = vld [vmem:[%s15226_s30 + $0xbc] sm:$0x1] }
 0x290   : > { %8678 = vmatpush1.bf16.msra.mxu0 %v12955_v57  ;;  %9643 = vmatpush1.bf16.msra.mxu1 %v12957_v11  ;;  %v12810_v57 = vrot.slane %v12784_v14, 9  ;;  %v2964_v11 = vrot.slane %v2962_v56, 4  ;;  %v12812_v14 = vrot.slane %v12790_v27, 9  ;;  %v12798_v27 = vld [vmem:[%s15226_s30 + $0xd4] sm:$0x1] }
 0x291   : > { %8840 = vmatprep.subr.bf16.mxu0 %v12964_v38  ;;  %9805 = vmatprep.subr.bf16.mxu1 %v12966_v49  ;;  %20465 = vst [vmem:[#allocation76_spill] sm:$0xff] %v17938_v44  ;;  %v2965_v38 = vrot.slane %v12786_v17, 5  ;;  %v12788_v49 = vld [vmem:[%s15226_s30 + $0xac] sm:$0xf]  ;;  %v2978_v17 = vrot.slane %v2976_v33, 4 }
 0x292   : > { %7602 = vmatmul.mubr.bf16.gmra.mrb[32].mxu0 %v17910_v54  ;;  %8567 = vmatmul.mubr.bf16.gmra.mrb[32].mxu1 %v17910_v54  ;;  %v2963_v63 = vsel %vm15898_vm5, %v12810_v57, %v2962_v56  ;;  %v2969_v23 = vrot.slane %v12788_v49, 5  ;;  %v2979_v57 = vrot.slane %v12792_v45, 5  ;;  %v18433_v54 = vld [vmem:[%s20204_s1 + $0x9d0] sm:$0xff] }
 0x293   : > { %7611 = vmatprep.mubr.bf16.mxu0 %v20457_v55  ;;  %8576 = vmatprep.mubr.bf16.mxu1 %v20457_v55  ;;  %v2966_v48 = vsel %vm15898_vm5, %v2964_v11, %v2965_v38  ;;  %v12794_v11 = vld [vmem:[%s15226_s30 + $0xc4] sm:$0xf]  ;;  %v2977_v38 = vsel %vm15898_vm5, %v12812_v14, %v2976_v33  ;;  %v12796_v33 = vld [vmem:[%s15226_s30 + $0xcc] sm:$0xe]  ;;  %20474 = vst [vmem:[#allocation83_spill] sm:$0xff] %v18433_v54 }
 0x294   : > { %v17951_v5 = vcombine.low %v2963_v63, %v2966_v48  ;;  %v2971_v51 = vrot.slane %v2969_v23, 4  ;;  %v2970_v40 = vsel %vm15898_vm5, %v12811_v32, %v2969_v23  ;;  %v2980_v49 = vsel %vm15898_vm5, %v2978_v17, %v2979_v57  ;;  %v12793_v48 = vld [vmem:[%s15226_s30 + $0xc0] sm:$0xe]  ;;  %v12795_v23 = vld [vmem:[%s15226_s30 + $0xc8] sm:$0x1] }
 0x295   : > { %v2983_v63 = vrot.slane %v12794_v11, 5  ;;  %v17977_v60 = vcombine.low %v2977_v38, %v2980_v49  ;;  %v12813_v37 = vrot.slane %v12793_v48, 9  ;;  %v12814_v14 = vrot.slane %v12796_v33, 9  ;;  %v3358_v48 = vld [vmem:[%s20204_s1 + $0x458] sm:$0xff] }
 0x296   : > { %20466 = vst [vmem:[#allocation77_spill] sm:$0xff] %v17951_v5  ;;  %v2973_v59 = vsel %vm15898_vm5, %v2971_v51, %v2972_v29  ;;  %v2986_v51 = vrot.slane %v12795_v23, 5  ;;  %v12797_v29 = vld [vmem:[%s15226_s30 + $0xd0] sm:$0xf]  ;;  %v2993_v57 = vrot.slane %v12798_v27, 5  ;;  %v3362_v23 = vld [vmem:[%s20204_s1 + $0x478] sm:$0xff]  ;;  %v20472_v27 = vcombine.low %v17645_v9, %v17650_v19 }
 0x297   : > { %v17964_v56 = vcombine.low %v2970_v40, %v2973_v59  ;;  %20468 = vst [vmem:[#allocation79_spill] sm:$0xff] %v17977_v60  ;;  %v2985_v32 = vrot.slane %v2983_v63, 4  ;;  %v2984_v62 = vsel %vm15898_vm5, %v12813_v37, %v2983_v63  ;;  %v2990_v59 = vrot.slane %v12797_v29, 5  ;;  %v3357_v63 = vld [vmem:[%s20204_s1 + $0x450] sm:$0xff]  ;;  %v3374_v9 = vld [vmem:[%s20204_s1 + $0x4d8] sm:$0xff] }
 0x298   : > { %v12972_v37 = vcombine.high %v3357_v63, %v3361_v58  ;;  %v12974_v29 = vcombine.high %v3358_v48, %v3362_v23  ;;  %v12971_v33 = vcombine.low %v3357_v63, %v3361_v58  ;;  %v15021_v63 = vld [vmem:[%s15226_s30 + $0xc] sm:$0xff]  }
 0x299   : > { %20467 = vst [vmem:[#allocation78_spill] sm:$0xff] %v17964_v56  ;;  %v2987_v40 = vsel %vm15898_vm5, %v2985_v32, %v2986_v51  ;;  %v2992_v17 = vrot.slane %v2990_v59, 4  ;;  %v2991_v11 = vsel %vm15898_vm5, %v12814_v14, %v2990_v59  ;;  %v3369_v32 = vld [vmem:[%s20204_s1 + $0x4b0] sm:$0xff]  ;;  %v15020_v51 = vld [vmem:[%s15226_s30] sm:$0xff]   ;;  %v20471_v59 = vcombine.low %v17627_v15, %v17632_v46 }
 0x29a   : > { %7612 = vmatmul.mubr.bf16.gmra.mrb[36].mxu0 %v17925_v25  ;;  %8577 = vmatmul.mubr.bf16.gmra.mrb[36].mxu1 %v17925_v25  ;;  %v17990_v45 = vcombine.low %v2984_v62, %v2987_v40  ;;  %v3366_v62 = vld [vmem:[%s20204_s1 + $0x498] sm:$0xff]  ;;  %v12973_v14 = vcombine.low %v3358_v48, %v3362_v23  ;;  %v3373_v15 = vld [vmem:[%s20204_s1 + $0x4d0] sm:$0xff] }
 0x29b   : > { %7621 = vmatprep.mubr.bf16.mxu0 %v20457_v55  ;;  %8586 = vmatprep.mubr.bf16.mxu1 %v20457_v55  ;;  %v2994_v38 = vsel %vm15898_vm5, %v2992_v17, %v2993_v57  ;;  %v3370_v40 = vld [vmem:[%s20204_s1 + $0x4b8] sm:$0xff]  ;;  %v3377_v46 = vld [vmem:[%s20204_s1 + $0x4f0] sm:$0xff] }
 0x29c   : > { %20469 = vst [vmem:[#allocation80_spill] sm:$0xff] %v17990_v45  ;;  %v18000_v49 = vcombine.low %v2991_v11, %v2994_v38  ;;  %v12982_v57 = vcombine.high %v3366_v62, %v3370_v40  ;;  %v12981_v11 = vcombine.low %v3366_v62, %v3370_v40  ;;  %v12988_v38 = vcombine.high %v3373_v15, %v3377_v46  ;;  %v3381_v48 = vld [vmem:[%s20204_s1 + $0x510] sm:$0xff]  ;;  %v18416_v25 = vld [vmem:[%s20204_s1 + $0x998] sm:$0xff] }
 0x29d   : > { %v3385_v23 = vld [vmem:[%s20204_s1 + $0x530] sm:$0xff] }
 0x29e   : > { %20470 = vst [vmem:[#allocation81_spill] sm:$0xff] %v18000_v49  ;;  %v3389_v40 = vld [vmem:[%s20204_s1 + $0x550] sm:$0xff] }
 0x2a2   : > { %7622 = vmatmul.mubr.bf16.gmra.mrb[40].mxu0 %v17938_v44  ;;  %8587 = vmatmul.mubr.bf16.gmra.mrb[40].mxu1 %v17938_v44  ;;  %v18411_v44 = vld [vmem:[%s20204_s1 + $0x9b0] sm:$0xff] }
 0x2a3   : > { %7631 = vmatprep.mubr.bf16.mxu0 %v20457_v55  ;;  %8596 = vmatprep.mubr.bf16.mxu1 %v20457_v55 }
 0x2aa   : > { %7632 = vmatmul.mubr.bf16.gmra.mrb[44].mxu0 %v17951_v5  ;;  %8597 = vmatmul.mubr.bf16.gmra.mrb[44].mxu1 %v17951_v5 }
 0x2ab   : > { %7641 = vmatprep.mubr.bf16.mxu0 %v20457_v55  ;;  %8606 = vmatprep.mubr.bf16.mxu1 %v20457_v55 }
 0x2b2   : > { %7642 = vmatmul.mubr.bf16.gmra.mrb[48].mxu0 %v17964_v56  ;;  %8607 = vmatmul.mubr.bf16.gmra.mrb[48].mxu1 %v17964_v56 }
 0x2b3   : > { %7651 = vmatprep.mubr.bf16.mxu0 %v20457_v55  ;;  %8616 = vmatprep.mubr.bf16.mxu1 %v20457_v55 }
 0x2ba   : > { %7652 = vmatmul.mubr.bf16.gmra.mrb[52].mxu0 %v17977_v60  ;;  %8617 = vmatmul.mubr.bf16.gmra.mrb[52].mxu1 %v17977_v60  ;;  %v18392_v60 = vld [vmem:[%s20204_s1 + $0x978] sm:$0xff] }
 0x2bb   : > { %7661 = vmatprep.mubr.bf16.mxu0 %v20457_v55  ;;  %8626 = vmatprep.mubr.bf16.mxu1 %v20457_v55 }
 0x2c2   : > { %7662 = vmatmul.mubr.bf16.gmra.mrb[56].mxu0 %v17990_v45  ;;  %8627 = vmatmul.mubr.bf16.gmra.mrb[56].mxu1 %v17990_v45  ;;  %v18387_v45 = vld [vmem:[%s20204_s1 + $0x958] sm:$0xff] }
 0x2c3   : > { %7671 = vmatprep.mubr.bf16.mxu0 %v20457_v55  ;;  %8636 = vmatprep.mubr.bf16.mxu1 %v20457_v55  ;;  %v18452_v55 = vld [vmem:[%s20204_s1 + $0x9d8] sm:$0xff] }
 0x2c4   : > { %20476 = vst [vmem:[#allocation85_spill] sm:$0xff] %v18452_v55 }
 0x2ca   : > { %7672 = vmatmul.mubr.bf16.gmra.mrb[60].mxu0 %v18000_v49  ;;  %8637 = vmatmul.mubr.bf16.gmra.mrb[60].mxu1 %v18000_v49 }
 0x2cb   : > { %8679 = vmatprep.mubr.bf16.mxu0 %v15283_v31  ;;  %9644 = vmatprep.mubr.bf16.mxu1 %v15283_v31  ;;  %v3365_v31 = vld [vmem:[%s20204_s1 + $0x490] sm:$0xff] }
 0x2cc   : > { %v12980_v17 = vcombine.high %v3365_v31, %v3369_v32  ;;  %v12979_v19 = vcombine.low %v3365_v31, %v3369_v32  ;;  %v3386_v31 = vld [vmem:[%s20204_s1 + $0x538] sm:$0xff]  ;;  %v12987_v32 = vcombine.low %v3373_v15, %v3377_v46 }
 0x2d2   : > { %8680 = vmatmul.mubr.bf16.vlgmr.msra.gmra.mrb[64].mxu0 %v15020_v51  ;;  %9645 = vmatmul.mubr.bf16.vlgmr.msra.gmra.mrb[64].mxu1 %v15020_v51 }
 0x2d3   : > { %8841 = vmatpush1.bf16.msra.mxu0 %v20471_v59  ;;  %9806 = vmatpush1.bf16.msra.mxu1 %v20472_v27  ;;  %v3393_v59 = vld [vmem:[%s20204_s1 + $0x570] sm:$0xff]  ;;  %v12995_v27 = vcombine.low %v3381_v48, %v3385_v23 }
 0x2d4   : > { %8689 = vmatprep.mubr.bf16.mxu0 %v15420_v22  ;;  %9654 = vmatprep.mubr.bf16.mxu1 %v15420_v22  ;;  %v3378_v22 = vld [vmem:[%s20204_s1 + $0x4f8] sm:$0xff]  ;;  %v13004_v46 = vcombine.high %v3389_v40, %v3393_v59 }
 0x2d5   : > { %8842 = vmatprep.subr.bf16.mxu0 %v12972_v37  ;;  %9807 = vmatprep.subr.bf16.mxu1 %v12974_v29  ;;  %v12990_v58 = vcombine.high %v3374_v9, %v3378_v22  ;;  %v3382_v37 = vld [vmem:[%s20204_s1 + $0x518] sm:$0xff]  ;;  %v12989_v51 = vcombine.low %v3374_v9, %v3378_v22  ;;  %v12996_v29 = vcombine.high %v3381_v48, %v3385_v23 }
 0x2d6   : > { %v12998_v62 = vcombine.high %v3382_v37, %v3386_v31  ;;  %v12997_v15 = vcombine.low %v3382_v37, %v3386_v31  ;;  %v18098_v22 = vld [vmem:[%s20204_s1 + $0x838] sm:$0xff]  ;;  %v13003_v37 = vcombine.low %v3389_v40, %v3393_v59 }
 0x2d7   : > { %8843 = vmatpush1.bf16.msra.mxu0 %v12971_v33  ;;  %9808 = vmatpush1.bf16.msra.mxu1 %v12973_v14  ;;  %v3394_v33 = vld [vmem:[%s20204_s1 + $0x578] sm:$0xff]  ;;  %v18081_v14 = vld [vmem:[%s20204_s1 + $0x810] sm:$0xff] }
 0x2d8   : > { %8844 = vmatprep.subr.bf16.mxu0 %v12980_v17  ;;  %9809 = vmatprep.subr.bf16.mxu1 %v12982_v57  ;;  %v18086_v17 = vld [vmem:[%s20204_s1 + $0x830] sm:$0xff]  ;;  %v18091_v57 = vld [vmem:[%s20204_s1 + $0x818] sm:$0xff] }
 0x2d9   : > { %v3398_v48 = vld [vmem:[%s20204_s1 + $0x598] sm:$0xff] }
 0x2da   : > { %8690 = vmatmul.mubr.bf16.gmra.mrb[68].mxu0 %v15021_v63  ;;  %9655 = vmatmul.mubr.bf16.gmra.mrb[68].mxu1 %v15021_v63  ;;  %v3401_v63 = vld [vmem:[%s20204_s1 + $0x5b0] sm:$0xff]  ;;  %v3402_v23 = vld [vmem:[%s20204_s1 + $0x5b8] sm:$0xff] }
 0x2db   : > { %8699 = vmatprep.mubr.bf16.mxu0 %v15459_v50  ;;  %9664 = vmatprep.mubr.bf16.mxu1 %v15459_v50  ;;  %v3390_v50 = vld [vmem:[%s20204_s1 + $0x558] sm:$0xff] }
 0x2dc   : > { %8845 = vmatpush1.bf16.msra.mxu0 %v12979_v19  ;;  %9810 = vmatpush1.bf16.msra.mxu1 %v12981_v11  ;;  %v15022_v19 = vld [vmem:[%s15226_s30 + $0x18] sm:$0xff]   ;;  %v13006_v11 = vcombine.high %v3390_v50, %v3394_v33  ;;  %v13005_v31 = vcombine.low %v3390_v50, %v3394_v33  ;;  %v13013_v50 = vcombine.low %v3398_v48, %v3402_v23 }
 0x2dd   : > { %8846 = vmatprep.subr.bf16.mxu0 %v12988_v38  ;;  %9811 = vmatprep.subr.bf16.mxu1 %v12990_v58  ;;  %v3397_v38 = vld [vmem:[%s20204_s1 + $0x590] sm:$0xff]  ;;  %v3410_v40 = vld [vmem:[%s20204_s1 + $0x5f8] sm:$0xff] }
 0x2de   : > { %v13011_v59 = vcombine.low %v3397_v38, %v3401_v63  ;;  %v18346_v58 = vld [vmem:[%s20204_s1 + $0x930] sm:$0xff]  ;;  %v18364_v9 = vld [vmem:[%s20204_s1 + $0x938] sm:$0xff] }
 0x2e0   : > { %8847 = vmatpush1.bf16.msra.mxu0 %v12987_v32  ;;  %9812 = vmatpush1.bf16.msra.mxu1 %v12989_v51  ;;  %v13012_v32 = vcombine.high %v3397_v38, %v3401_v63  ;;  %v13014_v51 = vcombine.high %v3398_v48, %v3402_v23  ;;  %v3418_v38 = vld [vmem:[%s20204_s1 + $0x638] sm:$0xff] }
 0x2e1   : > { %8848 = vmatprep.subr.bf16.mxu0 %v12996_v29  ;;  %9813 = vmatprep.subr.bf16.mxu1 %v12998_v62  ;;  %v3405_v29 = vld [vmem:[%s20204_s1 + $0x5d0] sm:$0xff] }
 0x2e2   : > { %8700 = vmatmul.mubr.bf16.gmra.mrb[72].mxu0 %v15022_v19  ;;  %9665 = vmatmul.mubr.bf16.gmra.mrb[72].mxu1 %v15022_v19  ;;  %v3409_v62 = vld [vmem:[%s20204_s1 + $0x5f0] sm:$0xff] }
 0x2e3   : > { %8709 = vmatprep.mubr.bf16.mxu0 %v15506_v26  ;;  %9674 = vmatprep.mubr.bf16.mxu1 %v15506_v26  ;;  %v3406_v26 = vld [vmem:[%s20204_s1 + $0x5d8] sm:$0xff]  ;;  %v13020_v33 = vcombine.high %v3405_v29, %v3409_v62  ;;  %v3417_v19 = vld [vmem:[%s20204_s1 + $0x630] sm:$0xff]  ;;  %v13019_v63 = vcombine.low %v3405_v29, %v3409_v62 }
 0x2e4   : > { %8849 = vmatpush1.bf16.msra.mxu0 %v12995_v27  ;;  %9814 = vmatpush1.bf16.msra.mxu1 %v12997_v15  ;;  %v15023_v27 = vld [vmem:[%s15226_s30 + $0x24] sm:$0xff]   ;;  %v13022_v15 = vcombine.high %v3406_v26, %v3410_v40  ;;  %v13021_v48 = vcombine.low %v3406_v26, %v3410_v40  ;;  %v15024_v40 = vld [vmem:[%s15226_s30 + $0x30] sm:$0xff]  }
 0x2e5   : > { %8850 = vmatprep.subr.bf16.mxu0 %v13004_v46  ;;  %9815 = vmatprep.subr.bf16.mxu1 %v13006_v11  ;;  %v3413_v46 = vld [vmem:[%s20204_s1 + $0x610] sm:$0xff]  ;;  %v3414_v11 = vld [vmem:[%s20204_s1 + $0x618] sm:$0xff] }
 0x2e6   : > { %v13028_v23 = vcombine.high %v3413_v46, %v3417_v19  ;;  %v13027_v29 = vcombine.low %v3413_v46, %v3417_v19  ;;  %v13029_v62 = vcombine.low %v3414_v11, %v3418_v38 }
 0x2e8   : > { %8851 = vmatpush1.bf16.msra.mxu0 %v13003_v37  ;;  %9816 = vmatpush1.bf16.msra.mxu1 %v13005_v31  ;;  %v13030_v37 = vcombine.high %v3414_v11, %v3418_v38  ;;  %v3421_v31 = vld [vmem:[%s20204_s1 + $0x650] sm:$0xff] }
 0x2e9   : > { %8852 = vmatprep.subr.bf16.mxu0 %v13012_v32  ;;  %9817 = vmatprep.subr.bf16.mxu1 %v13014_v51  ;;  %v3425_v32 = vld [vmem:[%s20204_s1 + $0x670] sm:$0xff]  ;;  %v3426_v51 = vld [vmem:[%s20204_s1 + $0x678] sm:$0xff] }
 0x2ea   : > { %8710 = vmatmul.mubr.bf16.gmra.mrb[76].mxu0 %v15023_v27  ;;  %9675 = vmatmul.mubr.bf16.gmra.mrb[76].mxu1 %v15023_v27  ;;  %v13036_v26 = vcombine.high %v3421_v31, %v3425_v32  ;;  %v3430_v27 = vld [vmem:[%s20204_s1 + $0x698] sm:$0xff]  ;;  %v13035_v46 = vcombine.low %v3421_v31, %v3425_v32 }
 0x2eb   : > { %8719 = vmatprep.mubr.bf16.mxu0 %v15554_v4  ;;  %9684 = vmatprep.mubr.bf16.mxu1 %v15554_v4  ;;  %v3422_v4 = vld [vmem:[%s20204_s1 + $0x658] sm:$0xff] }
 0x2ec   : > { %8853 = vmatpush1.bf16.msra.mxu0 %v13011_v59  ;;  %9818 = vmatpush1.bf16.msra.mxu1 %v13013_v50  ;;  %v13038_v59 = vcombine.high %v3422_v4, %v3426_v51  ;;  %v3429_v50 = vld [vmem:[%s20204_s1 + $0x690] sm:$0xff]  ;;  %v13037_v19 = vcombine.low %v3422_v4, %v3426_v51  ;;  %v15025_v4 = vld [vmem:[%s15226_s30 + $0x3c] sm:$0xff]  }
 0x2ed   : > { %8854 = vmatprep.subr.bf16.mxu0 %v13020_v33  ;;  %9819 = vmatprep.subr.bf16.mxu1 %v13022_v15  ;;  %v3433_v33 = vld [vmem:[%s20204_s1 + $0x6b0] sm:$0xff]  ;;  %v3434_v15 = vld [vmem:[%s20204_s1 + $0x6b8] sm:$0xff] }
 0x2ee   : > { %v13044_v11 = vcombine.high %v3429_v50, %v3433_v33  ;;  %v13046_v38 = vcombine.high %v3430_v27, %v3434_v15  ;;  %v13045_v31 = vcombine.low %v3430_v27, %v3434_v15  ;;  %v3453_v15 = vld [vmem:[%s20204_s1 + $0x750] sm:$0xff] }
 0x2f0   : > { %8855 = vmatpush1.bf16.msra.mxu0 %v13019_v63  ;;  %9820 = vmatpush1.bf16.msra.mxu1 %v13021_v48  ;;  %v3437_v63 = vld [vmem:[%s20204_s1 + $0x6d0] sm:$0xff] }
 0x2f1   : > { %8856 = vmatprep.subr.bf16.mxu0 %v13028_v23  ;;  %9821 = vmatprep.subr.bf16.mxu1 %v13030_v37  ;;  %v3441_v48 = vld [vmem:[%s20204_s1 + $0x6f0] sm:$0xff]  ;;  %v3442_v23 = vld [vmem:[%s20204_s1 + $0x6f8] sm:$0xff]  ;;  %v13043_v37 = vcombine.low %v3429_v50, %v3433_v33 }
 0x2f2   : > { %8720 = vmatmul.mubr.bf16.gmra.mrb[80].mxu0 %v15024_v40  ;;  %9685 = vmatmul.mubr.bf16.gmra.mrb[80].mxu1 %v15024_v40  ;;  %v13052_v32 = vcombine.high %v3437_v63, %v3441_v48  ;;  %v3450_v40 = vld [vmem:[%s20204_s1 + $0x738] sm:$0xff] }
 0x2f3   : > { %8729 = vmatprep.mubr.bf16.mxu0 %v15588_v36  ;;  %9694 = vmatprep.mubr.bf16.mxu1 %v15588_v36  ;;  %v3438_v36 = vld [vmem:[%s20204_s1 + $0x6d8] sm:$0xff] }
 0x2f4   : > { %8857 = vmatpush1.bf16.msra.mxu0 %v13027_v29  ;;  %9822 = vmatpush1.bf16.msra.mxu1 %v13029_v62  ;;  %v13054_v51 = vcombine.high %v3438_v36, %v3442_v23  ;;  %v3445_v29 = vld [vmem:[%s20204_s1 + $0x710] sm:$0xff]  ;;  %v13053_v50 = vcombine.low %v3438_v36, %v3442_v23 }
 0x2f5   : > { %8858 = vmatprep.subr.bf16.mxu0 %v13036_v26  ;;  %9823 = vmatprep.subr.bf16.mxu1 %v13038_v59  ;;  %v3449_v62 = vld [vmem:[%s20204_s1 + $0x730] sm:$0xff]  ;;  %v3446_v26 = vld [vmem:[%s20204_s1 + $0x718] sm:$0xff]  ;;  %v13051_v59 = vcombine.low %v3437_v63, %v3441_v48  ;;  %v15026_v48 = vld [vmem:[%s15226_s30 + $0x48] sm:$0xff]  }
 0x2f6   : > { %v13060_v33 = vcombine.high %v3445_v29, %v3449_v62  ;;  %v13062_v27 = vcombine.high %v3446_v26, %v3450_v40  ;;  %v3461_v23 = vld [vmem:[%s20204_s1 + $0x790] sm:$0xff] }
 0x2f8   : > { %8859 = vmatpush1.bf16.msra.mxu0 %v13035_v46  ;;  %9824 = vmatpush1.bf16.msra.mxu1 %v13037_v19  ;;  %v3457_v46 = vld [vmem:[%s20204_s1 + $0x770] sm:$0xff]  ;;  %v3458_v19 = vld [vmem:[%s20204_s1 + $0x778] sm:$0xff] }
 0x2f9   : > { %8860 = vmatprep.subr.bf16.mxu0 %v13044_v11  ;;  %9825 = vmatprep.subr.bf16.mxu1 %v13046_v38  ;;  %v13059_v11 = vcombine.low %v3445_v29, %v3449_v62  ;;  %v13061_v38 = vcombine.low %v3446_v26, %v3450_v40  ;;  %v13068_v63 = vcombine.high %v3453_v15, %v3457_v46  ;;  %v3469_v26 = vld [vmem:[%s20204_s1 + $0x7d0] sm:$0xff] }
 0x2fa   : > { %8730 = vmatmul.mubr.bf16.gmra.mrb[84].mxu0 %v15025_v4  ;;  %9695 = vmatmul.mubr.bf16.gmra.mrb[84].mxu1 %v15025_v4  ;;  %v13067_v4 = vcombine.low %v3453_v15, %v3457_v46  ;;  %v3473_v40 = vld [vmem:[%s20204_s1 + $0x7f0] sm:$0xff] }
 0x2fb   : > { %8739 = vmatprep.mubr.bf16.mxu0 %v15665_v21  ;;  %9704 = vmatprep.mubr.bf16.mxu1 %v15665_v21  ;;  %v3454_v21 = vld [vmem:[%s20204_s1 + $0x758] sm:$0xff] }
 0x2fc   : > { %8861 = vmatpush1.bf16.msra.mxu0 %v13043_v37  ;;  %9826 = vmatpush1.bf16.msra.mxu1 %v13045_v31  ;;  %v13070_v36 = vcombine.high %v3454_v21, %v3458_v19  ;;  %v3465_v37 = vld [vmem:[%s20204_s1 + $0x7b0] sm:$0xff]  ;;  %v3462_v31 = vld [vmem:[%s20204_s1 + $0x798] sm:$0xff] }
 0x2fd   : > { %8862 = vmatprep.subr.bf16.mxu0 %v13052_v32  ;;  %9827 = vmatprep.subr.bf16.mxu1 %v13054_v51  ;;  %v3466_v32 = vld [vmem:[%s20204_s1 + $0x7b8] sm:$0xff]  ;;  %v13069_v51 = vcombine.low %v3454_v21, %v3458_v19  ;;  %v13076_v29 = vcombine.high %v3461_v23, %v3465_v37  ;;  %v13083_v21 = vcombine.low %v3469_v26, %v3473_v40 }
 0x2fe   : > { %v13078_v62 = vcombine.high %v3462_v31, %v3466_v32  ;;  %v15027_v15 = vld [vmem:[%s15226_s30 + $0x54] sm:$0xff]  }
 0x300   : > { %8863 = vmatpush1.bf16.msra.mxu0 %v13051_v59  ;;  %9828 = vmatpush1.bf16.msra.mxu1 %v13053_v50  ;;  %v3474_v59 = vld [vmem:[%s20204_s1 + $0x7f8] sm:$0xff]  ;;  %v13075_v50 = vcombine.low %v3461_v23, %v3465_v37  ;;  %v3795_v23 = vld [vmem:[%s20205_s2] sm:$0xff] }
 0x301   : > { %8864 = vmatprep.subr.bf16.mxu0 %v13060_v33  ;;  %9829 = vmatprep.subr.bf16.mxu1 %v13062_v27  ;;  %v13077_v33 = vcombine.low %v3462_v31, %v3466_v32  ;;  %v13084_v27 = vcombine.high %v3469_v26, %v3473_v40  ;;  %v10833_v31 = vld [vmem:[%s20206_s3] sm:$0xff]  ;;  %v18280_v26 = vld [vmem:[%s20204_s1 + $0x878] sm:$0xff]  ;;  %v18285_v40 = vld [vmem:[%s20204_s1 + $0x890] sm:$0xff] }
 0x302   : > { %8740 = vmatmul.mubr.bf16.gmra.mrb[88].mxu0 %v15026_v48  ;;  %9705 = vmatmul.mubr.bf16.gmra.mrb[88].mxu1 %v15026_v48  ;;  %v3797_v48 = vlaneseq }
 0x303   : > { %8749 = vmatprep.mubr.bf16.mxu0 %v15747_v3  ;;  %9714 = vmatprep.mubr.bf16.mxu1 %v15747_v3  ;;  %v3470_v3 = vld [vmem:[%s20204_s1 + $0x7d8] sm:$0xff] }
 0x304   : > { %8865 = vmatpush1.bf16.msra.mxu0 %v13059_v11  ;;  %9830 = vmatpush1.bf16.msra.mxu1 %v13061_v38  ;;  %v13086_v46 = vcombine.high %v3470_v3, %v3474_v59  ;;  %v13085_v19 = vcombine.low %v3470_v3, %v3474_v59  ;;  %v13092_v11 = vcombine.high %v18081_v14, %v18086_v17  ;;  %v18290_v3 = vld [vmem:[%s20204_s1 + $0x8b0] sm:$0xff]  ;;  %v18295_v59 = vld [vmem:[%s20204_s1 + $0x898] sm:$0xff] }
 0x305   : > { %8866 = vmatprep.subr.bf16.mxu0 %v13068_v63  ;;  %9831 = vmatprep.subr.bf16.mxu1 %v13070_v36  ;;  %v13094_v38 = vcombine.high %v18091_v57, %v18098_v22  ;;  %v15028_v63 = vld [vmem:[%s15226_s30 + $0x60] sm:$0xff]   ;;  %v15029_v36 = vld [vmem:[%s15226_s30 + $0x6c] sm:$0xff]  }
 0x308   : > { %8867 = vmatpush1.bf16.msra.mxu0 %v13067_v4  ;;  %9832 = vmatpush1.bf16.msra.mxu1 %v13069_v51  ;;  %v18264_v51 = vld [vmem:[%s20204_s1 + $0x850] sm:$0xff] }
 0x309   : > { %8868 = vmatprep.subr.bf16.mxu0 %v13076_v29  ;;  %9833 = vmatprep.subr.bf16.mxu1 %v13078_v62  ;;  %v18269_v29 = vld [vmem:[%s20204_s1 + $0x870] sm:$0xff]  ;;  %v18274_v62 = vld [vmem:[%s20204_s1 + $0x858] sm:$0xff] }
 0x30a   : > { %8750 = vmatmul.mubr.bf16.gmra.mrb[92].mxu0 %v15027_v15  ;;  %9715 = vmatmul.mubr.bf16.gmra.mrb[92].mxu1 %v15027_v15 }
 0x30b   : > { %8759 = vmatprep.mubr.bf16.mxu0 %v15788_v47  ;;  %9724 = vmatprep.mubr.bf16.mxu1 %v15788_v47  ;;  %v18247_v47 = vshrl.u32 %v3797_v48, 7 }
 0x30c   : > { %8869 = vmatpush1.bf16.msra.mxu0 %v13075_v50  ;;  %9834 = vmatpush1.bf16.msra.mxu1 %v13077_v33  ;;  %v18305_v50 = vld [vmem:[%s20204_s1 + $0x8d0] sm:$0xff] }
 0x30d   : > { %8870 = vmatprep.subr.bf16.mxu0 %v13084_v27  ;;  %9835 = vmatprep.subr.bf16.mxu1 %v13086_v46  ;;  %20473 = vst [vmem:[#allocation82_spill] sm:$0xff] %v18247_v47  ;;  %v3799_v37 = vsub.s32 0, %v18247_v47  ;;  %v3807_v32 = vsub.s32 2, %v18247_v47  ;;  %v3803_v4 = vsub.s32 1, %v18247_v47 }
 0x30f   : > { %v18307_v33 = vrot.slane %v3795_v23, %v3799_v37  ;;  %v18309_v27 = vrot.slane %v3795_v23, %v3807_v32  ;;  %v18311_v15 = vrot.slane %v3795_v23, %v3803_v4  ;;  %v18334_v48 = vrot.slane %v10833_v31, %v3803_v4  ;;  %v18397_v4 = vld [vmem:[%s20204_s1 + $0x990] sm:$0xff] }
 0x310   : > { %8871 = vmatpush1.bf16.msra.mxu0 %v13083_v21  ;;  %9836 = vmatpush1.bf16.msra.mxu1 %v13085_v19  ;;  %v18318_v21 = vld [vmem:[%s20204_s1 + $0x8f0] sm:$0xff]  ;;  %v18323_v19 = vld [vmem:[%s20204_s1 + $0x8d8] sm:$0xff] }
 0x311   : > { %9033 = vmatprep.subr.bf16.mxu0 %v13092_v11  ;;  %9998 = vmatprep.subr.bf16.mxu1 %v13094_v38  ;;  %v18328_v11 = vld [vmem:[%s20204_s1 + $0x8f8] sm:$0xff]  ;;  %v18330_v38 = vrot.slane %v10833_v31, %v3799_v37 }
 0x312   : > { %8760 = vmatmul.mubr.bf16.gmra.mrb[96].mxu0 %v15028_v63  ;;  %9725 = vmatmul.mubr.bf16.gmra.mrb[96].mxu1 %v15028_v63  ;;  %v18332_v63 = vrot.slane %v10833_v31, %v3807_v32  ;;  %v18351_v37 = vld [vmem:[%s20204_s1 + $0x918] sm:$0xff] }
 0x313   : > { %8769 = vmatprep.mubr.bf16.mxu0 %v15822_v35  ;;  %9734 = vmatprep.mubr.bf16.mxu1 %v15822_v35  ;;  %v3811_v35 = vsub.s32 3, %v18247_v47  ;;  %v18369_v47 = vld [vmem:[%s20204_s1 + $0x950] sm:$0xff]  ;;  %v18421_v32 = vld [vmem:[%s20204_s1 + $0x9b8] sm:$0xff] }
 0x315   : > { %v18313_v46 = vrot.slane %v3795_v23, %v3811_v35  ;;  %v18341_v23 = vld [vmem:[%s20204_s1 + $0x910] sm:$0xff] }
 0x31a   : > { %8770 = vmatmul.mubr.bf16.gmra.mrb[100].mxu0 %v15029_v36  ;;  %9735 = vmatmul.mubr.bf16.gmra.mrb[100].mxu1 %v15029_v36  ;;  %v18336_v36 = vrot.slane %v10833_v31, %v3811_v35  ;;  %v18374_v31 = vld [vmem:[%s20204_s1 + $0x970] sm:$0xff]  ;;  %v15030_v35 = vld [vmem:[%s15226_s30 + $0x78] sm:$0xff]  }
 0x31b   : > { %8779 = vmatprep.mubr.bf16.mxu0 %v15836_v1  ;;  %9744 = vmatprep.mubr.bf16.mxu1 %v15836_v1  ;;  %v18300_v1 = vld [vmem:[%s20204_s1 + $0x8b8] sm:$0xff] }
 0x322   : > { %8780 = vmatmul.mubr.bf16.gmra.mrb[104].mxu0 %v15030_v35  ;;  %9745 = vmatmul.mubr.bf16.gmra.mrb[104].mxu1 %v15030_v35  ;;  %v18438_v35 = vld [vmem:[%s20204_s1 + $0x9f0] sm:$0xff] }
 0x323   : > { %8789 = vmatprep.mubr.bf16.mxu0 %v15848_v6  ;;  %20475 = vst [vmem:[#allocation84_spill] sm:$0xff] %v18438_v35  ;;  %9754 = vmatprep.mubr.bf16.mxu1 %v15848_v6  ;;  %v18457_v6 = vld [vmem:[%s20204_s1 + $0x9f8] sm:$0xff] }
 0x324   : > { %20477 = vst [vmem:[#allocation86_spill] sm:$0xff] %v18457_v6 }
 0x325   : > { %v7523_v56 = vpop.f32.mrb[0].mxu0  ;;  %v8488_v24 = vpop.f32.mrb[0].mxu1 }
 0x326   : > { %v13666_v43 = vadd.f32 %v7523_v56, %v18307_v33  ;;  %v7525_v34 = vpop.f32.mrb[1].mxu0  ;;  %v13730_v61 = vadd.f32 %v8488_v24, %v18309_v27  ;;  %v8490_v12 = vpop.f32.mrb[1].mxu1 }
 0x327   : > { %v13667_v7 = vadd.f32 %v7525_v34, %v18311_v15  ;;  %v7527_v20 = vpop.f32.mrb[2].mxu0  ;;  %v13731_v5 = vadd.f32 %v8490_v12, %v18313_v46  ;;  %v8492_v24 = vpop.f32.mrb[2].mxu1 }
 0x328   : > { %vm10577_vm6 = vcmp.ge.f32.partialorder %v13666_v43, 0.0  ;;  %v10875_v30 = vmul.f32 %v13666_v43, %v18330_v38  ;;  %v13668_v49 = vadd.f32 %v7527_v20, %v18307_v33  ;;  %v7529_v16 = vpop.f32.mrb[3].mxu0  ;;  %vm10579_vm7 = vcmp.ge.f32.partialorder %v13730_v61, 0.0  ;;  %v8494_v10 = vpop.f32.mrb[3].mxu1 }
 0x329   : > { %v10877_v34 = vmul.f32 %v13730_v61, %v18332_v63  ;;  %vm10578_vm8 = vcmp.ge.f32.partialorder %v13667_v7, 0.0  ;;  %v10876_v56 = vmul.f32 %v13667_v7, %v18334_v48  ;;  %vm10580_vm9 = vcmp.ge.f32.partialorder %v13731_v5, 0.0 }
 0x32a   : > { %v11131_v13 = vsel %vm10577_vm6, %v13666_v43, %v10875_v30  ;;  %v10878_v42 = vmul.f32 %v13731_v5, %v18336_v36  ;;  %vm10585_vm10 = vcmp.ge.f32.partialorder %v13668_v49, 0.0  ;;  %8790 = vmatmul.mubr.bf16.gmra.mrb[108].mxu0 %v15031_v2  ;;  %v10883_v12 = vmul.f32 %v13668_v49, %v18330_v38  ;;  %9755 = vmatmul.mubr.bf16.gmra.mrb[108].mxu1 %v15031_v2 }
 0x32b   : > { %v11133_v39 = vsel %vm10579_vm7, %v13730_v61, %v10877_v34  ;;  %v11132_v20 = vsel %vm10578_vm8, %v13667_v7, %v10876_v56  ;;  %v13732_v18 = vadd.f32 %v8492_v24, %v18309_v27  ;;  %v13669_v52 = vadd.f32 %v7529_v16, %v18311_v15  ;;  %8799 = vmatprep.mubr.bf16.mxu0 %v15860_v53 }
 0x32c   : > { %v13538_v30 = vpack.c.bf16 %v11132_v20, %v11131_v13  ;;  %v11134_v43 = vsel %vm10580_vm9, %v13731_v5, %v10878_v42  ;;  %v13733_v6 = vadd.f32 %v8494_v10, %v18313_v46  ;;  %v11139_v34 = vsel %vm10585_vm10, %v13668_v49, %v10883_v12  ;;  %9764 = vmatprep.mubr.bf16.mxu1 %v15860_v53 }
 0x32d   : > { %v13539_v61 = vpack.c.bf16 %v11134_v43, %v11133_v39  ;;  %vm10587_vm11 = vcmp.ge.f32.partialorder %v13732_v18, 0.0  ;;  %v10885_v55 = vmul.f32 %v13732_v18, %v18332_v63  ;;  %v7533_v7 = vpop.f32.mrb[4].mxu0  ;;  %vm10586_vm12 = vcmp.ge.f32.partialorder %v13669_v52, 0.0  ;;  %v8498_v16 = vpop.f32.mrb[4].mxu1 }
 0x32e   : > { %12155 = vst [vmem:[%s18491_s19] sm:$0xff] %v13538_v30  ;;  %v10884_v2 = vmul.f32 %v13669_v52, %v18334_v48  ;;  %vm10588_vm13 = vcmp.ge.f32.partialorder %v13733_v6, 0.0  ;;  %v10886_v13 = vmul.f32 %v13733_v6, %v18336_v36  ;;  %v7535_v42 = vpop.f32.mrb[5].mxu0  ;;  %v13670_v39 = vadd.f32 %v7533_v7, %v18307_v33  ;;  %v8500_v56 = vpop.f32.mrb[5].mxu1 }
 0x32f   : > { %12156 = vst [vmem:[%s18491_s19 + $0x8] sm:$0xff] %v13539_v61  ;;  %v11141_v10 = vsel %vm10587_vm11, %v13732_v18, %v10885_v55  ;;  %v13734_v5 = vadd.f32 %v8498_v16, %v18309_v27  ;;  %v13671_v49 = vadd.f32 %v7535_v42, %v18311_v15  ;;  %v7537_v24 = vpop.f32.mrb[6].mxu0  ;;  %v13735_v12 = vadd.f32 %v8500_v56, %v18313_v46  ;;  %v8502_v43 = vpop.f32.mrb[6].mxu1 }
 0x330   : > { %v11140_v53 = vsel %vm10586_vm12, %v13669_v52, %v10884_v2  ;;  %v11142_v20 = vsel %vm10588_vm13, %v13733_v6, %v10886_v13  ;;  %v13672_v30 = vadd.f32 %v7537_v24, %v18307_v33  ;;  %v7539_v61 = vpop.f32.mrb[7].mxu0  ;;  %vm10593_vm14 = vcmp.ge.f32.partialorder %v13670_v39, 0.0  ;;  %v8504_v16 = vpop.f32.mrb[7].mxu1  ;;  %v15032_v6 = vld [vmem:[%s15226_s30 + $0x90] sm:$0xff]  }
 0x331   : > { %v13542_v18 = vpack.c.bf16 %v11140_v53, %v11139_v34  ;;  %v13543_v55 = vpack.c.bf16 %v11142_v20, %v11141_v10  ;;  %v10891_v7 = vmul.f32 %v13670_v39, %v18330_v38  ;;  %vm10595_vm15 = vcmp.ge.f32.partialorder %v13734_v5, 0.0 }
 0x332   : > { %v10893_v42 = vmul.f32 %v13734_v5, %v18332_v63  ;;  %vm10594_vm0 = vcmp.ge.f32.partialorder %v13671_v49, 0.0  ;;  %v10892_v52 = vmul.f32 %v13671_v49, %v18334_v48  ;;  %8800 = vmatmul.mubr.bf16.gmra.mrb[112].mxu0 %v15032_v6  ;;  %vm10596_vm1 = vcmp.ge.f32.partialorder %v13735_v12, 0.0  ;;  %9765 = vmatmul.mubr.bf16.gmra.mrb[112].mxu1 %v15032_v6 }
 0x333   : > { %12159 = vst [vmem:[%s18491_s19 + $0x20] sm:$0xff] %v13542_v18  ;;  %12160 = vst [vmem:[%s18491_s19 + $0x28] sm:$0xff] %v13543_v55  ;;  %v11147_v2 = vsel %vm10593_vm14, %v13670_v39, %v10891_v7  ;;  %v10894_v13 = vmul.f32 %v13735_v12, %v18336_v36  ;;  %vm10601_vm2 = vcmp.ge.f32.partialorder %v13672_v30, 0.0  ;;  %8809 = vmatprep.mubr.bf16.mxu0 %v15870_v8  ;;  %9774 = vmatprep.mubr.bf16.mxu1 %v15870_v8 }
 0x334   : > { %v11149_v34 = vsel %vm10595_vm15, %v13734_v5, %v10893_v42  ;;  %v11148_v10 = vsel %vm10594_vm0, %v13671_v49, %v10892_v52  ;;  %v10899_v56 = vmul.f32 %v13672_v30, %v18330_v38  ;;  %v13736_v24 = vadd.f32 %v8502_v43, %v18309_v27 }
 0x335   : > { %v13546_v53 = vpack.c.bf16 %v11148_v10, %v11147_v2  ;;  %v11150_v20 = vsel %vm10596_vm1, %v13735_v12, %v10894_v13  ;;  %v13673_v39 = vadd.f32 %v7539_v61, %v18311_v15  ;;  %v13737_v18 = vadd.f32 %v8504_v16, %v18313_v46  ;;  %v7543_v55 = vpop.f32.mrb[8].mxu0  ;;  %v8508_v49 = vpop.f32.mrb[8].mxu1 }
 0x336   : > { %v13547_v7 = vpack.c.bf16 %v11150_v20, %v11149_v34  ;;  %v11155_v6 = vsel %vm10601_vm2, %v13672_v30, %v10899_v56  ;;  %vm10603_vm3 = vcmp.ge.f32.partialorder %v13736_v24, 0.0  ;;  %v10901_v5 = vmul.f32 %v13736_v24, %v18332_v63  ;;  %v7545_v42 = vpop.f32.mrb[9].mxu0  ;;  %v8510_v12 = vpop.f32.mrb[9].mxu1 }
 0x337   : > { %12163 = vst [vmem:[%s18491_s19 + $0x40] sm:$0xff] %v13546_v53  ;;  %vm10602_vm4 = vcmp.ge.f32.partialorder %v13673_v39, 0.0  ;;  %v10900_v43 = vmul.f32 %v13673_v39, %v18334_v48  ;;  %vm10604_vm5 = vcmp.ge.f32.partialorder %v13737_v18, 0.0  ;;  %v10902_v8 = vmul.f32 %v13737_v18, %v18336_v36  ;;  %v7547_v61 = vpop.f32.mrb[10].mxu0  ;;  %v8512_v13 = vpop.f32.mrb[10].mxu1 }
 0x338   : > { %12164 = vst [vmem:[%s18491_s19 + $0x48] sm:$0xff] %v13547_v7  ;;  %v11157_v16 = vsel %vm10603_vm3, %v13736_v24, %v10901_v5  ;;  %v13674_v52 = vadd.f32 %v7543_v55, %v18307_v33  ;;  %v13738_v30 = vadd.f32 %v8508_v49, %v18309_v27  ;;  %v13675_v2 = vadd.f32 %v7545_v42, %v18311_v15  ;;  %v7549_v34 = vpop.f32.mrb[11].mxu0  ;;  %v8514_v35 = vpop.f32.mrb[11].mxu1  ;;  %v15033_v55 = vld [vmem:[%s15226_s30 + $0x9c] sm:$0xff]  }
 0x339   : > { %v11156_v10 = vsel %vm10602_vm4, %v13673_v39, %v10900_v43  ;;  %v11158_v56 = vsel %vm10604_vm5, %v13737_v18, %v10902_v8  ;;  %v13739_v53 = vadd.f32 %v8510_v12, %v18313_v46  ;;  %v13676_v20 = vadd.f32 %v7547_v61, %v18307_v33 }
 0x33a   : > { %v13550_v7 = vpack.c.bf16 %v11156_v10, %v11155_v6  ;;  %v13551_v54 = vpack.c.bf16 %v11158_v56, %v11157_v16  ;;  %vm10609_vm6 = vcmp.ge.f32.partialorder %v13674_v52, 0.0  ;;  %v10907_v24 = vmul.f32 %v13674_v52, %v18330_v38  ;;  %8810 = vmatmul.mubr.bf16.gmra.mrb[116].mxu0 %v15033_v55  ;;  %9775 = vmatmul.mubr.bf16.gmra.mrb[116].mxu1 %v15033_v55 }
 0x33b   : > { %vm10611_vm7 = vcmp.ge.f32.partialorder %v13738_v30, 0.0  ;;  %v10909_v5 = vmul.f32 %v13738_v30, %v18332_v63  ;;  %vm10610_vm8 = vcmp.ge.f32.partialorder %v13675_v2, 0.0  ;;  %v10908_v39 = vmul.f32 %v13675_v2, %v18334_v48  ;;  %8819 = vmatprep.mubr.bf16.mxu0 %v15880_v28  ;;  %9784 = vmatprep.mubr.bf16.mxu1 %v15880_v28 }
 0x33c   : > { %12167 = vst [vmem:[%s18491_s19 + $0x60] sm:$0xff] %v13550_v7  ;;  %12168 = vst [vmem:[%s18491_s19 + $0x68] sm:$0xff] %v13551_v54  ;;  %v11163_v18 = vsel %vm10609_vm6, %v13674_v52, %v10907_v24  ;;  %vm10612_vm9 = vcmp.ge.f32.partialorder %v13739_v53, 0.0  ;;  %v10910_v6 = vmul.f32 %v13739_v53, %v18336_v36  ;;  %vm10617_vm10 = vcmp.ge.f32.partialorder %v13676_v20, 0.0 }
 0x33d   : > { %v11165_v49 = vsel %vm10611_vm7, %v13738_v30, %v10909_v5  ;;  %v11164_v42 = vsel %vm10610_vm8, %v13675_v2, %v10908_v39  ;;  %v10915_v43 = vmul.f32 %v13676_v20, %v18330_v38  ;;  %v13740_v8 = vadd.f32 %v8512_v13, %v18309_v27  ;;  %v7553_v12 = vpop.f32.mrb[12].mxu0  ;;  %v8518_v52 = vpop.f32.mrb[12].mxu1 }
 0x33e   : > { %v13554_v61 = vpack.c.bf16 %v11164_v42, %v11163_v18  ;;  %v11166_v16 = vsel %vm10612_vm9, %v13739_v53, %v10910_v6  ;;  %v13677_v10 = vadd.f32 %v7549_v34, %v18311_v15  ;;  %v13741_v54 = vadd.f32 %v8514_v35, %v18313_v46  ;;  %v7555_v56 = vpop.f32.mrb[13].mxu0  ;;  %v8520_v30 = vpop.f32.mrb[13].mxu1 }
 0x33f   : > { %v13555_v7 = vpack.c.bf16 %v11166_v16, %v11165_v49  ;;  %v11171_v24 = vsel %vm10617_vm10, %v13676_v20, %v10915_v43  ;;  %vm10619_vm11 = vcmp.ge.f32.partialorder %v13740_v8, 0.0  ;;  %v10917_v28 = vmul.f32 %v13740_v8, %v18332_v63  ;;  %v7557_v2 = vpop.f32.mrb[14].mxu0  ;;  %v8522_v53 = vpop.f32.mrb[14].mxu1 }
 0x340   : > { %12171 = vst [vmem:[%s18491_s19 + $0x80] sm:$0xff] %v13554_v61  ;;  %vm10618_vm12 = vcmp.ge.f32.partialorder %v13677_v10, 0.0  ;;  %v10916_v13 = vmul.f32 %v13677_v10, %v18334_v48  ;;  %vm10620_vm13 = vcmp.ge.f32.partialorder %v13741_v54, 0.0  ;;  %v10918_v34 = vmul.f32 %v13741_v54, %v18336_v36  ;;  %v7559_v35 = vpop.f32.mrb[15].mxu0  ;;  %v8524_v18 = vpop.f32.mrb[15].mxu1  ;;  %v15034_v61 = vld [vmem:[%s15226_s30 + $0xa8] sm:$0xff]  }
 0x341   : > { %12172 = vst [vmem:[%s18491_s19 + $0x88] sm:$0xff] %v13555_v7  ;;  %v11173_v55 = vsel %vm10619_vm11, %v13740_v8, %v10917_v28  ;;  %v13678_v5 = vadd.f32 %v7553_v12, %v18307_v33  ;;  %v13742_v20 = vadd.f32 %v8518_v52, %v18309_v27  ;;  %v13679_v39 = vadd.f32 %v7555_v56, %v18311_v15 }
 0x342   : > { %v11172_v6 = vsel %vm10618_vm12, %v13677_v10, %v10916_v13  ;;  %v11174_v49 = vsel %vm10620_vm13, %v13741_v54, %v10918_v34  ;;  %v13743_v42 = vadd.f32 %v8520_v30, %v18313_v46  ;;  %v13680_v43 = vadd.f32 %v7557_v2, %v18307_v33  ;;  %8820 = vmatmul.mubr.bf16.gmra.mrb[120].mxu0 %v15034_v61 }
 0x343   : > { %v13558_v16 = vpack.c.bf16 %v11172_v6, %v11171_v24  ;;  %v13559_v7 = vpack.c.bf16 %v11174_v49, %v11173_v55  ;;  %vm10625_vm14 = vcmp.ge.f32.partialorder %v13678_v5, 0.0  ;;  %v10923_v8 = vmul.f32 %v13678_v5, %v18330_v38  ;;  %9785 = vmatmul.mubr.bf16.gmra.mrb[120].mxu1 %v15034_v61  ;;  %8829 = vmatprep.mubr.bf16.mxu0 %v15889_v41 }
 0x344   : > { %vm10627_vm15 = vcmp.ge.f32.partialorder %v13742_v20, 0.0  ;;  %v10925_v12 = vmul.f32 %v13742_v20, %v18332_v63  ;;  %vm10626_vm0 = vcmp.ge.f32.partialorder %v13679_v39, 0.0  ;;  %v10924_v10 = vmul.f32 %v13679_v39, %v18334_v48  ;;  %9794 = vmatprep.mubr.bf16.mxu1 %v15889_v41 }
 0x345   : > { %12175 = vst [vmem:[%s18491_s19 + $0xa0] sm:$0xff] %v13558_v16  ;;  %12176 = vst [vmem:[%s18491_s19 + $0xa8] sm:$0xff] %v13559_v7  ;;  %v11179_v54 = vsel %vm10625_vm14, %v13678_v5, %v10923_v8  ;;  %vm10628_vm1 = vcmp.ge.f32.partialorder %v13743_v42, 0.0  ;;  %v10926_v52 = vmul.f32 %v13743_v42, %v18336_v36  ;;  %vm10633_vm2 = vcmp.ge.f32.partialorder %v13680_v43, 0.0  ;;  %v7563_v56 = vpop.f32.mrb[16].mxu0  ;;  %v8528_v13 = vpop.f32.mrb[16].mxu1 }
 0x346   : > { %v11181_v24 = vsel %vm10627_vm15, %v13742_v20, %v10925_v12  ;;  %v11180_v28 = vsel %vm10626_vm0, %v13679_v39, %v10924_v10  ;;  %v10931_v30 = vmul.f32 %v13680_v43, %v18330_v38  ;;  %v13744_v2 = vadd.f32 %v8522_v53, %v18309_v27  ;;  %v7565_v34 = vpop.f32.mrb[17].mxu0  ;;  %v8530_v49 = vpop.f32.mrb[17].mxu1 }
 0x347   : > { %v13562_v55 = vpack.c.bf16 %v11180_v28, %v11179_v54  ;;  %v11182_v6 = vsel %vm10628_vm1, %v13743_v42, %v10926_v52  ;;  %v13681_v41 = vadd.f32 %v7559_v35, %v18311_v15  ;;  %v13745_v5 = vadd.f32 %v8524_v18, %v18313_v46  ;;  %v7567_v61 = vpop.f32.mrb[18].mxu0  ;;  %v8532_v39 = vpop.f32.mrb[18].mxu1  ;;  %v15035_v54 = vld [vmem:[%s15226_s30 + $0xb4] sm:$0xff]  }
 0x348   : > { %v13563_v16 = vpack.c.bf16 %v11182_v6, %v11181_v24  ;;  %v11187_v7 = vsel %vm10633_vm2, %v13680_v43, %v10931_v30  ;;  %vm10635_vm3 = vcmp.ge.f32.partialorder %v13744_v2, 0.0  ;;  %v10933_v20 = vmul.f32 %v13744_v2, %v18332_v63  ;;  %v7569_v8 = vpop.f32.mrb[19].mxu0  ;;  %v8534_v42 = vpop.f32.mrb[19].mxu1 }
 0x349   : > { %12179 = vst [vmem:[%s18491_s19 + $0xc0] sm:$0xff] %v13562_v55  ;;  %vm10634_vm4 = vcmp.ge.f32.partialorder %v13681_v41, 0.0  ;;  %v10932_v53 = vmul.f32 %v13681_v41, %v18334_v48  ;;  %vm10636_vm5 = vcmp.ge.f32.partialorder %v13745_v5, 0.0  ;;  %v10934_v35 = vmul.f32 %v13745_v5, %v18336_v36 }
 0x34a   : > { %12180 = vst [vmem:[%s18491_s19 + $0xc8] sm:$0xff] %v13563_v16  ;;  %v11189_v18 = vsel %vm10635_vm3, %v13744_v2, %v10933_v20  ;;  %v13682_v12 = vadd.f32 %v7563_v56, %v18307_v33  ;;  %v13746_v43 = vadd.f32 %v8528_v13, %v18309_v27  ;;  %v13683_v10 = vadd.f32 %v7565_v34, %v18311_v15  ;;  %v15036_v2 = vld [vmem:[%s15226_s30 + $0xc] sm:$0xff]  }
 0x34b   : > { %8830 = vmatmul.mubr.bf16.gmra.mrb[124].mxu0 %v15035_v54  ;;  %v11188_v52 = vsel %vm10634_vm4, %v13681_v41, %v10932_v53  ;;  %v11190_v24 = vsel %vm10636_vm5, %v13745_v5, %v10934_v35  ;;  %v13747_v28 = vadd.f32 %v8530_v49, %v18313_v46  ;;  %v13684_v30 = vadd.f32 %v7567_v61, %v18307_v33 }
 0x34c   : > { %9795 = vmatmul.mubr.bf16.gmra.mrb[124].mxu1 %v15035_v54  ;;  %v13566_v55 = vpack.c.bf16 %v11188_v52, %v11187_v7  ;;  %v13567_v6 = vpack.c.bf16 %v11190_v24, %v11189_v18  ;;  %vm10641_vm6 = vcmp.ge.f32.partialorder %v13682_v12, 0.0  ;;  %v10939_v56 = vmul.f32 %v13682_v12, %v18330_v38  ;;  %8872 = vmatprep.mubr.bf16.mxu0 %v15036_v2 }
 0x34d   : > { %9837 = vmatprep.mubr.bf16.mxu1 %v15036_v2  ;;  %vm10643_vm7 = vcmp.ge.f32.partialorder %v13746_v43, 0.0  ;;  %v10941_v13 = vmul.f32 %v13746_v43, %v18332_v63  ;;  %vm10642_vm8 = vcmp.ge.f32.partialorder %v13683_v10, 0.0  ;;  %v10940_v34 = vmul.f32 %v13683_v10, %v18334_v48  ;;  %v7573_v41 = vpop.f32.mrb[20].mxu0  ;;  %v8538_v61 = vpop.f32.mrb[20].mxu1 }
 0x34e   : > { %12183 = vst [vmem:[%s18491_s19 + $0xe0] sm:$0xff] %v13566_v55  ;;  %12184 = vst [vmem:[%s18491_s19 + $0xe8] sm:$0xff] %v13567_v6  ;;  %v11195_v5 = vsel %vm10641_vm6, %v13682_v12, %v10939_v56  ;;  %vm10644_vm9 = vcmp.ge.f32.partialorder %v13747_v28, 0.0  ;;  %v10942_v49 = vmul.f32 %v13747_v28, %v18336_v36  ;;  %vm10649_vm10 = vcmp.ge.f32.partialorder %v13684_v30, 0.0  ;;  %v7575_v16 = vpop.f32.mrb[21].mxu0  ;;  %v8540_v18 = vpop.f32.mrb[21].mxu1 }
 0x34f   : > { %v11197_v7 = vsel %vm10643_vm7, %v13746_v43, %v10941_v13  ;;  %v11196_v20 = vsel %vm10642_vm8, %v13683_v10, %v10940_v34  ;;  %v10947_v53 = vmul.f32 %v13684_v30, %v18330_v38  ;;  %v13748_v35 = vadd.f32 %v8532_v39, %v18309_v27  ;;  %v7577_v54 = vpop.f32.mrb[22].mxu0  ;;  %v8542_v6 = vpop.f32.mrb[22].mxu1 }
 0x350   : > { %v13570_v52 = vpack.c.bf16 %v11196_v20, %v11195_v5  ;;  %v11198_v24 = vsel %vm10644_vm9, %v13747_v28, %v10942_v49  ;;  %v13685_v12 = vadd.f32 %v7569_v8, %v18311_v15  ;;  %v13749_v55 = vadd.f32 %v8534_v42, %v18313_v46  ;;  %v7579_v56 = vpop.f32.mrb[23].mxu0  ;;  %v8544_v13 = vpop.f32.mrb[23].mxu1 }
 0x351   : > { %v13571_v2 = vpack.c.bf16 %v11198_v24, %v11197_v7  ;;  %v11203_v43 = vsel %vm10649_vm10, %v13684_v30, %v10947_v53  ;;  %vm10651_vm11 = vcmp.ge.f32.partialorder %v13748_v35, 0.0  ;;  %v10949_v10 = vmul.f32 %v13748_v35, %v18332_v63 }
 0x352   : > { %12187 = vst [vmem:[%s18491_s19 + $0x100] sm:$0xff] %v13570_v52  ;;  %vm10650_vm12 = vcmp.ge.f32.partialorder %v13685_v12, 0.0  ;;  %v10948_v39 = vmul.f32 %v13685_v12, %v18334_v48  ;;  %vm10652_vm13 = vcmp.ge.f32.partialorder %v13749_v55, 0.0  ;;  %v10950_v28 = vmul.f32 %v13749_v55, %v18336_v36 }
 0x353   : > { %8873 = vmatmul.mubr.bf16.vlgmr.msra.gmra.mrb[64].mxu0 %v15909_v0  ;;  %12188 = vst [vmem:[%s18491_s19 + $0x108] sm:$0xff] %v13571_v2  ;;  %v11205_v8 = vsel %vm10651_vm11, %v13748_v35, %v10949_v10  ;;  %v13686_v42 = vadd.f32 %v7573_v41, %v18307_v33  ;;  %v13750_v30 = vadd.f32 %v8538_v61, %v18309_v27 }
 0x354   : > { %v13687_v34 = vadd.f32 %v7575_v16, %v18311_v15  ;;  %9838 = vmatmul.mubr.bf16.vlgmr.msra.gmra.mrb[64].mxu1 %v15909_v0  ;;  %v11204_v5 = vsel %vm10650_vm12, %v13685_v12, %v10948_v39  ;;  %v11206_v49 = vsel %vm10652_vm13, %v13749_v55, %v10950_v28  ;;  %v13751_v7 = vadd.f32 %v8540_v18, %v18313_v46  ;;  %v15037_v16 = vld [vmem:[%s15226_s30 + $0x18] sm:$0xff]  }
 0x355   : > { %v13688_v20 = vadd.f32 %v7577_v54, %v18307_v33  ;;  %v20478_v53 = vcombine.low %v18081_v14, %v18086_v17  ;;  %v13574_v35 = vpack.c.bf16 %v11204_v5, %v11203_v43  ;;  %v13575_v52 = vpack.c.bf16 %v11206_v49, %v11205_v8  ;;  %v7583_v61 = vpop.f32.mrb[24].mxu0  ;;  %8882 = vmatprep.mubr.bf16.mxu0 %v15037_v16  ;;  %v8548_v17 = vpop.f32.mrb[24].mxu1 }
 0x356   : > { %vm10657_vm14 = vcmp.ge.f32.partialorder %v13686_v42, 0.0  ;;  %v10955_v41 = vmul.f32 %v13686_v42, %v18330_v38  ;;  %v20479_v0 = vcombine.low %v18091_v57, %v18098_v22  ;;  %vm10659_vm15 = vcmp.ge.f32.partialorder %v13750_v30, 0.0  ;;  %v7585_v54 = vpop.f32.mrb[25].mxu0  ;;  %9847 = vmatprep.mubr.bf16.mxu1 %v15037_v16  ;;  %v8550_v12 = vpop.f32.mrb[25].mxu1 }
 0x357   : > { %9034 = vmatpush1.bf16.msra.mxu0 %v20478_v53  ;;  %v10957_v18 = vmul.f32 %v13750_v30, %v18332_v63  ;;  %vm10658_vm0 = vcmp.ge.f32.partialorder %v13687_v34, 0.0  ;;  %v10956_v14 = vmul.f32 %v13687_v34, %v18334_v48  ;;  %v20480_v24 = vcombine.high %v18264_v51, %v18269_v29  ;;  %12191 = vst [vmem:[%s18491_s19 + $0x120] sm:$0xff] %v13574_v35  ;;  %v7587_v55 = vpop.f32.mrb[26].mxu0  ;;  %v8552_v8 = vpop.f32.mrb[26].mxu1 }
 0x358   : > { %9999 = vmatpush1.bf16.msra.mxu1 %v20479_v0  ;;  %12192 = vst [vmem:[%s18491_s19 + $0x128] sm:$0xff] %v13575_v52  ;;  %v11211_v57 = vsel %vm10657_vm14, %v13686_v42, %v10955_v41  ;;  %vm10660_vm1 = vcmp.ge.f32.partialorder %v13751_v7, 0.0  ;;  %v10958_v22 = vmul.f32 %v13751_v7, %v18336_v36  ;;  %vm10665_vm2 = vcmp.ge.f32.partialorder %v13688_v20, 0.0  ;;  %v18627_v42 = vpop.f32.mrb[27].mxu0 }
 0x359   : > { %9035 = vmatprep.subr.bf16.mxu0 %v20480_v24  ;;  %v20481_v2 = vcombine.high %v18274_v62, %v18280_v26  ;;  %v11213_v43 = vsel %vm10659_vm15, %v13750_v30, %v10957_v18  ;;  %v11212_v10 = vsel %vm10658_vm0, %v13687_v34, %v10956_v14  ;;  %v10963_v39 = vmul.f32 %v13688_v20, %v18330_v38  ;;  %v8554_v34 = vpop.f32.mrb[27].mxu1 }
 0x35a   : > { %v13752_v28 = vadd.f32 %v8542_v6, %v18309_v27  ;;  %v20482_v5 = vcombine.low %v18264_v51, %v18269_v29  ;;  %v13578_v49 = vpack.c.bf16 %v11212_v10, %v11211_v57  ;;  %v11214_v53 = vsel %vm10660_vm1, %v13751_v7, %v10958_v22  ;;  %v20484_v29 = vld [vmem:[#allocation3_spill] sm:$0xff] }
 0x35b   : > { %10000 = vmatprep.subr.bf16.mxu1 %v20481_v2  ;;  %v13689_v35 = vadd.f32 %v7579_v56, %v18311_v15  ;;  %v13753_v30 = vadd.f32 %v8544_v13, %v18313_v46  ;;  %v20483_v52 = vcombine.low %v18274_v62, %v18280_v26  ;;  %v13579_v6 = vpack.c.bf16 %v11214_v53, %v11213_v43  ;;  %v15038_v26 = vld [vmem:[%s15226_s30 + $0x24] sm:$0xff]  }
 0x35c   : > { %9036 = vmatpush1.bf16.msra.mxu0 %v20482_v5  ;;  %v11219_v41 = vsel %vm10665_vm2, %v13688_v20, %v10963_v39  ;;  %vm10667_vm3 = vcmp.ge.f32.partialorder %v13752_v28, 0.0  ;;  %v10965_v51 = vmul.f32 %v13752_v28, %v18332_v63  ;;  %v20485_v56 = vcombine.high %v18285_v40, %v18290_v3  ;;  %12195 = vst [vmem:[%s18491_s19 + $0x140] sm:$0xff] %v13578_v49 }
 0x35d   : > { %10001 = vmatpush1.bf16.msra.mxu1 %v20483_v52  ;;  %8883 = vmatmul.mubr.bf16.gmra.mrb[68].mxu0 %v20484_v29  ;;  %vm10666_vm4 = vcmp.ge.f32.partialorder %v13689_v35, 0.0  ;;  %v10964_v13 = vmul.f32 %v13689_v35, %v18334_v48  ;;  %vm10668_vm5 = vcmp.ge.f32.partialorder %v13753_v30, 0.0  ;;  %v10966_v62 = vmul.f32 %v13753_v30, %v18336_v36  ;;  %12196 = vst [vmem:[%s18491_s19 + $0x148] sm:$0xff] %v13579_v6  ;;  %v7593_v22 = vpop.f32.mrb[28].mxu0 }
 0x35e   : > { %9037 = vmatprep.subr.bf16.mxu0 %v20485_v56  ;;  %9848 = vmatmul.mubr.bf16.gmra.mrb[68].mxu1 %v20484_v29  ;;  %v11221_v7 = vsel %vm10667_vm3, %v13752_v28, %v10965_v51  ;;  %v13690_v20 = vadd.f32 %v7583_v61, %v18307_v33  ;;  %v13754_v0 = vadd.f32 %v8548_v17, %v18309_v27  ;;  %v8558_v17 = vpop.f32.mrb[28].mxu1 }
 0x35f   : > { %8892 = vmatprep.mubr.bf16.mxu0 %v15038_v26  ;;  %v13691_v16 = vadd.f32 %v7585_v54, %v18311_v15  ;;  %9857 = vmatprep.mubr.bf16.mxu1 %v15038_v26  ;;  %v11220_v18 = vsel %vm10666_vm4, %v13689_v35, %v10964_v13  ;;  %v11222_v14 = vsel %vm10668_vm5, %v13753_v30, %v10966_v62  ;;  %v7595_v54 = vpop.f32.mrb[29].mxu0  ;;  %v8560_v5 = vpop.f32.mrb[29].mxu1  ;;  %v20491_v26 = vld [vmem:[#allocation4_spill] sm:$0xff] }
 0x360   : > { %v13755_v24 = vadd.f32 %v8550_v12, %v18313_v46  ;;  %v13692_v57 = vadd.f32 %v7587_v55, %v18307_v33  ;;  %v20486_v2 = vcombine.high %v18295_v59, %v18300_v1  ;;  %v13582_v43 = vpack.c.bf16 %v11220_v18, %v11219_v41  ;;  %v7597_v49 = vpop.f32.mrb[30].mxu0 }
 0x361   : > { %v13583_v10 = vpack.c.bf16 %v11222_v14, %v11221_v7  ;;  %vm10673_vm6 = vcmp.ge.f32.partialorder %v13690_v20, 0.0  ;;  %v10971_v61 = vmul.f32 %v13690_v20, %v18330_v38  ;;  %v20487_v39 = vcombine.low %v18285_v40, %v18290_v3  ;;  %v18678_v35 = vpop.f32.mrb[31].mxu0 }
 0x362   : > { %10002 = vmatprep.subr.bf16.mxu1 %v20486_v2  ;;  %v20488_v12 = vcombine.low %v18295_v59, %v18300_v1  ;;  %vm10675_vm7 = vcmp.ge.f32.partialorder %v13754_v0, 0.0  ;;  %v10973_v55 = vmul.f32 %v13754_v0, %v18332_v63  ;;  %vm10674_vm8 = vcmp.ge.f32.partialorder %v13691_v16, 0.0  ;;  %12199 = vst [vmem:[%s18491_s19 + $0x160] sm:$0xff] %v13582_v43  ;;  %v18676_v1 = vpop.f32.mrb[30].mxu1 }
 0x363   : > { %9038 = vmatpush1.bf16.msra.mxu0 %v20487_v39  ;;  %v10972_v28 = vmul.f32 %v13691_v16, %v18334_v48  ;;  %v20489_v53 = vcombine.high %v18305_v50, %v18318_v21  ;;  %v20490_v40 = vcombine.high %v18323_v19, %v18328_v11  ;;  %12200 = vst [vmem:[%s18491_s19 + $0x168] sm:$0xff] %v13583_v10  ;;  %vm10676_vm9 = vcmp.ge.f32.partialorder %v13755_v24, 0.0  ;;  %v18683_v51 = vpop.f32.mrb[31].mxu1 }
 0x364   : > { %10003 = vmatpush1.bf16.msra.mxu1 %v20488_v12  ;;  %v11227_v3 = vsel %vm10673_vm6, %v13690_v20, %v10971_v61  ;;  %v10974_v59 = vmul.f32 %v13755_v24, %v18336_v36  ;;  %vm10681_vm10 = vcmp.ge.f32.partialorder %v13692_v57, 0.0  ;;  %v11229_v30 = vsel %vm10675_vm7, %v13754_v0, %v10973_v55 }
 0x365   : > { %9039 = vmatprep.subr.bf16.mxu0 %v20489_v53  ;;  %10004 = vmatprep.subr.bf16.mxu1 %v20490_v40  ;;  %v11228_v52 = vsel %vm10674_vm8, %v13691_v16, %v10972_v28  ;;  %v10979_v6 = vmul.f32 %v13692_v57, %v18330_v38  ;;  %v13756_v41 = vadd.f32 %v8552_v8, %v18309_v27  ;;  %v15039_v8 = vld [vmem:[%s15226_s30 + $0x30] sm:$0xff]   ;;  %v7603_v2 = vpop.f32.mrb[32].mxu0 }
 0x366   : > { %v13586_v29 = vpack.c.bf16 %v11228_v52, %v11227_v3  ;;  %v11230_v56 = vsel %vm10676_vm9, %v13755_v24, %v10974_v59  ;;  %v13693_v13 = vadd.f32 %v18627_v42, %v18311_v15  ;;  %v13757_v62 = vadd.f32 %v8554_v34, %v18313_v46  ;;  %8893 = vmatmul.mubr.bf16.gmra.mrb[72].mxu0 %v20491_v26  ;;  %v7605_v12 = vpop.f32.mrb[33].mxu0 }
 0x367   : > { %v13587_v7 = vpack.c.bf16 %v11230_v56, %v11229_v30  ;;  %v11235_v20 = vsel %vm10681_vm10, %v13692_v57, %v10979_v6  ;;  %vm10683_vm11 = vcmp.ge.f32.partialorder %v13756_v41, 0.0  ;;  %v10981_v0 = vmul.f32 %v13756_v41, %v18332_v63  ;;  %9858 = vmatmul.mubr.bf16.gmra.mrb[72].mxu1 %v20491_v26  ;;  %8902 = vmatprep.mubr.bf16.mxu0 %v15039_v8  ;;  %v7607_v55 = vpop.f32.mrb[34].mxu0 }
 0x368   : > { %12203 = vst [vmem:[%s18491_s19 + $0x180] sm:$0xff] %v13586_v29  ;;  %vm10682_vm12 = vcmp.ge.f32.partialorder %v13693_v13, 0.0  ;;  %v10980_v16 = vmul.f32 %v13693_v13, %v18334_v48  ;;  %vm10684_vm13 = vcmp.ge.f32.partialorder %v13757_v62, 0.0  ;;  %v10982_v42 = vmul.f32 %v13757_v62, %v18336_v36  ;;  %9867 = vmatprep.mubr.bf16.mxu1 %v15039_v8  ;;  %v18718_v40 = vpop.f32.mrb[35].mxu0  ;;  %v15040_v8 = vld [vmem:[%s15226_s30 + $0x3c] sm:$0xff]  }
 0x369   : > { %v20492_v34 = vcombine.low %v18305_v50, %v18318_v21  ;;  %12204 = vst [vmem:[%s18491_s19 + $0x188] sm:$0xff] %v13587_v7  ;;  %v11237_v18 = vsel %vm10683_vm11, %v13756_v41, %v10981_v0  ;;  %v13694_v14 = vadd.f32 %v7593_v22, %v18307_v33  ;;  %v13758_v24 = vadd.f32 %v8558_v17, %v18309_v27  ;;  %v8568_v21 = vpop.f32.mrb[32].mxu1 }
 0x36a   : > { %v13695_v57 = vadd.f32 %v7595_v54, %v18311_v15  ;;  %v20493_v43 = vcombine.low %v18323_v19, %v18328_v11  ;;  %v11236_v10 = vsel %vm10682_vm12, %v13693_v13, %v10980_v16  ;;  %v11238_v61 = vsel %vm10684_vm13, %v13757_v62, %v10982_v42  ;;  %v8570_v11 = vpop.f32.mrb[33].mxu1  ;;  %v20499_v13 = vld [vmem:[#allocation5_spill] sm:$0xff] }
 0x36b   : > { %9040 = vmatpush1.bf16.msra.mxu0 %v20492_v34  ;;  %v13759_v39 = vadd.f32 %v8560_v5, %v18313_v46  ;;  %v13696_v50 = vadd.f32 %v7597_v49, %v18307_v33  ;;  %v20494_v22 = vcombine.high %v18341_v23, %v18346_v58  ;;  %v13590_v17 = vpack.c.bf16 %v11236_v10, %v11235_v20  ;;  %v18716_v53 = vpop.f32.mrb[34].mxu1 }
 0x36c   : > { %10005 = vmatpush1.bf16.msra.mxu1 %v20493_v43  ;;  %v13591_v54 = vpack.c.bf16 %v11238_v61, %v11237_v18  ;;  %vm10689_vm14 = vcmp.ge.f32.partialorder %v13694_v14, 0.0  ;;  %v10987_v19 = vmul.f32 %v13694_v14, %v18330_v38  ;;  %v20495_v28 = vcombine.high %v18351_v37, %v18364_v9  ;;  %v18726_v52 = vpop.f32.mrb[35].mxu1 }
 0x36d   : > { %9041 = vmatprep.subr.bf16.mxu0 %v20494_v22  ;;  %vm10691_vm15 = vcmp.ge.f32.partialorder %v13758_v24, 0.0  ;;  %v10989_v5 = vmul.f32 %v13758_v24, %v18332_v63  ;;  %vm10690_vm0 = vcmp.ge.f32.partialorder %v13695_v57, 0.0  ;;  %v10988_v49 = vmul.f32 %v13695_v57, %v18334_v48  ;;  %12207 = vst [vmem:[%s18491_s19 + $0x1a0] sm:$0xff] %v13590_v17  ;;  %v18749_v16 = vpop.f32.mrb[36].mxu0 }
 0x36e   : > { %10006 = vmatprep.subr.bf16.mxu1 %v20495_v28  ;;  %v20496_v3 = vcombine.low %v18341_v23, %v18346_v58  ;;  %12208 = vst [vmem:[%s18491_s19 + $0x1a8] sm:$0xff] %v13591_v54  ;;  %v11243_v59 = vsel %vm10689_vm14, %v13694_v14, %v10987_v19  ;;  %vm10692_vm1 = vcmp.ge.f32.partialorder %v13759_v39, 0.0  ;;  %v10990_v30 = vmul.f32 %v13759_v39, %v18336_v36  ;;  %v7615_v43 = vpop.f32.mrb[37].mxu0 }
 0x36f   : > { %vm10697_vm2 = vcmp.ge.f32.partialorder %v13696_v50, 0.0  ;;  %v20497_v6 = vcombine.low %v18351_v37, %v18364_v9  ;;  %v20498_v41 = vcombine.high %v18369_v47, %v18374_v31  ;;  %v11245_v58 = vsel %vm10691_vm15, %v13758_v24, %v10989_v5  ;;  %8903 = vmatmul.mubr.bf16.gmra.mrb[76].mxu0 %v20499_v13  ;;  %9868 = vmatmul.mubr.bf16.gmra.mrb[76].mxu1 %v20499_v13  ;;  %v7617_v22 = vpop.f32.mrb[38].mxu0 }
 0x370   : > { %9042 = vmatpush1.bf16.msra.mxu0 %v20496_v3  ;;  %v11244_v23 = vsel %vm10690_vm0, %v13695_v57, %v10988_v49  ;;  %v10995_v29 = vmul.f32 %v13696_v50, %v18330_v38  ;;  %v13760_v56 = vadd.f32 %v18676_v1, %v18309_v27  ;;  %v11246_v26 = vsel %vm10692_vm1, %v13759_v39, %v10990_v30  ;;  %v8578_v57 = vpop.f32.mrb[36].mxu1  ;;  %v18772_v17 = vpop.f32.mrb[39].mxu0  ;;  %v20506_v3 = vld [vmem:[#allocation6_spill] sm:$0xff] }
 0x371   : > { %10007 = vmatpush1.bf16.msra.mxu1 %v20497_v6  ;;  %9043 = vmatprep.subr.bf16.mxu0 %v20498_v41  ;;  %v13594_v62 = vpack.c.bf16 %v11244_v23, %v11243_v59  ;;  %v13697_v9 = vadd.f32 %v18678_v35, %v18311_v15  ;;  %v13761_v37 = vadd.f32 %v18683_v51, %v18313_v46 }
 0x372   : > { %v13595_v7 = vpack.c.bf16 %v11246_v26, %v11245_v58  ;;  %v11251_v20 = vsel %vm10697_vm2, %v13696_v50, %v10995_v29  ;;  %vm10699_vm3 = vcmp.ge.f32.partialorder %v13760_v56, 0.0  ;;  %v10997_v0 = vmul.f32 %v13760_v56, %v18332_v63  ;;  %8912 = vmatprep.mubr.bf16.mxu0 %v15040_v8  ;;  %9877 = vmatprep.mubr.bf16.mxu1 %v15040_v8  ;;  %v20509_v26 = vld [vmem:[#allocation84_spill] sm:$0xff] }
 0x373   : > { %12211 = vst [vmem:[%s18491_s19 + $0x1c0] sm:$0xff] %v13594_v62  ;;  %vm10698_vm4 = vcmp.ge.f32.partialorder %v13697_v9, 0.0  ;;  %v10996_v1 = vmul.f32 %v13697_v9, %v18334_v48  ;;  %vm10700_vm5 = vcmp.ge.f32.partialorder %v13761_v37, 0.0  ;;  %v10998_v35 = vmul.f32 %v13761_v37, %v18336_v36 }
 0x374   : > { %v20500_v51 = vcombine.high %v18387_v45, %v18392_v60  ;;  %v20501_v42 = vcombine.low %v18369_v47, %v18374_v31  ;;  %12212 = vst [vmem:[%s18491_s19 + $0x1c8] sm:$0xff] %v13595_v7  ;;  %v11253_v34 = vsel %vm10699_vm3, %v13760_v56, %v10997_v0  ;;  %v13698_v18 = vadd.f32 %v7603_v2, %v18307_v33  ;;  %v8580_v31 = vpop.f32.mrb[37].mxu1  ;;  %v20512_v0 = vld [vmem:[#allocation86_spill] sm:$0xff] }
 0x375   : > { %v13762_v14 = vadd.f32 %v8568_v21, %v18309_v27  ;;  %v13699_v24 = vadd.f32 %v7605_v12, %v18311_v15  ;;  %v20502_v10 = vcombine.low %v18387_v45, %v18392_v60  ;;  %v11252_v61 = vsel %vm10698_vm4, %v13697_v9, %v10996_v1  ;;  %v18770_v45 = vpop.f32.mrb[38].mxu1  ;;  %v18801_v62 = vpop.f32.mrb[40].mxu0 }
 0x376   : > { %10008 = vmatprep.subr.bf16.mxu1 %v20500_v51  ;;  %9044 = vmatpush1.bf16.msra.mxu0 %v20501_v42  ;;  %v11254_v39 = vsel %vm10700_vm5, %v13761_v37, %v10998_v35  ;;  %v13763_v50 = vadd.f32 %v8570_v11, %v18313_v46  ;;  %v13700_v47 = vadd.f32 %v7607_v55, %v18307_v33  ;;  %vm10705_vm6 = vcmp.ge.f32.partialorder %v13698_v18, 0.0  ;;  %v18779_v55 = vpop.f32.mrb[39].mxu1  ;;  %v18811_v7 = vpop.f32.mrb[41].mxu0 }
 0x377   : > { %10009 = vmatpush1.bf16.msra.mxu1 %v20502_v10  ;;  %v20503_v2 = vcombine.high %v18397_v4, %v18411_v44  ;;  %v13598_v21 = vpack.c.bf16 %v11252_v61, %v11251_v20  ;;  %v13599_v12 = vpack.c.bf16 %v11254_v39, %v11253_v34  ;;  %v11003_v60 = vmul.f32 %v13698_v18, %v18330_v38  ;;  %v18809_v37 = vpop.f32.mrb[40].mxu1  ;;  %v20511_v20 = vld [vmem:[#allocation85_spill] sm:$0xff] }
 0x378   : > { %v20504_v54 = vcombine.high %v18416_v25, %v18421_v32  ;;  %vm10707_vm7 = vcmp.ge.f32.partialorder %v13762_v14, 0.0  ;;  %v11005_v19 = vmul.f32 %v13762_v14, %v18332_v63  ;;  %vm10706_vm8 = vcmp.ge.f32.partialorder %v13699_v24, 0.0  ;;  %8913 = vmatmul.mubr.bf16.gmra.mrb[80].mxu0 %v20506_v3  ;;  %9878 = vmatmul.mubr.bf16.gmra.mrb[80].mxu1 %v20506_v3 }
 0x379   : > { %9045 = vmatprep.subr.bf16.mxu0 %v20503_v2  ;;  %v11004_v11 = vmul.f32 %v13699_v24, %v18334_v48  ;;  %v20505_v28 = vcombine.low %v18397_v4, %v18411_v44  ;;  %12215 = vst [vmem:[%s18491_s19 + $0x1e0] sm:$0xff] %v13598_v21  ;;  %12216 = vst [vmem:[%s18491_s19 + $0x1e8] sm:$0xff] %v13599_v12  ;;  %v11259_v5 = vsel %vm10705_vm6, %v13698_v18, %v11003_v60  ;;  %v8590_v18 = vpop.f32.mrb[41].mxu1  ;;  %v20516_v60 = vld [vmem:[#allocation7_spill] sm:$0xff] }
 0x37a   : > { %10010 = vmatprep.subr.bf16.mxu1 %v20504_v54  ;;  %vm10708_vm9 = vcmp.ge.f32.partialorder %v13763_v50, 0.0  ;;  %v11006_v49 = vmul.f32 %v13763_v50, %v18336_v36  ;;  %vm10713_vm10 = vcmp.ge.f32.partialorder %v13700_v47, 0.0  ;;  %v20507_v59 = vcombine.low %v18416_v25, %v18421_v32  ;;  %v15041_v25 = vld [vmem:[%s15226_s30 + $0x48] sm:$0xff]  }
 0x37b   : > { %9046 = vmatpush1.bf16.msra.mxu0 %v20505_v28  ;;  %v11261_v30 = vsel %vm10707_vm7, %v13762_v14, %v11005_v19  ;;  %v11260_v6 = vsel %vm10706_vm8, %v13699_v24, %v11004_v11  ;;  %v11011_v41 = vmul.f32 %v13700_v47, %v18330_v38  ;;  %v13764_v44 = vadd.f32 %v18716_v53, %v18309_v27  ;;  %v20508_v53 = vld [vmem:[#allocation83_spill] sm:$0xff]  ;;  %v7627_v14 = vpop.f32.mrb[42].mxu0  ;;  %v15042_v19 = vld [vmem:[%s15226_s30 + $0x54] sm:$0xff]  }
 0x37c   : > { %10011 = vmatpush1.bf16.msra.mxu1 %v20507_v59  ;;  %v13602_v4 = vpack.c.bf16 %v11260_v6, %v11259_v5  ;;  %v11262_v58 = vsel %vm10708_vm9, %v13763_v50, %v11006_v49  ;;  %v13701_v23 = vadd.f32 %v18718_v40, %v18311_v15  ;;  %v13765_v29 = vadd.f32 %v18726_v52, %v18313_v46 }
 0x37d   : > { %8922 = vmatprep.mubr.bf16.mxu0 %v15041_v25  ;;  %v13603_v32 = vpack.c.bf16 %v11262_v58, %v11261_v30  ;;  %v11267_v56 = vsel %vm10713_vm10, %v13700_v47, %v11011_v41  ;;  %vm10715_vm11 = vcmp.ge.f32.partialorder %v13764_v44, 0.0  ;;  %v11013_v13 = vmul.f32 %v13764_v44, %v18332_v63  ;;  %9887 = vmatprep.mubr.bf16.mxu1 %v15041_v25 }
 0x37e   : > { %v20510_v9 = vcombine.high %v20508_v53, %v20509_v26  ;;  %12219 = vst [vmem:[%s18491_s19 + $0x200] sm:$0xff] %v13602_v4  ;;  %vm10714_vm12 = vcmp.ge.f32.partialorder %v13701_v23, 0.0  ;;  %v11012_v40 = vmul.f32 %v13701_v23, %v18334_v48  ;;  %vm10716_vm13 = vcmp.ge.f32.partialorder %v13765_v29, 0.0 }
 0x37f   : > { %v11014_v52 = vmul.f32 %v13765_v29, %v18336_v36  ;;  %v20513_v8 = vcombine.high %v20511_v20, %v20512_v0  ;;  %v20514_v1 = vcombine.low %v20508_v53, %v20509_v26  ;;  %12220 = vst [vmem:[%s18491_s19 + $0x208] sm:$0xff] %v13603_v32  ;;  %v11269_v35 = vsel %vm10715_vm11, %v13764_v44, %v11013_v13 }
 0x380   : > { %9047 = vmatprep.subr.bf16.mxu0 %v20510_v9  ;;  %v13702_v51 = vadd.f32 %v18749_v16, %v18307_v33  ;;  %v13766_v42 = vadd.f32 %v8578_v57, %v18309_v27  ;;  %v13703_v34 = vadd.f32 %v7615_v43, %v18311_v15  ;;  %v20515_v24 = vcombine.low %v20511_v20, %v20512_v0  ;;  %v18830_v16 = vpop.f32.mrb[42].mxu1  ;;  %v18832_v57 = vpop.f32.mrb[43].mxu0 }
 0x381   : > { %10012 = vmatprep.subr.bf16.mxu1 %v20513_v8  ;;  %9048 = vmatpush1.bf16.msra.mxu0 %v20514_v1  ;;  %v11268_v10 = vsel %vm10714_vm12, %v13701_v23, %v11012_v40  ;;  %v11270_v61 = vsel %vm10716_vm13, %v13765_v29, %v11014_v52  ;;  %v13767_v39 = vadd.f32 %v8580_v31, %v18313_v46  ;;  %v18835_v21 = vpop.f32.mrb[43].mxu1  ;;  %v18852_v41 = vpop.f32.mrb[44].mxu0  ;;  %v20517_v1 = vld [vmem:[#allocation8_spill] sm:$0xff] }
 0x382   : > { %10013 = vmatpush1.bf16.msra.mxu1 %v20515_v24  ;;  %v13704_v50 = vadd.f32 %v7617_v22, %v18307_v33  ;;  %v13606_v43 = vpack.c.bf16 %v11268_v10, %v11267_v56  ;;  %v13607_v47 = vpack.c.bf16 %v11270_v61, %v11269_v35  ;;  %vm10721_vm14 = vcmp.ge.f32.partialorder %v13702_v51, 0.0  ;;  %8923 = vmatmul.mubr.bf16.gmra.mrb[84].mxu0 %v20516_v60  ;;  %v18855_v23 = vpop.f32.mrb[44].mxu1 }
 0x383   : > { %v11019_v2 = vmul.f32 %v13702_v51, %v18330_v38  ;;  %vm10723_vm15 = vcmp.ge.f32.partialorder %v13766_v42, 0.0  ;;  %v11021_v12 = vmul.f32 %v13766_v42, %v18332_v63  ;;  %vm10722_vm0 = vcmp.ge.f32.partialorder %v13703_v34, 0.0  ;;  %9888 = vmatmul.mubr.bf16.gmra.mrb[84].mxu1 %v20516_v60  ;;  %8932 = vmatprep.mubr.bf16.mxu0 %v15042_v19  ;;  %v18862_v25 = vpop.f32.mrb[45].mxu1 }
 0x384   : > { %v11020_v31 = vmul.f32 %v13703_v34, %v18334_v48  ;;  %12223 = vst [vmem:[%s18491_s19 + $0x220] sm:$0xff] %v13606_v43  ;;  %12224 = vst [vmem:[%s18491_s19 + $0x228] sm:$0xff] %v13607_v47  ;;  %vm10724_vm1 = vcmp.ge.f32.partialorder %v13767_v39, 0.0  ;;  %v11022_v54 = vmul.f32 %v13767_v39, %v18336_v36  ;;  %vm10729_vm2 = vcmp.ge.f32.partialorder %v13704_v50, 0.0  ;;  %9897 = vmatprep.mubr.bf16.mxu1 %v15042_v19  ;;  %v18873_v26 = vpop.f32.mrb[46].mxu1 }
 0x385   : > { %v11275_v22 = vsel %vm10721_vm14, %v13702_v51, %v11019_v2  ;;  %v11277_v11 = vsel %vm10723_vm15, %v13766_v42, %v11021_v12  ;;  %v11027_v5 = vmul.f32 %v13704_v50, %v18330_v38  ;;  %v13768_v49 = vadd.f32 %v18770_v45, %v18309_v27  ;;  %v18857_v45 = vpop.f32.mrb[45].mxu0  ;;  %v15043_v42 = vld [vmem:[%s15226_s30 + $0x60] sm:$0xff]  }
 0x386   : > { %v11276_v28 = vsel %vm10722_vm0, %v13703_v34, %v11020_v31  ;;  %v11278_v59 = vsel %vm10724_vm1, %v13767_v39, %v11022_v54  ;;  %v13705_v30 = vadd.f32 %v18772_v17, %v18311_v15  ;;  %v13769_v6 = vadd.f32 %v18779_v55, %v18313_v46  ;;  %v18864_v55 = vpop.f32.mrb[46].mxu0 }
 0x387   : > { %v13610_v3 = vpack.c.bf16 %v11276_v28, %v11275_v22  ;;  %v13611_v44 = vpack.c.bf16 %v11278_v59, %v11277_v11  ;;  %v11283_v4 = vsel %vm10729_vm2, %v13704_v50, %v11027_v5  ;;  %vm10731_vm3 = vcmp.ge.f32.partialorder %v13768_v49, 0.0  ;;  %v18875_v9 = vpop.f32.mrb[47].mxu0 }
 0x388   : > { %v11029_v58 = vmul.f32 %v13768_v49, %v18332_v63  ;;  %vm10730_vm4 = vcmp.ge.f32.partialorder %v13705_v30, 0.0  ;;  %v11028_v29 = vmul.f32 %v13705_v30, %v18334_v48  ;;  %vm10732_vm5 = vcmp.ge.f32.partialorder %v13769_v6, 0.0  ;;  %v18893_v39 = vpop.f32.mrb[48].mxu0 }
 0x389   : > { %12227 = vst [vmem:[%s18491_s19 + $0x240] sm:$0xff] %v13610_v3  ;;  %v11030_v17 = vmul.f32 %v13769_v6, %v18336_v36  ;;  %12228 = vst [vmem:[%s18491_s19 + $0x248] sm:$0xff] %v13611_v44  ;;  %v13706_v56 = vadd.f32 %v18801_v62, %v18307_v33  ;;  %v13770_v13 = vadd.f32 %v18809_v37, %v18309_v27  ;;  %v18879_v62 = vpop.f32.mrb[47].mxu1  ;;  %v18901_v31 = vpop.f32.mrb[49].mxu0 }
 0x38a   : > { %v11285_v32 = vsel %vm10731_vm3, %v13768_v49, %v11029_v58  ;;  %v13707_v53 = vadd.f32 %v18811_v7, %v18311_v15  ;;  %v11284_v40 = vsel %vm10730_vm4, %v13705_v30, %v11028_v29  ;;  %v13771_v20 = vadd.f32 %v8590_v18, %v18313_v46  ;;  %8933 = vmatmul.mubr.bf16.gmra.mrb[88].mxu0 %v20517_v1  ;;  %v18899_v12 = vpop.f32.mrb[48].mxu1  ;;  %v18906_v19 = vpop.f32.mrb[50].mxu0  ;;  %v20518_v29 = vld [vmem:[#allocation9_spill] sm:$0xff] }
 0x38b   : > { %v11286_v52 = vsel %vm10732_vm5, %v13769_v6, %v11030_v17  ;;  %v13708_v0 = vadd.f32 %v7627_v14, %v18307_v33  ;;  %v13614_v8 = vpack.c.bf16 %v11284_v40, %v11283_v4  ;;  %vm10737_vm6 = vcmp.ge.f32.partialorder %v13706_v56, 0.0  ;;  %9898 = vmatmul.mubr.bf16.gmra.mrb[88].mxu1 %v20517_v1  ;;  %8942 = vmatprep.mubr.bf16.mxu0 %v15043_v42  ;;  %v18904_v54 = vpop.f32.mrb[49].mxu1  ;;  %v18913_v28 = vpop.f32.mrb[51].mxu0 }
 0x38c   : > { %v13615_v37 = vpack.c.bf16 %v11286_v52, %v11285_v32  ;;  %v11035_v7 = vmul.f32 %v13706_v56, %v18330_v38  ;;  %vm10739_vm7 = vcmp.ge.f32.partialorder %v13770_v13, 0.0  ;;  %v11037_v35 = vmul.f32 %v13770_v13, %v18332_v63  ;;  %9907 = vmatprep.mubr.bf16.mxu1 %v15043_v42  ;;  %v18911_v11 = vpop.f32.mrb[50].mxu1 }
 0x38d   : > { %vm10738_vm8 = vcmp.ge.f32.partialorder %v13707_v53, 0.0  ;;  %v11036_v51 = vmul.f32 %v13707_v53, %v18334_v48  ;;  %12231 = vst [vmem:[%s18491_s19 + $0x260] sm:$0xff] %v13614_v8  ;;  %vm10740_vm9 = vcmp.ge.f32.partialorder %v13771_v20, 0.0  ;;  %v11038_v18 = vmul.f32 %v13771_v20, %v18336_v36  ;;  %v18922_v30 = vpop.f32.mrb[51].mxu1 }
 0x38e   : > { %12232 = vst [vmem:[%s18491_s19 + $0x268] sm:$0xff] %v13615_v37  ;;  %v11291_v34 = vsel %vm10737_vm6, %v13706_v56, %v11035_v7  ;;  %vm10745_vm10 = vcmp.ge.f32.partialorder %v13708_v0, 0.0  ;;  %v11293_v14 = vsel %vm10739_vm7, %v13770_v13, %v11037_v35  ;;  %v11043_v10 = vmul.f32 %v13708_v0, %v18330_v38  ;;  %v18937_v13 = vpop.f32.mrb[52].mxu0 }
 0x38f   : > { %v11292_v24 = vsel %vm10738_vm8, %v13707_v53, %v11036_v51  ;;  %v13772_v61 = vadd.f32 %v18830_v16, %v18309_v27  ;;  %v11294_v43 = vsel %vm10740_vm9, %v13771_v20, %v11038_v18  ;;  %v13709_v47 = vadd.f32 %v18832_v57, %v18311_v15  ;;  %v18944_v8 = vpop.f32.mrb[53].mxu0 }
 0x390   : > { %v13618_v50 = vpack.c.bf16 %v11292_v24, %v11291_v34  ;;  %v13773_v2 = vadd.f32 %v18835_v21, %v18313_v46  ;;  %v13619_v60 = vpack.c.bf16 %v11294_v43, %v11293_v14  ;;  %v11299_v22 = vsel %vm10745_vm10, %v13708_v0, %v11043_v10  ;;  %v18942_v0 = vpop.f32.mrb[52].mxu1  ;;  %v18952_v42 = vpop.f32.mrb[54].mxu0 }
 0x391   : > { %vm10747_vm11 = vcmp.ge.f32.partialorder %v13772_v61, 0.0  ;;  %v11045_v16 = vmul.f32 %v13772_v61, %v18332_v63  ;;  %vm10746_vm12 = vcmp.ge.f32.partialorder %v13709_v47, 0.0  ;;  %v11044_v57 = vmul.f32 %v13709_v47, %v18334_v48  ;;  %v18950_v51 = vpop.f32.mrb[53].mxu1  ;;  %v18957_v24 = vpop.f32.mrb[55].mxu0 }
 0x392   : > { %12235 = vst [vmem:[%s18491_s19 + $0x280] sm:$0xff] %v13618_v50  ;;  %vm10748_vm13 = vcmp.ge.f32.partialorder %v13773_v2, 0.0  ;;  %v11046_v21 = vmul.f32 %v13773_v2, %v18336_v36  ;;  %12236 = vst [vmem:[%s18491_s19 + $0x288] sm:$0xff] %v13619_v60  ;;  %v13710_v49 = vadd.f32 %v18852_v41, %v18307_v33  ;;  %v13774_v3 = vadd.f32 %v18855_v23, %v18309_v27  ;;  %v18955_v14 = vpop.f32.mrb[54].mxu1 }
 0x393   : > { %v11301_v5 = vsel %vm10747_vm11, %v13772_v61, %v11045_v16  ;;  %v13711_v59 = vadd.f32 %v18857_v45, %v18311_v15  ;;  %v11300_v6 = vsel %vm10746_vm12, %v13709_v47, %v11044_v57  ;;  %v13775_v4 = vadd.f32 %v18862_v25, %v18313_v46  ;;  %8943 = vmatmul.mubr.bf16.gmra.mrb[92].mxu0 %v20518_v29  ;;  %v15044_v45 = vld [vmem:[%s15226_s30 + $0x6c] sm:$0xff]   ;;  %v18962_v10 = vpop.f32.mrb[55].mxu1 }
 0x394   : > { %v11302_v44 = vsel %vm10748_vm13, %v13773_v2, %v11046_v21  ;;  %v13712_v58 = vadd.f32 %v18864_v55, %v18307_v33  ;;  %v13622_v41 = vpack.c.bf16 %v11300_v6, %v11299_v22  ;;  %vm10753_vm14 = vcmp.ge.f32.partialorder %v13710_v49, 0.0  ;;  %9908 = vmatmul.mubr.bf16.gmra.mrb[92].mxu1 %v20518_v29  ;;  %8952 = vmatprep.mubr.bf16.mxu0 %v15044_v45  ;;  %v20519_v2 = vld [vmem:[#allocation10_spill] sm:$0xff] }
 0x395   : > { %v13623_v17 = vpack.c.bf16 %v11302_v44, %v11301_v5  ;;  %v11051_v23 = vmul.f32 %v13710_v49, %v18330_v38  ;;  %vm10755_vm15 = vcmp.ge.f32.partialorder %v13774_v3, 0.0  ;;  %v11053_v32 = vmul.f32 %v13774_v3, %v18332_v63  ;;  %9917 = vmatprep.mubr.bf16.mxu1 %v15044_v45 }
 0x396   : > { %vm10754_vm0 = vcmp.ge.f32.partialorder %v13711_v59, 0.0  ;;  %v11052_v25 = vmul.f32 %v13711_v59, %v18334_v48  ;;  %12239 = vst [vmem:[%s18491_s19 + $0x2a0] sm:$0xff] %v13622_v41  ;;  %vm10756_vm1 = vcmp.ge.f32.partialorder %v13775_v4, 0.0  ;;  %v11054_v56 = vmul.f32 %v13775_v4, %v18336_v36 }
 0x397   : > { %12240 = vst [vmem:[%s18491_s19 + $0x2a8] sm:$0xff] %v13623_v17  ;;  %v11307_v55 = vsel %vm10753_vm14, %v13710_v49, %v11051_v23  ;;  %vm10761_vm2 = vcmp.ge.f32.partialorder %v13712_v58, 0.0  ;;  %v11309_v53 = vsel %vm10755_vm15, %v13774_v3, %v11053_v32  ;;  %v11059_v52 = vmul.f32 %v13712_v58, %v18330_v38  ;;  %v18981_v49 = vpop.f32.mrb[56].mxu0 }
 0x398   : > { %v11308_v40 = vsel %vm10754_vm0, %v13711_v59, %v11052_v25  ;;  %v13776_v20 = vadd.f32 %v18873_v26, %v18309_v27  ;;  %v11310_v7 = vsel %vm10756_vm1, %v13775_v4, %v11054_v56  ;;  %v13713_v1 = vadd.f32 %v18875_v9, %v18311_v15  ;;  %v18986_v59 = vpop.f32.mrb[56].mxu1  ;;  %v18988_v6 = vpop.f32.mrb[57].mxu0 }
 0x399   : > { %v13626_v37 = vpack.c.bf16 %v11308_v40, %v11307_v55  ;;  %v13777_v35 = vadd.f32 %v18879_v62, %v18313_v46  ;;  %v13627_v34 = vpack.c.bf16 %v11310_v7, %v11309_v53  ;;  %v11315_v18 = vsel %vm10761_vm2, %v13712_v58, %v11059_v52  ;;  %v18993_v41 = vpop.f32.mrb[57].mxu1  ;;  %v18995_v17 = vpop.f32.mrb[58].mxu0 }
 0x39a   : > { %vm10763_vm3 = vcmp.ge.f32.partialorder %v13776_v20, 0.0  ;;  %v11061_v26 = vmul.f32 %v13776_v20, %v18332_v63  ;;  %vm10762_vm4 = vcmp.ge.f32.partialorder %v13713_v1, 0.0  ;;  %v11060_v9 = vmul.f32 %v13713_v1, %v18334_v48  ;;  %v19001_v55 = vpop.f32.mrb[58].mxu1  ;;  %v19003_v56 = vpop.f32.mrb[59].mxu0 }
 0x39b   : > { %12243 = vst [vmem:[%s18491_s19 + $0x2c0] sm:$0xff] %v13626_v37  ;;  %vm10764_vm5 = vcmp.ge.f32.partialorder %v13777_v35, 0.0  ;;  %v11062_v62 = vmul.f32 %v13777_v35, %v18336_v36  ;;  %12244 = vst [vmem:[%s18491_s19 + $0x2c8] sm:$0xff] %v13627_v34  ;;  %v13714_v50 = vadd.f32 %v18893_v39, %v18307_v33  ;;  %v13778_v43 = vadd.f32 %v18899_v12, %v18309_v27  ;;  %v19007_v52 = vpop.f32.mrb[59].mxu1 }
 0x39c   : > { %v11317_v61 = vsel %vm10763_vm3, %v13776_v20, %v11061_v26  ;;  %v13715_v47 = vadd.f32 %v18901_v31, %v18311_v15  ;;  %8953 = vmatmul.mubr.bf16.gmra.mrb[96].mxu0 %v20519_v2  ;;  %v11316_v60 = vsel %vm10762_vm4, %v13713_v1, %v11060_v9  ;;  %v13779_v16 = vadd.f32 %v18904_v54, %v18313_v46  ;;  %v15045_v31 = vld [vmem:[%s15226_s30 + $0x78] sm:$0xff]   ;;  %v20520_v20 = vld [vmem:[#allocation11_spill] sm:$0xff] }
 0x39d   : > { %v11318_v22 = vsel %vm10764_vm5, %v13777_v35, %v11062_v62  ;;  %v13716_v57 = vadd.f32 %v18906_v19, %v18307_v33  ;;  %9918 = vmatmul.mubr.bf16.gmra.mrb[96].mxu1 %v20519_v2  ;;  %v13630_v39 = vpack.c.bf16 %v11316_v60, %v11315_v18  ;;  %vm10769_vm6 = vcmp.ge.f32.partialorder %v13714_v50, 0.0  ;;  %8962 = vmatprep.mubr.bf16.mxu0 %v15045_v31  ;;  %v15046_v62 = vld [vmem:[%s15226_s30 + $0x84] sm:$0xff]  }
 0x39e   : > { %v13631_v21 = vpack.c.bf16 %v11318_v22, %v11317_v61  ;;  %v11067_v12 = vmul.f32 %v13714_v50, %v18330_v38  ;;  %9927 = vmatprep.mubr.bf16.mxu1 %v15045_v31  ;;  %vm10771_vm7 = vcmp.ge.f32.partialorder %v13778_v43, 0.0  ;;  %v11069_v5 = vmul.f32 %v13778_v43, %v18332_v63 }
 0x39f   : > { %vm10770_vm8 = vcmp.ge.f32.partialorder %v13715_v47, 0.0  ;;  %v11068_v54 = vmul.f32 %v13715_v47, %v18334_v48  ;;  %12247 = vst [vmem:[%s18491_s19 + $0x2e0] sm:$0xff] %v13630_v39  ;;  %vm10772_vm9 = vcmp.ge.f32.partialorder %v13779_v16, 0.0  ;;  %v11070_v3 = vmul.f32 %v13779_v16, %v18336_v36 }
 0x3a0   : > { %12248 = vst [vmem:[%s18491_s19 + $0x2e8] sm:$0xff] %v13631_v21  ;;  %v11323_v19 = vsel %vm10769_vm6, %v13714_v50, %v11067_v12  ;;  %vm10777_vm10 = vcmp.ge.f32.partialorder %v13716_v57, 0.0  ;;  %v11325_v44 = vsel %vm10771_vm7, %v13778_v43, %v11069_v5  ;;  %v11075_v58 = vmul.f32 %v13716_v57, %v18330_v38  ;;  %v19031_v43 = vpop.f32.mrb[60].mxu1  ;;  %v3541_v12 = vld [vmem:[%s20204_s1 + $0xa10] sm:$0xff] }
 0x3a1   : > { %v11324_v4 = vsel %vm10770_vm8, %v13715_v47, %v11068_v54  ;;  %v13780_v29 = vadd.f32 %v18911_v11, %v18309_v27  ;;  %v11326_v45 = vsel %vm10772_vm9, %v13779_v16, %v11070_v3  ;;  %v13717_v32 = vadd.f32 %v18913_v28, %v18311_v15  ;;  %v19038_v60 = vpop.f32.mrb[61].mxu1 }
 0x3a2   : > { %v13634_v23 = vpack.c.bf16 %v11324_v4, %v11323_v19  ;;  %v13781_v25 = vadd.f32 %v18922_v30, %v18313_v46  ;;  %v13635_v53 = vpack.c.bf16 %v11326_v45, %v11325_v44  ;;  %v11331_v11 = vsel %vm10777_vm10, %v13716_v57, %v11075_v58  ;;  %v19048_v31 = vpop.f32.mrb[62].mxu1  ;;  %v3542_v4 = vld [vmem:[%s20204_s1 + $0xa18] sm:$0xff]  ;;  %v20521_v45 = vld [vmem:[#allocation12_spill] sm:$0xff] }
 0x3a3   : > { %vm10779_vm11 = vcmp.ge.f32.partialorder %v13780_v29, 0.0  ;;  %v11077_v40 = vmul.f32 %v13780_v29, %v18332_v63  ;;  %vm10778_vm12 = vcmp.ge.f32.partialorder %v13717_v32, 0.0  ;;  %v11076_v28 = vmul.f32 %v13717_v32, %v18334_v48  ;;  %v3546_v58 = vld [vmem:[%s20204_s1 + $0xa38] sm:$0xff] }
 0x3a4   : > { %12251 = vst [vmem:[%s18491_s19 + $0x300] sm:$0xff] %v13634_v23  ;;  %vm10780_vm13 = vcmp.ge.f32.partialorder %v13781_v25, 0.0  ;;  %v11078_v30 = vmul.f32 %v13781_v25, %v18336_v36  ;;  %8963 = vmatmul.mubr.bf16.gmra.mrb[100].mxu0 %v20520_v20  ;;  %12252 = vst [vmem:[%s18491_s19 + $0x308] sm:$0xff] %v13635_v53  ;;  %v13718_v7 = vadd.f32 %v18937_v13, %v18307_v33  ;;  %v15047_v53 = vld [vmem:[%s15226_s30 + $0x90] sm:$0xff]  }
 0x3a5   : > { %v11333_v37 = vsel %vm10779_vm11, %v13780_v29, %v11077_v40  ;;  %v13782_v1 = vadd.f32 %v18942_v0, %v18309_v27  ;;  %v13719_v35 = vadd.f32 %v18944_v8, %v18311_v15  ;;  %9928 = vmatmul.mubr.bf16.gmra.mrb[100].mxu1 %v20520_v20  ;;  %v11332_v34 = vsel %vm10778_vm12, %v13717_v32, %v11076_v28  ;;  %v19027_v8 = vpop.f32.mrb[60].mxu0  ;;  %v19065_v29 = vpop.f32.mrb[63].mxu1 }
 0x3a6   : > { %v11334_v18 = vsel %vm10780_vm13, %v13781_v25, %v11078_v30  ;;  %v13783_v26 = vadd.f32 %v18950_v51, %v18313_v46  ;;  %v13720_v9 = vadd.f32 %v18952_v42, %v18307_v33  ;;  %8972 = vmatprep.mubr.bf16.mxu0 %v15046_v62  ;;  %v13638_v13 = vpack.c.bf16 %v11332_v34, %v11331_v11  ;;  %v19033_v42 = vpop.f32.mrb[61].mxu0 }
 0x3a7   : > { %v13639_v61 = vpack.c.bf16 %v11334_v18, %v11333_v37  ;;  %vm10785_vm14 = vcmp.ge.f32.partialorder %v13718_v7, 0.0  ;;  %v11083_v0 = vmul.f32 %v13718_v7, %v18330_v38  ;;  %9937 = vmatprep.mubr.bf16.mxu1 %v15046_v62  ;;  %vm10787_vm15 = vcmp.ge.f32.partialorder %v13782_v1, 0.0  ;;  %v19040_v22 = vpop.f32.mrb[62].mxu0 }
 0x3a8   : > { %v11085_v50 = vmul.f32 %v13782_v1, %v18332_v63  ;;  %vm10786_vm0 = vcmp.ge.f32.partialorder %v13719_v35, 0.0  ;;  %v11084_v51 = vmul.f32 %v13719_v35, %v18334_v48  ;;  %12255 = vst [vmem:[%s18491_s19 + $0x320] sm:$0xff] %v13638_v13  ;;  %vm10788_vm1 = vcmp.ge.f32.partialorder %v13783_v26, 0.0  ;;  %v19050_v5 = vpop.f32.mrb[63].mxu0 }
 0x3a9   : > { %12256 = vst [vmem:[%s18491_s19 + $0x328] sm:$0xff] %v13639_v61  ;;  %v11339_v47 = vsel %vm10785_vm14, %v13718_v7, %v11083_v0  ;;  %v11086_v2 = vmul.f32 %v13783_v26, %v18336_v36  ;;  %vm10793_vm2 = vcmp.ge.f32.partialorder %v13720_v9, 0.0  ;;  %v11091_v39 = vmul.f32 %v13720_v9, %v18330_v38 }
 0x3aa   : > { %v11341_v16 = vsel %vm10787_vm15, %v13782_v1, %v11085_v50  ;;  %v11340_v57 = vsel %vm10786_vm0, %v13719_v35, %v11084_v51  ;;  %v13784_v21 = vadd.f32 %v18955_v14, %v18309_v27  ;;  %v13721_v3 = vadd.f32 %v18957_v24, %v18311_v15  ;;  %v3545_v14 = vld [vmem:[%s20204_s1 + $0xa30] sm:$0xff] }
 0x3ab   : > { %v13642_v54 = vpack.c.bf16 %v11340_v57, %v11339_v47  ;;  %v11342_v19 = vsel %vm10788_vm1, %v13783_v26, %v11086_v2  ;;  %v13785_v44 = vadd.f32 %v18962_v10, %v18313_v46  ;;  %v11347_v23 = vsel %vm10793_vm2, %v13720_v9, %v11091_v39  ;;  %v3549_v51 = vld [vmem:[%s20204_s1 + $0xa50] sm:$0xff] }
 0x3ac   : > { %v13643_v24 = vpack.c.bf16 %v11342_v19, %v11341_v16  ;;  %vm10795_vm3 = vcmp.ge.f32.partialorder %v13784_v21, 0.0  ;;  %v11093_v10 = vmul.f32 %v13784_v21, %v18332_v63  ;;  %8973 = vmatmul.mubr.bf16.gmra.mrb[104].mxu0 %v20521_v45  ;;  %vm10794_vm4 = vcmp.ge.f32.partialorder %v13721_v3, 0.0  ;;  %v20522_v47 = vld [vmem:[#allocation13_spill] sm:$0xff]  ;;  %v15048_v19 = vld [vmem:[%s15226_s30 + $0x9c] sm:$0xff]  }
 0x3ad   : > { %12259 = vst [vmem:[%s18491_s19 + $0x340] sm:$0xff] %v13642_v54  ;;  %v11092_v32 = vmul.f32 %v13721_v3, %v18334_v48  ;;  %vm10796_vm5 = vcmp.ge.f32.partialorder %v13785_v44, 0.0  ;;  %v11094_v25 = vmul.f32 %v13785_v44, %v18336_v36  ;;  %9938 = vmatmul.mubr.bf16.gmra.mrb[104].mxu1 %v20521_v45  ;;  %8982 = vmatprep.mubr.bf16.mxu0 %v15047_v53 }
 0x3ae   : > { %12260 = vst [vmem:[%s18491_s19 + $0x348] sm:$0xff] %v13643_v24  ;;  %v11349_v11 = vsel %vm10795_vm3, %v13784_v21, %v11093_v10  ;;  %v13155_v40 = vcombine.low %v3541_v12, %v3545_v14  ;;  %v13156_v28 = vcombine.high %v3541_v12, %v3545_v14  ;;  %v13157_v30 = vcombine.low %v3542_v4, %v3546_v58  ;;  %v3553_v21 = vld [vmem:[%s20204_s1 + $0xa70] sm:$0xff]  ;;  %v3554_v12 = vld [vmem:[%s20204_s1 + $0xa78] sm:$0xff] }
 0x3af   : > { %9947 = vmatprep.mubr.bf16.mxu1 %v15047_v53  ;;  %v11348_v20 = vsel %vm10794_vm4, %v13721_v3, %v11092_v32  ;;  %v11350_v37 = vsel %vm10796_vm5, %v13785_v44, %v11094_v25  ;;  %v13158_v7 = vcombine.high %v3542_v4, %v3546_v58  ;;  %v13722_v1 = vadd.f32 %v18981_v49, %v18307_v33 }
 0x3b0   : > { %v13646_v35 = vpack.c.bf16 %v11348_v20, %v11347_v23  ;;  %v13647_v34 = vpack.c.bf16 %v11350_v37, %v11349_v11  ;;  %9049 = vmatprep.subr.bf16.mxu0 %v13156_v28  ;;  %v13786_v18 = vadd.f32 %v18986_v59, %v18309_v27  ;;  %v13723_v26 = vadd.f32 %v18988_v6, %v18311_v15  ;;  %v20523_v20 = vld [vmem:[#allocation14_spill] sm:$0xff] }
 0x3b1   : > { %10014 = vmatprep.subr.bf16.mxu1 %v13158_v7  ;;  %9050 = vmatpush1.bf16.msra.mxu0 %v13155_v40  ;;  %vm10801_vm6 = vcmp.ge.f32.partialorder %v13722_v1, 0.0  ;;  %v11099_v9 = vmul.f32 %v13722_v1, %v18330_v38  ;;  %v13787_v62 = vadd.f32 %v18993_v41, %v18313_v46  ;;  %v13724_v49 = vadd.f32 %v18995_v17, %v18307_v33 }
 0x3b2   : > { %12263 = vst [vmem:[%s18491_s19 + $0x360] sm:$0xff] %v13646_v35  ;;  %12264 = vst [vmem:[%s18491_s19 + $0x368] sm:$0xff] %v13647_v34  ;;  %10015 = vmatpush1.bf16.msra.mxu1 %v13157_v30  ;;  %vm10803_vm7 = vcmp.ge.f32.partialorder %v13786_v18, 0.0  ;;  %v11101_v59 = vmul.f32 %v13786_v18, %v18332_v63  ;;  %vm10802_vm8 = vcmp.ge.f32.partialorder %v13723_v26, 0.0  ;;  %v11100_v6 = vmul.f32 %v13723_v26, %v18334_v48  ;;  %v3557_v34 = vld [vmem:[%s20204_s1 + $0xa90] sm:$0xff] }
 0x3b3   : > { %v11355_v13 = vsel %vm10801_vm6, %v13722_v1, %v11099_v9  ;;  %vm10804_vm9 = vcmp.ge.f32.partialorder %v13787_v62, 0.0  ;;  %v11102_v61 = vmul.f32 %v13787_v62, %v18336_v36  ;;  %vm10809_vm10 = vcmp.ge.f32.partialorder %v13724_v49, 0.0 }
 0x3b4   : > { %v11357_v0 = vsel %vm10803_vm7, %v13786_v18, %v11101_v59  ;;  %v11356_v50 = vsel %vm10802_vm8, %v13723_v26, %v11100_v6  ;;  %v11107_v41 = vmul.f32 %v13724_v49, %v18330_v38  ;;  %v13788_v17 = vadd.f32 %v19001_v55, %v18309_v27  ;;  %8983 = vmatmul.mubr.bf16.gmra.mrb[108].mxu0 %v20522_v47  ;;  %v3550_v55 = vld [vmem:[%s20204_s1 + $0xa58] sm:$0xff]  ;;  %v3569_v6 = vld [vmem:[%s20204_s1 + $0xaf0] sm:$0xff] }
 0x3b5   : > { %v13650_v2 = vpack.c.bf16 %v11356_v50, %v11355_v13  ;;  %v11358_v16 = vsel %vm10804_vm9, %v13787_v62, %v11102_v61  ;;  %v13725_v57 = vadd.f32 %v19003_v56, %v18311_v15  ;;  %v13789_v39 = vadd.f32 %v19007_v52, %v18313_v46  ;;  %9948 = vmatmul.mubr.bf16.gmra.mrb[108].mxu1 %v20522_v47  ;;  %v3577_v47 = vld [vmem:[%s20204_s1 + $0xb30] sm:$0xff] }
 0x3b6   : > { %v13651_v54 = vpack.c.bf16 %v11358_v16, %v11357_v0  ;;  %v11363_v56 = vsel %vm10809_vm10, %v13724_v49, %v11107_v41  ;;  %vm10811_vm11 = vcmp.ge.f32.partialorder %v13788_v17, 0.0  ;;  %v11109_v52 = vmul.f32 %v13788_v17, %v18332_v63  ;;  %8992 = vmatprep.mubr.bf16.mxu0 %v15048_v19  ;;  %9957 = vmatprep.mubr.bf16.mxu1 %v15048_v19  ;;  %v20524_v19 = vld [vmem:[#allocation15_spill] sm:$0xff] }
 0x3b7   : > { %12267 = vst [vmem:[%s18491_s19 + $0x380] sm:$0xff] %v13650_v2  ;;  %vm10810_vm12 = vcmp.ge.f32.partialorder %v13725_v57, 0.0  ;;  %v11108_v3 = vmul.f32 %v13725_v57, %v18334_v48  ;;  %vm10812_vm13 = vcmp.ge.f32.partialorder %v13789_v39, 0.0  ;;  %v11110_v44 = vmul.f32 %v13789_v39, %v18336_v36 }
 0x3b8   : > { %12268 = vst [vmem:[%s18491_s19 + $0x388] sm:$0xff] %v13651_v54  ;;  %v11365_v14 = vsel %vm10811_vm11, %v13788_v17, %v11109_v52  ;;  %v13163_v4 = vcombine.low %v3549_v51, %v3553_v21  ;;  %v13164_v58 = vcombine.high %v3549_v51, %v3553_v21  ;;  %v13165_v24 = vcombine.low %v3550_v55, %v3554_v12  ;;  %v3573_v51 = vld [vmem:[%s20204_s1 + $0xb10] sm:$0xff]  ;;  %v3578_v21 = vld [vmem:[%s20204_s1 + $0xb38] sm:$0xff] }
 0x3b9   : > { %v11364_v23 = vsel %vm10810_vm12, %v13725_v57, %v11108_v3  ;;  %v11366_v10 = vsel %vm10812_vm13, %v13789_v39, %v11110_v44  ;;  %v13166_v45 = vcombine.high %v3550_v55, %v3554_v12  ;;  %v13726_v32 = vadd.f32 %v19027_v8, %v18307_v33  ;;  %v3574_v39 = vld [vmem:[%s20204_s1 + $0xb18] sm:$0xff]  ;;  %v3581_v3 = vld [vmem:[%s20204_s1 + $0xb50] sm:$0xff] }
 0x3ba   : > { %v13654_v25 = vpack.c.bf16 %v11364_v23, %v11363_v56  ;;  %v13655_v53 = vpack.c.bf16 %v11366_v10, %v11365_v14  ;;  %9051 = vmatprep.subr.bf16.mxu0 %v13164_v58  ;;  %v13790_v11 = vadd.f32 %v19031_v43, %v18309_v27  ;;  %v13727_v40 = vadd.f32 %v19033_v42, %v18311_v15  ;;  %v3585_v44 = vld [vmem:[%s20204_s1 + $0xb70] sm:$0xff]  ;;  %v3582_v14 = vld [vmem:[%s20204_s1 + $0xb58] sm:$0xff] }
 0x3bb   : > { %10016 = vmatprep.subr.bf16.mxu1 %v13166_v45  ;;  %9052 = vmatpush1.bf16.msra.mxu0 %v13163_v4  ;;  %vm10817_vm14 = vcmp.ge.f32.partialorder %v13726_v32, 0.0  ;;  %v11115_v28 = vmul.f32 %v13726_v32, %v18330_v38  ;;  %v13791_v30 = vadd.f32 %v19038_v60, %v18313_v46  ;;  %v13728_v8 = vadd.f32 %v19040_v22, %v18307_v33  ;;  %v15049_v60 = vld [vmem:[%s15226_s30 + $0xa8] sm:$0xff]   ;;  %v3586_v4 = vld [vmem:[%s20204_s1 + $0xb78] sm:$0xff] }
 0x3bc   : > { %12271 = vst [vmem:[%s18491_s19 + $0x3a0] sm:$0xff] %v13654_v25  ;;  %12272 = vst [vmem:[%s18491_s19 + $0x3a8] sm:$0xff] %v13655_v53  ;;  %10017 = vmatpush1.bf16.msra.mxu1 %v13165_v24  ;;  %vm10819_vm15 = vcmp.ge.f32.partialorder %v13790_v11, 0.0  ;;  %v11117_v43 = vmul.f32 %v13790_v11, %v18332_v63  ;;  %vm10818_vm0 = vcmp.ge.f32.partialorder %v13727_v40, 0.0  ;;  %v11116_v42 = vmul.f32 %v13727_v40, %v18334_v48  ;;  %v15050_v58 = vld [vmem:[%s15226_s30 + $0xb4] sm:$0xff]  }
 0x3bd   : > { %8993 = vmatmul.mubr.bf16.gmra.mrb[112].mxu0 %v20523_v20  ;;  %v11371_v37 = vsel %vm10817_vm14, %v13726_v32, %v11115_v28  ;;  %vm10820_vm1 = vcmp.ge.f32.partialorder %v13791_v30, 0.0  ;;  %v11118_v7 = vmul.f32 %v13791_v30, %v18336_v36  ;;  %vm10825_vm2 = vcmp.ge.f32.partialorder %v13728_v8, 0.0  ;;  %9958 = vmatmul.mubr.bf16.gmra.mrb[112].mxu1 %v20523_v20  ;;  %v3589_v32 = vld [vmem:[%s20204_s1 + $0xb90] sm:$0xff]  ;;  %v3590_v53 = vld [vmem:[%s20204_s1 + $0xb98] sm:$0xff] }
 0x3be   : > { %9002 = vmatprep.mubr.bf16.mxu0 %v15049_v60  ;;  %v11373_v33 = vsel %vm10819_vm15, %v13790_v11, %v11117_v43  ;;  %v11372_v22 = vsel %vm10818_vm0, %v13727_v40, %v11116_v42  ;;  %v11123_v1 = vmul.f32 %v13728_v8, %v18330_v38  ;;  %v13792_v35 = vadd.f32 %v19048_v31, %v18309_v27  ;;  %v3561_v38 = vld [vmem:[%s20204_s1 + $0xab0] sm:$0xff]  ;;  %v3558_v27 = vld [vmem:[%s20204_s1 + $0xa98] sm:$0xff] }
 0x3bf   : > { %9967 = vmatprep.mubr.bf16.mxu1 %v15049_v60  ;;  %v13658_v18 = vpack.c.bf16 %v11372_v22, %v11371_v37  ;;  %v11374_v26 = vsel %vm10820_vm1, %v13791_v30, %v11118_v7  ;;  %v13729_v9 = vadd.f32 %v19050_v5, %v18311_v15  ;;  %v13793_v62 = vadd.f32 %v19065_v29, %v18313_v46  ;;  %v3562_v31 = vld [vmem:[%s20204_s1 + $0xab8] sm:$0xff]  ;;  %v3565_v29 = vld [vmem:[%s20204_s1 + $0xad0] sm:$0xff]  ;;  %v15051_v37 = vld [vmem:[%s15226_s30 + $0xc0] sm:$0xff]  }
 0x3c0   : > { %v13659_v49 = vpack.c.bf16 %v11374_v26, %v11373_v33  ;;  %v11379_v59 = vsel %vm10825_vm2, %v13728_v8, %v11123_v1  ;;  %vm10827_vm3 = vcmp.ge.f32.partialorder %v13792_v35, 0.0  ;;  %v11125_v15 = vmul.f32 %v13792_v35, %v18332_v63  ;;  %v3593_v25 = vld [vmem:[%s20204_s1 + $0xbb0] sm:$0xff]  ;;  %v3594_v11 = vld [vmem:[%s20204_s1 + $0xbb8] sm:$0xff]  ;;  %v20525_v8 = vld [vmem:[#allocation16_spill] sm:$0xff] }
 0x3c1   : > { %12275 = vst [vmem:[%s18491_s19 + $0x3c0] sm:$0xff] %v13658_v18  ;;  %vm10826_vm4 = vcmp.ge.f32.partialorder %v13729_v9, 0.0  ;;  %v11124_v46 = vmul.f32 %v13729_v9, %v18334_v48  ;;  %vm10828_vm5 = vcmp.ge.f32.partialorder %v13793_v62, 0.0  ;;  %v11126_v5 = vmul.f32 %v13793_v62, %v18336_v36  ;;  %v3566_v48 = vld [vmem:[%s20204_s1 + $0xad8] sm:$0xff]  ;;  %v3597_v42 = vld [vmem:[%s20204_s1 + $0xbd0] sm:$0xff] }
 0x3c2   : > { %12276 = vst [vmem:[%s18491_s19 + $0x3c8] sm:$0xff] %v13659_v49  ;;  %v11381_v13 = vsel %vm10827_vm3, %v13792_v35, %v11125_v15  ;;  %v13171_v61 = vcombine.low %v3557_v34, %v3561_v38  ;;  %v13172_v0 = vcombine.high %v3557_v34, %v3561_v38  ;;  %v13173_v63 = vcombine.low %v3558_v27, %v3562_v31  ;;  %v3570_v36 = vld [vmem:[%s20204_s1 + $0xaf8] sm:$0xff]  ;;  %v3601_v20 = vld [vmem:[%s20204_s1 + $0xbf0] sm:$0xff] }
 0x3c3   : > { %v11380_v50 = vsel %vm10826_vm4, %v13729_v9, %v11124_v46  ;;  %v11382_v41 = vsel %vm10828_vm5, %v13793_v62, %v11126_v5  ;;  %v13174_v17 = vcombine.high %v3558_v27, %v3562_v31  ;;  %v13180_v57 = vcombine.high %v3565_v29, %v3569_v6  ;;  %v3598_v7 = vld [vmem:[%s20204_s1 + $0xbd8] sm:$0xff]  ;;  %v3605_v34 = vld [vmem:[%s20204_s1 + $0xc10] sm:$0xff] }
 0x3c4   : > { %v13662_v2 = vpack.c.bf16 %v11380_v50, %v11379_v59  ;;  %v13663_v16 = vpack.c.bf16 %v11382_v41, %v11381_v13  ;;  %9053 = vmatprep.subr.bf16.mxu0 %v13172_v0  ;;  %v13179_v55 = vcombine.low %v3565_v29, %v3569_v6  ;;  %v13182_v12 = vcombine.high %v3566_v48, %v3570_v36  ;;  %v3602_v60 = vld [vmem:[%s20204_s1 + $0xbf8] sm:$0xff]  ;;  %v3609_v18 = vld [vmem:[%s20204_s1 + $0xc30] sm:$0xff] }
 0x3c5   : > { %10018 = vmatprep.subr.bf16.mxu1 %v13174_v17  ;;  %9054 = vmatpush1.bf16.msra.mxu0 %v13171_v61  ;;  %v13181_v54 = vcombine.low %v3566_v48, %v3570_v36  ;;  %v13188_v56 = vcombine.high %v3573_v51, %v3577_v47  ;;  %v13190_v52 = vcombine.high %v3574_v39, %v3578_v21  ;;  %v3606_v26 = vld [vmem:[%s20204_s1 + $0xc18] sm:$0xff]  ;;  %v20526_v31 = vld [vmem:[#allocation17_spill] sm:$0xff]  ;;  %v20528_v36 = vld [vmem:[#allocation19_spill] sm:$0xff] }
 0x3c6   : > { %12279 = vst [vmem:[%s18491_s19 + $0x3e0] sm:$0xff] %v13662_v2  ;;  %12280 = vst [vmem:[%s18491_s19 + $0x3e8] sm:$0xff] %v13663_v16  ;;  %10019 = vmatpush1.bf16.msra.mxu1 %v13173_v63  ;;  %9055 = vmatprep.subr.bf16.mxu0 %v13180_v57  ;;  %v13187_v24 = vcombine.low %v3573_v51, %v3577_v47  ;;  %v13189_v23 = vcombine.low %v3574_v39, %v3578_v21  ;;  %v3610_v9 = vld [vmem:[%s20204_s1 + $0xc38] sm:$0xff]  ;;  %v3613_v15 = vld [vmem:[%s20204_s1 + $0xc50] sm:$0xff] }
 0x3c7   : > { %10020 = vmatprep.subr.bf16.mxu1 %v13182_v12  ;;  %9003 = vmatmul.mubr.bf16.gmra.mrb[116].mxu0 %v20524_v19  ;;  %v13196_v10 = vcombine.high %v3581_v3, %v3585_v44  ;;  %v13198_v45 = vcombine.high %v3582_v14, %v3586_v4  ;;  %v13195_v40 = vcombine.low %v3581_v3, %v3585_v44  ;;  %v20527_v59 = vld [vmem:[#allocation18_spill] sm:$0xff]  ;;  %v3617_v46 = vld [vmem:[%s20204_s1 + $0xc70] sm:$0xff]  ;;  %v20529_v39 = vld [vmem:[#allocation20_spill] sm:$0xff] }
 0x3c8   : > { %9968 = vmatmul.mubr.bf16.gmra.mrb[116].mxu1 %v20524_v19  ;;  %9012 = vmatprep.mubr.bf16.mxu0 %v15050_v58  ;;  %v13197_v28 = vcombine.low %v3582_v14, %v3586_v4  ;;  %v13204_v30 = vcombine.high %v3589_v32, %v3593_v25  ;;  %v13206_v43 = vcombine.high %v3590_v53, %v3594_v11  ;;  %v3614_v29 = vld [vmem:[%s20204_s1 + $0xc58] sm:$0xff]  ;;  %v3621_v0 = vld [vmem:[%s20204_s1 + $0xc90] sm:$0xff] }
 0x3c9   : > { %9056 = vmatpush1.bf16.msra.mxu0 %v13179_v55  ;;  %9977 = vmatprep.mubr.bf16.mxu1 %v15050_v58  ;;  %v13203_v33 = vcombine.low %v3589_v32, %v3593_v25  ;;  %v13205_v22 = vcombine.low %v3590_v53, %v3594_v11  ;;  %v13212_v1 = vcombine.high %v3597_v42, %v3601_v20  ;;  %v3618_v6 = vld [vmem:[%s20204_s1 + $0xc78] sm:$0xff]  ;;  %v3625_v63 = vld [vmem:[%s20204_s1 + $0xcb0] sm:$0xff] }
 0x3ca   : > { %10021 = vmatpush1.bf16.msra.mxu1 %v13181_v54  ;;  %9057 = vmatprep.subr.bf16.mxu0 %v13188_v56  ;;  %v13214_v35 = vcombine.high %v3598_v7, %v3602_v60  ;;  %v13211_v62 = vcombine.low %v3597_v42, %v3601_v20  ;;  %v13213_v38 = vcombine.low %v3598_v7, %v3602_v60  ;;  %v3622_v48 = vld [vmem:[%s20204_s1 + $0xc98] sm:$0xff]  ;;  %v19276_v17 = vld [vmem:[%s20204_s1 + $0x1010] sm:$0xff]  ;;  %v20532_v60 = vld [vmem:[#allocation23_spill] sm:$0xff] }
 0x3cb   : > { %10022 = vmatprep.subr.bf16.mxu1 %v13190_v52  ;;  %v13220_v27 = vcombine.high %v3605_v34, %v3609_v18  ;;  %v13222_v49 = vcombine.high %v3606_v26, %v3610_v9  ;;  %v13219_v5 = vcombine.low %v3605_v34, %v3609_v18  ;;  %v13221_v13 = vcombine.low %v3606_v26, %v3610_v9  ;;  %v3626_v41 = vld [vmem:[%s20204_s1 + $0xcb8] sm:$0xff]  ;;  %v19281_v51 = vld [vmem:[%s20204_s1 + $0x1030] sm:$0xff] }
 0x3cc   : > { %v13228_v61 = vcombine.high %v3613_v15, %v3617_v46  ;;  %v13230_v50 = vcombine.high %v3614_v29, %v3618_v6  ;;  %v13227_v47 = vcombine.low %v3613_v15, %v3617_v46  ;;  %v13347_v2 = vcombine.low %v19276_v17, %v19281_v51  ;;  %v19289_v16 = vld [vmem:[%s20204_s1 + $0x1018] sm:$0xff]  ;;  %v3629_v56 = vld [vmem:[%s20204_s1 + $0xcd0] sm:$0xff] }
 0x3cd   : > { %9058 = vmatpush1.bf16.msra.mxu0 %v13187_v24  ;;  %v19294_v57 = vld [vmem:[%s20204_s1 + $0x1038] sm:$0xff]  ;;  %v13229_v21 = vcombine.low %v3614_v29, %v3618_v6  ;;  %v13236_v55 = vcombine.high %v3621_v0, %v3625_v63  ;;  %v13238_v54 = vcombine.high %v3622_v48, %v3626_v41  ;;  %v3633_v52 = vld [vmem:[%s20204_s1 + $0xcf0] sm:$0xff]  ;;  %v13235_v44 = vcombine.low %v3621_v0, %v3625_v63 }
 0x3ce   : > { %10023 = vmatpush1.bf16.msra.mxu1 %v13189_v23  ;;  %9059 = vmatprep.subr.bf16.mxu0 %v13196_v10  ;;  %v13349_v12 = vcombine.low %v19289_v16, %v19294_v57  ;;  %v3630_v19 = vld [vmem:[%s20204_s1 + $0xcd8] sm:$0xff]  ;;  %v13237_v14 = vcombine.low %v3622_v48, %v3626_v41  ;;  %v13244_v4 = vcombine.high %v3629_v56, %v3633_v52  ;;  %v20530_v58 = vld [vmem:[#allocation21_spill] sm:$0xff] }
 0x3cf   : > { %10024 = vmatprep.subr.bf16.mxu1 %v13198_v45  ;;  %9013 = vmatmul.mubr.bf16.gmra.mrb[120].mxu0 %v20525_v8  ;;  %v3634_v3 = vld [vmem:[%s20204_s1 + $0xcf8] sm:$0xff]  ;;  %v3637_v23 = vld [vmem:[%s20204_s1 + $0xd10] sm:$0xff]  ;;  %v13243_v53 = vcombine.low %v3629_v56, %v3633_v52 }
 0x3d0   : > { %9978 = vmatmul.mubr.bf16.gmra.mrb[120].mxu1 %v20525_v8  ;;  %9022 = vmatprep.mubr.bf16.mxu0 %v15051_v37  ;;  %v13246_v24 = vcombine.high %v3630_v19, %v3634_v3  ;;  %v3641_v10 = vld [vmem:[%s20204_s1 + $0xd30] sm:$0xff]  ;;  %v20531_v45 = vld [vmem:[#allocation22_spill] sm:$0xff]  ;;  %v13245_v11 = vcombine.low %v3630_v19, %v3634_v3  ;;  %v20536_v3 = vld [vmem:[#allocation27_spill] sm:$0xff] }
 0x3d1   : > { %9060 = vmatpush1.bf16.msra.mxu0 %v13195_v40  ;;  %9987 = vmatprep.mubr.bf16.mxu1 %v15051_v37  ;;  %v3638_v32 = vld [vmem:[%s20204_s1 + $0xd18] sm:$0xff]  ;;  %v13252_v40 = vcombine.high %v3637_v23, %v3641_v10  ;;  %v3649_v8 = vld [vmem:[%s20204_s1 + $0xd70] sm:$0xff]  ;;  %v13251_v20 = vcombine.low %v3637_v23, %v3641_v10 }
 0x3d2   : > { %10025 = vmatpush1.bf16.msra.mxu1 %v13197_v28  ;;  %9061 = vmatprep.subr.bf16.mxu0 %v13204_v30  ;;  %v3642_v25 = vld [vmem:[%s20204_s1 + $0xd38] sm:$0xff]  ;;  %v3645_v30 = vld [vmem:[%s20204_s1 + $0xd50] sm:$0xff] }
 0x3d3   : > { %10026 = vmatprep.subr.bf16.mxu1 %v13206_v43  ;;  %v13254_v28 = vcombine.high %v3638_v32, %v3642_v25  ;;  %v3646_v43 = vld [vmem:[%s20204_s1 + $0xd58] sm:$0xff]  ;;  %v13253_v37 = vcombine.low %v3638_v32, %v3642_v25  ;;  %v13260_v7 = vcombine.high %v3645_v30, %v3649_v8  ;;  %v13259_v26 = vcombine.low %v3645_v30, %v3649_v8  ;;  %v20534_v29 = vld [vmem:[#allocation25_spill] sm:$0xff] }
 0x3d4   : > { %v3650_v42 = vld [vmem:[%s20204_s1 + $0xd78] sm:$0xff] }
 0x3d5   : > { %9062 = vmatpush1.bf16.msra.mxu0 %v13203_v33  ;;  %v13262_v33 = vcombine.high %v3646_v43, %v3650_v42  ;;  %v3654_v34 = vld [vmem:[%s20204_s1 + $0xd98] sm:$0xff]  ;;  %v13261_v9 = vcombine.low %v3646_v43, %v3650_v42  ;;  %v20538_v42 = vld [vmem:[#allocation29_spill] sm:$0xff] }
 0x3d6   : > { %10027 = vmatpush1.bf16.msra.mxu1 %v13205_v22  ;;  %9063 = vmatprep.subr.bf16.mxu0 %v13212_v1  ;;  %v3653_v22 = vld [vmem:[%s20204_s1 + $0xd90] sm:$0xff]  ;;  %v3658_v18 = vld [vmem:[%s20204_s1 + $0xdb8] sm:$0xff] }
 0x3d7   : > { %9023 = vmatmul.mubr.bf16.gmra.mrb[124].mxu0 %v20526_v31  ;;  %10028 = vmatprep.subr.bf16.mxu1 %v13214_v35  ;;  %v3657_v1 = vld [vmem:[%s20204_s1 + $0xdb0] sm:$0xff]  ;;  %v20533_v35 = vld [vmem:[#allocation24_spill] sm:$0xff]  ;;  %v13269_v46 = vcombine.low %v3654_v34, %v3658_v18  ;;  %v20535_v0 = vld [vmem:[#allocation26_spill] sm:$0xff] }
 0x3d8   : > { %9988 = vmatmul.mubr.bf16.gmra.mrb[124].mxu1 %v20526_v31  ;;  %9065 = vmatprep.mubr.bf16.mxu0 %v20527_v59  ;;  %v3665_v31 = vld [vmem:[%s20204_s1 + $0xdf0] sm:$0xff]  ;;  %v13267_v15 = vcombine.low %v3653_v22, %v3657_v1  ;;  %v3670_v63 = vld [vmem:[%s20204_s1 + $0xe18] sm:$0xff] }
 0x3d9   : > { %9064 = vmatpush1.bf16.msra.mxu0 %v13211_v62  ;;  %10030 = vmatprep.mubr.bf16.mxu1 %v20527_v59  ;;  %v13268_v62 = vcombine.high %v3653_v22, %v3657_v1  ;;  %v3666_v59 = vld [vmem:[%s20204_s1 + $0xdf8] sm:$0xff] }
 0x3da   : > { %10029 = vmatpush1.bf16.msra.mxu1 %v13213_v38  ;;  %9226 = vmatprep.subr.bf16.mxu0 %v13220_v27  ;;  %v13270_v38 = vcombine.high %v3654_v34, %v3658_v18  ;;  %v3661_v27 = vld [vmem:[%s20204_s1 + $0xdd0] sm:$0xff]  ;;  %v3674_v48 = vld [vmem:[%s20204_s1 + $0xe38] sm:$0xff] }
 0x3db   : > { %10191 = vmatprep.subr.bf16.mxu1 %v13222_v49  ;;  %v3662_v49 = vld [vmem:[%s20204_s1 + $0xdd8] sm:$0xff]  ;;  %v13285_v52 = vcombine.low %v3670_v63, %v3674_v48 }
 0x3dc   : > { %v13278_v6 = vcombine.high %v3662_v49, %v3666_v59  ;;  %v3690_v23 = vld [vmem:[%s20204_s1 + $0xeb8] sm:$0xff] }
 0x3dd   : > { %v3706_v22 = vld [vmem:[%s20204_s1 + $0xf38] sm:$0xff] }
 0x3df   : > { %9066 = vmatmul.mubr.bf16.vlgmr.msra.gmra.mrb[64].mxu0 %v20528_v36 }
 0x3e0   : > { %10031 = vmatmul.mubr.bf16.vlgmr.msra.gmra.mrb[64].mxu1 %v20528_v36  ;;  %9227 = vmatpush1.bf16.msra.mxu0 %v13219_v5  ;;  %v13276_v5 = vcombine.high %v3661_v27, %v3665_v31  ;;  %v13275_v36 = vcombine.low %v3661_v27, %v3665_v31 }
 0x3e1   : > { %10192 = vmatpush1.bf16.msra.mxu1 %v13221_v13  ;;  %9075 = vmatprep.mubr.bf16.mxu0 %v20529_v39  ;;  %v3669_v13 = vld [vmem:[%s20204_s1 + $0xe10] sm:$0xff] }
 0x3e2   : > { %10040 = vmatprep.mubr.bf16.mxu1 %v20529_v39  ;;  %9228 = vmatprep.subr.bf16.mxu0 %v13228_v61  ;;  %v3673_v61 = vld [vmem:[%s20204_s1 + $0xe30] sm:$0xff] }
 0x3e3   : > { %10193 = vmatprep.subr.bf16.mxu1 %v13230_v50  ;;  %v13277_v50 = vcombine.low %v3662_v49, %v3666_v59  ;;  %v13284_v41 = vcombine.high %v3669_v13, %v3673_v61  ;;  %v3677_v39 = vld [vmem:[%s20204_s1 + $0xe50] sm:$0xff]  ;;  %v13283_v56 = vcombine.low %v3669_v13, %v3673_v61  ;;  %v20540_v59 = vld [vmem:[#allocation31_spill] sm:$0xff]  ;;  %v3722_v13 = vld [vmem:[%s20204_s1 + $0xfb8] sm:$0xff] }
 0x3e4   : > { %9229 = vmatpush1.bf16.msra.mxu0 %v13227_v47  ;;  %v13286_v47 = vcombine.high %v3670_v63, %v3674_v48 }
 0x3e5   : > { %10194 = vmatpush1.bf16.msra.mxu1 %v13229_v21  ;;  %9230 = vmatprep.subr.bf16.mxu0 %v13236_v55  ;;  %v3681_v21 = vld [vmem:[%s20204_s1 + $0xe70] sm:$0xff]  ;;  %v3678_v55 = vld [vmem:[%s20204_s1 + $0xe58] sm:$0xff] }
 0x3e6   : > { %10195 = vmatprep.subr.bf16.mxu1 %v13238_v54  ;;  %v3682_v54 = vld [vmem:[%s20204_s1 + $0xe78] sm:$0xff]  ;;  %v13292_v19 = vcombine.high %v3677_v39, %v3681_v21  ;;  %v13291_v10 = vcombine.low %v3677_v39, %v3681_v21 }
 0x3e7   : > { %9076 = vmatmul.mubr.bf16.gmra.mrb[68].mxu0 %v20530_v58 }
 0x3e8   : > { %10041 = vmatmul.mubr.bf16.gmra.mrb[68].mxu1 %v20530_v58  ;;  %9085 = vmatprep.mubr.bf16.mxu0 %v20531_v45  ;;  %v20537_v58 = vld [vmem:[#allocation28_spill] sm:$0xff] }
 0x3e9   : > { %10050 = vmatprep.mubr.bf16.mxu1 %v20531_v45  ;;  %9231 = vmatpush1.bf16.msra.mxu0 %v13235_v44  ;;  %v13294_v44 = vcombine.high %v3678_v55, %v3682_v54  ;;  %v13293_v45 = vcombine.low %v3678_v55, %v3682_v54  ;;  %v20542_v54 = vld [vmem:[#allocation33_spill] sm:$0xff] }
 0x3ea   : > { %10196 = vmatpush1.bf16.msra.mxu1 %v13237_v14  ;;  %9232 = vmatprep.subr.bf16.mxu0 %v13244_v4  ;;  %v3685_v14 = vld [vmem:[%s20204_s1 + $0xe90] sm:$0xff] }
 0x3eb   : > { %10197 = vmatprep.subr.bf16.mxu1 %v13246_v24  ;;  %v3689_v4 = vld [vmem:[%s20204_s1 + $0xeb0] sm:$0xff]  ;;  %v3686_v24 = vld [vmem:[%s20204_s1 + $0xe98] sm:$0xff] }
 0x3ec   : > { %v13300_v32 = vcombine.high %v3685_v14, %v3689_v4  ;;  %v13302_v25 = vcombine.high %v3686_v24, %v3690_v23  ;;  %v13299_v30 = vcombine.low %v3685_v14, %v3689_v4  ;;  %v13301_v8 = vcombine.low %v3686_v24, %v3690_v23  ;;  %v20544_v4 = vld [vmem:[#allocation35_spill] sm:$0xff]  ;;  %v20546_v24 = vld [vmem:[#allocation37_spill] sm:$0xff]  ;;  %v20547_v23 = vld [vmem:[#allocation38_spill] sm:$0xff] }
 0x3ed   : > { %9233 = vmatpush1.bf16.msra.mxu0 %v13243_v53  ;;  %v3693_v53 = vld [vmem:[%s20204_s1 + $0xed0] sm:$0xff]  ;;  %v13350_v14 = vcombine.high %v19289_v16, %v19294_v57  ;;  %v3762_v16 = vld [vmem:[%s20204_s1 + $0x10f8] sm:$0xff] }
 0x3ee   : > { %10198 = vmatpush1.bf16.msra.mxu1 %v13245_v11  ;;  %9234 = vmatprep.subr.bf16.mxu0 %v13252_v40  ;;  %v3697_v11 = vld [vmem:[%s20204_s1 + $0xef0] sm:$0xff]  ;;  %v3694_v40 = vld [vmem:[%s20204_s1 + $0xed8] sm:$0xff] }
 0x3ef   : > { %9086 = vmatmul.mubr.bf16.gmra.mrb[72].mxu0 %v20532_v60  ;;  %10199 = vmatprep.subr.bf16.mxu1 %v13254_v28  ;;  %v3698_v28 = vld [vmem:[%s20204_s1 + $0xef8] sm:$0xff]  ;;  %v13308_v43 = vcombine.high %v3693_v53, %v3697_v11  ;;  %v13307_v1 = vcombine.low %v3693_v53, %v3697_v11  ;;  %v20552_v53 = vld [vmem:[#allocation43_spill] sm:$0xff]  ;;  %v20553_v11 = vld [vmem:[#allocation44_spill] sm:$0xff] }
 0x3f0   : > { %10051 = vmatmul.mubr.bf16.gmra.mrb[72].mxu1 %v20532_v60  ;;  %9095 = vmatprep.mubr.bf16.mxu0 %v20533_v35  ;;  %v20539_v60 = vld [vmem:[#allocation30_spill] sm:$0xff] }
 0x3f1   : > { %10060 = vmatprep.mubr.bf16.mxu1 %v20533_v35  ;;  %9235 = vmatpush1.bf16.msra.mxu0 %v13251_v20  ;;  %v13310_v20 = vcombine.high %v3694_v40, %v3698_v28  ;;  %v13309_v35 = vcombine.low %v3694_v40, %v3698_v28  ;;  %v20554_v40 = vld [vmem:[#allocation45_spill] sm:$0xff]  ;;  %v20555_v28 = vld [vmem:[#allocation46_spill] sm:$0xff] }
 0x3f2   : > { %10200 = vmatpush1.bf16.msra.mxu1 %v13253_v37  ;;  %9236 = vmatprep.subr.bf16.mxu0 %v13260_v7  ;;  %v3701_v37 = vld [vmem:[%s20204_s1 + $0xf10] sm:$0xff] }
 0x3f3   : > { %10201 = vmatprep.subr.bf16.mxu1 %v13262_v33  ;;  %v3705_v7 = vld [vmem:[%s20204_s1 + $0xf30] sm:$0xff]  ;;  %v3702_v33 = vld [vmem:[%s20204_s1 + $0xf18] sm:$0xff] }
 0x3f4   : > { %v13316_v34 = vcombine.high %v3701_v37, %v3705_v7  ;;  %v13318_v18 = vcombine.high %v3702_v33, %v3706_v22  ;;  %v13315_v27 = vcombine.low %v3701_v37, %v3705_v7  ;;  %v13317_v31 = vcombine.low %v3702_v33, %v3706_v22  ;;  %v3745_v37 = vld [vmem:[%s20204_s1 + $0x1070] sm:$0xff]  ;;  %v3742_v7 = vld [vmem:[%s20204_s1 + $0x1058] sm:$0xff] }
 0x3f5   : > { %9237 = vmatpush1.bf16.msra.mxu0 %v13259_v26  ;;  %v3709_v26 = vld [vmem:[%s20204_s1 + $0xf50] sm:$0xff] }
 0x3f6   : > { %10202 = vmatpush1.bf16.msra.mxu1 %v13261_v9  ;;  %9238 = vmatprep.subr.bf16.mxu0 %v13268_v62  ;;  %v3713_v9 = vld [vmem:[%s20204_s1 + $0xf70] sm:$0xff]  ;;  %v3710_v62 = vld [vmem:[%s20204_s1 + $0xf58] sm:$0xff] }
 0x3f7   : > { %9096 = vmatmul.mubr.bf16.gmra.mrb[76].mxu0 %v20534_v29  ;;  %10203 = vmatprep.subr.bf16.mxu1 %v13270_v38  ;;  %v3714_v38 = vld [vmem:[%s20204_s1 + $0xf78] sm:$0xff]  ;;  %v13324_v49 = vcombine.high %v3709_v26, %v3713_v9  ;;  %v13323_v61 = vcombine.low %v3709_v26, %v3713_v9  ;;  %v3749_v22 = vld [vmem:[%s20204_s1 + $0x1090] sm:$0xff] }
 0x3f8   : > { %10061 = vmatmul.mubr.bf16.gmra.mrb[76].mxu1 %v20534_v29  ;;  %9105 = vmatprep.mubr.bf16.mxu0 %v20535_v0  ;;  %v20541_v29 = vld [vmem:[#allocation32_spill] sm:$0xff]  ;;  %v3754_v26 = vld [vmem:[%s20204_s1 + $0x10b8] sm:$0xff] }
 0x3f9   : > { %10070 = vmatprep.mubr.bf16.mxu1 %v20535_v0  ;;  %9239 = vmatpush1.bf16.msra.mxu0 %v13267_v15  ;;  %v13326_v15 = vcombine.high %v3710_v62, %v3714_v38  ;;  %v13325_v0 = vcombine.low %v3710_v62, %v3714_v38  ;;  %v20560_v62 = vld [vmem:[#allocation51_spill] sm:$0xff] }
 0x3fa   : > { %10204 = vmatpush1.bf16.msra.mxu1 %v13269_v46  ;;  %9240 = vmatprep.subr.bf16.mxu0 %v13276_v5  ;;  %v3717_v46 = vld [vmem:[%s20204_s1 + $0xf90] sm:$0xff] }
 0x3fb   : > { %10205 = vmatprep.subr.bf16.mxu1 %v13278_v6  ;;  %v3721_v5 = vld [vmem:[%s20204_s1 + $0xfb0] sm:$0xff]  ;;  %v3718_v6 = vld [vmem:[%s20204_s1 + $0xf98] sm:$0xff] }
 0x3fc   : > { %v13332_v63 = vcombine.high %v3717_v46, %v3721_v5  ;;  %v13334_v48 = vcombine.high %v3718_v6, %v3722_v13  ;;  %v13331_v39 = vcombine.low %v3717_v46, %v3721_v5  ;;  %v13333_v21 = vcombine.low %v3718_v6, %v3722_v13  ;;  %v3765_v46 = vld [vmem:[%s20204_s1 + $0x1110] sm:$0xff]  ;;  %v3766_v6 = vld [vmem:[%s20204_s1 + $0x1118] sm:$0xff] }
 0x3fd   : > { %9241 = vmatpush1.bf16.msra.mxu0 %v13275_v36  ;;  %v3725_v36 = vld [vmem:[%s20204_s1 + $0xfd0] sm:$0xff]  ;;  %v3770_v13 = vld [vmem:[%s20204_s1 + $0x1138] sm:$0xff] }
 0x3fe   : > { %10206 = vmatpush1.bf16.msra.mxu1 %v13277_v50  ;;  %9242 = vmatprep.subr.bf16.mxu0 %v13284_v41  ;;  %v3729_v50 = vld [vmem:[%s20204_s1 + $0xff0] sm:$0xff]  ;;  %v3726_v41 = vld [vmem:[%s20204_s1 + $0xfd8] sm:$0xff] }
 0x3ff   : > { %9106 = vmatmul.mubr.bf16.gmra.mrb[80].mxu0 %v20536_v3  ;;  %10207 = vmatprep.subr.bf16.mxu1 %v13286_v47  ;;  %v3730_v47 = vld [vmem:[%s20204_s1 + $0xff8] sm:$0xff]  ;;  %v13340_v55 = vcombine.high %v3725_v36, %v3729_v50  ;;  %v3769_v5 = vld [vmem:[%s20204_s1 + $0x1130] sm:$0xff] }
 0x400   : > { %10071 = vmatmul.mubr.bf16.gmra.mrb[80].mxu1 %v20536_v3  ;;  %9115 = vmatprep.mubr.bf16.mxu0 %v20537_v58  ;;  %v13341_v3 = vcombine.low %v3726_v41, %v3730_v47 }
 0x401   : > { %10080 = vmatprep.mubr.bf16.mxu1 %v20537_v58  ;;  %9243 = vmatpush1.bf16.msra.mxu0 %v13283_v56  ;;  %v13342_v56 = vcombine.high %v3726_v41, %v3730_v47  ;;  %v20545_v58 = vld [vmem:[#allocation36_spill] sm:$0xff]  ;;  %v3774_v41 = vld [vmem:[%s20204_s1 + $0x1158] sm:$0xff] }
 0x402   : > { %10208 = vmatpush1.bf16.msra.mxu1 %v13285_v52  ;;  %9244 = vmatprep.subr.bf16.mxu0 %v13292_v19  ;;  %v20543_v52 = vld [vmem:[#allocation34_spill] sm:$0xff]  ;;  %v13339_v19 = vcombine.low %v3725_v36, %v3729_v50  ;;  %v3773_v36 = vld [vmem:[%s20204_s1 + $0x1150] sm:$0xff] }
 0x403   : > { %10209 = vmatprep.subr.bf16.mxu1 %v13294_v44  ;;  %v13348_v44 = vcombine.high %v19276_v17, %v19281_v51  ;;  %v3757_v17 = vld [vmem:[%s20204_s1 + $0x10d0] sm:$0xff]  ;;  %v3778_v47 = vld [vmem:[%s20204_s1 + $0x1178] sm:$0xff] }
 0x404   : > { %v3761_v51 = vld [vmem:[%s20204_s1 + $0x10f0] sm:$0xff] }
 0x405   : > { %9245 = vmatpush1.bf16.msra.mxu0 %v13291_v10  ;;  %v20548_v10 = vld [vmem:[#allocation39_spill] sm:$0xff]  ;;  %v3777_v50 = vld [vmem:[%s20204_s1 + $0x1170] sm:$0xff] }
 0x406   : > { %10210 = vmatpush1.bf16.msra.mxu1 %v13293_v45  ;;  %9246 = vmatprep.subr.bf16.mxu0 %v13300_v32  ;;  %v20549_v45 = vld [vmem:[#allocation40_spill] sm:$0xff]  ;;  %v20550_v32 = vld [vmem:[#allocation41_spill] sm:$0xff] }
 0x407   : > { %9116 = vmatmul.mubr.bf16.gmra.mrb[84].mxu0 %v20538_v42  ;;  %10211 = vmatprep.subr.bf16.mxu1 %v13302_v25  ;;  %v20551_v25 = vld [vmem:[#allocation42_spill] sm:$0xff] }
 0x408   : > { %10081 = vmatmul.mubr.bf16.gmra.mrb[84].mxu1 %v20538_v42  ;;  %9125 = vmatprep.mubr.bf16.mxu0 %v20539_v60  ;;  %v20559_v42 = vld [vmem:[#allocation50_spill] sm:$0xff] }
 0x409   : > { %10090 = vmatprep.mubr.bf16.mxu1 %v20539_v60  ;;  %9247 = vmatpush1.bf16.msra.mxu0 %v13299_v30  ;;  %v20556_v30 = vld [vmem:[#allocation47_spill] sm:$0xff]  ;;  %v3746_v60 = vld [vmem:[%s20204_s1 + $0x1078] sm:$0xff] }
 0x40a   : > { %10212 = vmatpush1.bf16.msra.mxu1 %v13301_v8  ;;  %9248 = vmatprep.subr.bf16.mxu0 %v13308_v43  ;;  %v20557_v8 = vld [vmem:[#allocation48_spill] sm:$0xff]  ;;  %v20558_v43 = vld [vmem:[#allocation49_spill] sm:$0xff]  ;;  %v13357_v38 = vcombine.low %v3742_v7, %v3746_v60 }
 0x40b   : > { %10213 = vmatprep.subr.bf16.mxu1 %v13310_v20  ;;  %v3741_v20 = vld [vmem:[%s20204_s1 + $0x1050] sm:$0xff] }
 0x40c   : > { %v13356_v33 = vcombine.high %v3741_v20, %v3745_v37  ;;  %v13355_v9 = vcombine.low %v3741_v20, %v3745_v37  ;;  %v15056_v20 = vld [vmem:[%s15226_s30 + $0x48] sm:$0xff]   ;;  %v20564_v37 = vld [vmem:[#allocation55_spill] sm:$0xff] }
 0x40d   : > { %9249 = vmatpush1.bf16.msra.mxu0 %v13307_v1  ;;  %v3753_v1 = vld [vmem:[%s20204_s1 + $0x10b0] sm:$0xff] }
 0x40e   : > { %10214 = vmatpush1.bf16.msra.mxu1 %v13309_v35  ;;  %9250 = vmatprep.subr.bf16.mxu0 %v13316_v34  ;;  %v15052_v35 = vld [vmem:[%s15226_s30 + $0x18] sm:$0xff]   ;;  %v13358_v34 = vcombine.high %v3742_v7, %v3746_v60  ;;  %v13363_v57 = vcombine.low %v3749_v22, %v3753_v1  ;;  %v20565_v60 = vld [vmem:[#allocation56_spill] sm:$0xff] }
 0x40f   : > { %9126 = vmatmul.mubr.bf16.gmra.mrb[88].mxu0 %v20540_v59  ;;  %10215 = vmatprep.subr.bf16.mxu1 %v13318_v18  ;;  %v3750_v18 = vld [vmem:[%s20204_s1 + $0x1098] sm:$0xff] }
 0x410   : > { %10091 = vmatmul.mubr.bf16.gmra.mrb[88].mxu1 %v20540_v59  ;;  %9135 = vmatprep.mubr.bf16.mxu0 %v20541_v29  ;;  %v15053_v59 = vld [vmem:[%s15226_s30 + $0x24] sm:$0xff]   ;;  %v15057_v7 = vld [vmem:[%s15226_s30 + $0x54] sm:$0xff]  }
 0x411   : > { %10100 = vmatprep.mubr.bf16.mxu1 %v20541_v29  ;;  %9251 = vmatpush1.bf16.msra.mxu0 %v13315_v27  ;;  %v13364_v27 = vcombine.high %v3749_v22, %v3753_v1  ;;  %v20561_v29 = vld [vmem:[#allocation52_spill] sm:$0xff]  ;;  %v20566_v22 = vld [vmem:[#allocation57_spill] sm:$0xff] }
 0x412   : > { %10216 = vmatpush1.bf16.msra.mxu1 %v13317_v31  ;;  %9252 = vmatprep.subr.bf16.mxu0 %v13324_v49  ;;  %v13366_v31 = vcombine.high %v3750_v18, %v3754_v26  ;;  %v13372_v49 = vcombine.high %v3757_v17, %v3761_v51  ;;  %v15059_v1 = vld [vmem:[%s15226_s30 + $0x6c] sm:$0xff]  }
 0x413   : > { %10217 = vmatprep.subr.bf16.mxu1 %v13326_v15 }
 0x415   : > { %9253 = vmatpush1.bf16.msra.mxu0 %v13323_v61  ;;  %v13371_v61 = vcombine.low %v3757_v17, %v3761_v51  ;;  %v15064_v17 = vld [vmem:[%s15226_s30 + $0xa8] sm:$0xff]   ;;  %v20572_v51 = vld [vmem:[#allocation63_spill] sm:$0xff] }
 0x416   : > { %10218 = vmatpush1.bf16.msra.mxu1 %v13325_v0  ;;  %9254 = vmatprep.subr.bf16.mxu0 %v13332_v63  ;;  %v13380_v63 = vcombine.high %v3765_v46, %v3769_v5 }
 0x417   : > { %9136 = vmatmul.mubr.bf16.gmra.mrb[92].mxu0 %v20542_v54  ;;  %10219 = vmatprep.subr.bf16.mxu1 %v13334_v48  ;;  %v13382_v48 = vcombine.high %v3766_v6, %v3770_v13 }
 0x418   : > { %10101 = vmatmul.mubr.bf16.gmra.mrb[92].mxu1 %v20542_v54  ;;  %9145 = vmatprep.mubr.bf16.mxu0 %v20543_v52  ;;  %v15054_v54 = vld [vmem:[%s15226_s30 + $0x30] sm:$0xff]  }
 0x419   : > { %10110 = vmatprep.mubr.bf16.mxu1 %v20543_v52  ;;  %9255 = vmatpush1.bf16.msra.mxu0 %v13331_v39  ;;  %v13379_v39 = vcombine.low %v3765_v46, %v3769_v5  ;;  %v3781_v52 = vld [vmem:[%s20204_s1 + $0x1190] sm:$0xff]  ;;  %v20577_v46 = vld [vmem:[#allocation67_spill] sm:$0xff]  ;;  %v20578_v5 = vld [vmem:[#allocation68_spill] sm:$0xff] }
 0x41a   : > { %10220 = vmatpush1.bf16.msra.mxu1 %v13333_v21  ;;  %9256 = vmatprep.subr.bf16.mxu0 %v13340_v55  ;;  %v13381_v21 = vcombine.low %v3766_v6, %v3770_v13  ;;  %v13388_v55 = vcombine.high %v3773_v36, %v3777_v50  ;;  %v20580_v6 = vld [vmem:[#allocation70_spill] sm:$0xff]  ;;  %v20581_v13 = vld [vmem:[#allocation71_spill] sm:$0xff] }
 0x41b   : > { %10221 = vmatprep.subr.bf16.mxu1 %v13342_v56  ;;  %v13390_v56 = vcombine.high %v3774_v41, %v3778_v47 }
 0x41d   : > { %9257 = vmatpush1.bf16.msra.mxu0 %v13339_v19  ;;  %v3785_v19 = vld [vmem:[%s20204_s1 + $0x11b0] sm:$0xff] }
 0x41e   : > { %10222 = vmatpush1.bf16.msra.mxu1 %v13341_v3  ;;  %9419 = vmatprep.subr.bf16.mxu0 %v13348_v44  ;;  %v20562_v3 = vld [vmem:[#allocation53_spill] sm:$0xff]  ;;  %v3782_v44 = vld [vmem:[%s20204_s1 + $0x1198] sm:$0xff] }
 0x41f   : > { %9146 = vmatmul.mubr.bf16.gmra.mrb[96].mxu0 %v20544_v4  ;;  %10384 = vmatprep.subr.bf16.mxu1 %v13350_v14  ;;  %v3786_v14 = vld [vmem:[%s20204_s1 + $0x11b8] sm:$0xff] }
 0x420   : > { %10111 = vmatmul.mubr.bf16.gmra.mrb[96].mxu1 %v20544_v4  ;;  %9155 = vmatprep.mubr.bf16.mxu0 %v20545_v58  ;;  %v13387_v4 = vcombine.low %v3773_v36, %v3777_v50  ;;  %v20586_v36 = vld [vmem:[#allocation76_spill] sm:$0xff]  ;;  %v20587_v50 = vld [vmem:[#allocation77_spill] sm:$0xff] }
 0x421   : > { %10120 = vmatprep.mubr.bf16.mxu1 %v20545_v58  ;;  %v13389_v58 = vcombine.low %v3774_v41, %v3778_v47  ;;  %v20588_v41 = vld [vmem:[#allocation78_spill] sm:$0xff]  ;;  %v20589_v47 = vld [vmem:[#allocation79_spill] sm:$0xff] }
 0x427   : > { %9156 = vmatmul.mubr.bf16.gmra.mrb[100].mxu0 %v20546_v24 }
 0x428   : > { %10121 = vmatmul.mubr.bf16.gmra.mrb[100].mxu1 %v20546_v24  ;;  %9165 = vmatprep.mubr.bf16.mxu0 %v20547_v23  ;;  %v13396_v24 = vcombine.high %v3781_v52, %v3785_v19 }
 0x429   : > { %10130 = vmatprep.mubr.bf16.mxu1 %v20547_v23  ;;  %v13398_v23 = vcombine.high %v3782_v44, %v3786_v14 }
 0x42f   : > { %9166 = vmatmul.mubr.bf16.gmra.mrb[104].mxu0 %v20548_v10 }
 0x430   : > { %10131 = vmatmul.mubr.bf16.gmra.mrb[104].mxu1 %v20548_v10  ;;  %9175 = vmatprep.mubr.bf16.mxu0 %v20549_v45  ;;  %v3789_v10 = vld [vmem:[%s20204_s1 + $0x11d0] sm:$0xff] }
 0x431   : > { %10140 = vmatprep.mubr.bf16.mxu1 %v20549_v45  ;;  %v3793_v45 = vld [vmem:[%s20204_s1 + $0x11f0] sm:$0xff] }
 0x437   : > { %9176 = vmatmul.mubr.bf16.gmra.mrb[108].mxu0 %v20550_v32 }
 0x438   : > { %10141 = vmatmul.mubr.bf16.gmra.mrb[108].mxu1 %v20550_v32  ;;  %9185 = vmatprep.mubr.bf16.mxu0 %v20551_v25  ;;  %v3790_v32 = vld [vmem:[%s20204_s1 + $0x11d8] sm:$0xff] }
 0x439   : > { %10150 = vmatprep.mubr.bf16.mxu1 %v20551_v25  ;;  %v3794_v25 = vld [vmem:[%s20204_s1 + $0x11f8] sm:$0xff] }
 0x43f   : > { %9186 = vmatmul.mubr.bf16.gmra.mrb[112].mxu0 %v20552_v53 }
 0x440   : > { %10151 = vmatmul.mubr.bf16.gmra.mrb[112].mxu1 %v20552_v53  ;;  %9195 = vmatprep.mubr.bf16.mxu0 %v20553_v11  ;;  %v13395_v53 = vcombine.low %v3781_v52, %v3785_v19 }
 0x441   : > { %10160 = vmatprep.mubr.bf16.mxu1 %v20553_v11  ;;  %v13397_v11 = vcombine.low %v3782_v44, %v3786_v14 }
 0x447   : > { %9196 = vmatmul.mubr.bf16.gmra.mrb[116].mxu0 %v20554_v40 }
 0x448   : > { %10161 = vmatmul.mubr.bf16.gmra.mrb[116].mxu1 %v20554_v40  ;;  %9205 = vmatprep.mubr.bf16.mxu0 %v20555_v28  ;;  %v13404_v40 = vcombine.high %v3789_v10, %v3793_v45 }
 0x449   : > { %10170 = vmatprep.mubr.bf16.mxu1 %v20555_v28  ;;  %v15055_v28 = vld [vmem:[%s15226_s30 + $0x3c] sm:$0xff]  }
 0x44f   : > { %9206 = vmatmul.mubr.bf16.gmra.mrb[120].mxu0 %v20556_v30 }
 0x450   : > { %10171 = vmatmul.mubr.bf16.gmra.mrb[120].mxu1 %v20556_v30  ;;  %9215 = vmatprep.mubr.bf16.mxu0 %v20557_v8  ;;  %v13406_v30 = vcombine.high %v3790_v32, %v3794_v25 }
 0x451   : > { %10180 = vmatprep.mubr.bf16.mxu1 %v20557_v8  ;;  %v20563_v8 = vld [vmem:[#allocation54_spill] sm:$0xff] }
 0x457   : > { %9216 = vmatmul.mubr.bf16.gmra.mrb[124].mxu0 %v20558_v43 }
 0x458   : > { %10181 = vmatmul.mubr.bf16.gmra.mrb[124].mxu1 %v20558_v43  ;;  %9258 = vmatprep.mubr.bf16.mxu0 %v20559_v42  ;;  %v13403_v43 = vcombine.low %v3789_v10, %v3793_v45 }
 0x459   : > { %10223 = vmatprep.mubr.bf16.mxu1 %v20559_v42  ;;  %v13405_v42 = vcombine.low %v3790_v32, %v3794_v25 }
 0x45f   : > { %9259 = vmatmul.mubr.bf16.vlgmr.msra.gmra.mrb[64].mxu0 %v15052_v35 }
 0x460   : > { %10224 = vmatmul.mubr.bf16.vlgmr.msra.gmra.mrb[64].mxu1 %v15052_v35  ;;  %9420 = vmatpush1.bf16.msra.mxu0 %v13347_v2  ;;  %v3758_v2 = vld [vmem:[%s20204_s1 + $0x10d8] sm:$0xff] }
 0x461   : > { %10385 = vmatpush1.bf16.msra.mxu1 %v13349_v12  ;;  %9268 = vmatprep.mubr.bf16.mxu0 %v20560_v62  ;;  %v13365_v12 = vcombine.low %v3750_v18, %v3754_v26  ;;  %v13374_v15 = vcombine.high %v3758_v2, %v3762_v16  ;;  %v13373_v0 = vcombine.low %v3758_v2, %v3762_v16  ;;  %v20567_v35 = vld [vmem:[#allocation58_spill] sm:$0xff]  ;;  %v20568_v18 = vld [vmem:[#allocation59_spill] sm:$0xff]  ;;  %v20573_v16 = vld [vmem:[#allocation64_spill] sm:$0xff] }
 0x462   : > { %10233 = vmatprep.mubr.bf16.mxu1 %v20560_v62  ;;  %9421 = vmatprep.subr.bf16.mxu0 %v13356_v33  ;;  %v15058_v33 = vld [vmem:[%s15226_s30 + $0x60] sm:$0xff]   ;;  %v15062_v62 = vld [vmem:[%s15226_s30 + $0x90] sm:$0xff]  }
 0x463   : > { %10386 = vmatprep.subr.bf16.mxu1 %v13358_v34  ;;  %v15060_v34 = vld [vmem:[%s15226_s30 + $0x78] sm:$0xff]   ;;  %v15061_v26 = vld [vmem:[%s15226_s30 + $0x84] sm:$0xff]  }
 0x464   : > { %9422 = vmatpush1.bf16.msra.mxu0 %v13355_v9  ;;  %v20569_v9 = vld [vmem:[#allocation60_spill] sm:$0xff]  ;;  %v15065_v2 = vld [vmem:[%s15226_s30 + $0xb4] sm:$0xff]  }
 0x465   : > { %10387 = vmatpush1.bf16.msra.mxu1 %v13357_v38  ;;  %9423 = vmatprep.subr.bf16.mxu0 %v13364_v27  ;;  %v20570_v38 = vld [vmem:[#allocation61_spill] sm:$0xff]  ;;  %v15063_v27 = vld [vmem:[%s15226_s30 + $0x9c] sm:$0xff]  }
 0x466   : > { %10388 = vmatprep.subr.bf16.mxu1 %v13366_v31  ;;  %v20571_v31 = vld [vmem:[#allocation62_spill] sm:$0xff] }
 0x467   : > { %9269 = vmatmul.mubr.bf16.gmra.mrb[68].mxu0 %v15053_v59 }
 0x468   : > { %10234 = vmatmul.mubr.bf16.gmra.mrb[68].mxu1 %v15053_v59  ;;  %9278 = vmatprep.mubr.bf16.mxu0 %v20561_v29  ;;  %v20575_v59 = vmov 0  }
 0x469   : > { %10243 = vmatprep.mubr.bf16.mxu1 %v20561_v29  ;;  %9424 = vmatpush1.bf16.msra.mxu0 %v13363_v57  ;;  %v15066_v57 = vld [vmem:[%s15226_s30 + $0xc0] sm:$0xff]   ;;  %v20579_v29 = vld [vmem:[#allocation69_spill] sm:$0xff] }
 0x46a   : > { %10389 = vmatpush1.bf16.msra.mxu1 %v13365_v12  ;;  %9425 = vmatprep.subr.bf16.mxu0 %v13372_v49  ;;  %v20574_v12 = vld [vmem:[#allocation65_spill] sm:$0xff] }
 0x46b   : > { %10390 = vmatprep.subr.bf16.mxu1 %v13374_v15  ;;  %v15067_v49 = vld [vmem:[%s15226_s30 + $0xcc] sm:$0xff]   ;;  %v20576_v15 = vld [vmem:[#allocation66_spill] sm:$0xff] }
 0x46d   : > { %9426 = vmatpush1.bf16.msra.mxu0 %v13371_v61  ;;  %v20582_v61 = vld [vmem:[#allocation72_spill] sm:$0xff] }
 0x46e   : > { %10391 = vmatpush1.bf16.msra.mxu1 %v13373_v0  ;;  %9427 = vmatprep.subr.bf16.mxu0 %v13380_v63  ;;  %v20583_v0 = vld [vmem:[#allocation73_spill] sm:$0xff]  ;;  %v20584_v63 = vld [vmem:[#allocation74_spill] sm:$0xff] }
 0x46f   : > { %9279 = vmatmul.mubr.bf16.gmra.mrb[72].mxu0 %v15054_v54  ;;  %10392 = vmatprep.subr.bf16.mxu1 %v13382_v48  ;;  %v20585_v48 = vld [vmem:[#allocation75_spill] sm:$0xff] }
 0x470   : > { %10244 = vmatmul.mubr.bf16.gmra.mrb[72].mxu1 %v15054_v54  ;;  %9288 = vmatprep.mubr.bf16.mxu0 %v20562_v3 }
 0x471   : > { %10253 = vmatprep.mubr.bf16.mxu1 %v20562_v3  ;;  %9428 = vmatpush1.bf16.msra.mxu0 %v13379_v39  ;;  %v20590_v39 = vld [vmem:[#allocation80_spill] sm:$0xff]  ;;  %v15068_v3 = vld [vmem:[%s20205_s2] sm:$0xff] }
 0x472   : > { %10393 = vmatpush1.bf16.msra.mxu1 %v13381_v21  ;;  %9429 = vmatprep.subr.bf16.mxu0 %v13388_v55  ;;  %v20591_v21 = vld [vmem:[#allocation81_spill] sm:$0xff]  ;;  %v20592_v55 = vld [vmem:[#allocation82_spill] sm:$0xff] }
 0x473   : > { %10394 = vmatprep.subr.bf16.mxu1 %v13390_v56  ;;  %v3815_v54 = vsub.s32 4, %v20592_v55  ;;  %v3823_v56 = vsub.s32 6, %v20592_v55  ;;  %v3819_v52 = vsub.s32 5, %v20592_v55  ;;  %v3827_v19 = vsub.s32 7, %v20592_v55 }
 0x475   : > { %9430 = vmatpush1.bf16.msra.mxu0 %v13387_v4  ;;  %v19727_v44 = vrot.slane %v15068_v3, %v3815_v54  ;;  %v19729_v14 = vrot.slane %v15068_v3, %v3823_v56  ;;  %v19731_v4 = vrot.slane %v15068_v3, %v3819_v52 }
 0x476   : > { %10395 = vmatpush1.bf16.msra.mxu1 %v13389_v58  ;;  %9431 = vmatprep.subr.bf16.mxu0 %v13396_v24  ;;  %v15069_v58 = vld [vmem:[%s20206_s3] sm:$0xff] }
 0x477   : > { %9289 = vmatmul.mubr.bf16.gmra.mrb[76].mxu0 %v15055_v28  ;;  %10396 = vmatprep.subr.bf16.mxu1 %v13398_v23  ;;  %v19736_v24 = vrot.slane %v15069_v58, %v3815_v54  ;;  %v19738_v23 = vrot.slane %v15068_v3, %v3827_v19  ;;  %v19740_v45 = vrot.slane %v15069_v58, %v3823_v56 }
 0x478   : > { %10254 = vmatmul.mubr.bf16.gmra.mrb[76].mxu1 %v15055_v28  ;;  %9298 = vmatprep.mubr.bf16.mxu0 %v20563_v8  ;;  %v19742_v32 = vrot.slane %v15069_v58, %v3819_v52 }
 0x479   : > { %10263 = vmatprep.mubr.bf16.mxu1 %v20563_v8  ;;  %9432 = vmatpush1.bf16.msra.mxu0 %v13395_v53 }
 0x47a   : > { %10397 = vmatpush1.bf16.msra.mxu1 %v13397_v11  ;;  %9433 = vmatprep.subr.bf16.mxu0 %v13404_v40  ;;  %v19745_v40 = vrot.slane %v15069_v58, %v3827_v19 }
 0x47b   : > { %10398 = vmatprep.subr.bf16.mxu1 %v13406_v30 }
 0x47d   : > { %9434 = vmatpush1.bf16.msra.mxu0 %v13403_v43 }
 0x47e   : > { %10399 = vmatpush1.bf16.msra.mxu1 %v13405_v42 }
 0x47f   : > { %9299 = vmatmul.mubr.bf16.gmra.mrb[80].mxu0 %v15056_v20 }
 0x480   : > { %10264 = vmatmul.mubr.bf16.gmra.mrb[80].mxu1 %v15056_v20  ;;  %9308 = vmatprep.mubr.bf16.mxu0 %v20564_v37 }
 0x481   : > { %10273 = vmatprep.mubr.bf16.mxu1 %v20564_v37 }
 0x487   : > { %9309 = vmatmul.mubr.bf16.gmra.mrb[84].mxu0 %v15057_v7 }
 0x488   : > { %10274 = vmatmul.mubr.bf16.gmra.mrb[84].mxu1 %v15057_v7  ;;  %9318 = vmatprep.mubr.bf16.mxu0 %v20565_v60 }
 0x489   : > { %10283 = vmatprep.mubr.bf16.mxu1 %v20565_v60 }
 0x48f   : > { %9319 = vmatmul.mubr.bf16.gmra.mrb[88].mxu0 %v15058_v33 }
 0x490   : > { %10284 = vmatmul.mubr.bf16.gmra.mrb[88].mxu1 %v15058_v33  ;;  %9328 = vmatprep.mubr.bf16.mxu0 %v20566_v22 }
 0x491   : > { %10293 = vmatprep.mubr.bf16.mxu1 %v20566_v22 }
 0x497   : > { %9329 = vmatmul.mubr.bf16.gmra.mrb[92].mxu0 %v15059_v1 }
 0x498   : > { %10294 = vmatmul.mubr.bf16.gmra.mrb[92].mxu1 %v15059_v1  ;;  %9338 = vmatprep.mubr.bf16.mxu0 %v20567_v35 }
 0x499   : > { %10303 = vmatprep.mubr.bf16.mxu1 %v20567_v35 }
 0x49f   : > { %9339 = vmatmul.mubr.bf16.gmra.mrb[96].mxu0 %v15060_v34 }
 0x4a0   : > { %10304 = vmatmul.mubr.bf16.gmra.mrb[96].mxu1 %v15060_v34  ;;  %9348 = vmatprep.mubr.bf16.mxu0 %v20568_v18 }
 0x4a1   : > { %10313 = vmatprep.mubr.bf16.mxu1 %v20568_v18 }
 0x4a7   : > { %9349 = vmatmul.mubr.bf16.gmra.mrb[100].mxu0 %v15061_v26 }
 0x4a8   : > { %10314 = vmatmul.mubr.bf16.gmra.mrb[100].mxu1 %v15061_v26  ;;  %9358 = vmatprep.mubr.bf16.mxu0 %v20569_v9 }
 0x4a9   : > { %10323 = vmatprep.mubr.bf16.mxu1 %v20569_v9 }
 0x4af   : > { %9359 = vmatmul.mubr.bf16.gmra.mrb[104].mxu0 %v15062_v62 }
 0x4b0   : > { %10324 = vmatmul.mubr.bf16.gmra.mrb[104].mxu1 %v15062_v62  ;;  %9368 = vmatprep.mubr.bf16.mxu0 %v20570_v38 }
 0x4b1   : > { %10333 = vmatprep.mubr.bf16.mxu1 %v20570_v38 }
 0x4b7   : > { %9369 = vmatmul.mubr.bf16.gmra.mrb[108].mxu0 %v15063_v27 }
 0x4b8   : > { %10334 = vmatmul.mubr.bf16.gmra.mrb[108].mxu1 %v15063_v27  ;;  %9378 = vmatprep.mubr.bf16.mxu0 %v20571_v31 }
 0x4b9   : > { %10343 = vmatprep.mubr.bf16.mxu1 %v20571_v31 }
 0x4bf   : > { %9379 = vmatmul.mubr.bf16.gmra.mrb[112].mxu0 %v15064_v17 }
 0x4c0   : > { %10344 = vmatmul.mubr.bf16.gmra.mrb[112].mxu1 %v15064_v17  ;;  %9388 = vmatprep.mubr.bf16.mxu0 %v20572_v51 }
 0x4c1   : > { %10353 = vmatprep.mubr.bf16.mxu1 %v20572_v51 }
 0x4c7   : > { %9389 = vmatmul.mubr.bf16.gmra.mrb[116].mxu0 %v15065_v2 }
 0x4c8   : > { %10354 = vmatmul.mubr.bf16.gmra.mrb[116].mxu1 %v15065_v2  ;;  %9398 = vmatprep.mubr.bf16.mxu0 %v20573_v16 }
 0x4c9   : > { %10363 = vmatprep.mubr.bf16.mxu1 %v20573_v16 }
 0x4cf   : > { %9399 = vmatmul.mubr.bf16.gmra.mrb[120].mxu0 %v15066_v57 }
 0x4d0   : > { %10364 = vmatmul.mubr.bf16.gmra.mrb[120].mxu1 %v15066_v57  ;;  %9408 = vmatprep.mubr.bf16.mxu0 %v20574_v12 }
 0x4d1   : > { %10373 = vmatprep.mubr.bf16.mxu1 %v20574_v12 }
 0x4d7   : > { %9409 = vmatmul.mubr.bf16.gmra.mrb[124].mxu0 %v15067_v49 }
 0x4d8   : > { %10374 = vmatmul.mubr.bf16.gmra.mrb[124].mxu1 %v15067_v49  ;;  %9451 = vmatprep.mubr.bf16.mxu0 %v20575_v59 }
 0x4d9   : > { %10416 = vmatprep.mubr.bf16.mxu1 %v20575_v59 }
 0x4df   : > { %9452 = vmatmul.mubr.bf16.vlgmr.msra.gmra.mrb[64].mxu0 %v20576_v15 }
 0x4e0   : > { %10417 = vmatmul.mubr.bf16.vlgmr.msra.gmra.mrb[64].mxu1 %v20576_v15  ;;  %9461 = vmatprep.mubr.bf16.mxu0 %v20575_v59 }
 0x4e1   : > { %10426 = vmatprep.mubr.bf16.mxu1 %v20575_v59 }
 0x4e7   : > { %9462 = vmatmul.mubr.bf16.gmra.mrb[68].mxu0 %v20577_v46 }
 0x4e8   : > { %10427 = vmatmul.mubr.bf16.gmra.mrb[68].mxu1 %v20577_v46  ;;  %9471 = vmatprep.mubr.bf16.mxu0 %v20575_v59 }
 0x4e9   : > { %10436 = vmatprep.mubr.bf16.mxu1 %v20575_v59 }
 0x4ef   : > { %9472 = vmatmul.mubr.bf16.gmra.mrb[72].mxu0 %v20578_v5 }
 0x4f0   : > { %10437 = vmatmul.mubr.bf16.gmra.mrb[72].mxu1 %v20578_v5  ;;  %9481 = vmatprep.mubr.bf16.mxu0 %v20575_v59 }
 0x4f1   : > { %10446 = vmatprep.mubr.bf16.mxu1 %v20575_v59 }
 0x4f7   : > { %9482 = vmatmul.mubr.bf16.gmra.mrb[76].mxu0 %v20579_v29 }
 0x4f8   : > { %10447 = vmatmul.mubr.bf16.gmra.mrb[76].mxu1 %v20579_v29  ;;  %9491 = vmatprep.mubr.bf16.mxu0 %v20575_v59 }
 0x4f9   : > { %10456 = vmatprep.mubr.bf16.mxu1 %v20575_v59 }
 0x4ff   : > { %9492 = vmatmul.mubr.bf16.gmra.mrb[80].mxu0 %v20580_v6 }
 0x500   : > { %10457 = vmatmul.mubr.bf16.gmra.mrb[80].mxu1 %v20580_v6  ;;  %9501 = vmatprep.mubr.bf16.mxu0 %v20575_v59 }
 0x501   : > { %10466 = vmatprep.mubr.bf16.mxu1 %v20575_v59 }
 0x507   : > { %9502 = vmatmul.mubr.bf16.gmra.mrb[84].mxu0 %v20581_v13 }
 0x508   : > { %10467 = vmatmul.mubr.bf16.gmra.mrb[84].mxu1 %v20581_v13  ;;  %9511 = vmatprep.mubr.bf16.mxu0 %v20575_v59 }
 0x509   : > { %10476 = vmatprep.mubr.bf16.mxu1 %v20575_v59 }
 0x50f   : > { %9512 = vmatmul.mubr.bf16.gmra.mrb[88].mxu0 %v20582_v61 }
 0x510   : > { %10477 = vmatmul.mubr.bf16.gmra.mrb[88].mxu1 %v20582_v61  ;;  %9521 = vmatprep.mubr.bf16.mxu0 %v20575_v59 }
 0x511   : > { %10486 = vmatprep.mubr.bf16.mxu1 %v20575_v59 }
 0x517   : > { %9522 = vmatmul.mubr.bf16.gmra.mrb[92].mxu0 %v20583_v0 }
 0x518   : > { %10487 = vmatmul.mubr.bf16.gmra.mrb[92].mxu1 %v20583_v0  ;;  %9531 = vmatprep.mubr.bf16.mxu0 %v20575_v59 }
 0x519   : > { %10496 = vmatprep.mubr.bf16.mxu1 %v20575_v59 }
 0x51f   : > { %9532 = vmatmul.mubr.bf16.gmra.mrb[96].mxu0 %v20584_v63 }
 0x520   : > { %10497 = vmatmul.mubr.bf16.gmra.mrb[96].mxu1 %v20584_v63  ;;  %9541 = vmatprep.mubr.bf16.mxu0 %v20575_v59 }
 0x521   : > { %10506 = vmatprep.mubr.bf16.mxu1 %v20575_v59 }
 0x527   : > { %9542 = vmatmul.mubr.bf16.gmra.mrb[100].mxu0 %v20585_v48 }
 0x528   : > { %10507 = vmatmul.mubr.bf16.gmra.mrb[100].mxu1 %v20585_v48  ;;  %9551 = vmatprep.mubr.bf16.mxu0 %v20575_v59 }
 0x529   : > { %10516 = vmatprep.mubr.bf16.mxu1 %v20575_v59 }
 0x52f   : > { %9552 = vmatmul.mubr.bf16.gmra.mrb[104].mxu0 %v20586_v36 }
 0x530   : > { %10517 = vmatmul.mubr.bf16.gmra.mrb[104].mxu1 %v20586_v36  ;;  %9561 = vmatprep.mubr.bf16.mxu0 %v20575_v59 }
 0x531   : > { %10526 = vmatprep.mubr.bf16.mxu1 %v20575_v59 }
 0x537   : > { %9562 = vmatmul.mubr.bf16.gmra.mrb[108].mxu0 %v20587_v50 }
 0x538   : > { %10527 = vmatmul.mubr.bf16.gmra.mrb[108].mxu1 %v20587_v50  ;;  %9571 = vmatprep.mubr.bf16.mxu0 %v20575_v59 }
 0x539   : > { %10536 = vmatprep.mubr.bf16.mxu1 %v20575_v59 }
 0x53f   : > { %9572 = vmatmul.mubr.bf16.gmra.mrb[112].mxu0 %v20588_v41 }
 0x540   : > { %10537 = vmatmul.mubr.bf16.gmra.mrb[112].mxu1 %v20588_v41  ;;  %9581 = vmatprep.mubr.bf16.mxu0 %v20575_v59 }
 0x541   : > { %10546 = vmatprep.mubr.bf16.mxu1 %v20575_v59 }
 0x547   : > { %9582 = vmatmul.mubr.bf16.gmra.mrb[116].mxu0 %v20589_v47 }
 0x548   : > { %10547 = vmatmul.mubr.bf16.gmra.mrb[116].mxu1 %v20589_v47  ;;  %9591 = vmatprep.mubr.bf16.mxu0 %v20575_v59 }
 0x549   : > { %10556 = vmatprep.mubr.bf16.mxu1 %v20575_v59 }
 0x54f   : > { %9592 = vmatmul.mubr.bf16.gmra.mrb[120].mxu0 %v20590_v39 }
 0x550   : > { %10557 = vmatmul.mubr.bf16.gmra.mrb[120].mxu1 %v20590_v39  ;;  %9601 = vmatprep.mubr.bf16.mxu0 %v20575_v59 }
 0x551   : > { %10566 = vmatprep.mubr.bf16.mxu1 %v20575_v59 }
 0x557   : > { %9602 = vmatmul.mubr.bf16.gmra.mrb[124].mxu0 %v20591_v21 }
 0x558   : > { %10567 = vmatmul.mubr.bf16.gmra.mrb[124].mxu1 %v20591_v21 }
 0x5b2   : > { %v9453_v10 = vpop.f32.mrb[64].mxu0 }
 0x5b3   : > { %v13794_v25 = vadd.f32 %v9453_v10, %v19727_v44  ;;  %v10418_v53 = vpop.f32.mrb[64].mxu1  ;;  %v9455_v11 = vpop.f32.mrb[65].mxu0 }
 0x5b4   : > { %v13858_v28 = vadd.f32 %v10418_v53, %v19729_v14  ;;  %v13795_v30 = vadd.f32 %v9455_v11, %v19731_v4  ;;  %v10420_v8 = vpop.f32.mrb[65].mxu1  ;;  %v9457_v43 = vpop.f32.mrb[66].mxu0 }
 0x5b5   : > { %vm10581_vm6 = vcmp.ge.f32.partialorder %v13794_v25, 0.0  ;;  %v10879_v42 = vmul.f32 %v13794_v25, %v19736_v24  ;;  %v13859_v20 = vadd.f32 %v10420_v8, %v19738_v23  ;;  %v13796_v37 = vadd.f32 %v9457_v43, %v19727_v44  ;;  %v10422_v7 = vpop.f32.mrb[66].mxu1  ;;  %v9459_v60 = vpop.f32.mrb[67].mxu0 }
 0x5b6   : > { %vm10583_vm7 = vcmp.ge.f32.partialorder %v13858_v28, 0.0  ;;  %v10881_v33 = vmul.f32 %v13858_v28, %v19740_v45  ;;  %vm10582_vm8 = vcmp.ge.f32.partialorder %v13795_v30, 0.0  ;;  %v10880_v22 = vmul.f32 %v13795_v30, %v19742_v32  ;;  %v10424_v1 = vpop.f32.mrb[67].mxu1 }
 0x5b7   : > { %v11135_v35 = vsel %vm10581_vm6, %v13794_v25, %v10879_v42  ;;  %vm10584_vm9 = vcmp.ge.f32.partialorder %v13859_v20, 0.0  ;;  %v10882_v34 = vmul.f32 %v13859_v20, %v19745_v40  ;;  %vm10589_vm10 = vcmp.ge.f32.partialorder %v13796_v37, 0.0 }
 0x5b8   : > { %v11137_v18 = vsel %vm10583_vm7, %v13858_v28, %v10881_v33  ;;  %v11136_v26 = vsel %vm10582_vm8, %v13795_v30, %v10880_v22  ;;  %v10887_v9 = vmul.f32 %v13796_v37, %v19736_v24  ;;  %v13860_v62 = vadd.f32 %v10422_v7, %v19729_v14 }
 0x5b9   : > { %v13540_v38 = vpack.c.bf16 %v11136_v26, %v11135_v35  ;;  %v11138_v27 = vsel %vm10584_vm9, %v13859_v20, %v10882_v34  ;;  %v13797_v31 = vadd.f32 %v9459_v60, %v19731_v4  ;;  %v13861_v17 = vadd.f32 %v10424_v1, %v19738_v23 }
 0x5ba   : > { %v13541_v51 = vpack.c.bf16 %v11138_v27, %v11137_v18  ;;  %v11143_v2 = vsel %vm10589_vm10, %v13796_v37, %v10887_v9  ;;  %vm10591_vm11 = vcmp.ge.f32.partialorder %v13860_v62, 0.0  ;;  %v10889_v16 = vmul.f32 %v13860_v62, %v19740_v45  ;;  %v9463_v57 = vpop.f32.mrb[68].mxu0 }
 0x5bb   : > { %12157 = vst [vmem:[%s18491_s19 + $0x10] sm:$0xff] %v13540_v38  ;;  %vm10590_vm12 = vcmp.ge.f32.partialorder %v13797_v31, 0.0  ;;  %v10888_v12 = vmul.f32 %v13797_v31, %v19742_v32  ;;  %vm10592_vm13 = vcmp.ge.f32.partialorder %v13861_v17, 0.0  ;;  %v10890_v49 = vmul.f32 %v13861_v17, %v19745_v40  ;;  %v10428_v59 = vpop.f32.mrb[68].mxu1  ;;  %v9465_v15 = vpop.f32.mrb[69].mxu0 }
 0x5bc   : > { %12158 = vst [vmem:[%s18491_s19 + $0x18] sm:$0xff] %v13541_v51  ;;  %v11145_v46 = vsel %vm10591_vm11, %v13860_v62, %v10889_v16  ;;  %v13798_v5 = vadd.f32 %v9463_v57, %v19727_v44  ;;  %v13862_v29 = vadd.f32 %v10428_v59, %v19729_v14  ;;  %v13799_v6 = vadd.f32 %v9465_v15, %v19731_v4  ;;  %v10430_v13 = vpop.f32.mrb[69].mxu1  ;;  %v9467_v61 = vpop.f32.mrb[70].mxu0 }
 0x5bd   : > { %v11144_v0 = vsel %vm10590_vm12, %v13797_v31, %v10888_v12  ;;  %v11146_v63 = vsel %vm10592_vm13, %v13861_v17, %v10890_v49  ;;  %v13863_v48 = vadd.f32 %v10430_v13, %v19738_v23  ;;  %v13800_v36 = vadd.f32 %v9467_v61, %v19727_v44  ;;  %v10432_v50 = vpop.f32.mrb[70].mxu1  ;;  %v9469_v41 = vpop.f32.mrb[71].mxu0 }
 0x5be   : > { %v13544_v47 = vpack.c.bf16 %v11144_v0, %v11143_v2  ;;  %v13545_v39 = vpack.c.bf16 %v11146_v63, %v11145_v46  ;;  %vm10597_vm14 = vcmp.ge.f32.partialorder %v13798_v5, 0.0  ;;  %v10895_v21 = vmul.f32 %v13798_v5, %v19736_v24  ;;  %v10434_v55 = vpop.f32.mrb[71].mxu1 }
 0x5bf   : > { %vm10599_vm15 = vcmp.ge.f32.partialorder %v13862_v29, 0.0  ;;  %v10897_v54 = vmul.f32 %v13862_v29, %v19740_v45  ;;  %vm10598_vm0 = vcmp.ge.f32.partialorder %v13799_v6, 0.0  ;;  %v10896_v56 = vmul.f32 %v13799_v6, %v19742_v32 }
 0x5c0   : > { %12161 = vst [vmem:[%s18491_s19 + $0x30] sm:$0xff] %v13544_v47  ;;  %12162 = vst [vmem:[%s18491_s19 + $0x38] sm:$0xff] %v13545_v39  ;;  %v11151_v52 = vsel %vm10597_vm14, %v13798_v5, %v10895_v21  ;;  %vm10600_vm1 = vcmp.ge.f32.partialorder %v13863_v48, 0.0  ;;  %v10898_v19 = vmul.f32 %v13863_v48, %v19745_v40  ;;  %vm10605_vm2 = vcmp.ge.f32.partialorder %v13800_v36, 0.0 }
 0x5c1   : > { %v11153_v3 = vsel %vm10599_vm15, %v13862_v29, %v10897_v54  ;;  %v11152_v58 = vsel %vm10598_vm0, %v13799_v6, %v10896_v56  ;;  %v10903_v10 = vmul.f32 %v13800_v36, %v19736_v24  ;;  %v13864_v25 = vadd.f32 %v10432_v50, %v19729_v14 }
 0x5c2   : > { %v13548_v53 = vpack.c.bf16 %v11152_v58, %v11151_v52  ;;  %v11154_v11 = vsel %vm10600_vm1, %v13863_v48, %v10898_v19  ;;  %v13801_v28 = vadd.f32 %v9469_v41, %v19731_v4  ;;  %v13865_v30 = vadd.f32 %v10434_v55, %v19738_v23  ;;  %v9473_v8 = vpop.f32.mrb[72].mxu0 }
 0x5c3   : > { %v13549_v43 = vpack.c.bf16 %v11154_v11, %v11153_v3  ;;  %v11159_v42 = vsel %vm10605_vm2, %v13800_v36, %v10903_v10  ;;  %vm10607_vm3 = vcmp.ge.f32.partialorder %v13864_v25, 0.0  ;;  %v10905_v20 = vmul.f32 %v13864_v25, %v19740_v45  ;;  %v10438_v37 = vpop.f32.mrb[72].mxu1  ;;  %v9475_v7 = vpop.f32.mrb[73].mxu0 }
 0x5c4   : > { %12165 = vst [vmem:[%s18491_s19 + $0x50] sm:$0xff] %v13548_v53  ;;  %vm10606_vm4 = vcmp.ge.f32.partialorder %v13801_v28, 0.0  ;;  %v10904_v60 = vmul.f32 %v13801_v28, %v19742_v32  ;;  %vm10608_vm5 = vcmp.ge.f32.partialorder %v13865_v30, 0.0  ;;  %v10906_v33 = vmul.f32 %v13865_v30, %v19745_v40  ;;  %v10440_v22 = vpop.f32.mrb[73].mxu1  ;;  %v9477_v1 = vpop.f32.mrb[74].mxu0 }
 0x5c5   : > { %12166 = vst [vmem:[%s18491_s19 + $0x58] sm:$0xff] %v13549_v43  ;;  %v11161_v35 = vsel %vm10607_vm3, %v13864_v25, %v10905_v20  ;;  %v13802_v34 = vadd.f32 %v9473_v8, %v19727_v44  ;;  %v13866_v18 = vadd.f32 %v10438_v37, %v19729_v14  ;;  %v13803_v26 = vadd.f32 %v9475_v7, %v19731_v4  ;;  %v10442_v9 = vpop.f32.mrb[74].mxu1  ;;  %v9479_v62 = vpop.f32.mrb[75].mxu0 }
 0x5c6   : > { %v11160_v38 = vsel %vm10606_vm4, %v13801_v28, %v10904_v60  ;;  %v11162_v27 = vsel %vm10608_vm5, %v13865_v30, %v10906_v33  ;;  %v13867_v31 = vadd.f32 %v10440_v22, %v19738_v23  ;;  %v13804_v17 = vadd.f32 %v9477_v1, %v19727_v44  ;;  %v10444_v51 = vpop.f32.mrb[75].mxu1 }
 0x5c7   : > { %v13552_v2 = vpack.c.bf16 %v11160_v38, %v11159_v42  ;;  %v13553_v16 = vpack.c.bf16 %v11162_v27, %v11161_v35  ;;  %vm10613_vm6 = vcmp.ge.f32.partialorder %v13802_v34, 0.0  ;;  %v10911_v57 = vmul.f32 %v13802_v34, %v19736_v24 }
 0x5c8   : > { %vm10615_vm7 = vcmp.ge.f32.partialorder %v13866_v18, 0.0  ;;  %v10913_v12 = vmul.f32 %v13866_v18, %v19740_v45  ;;  %vm10614_vm8 = vcmp.ge.f32.partialorder %v13803_v26, 0.0  ;;  %v10912_v49 = vmul.f32 %v13803_v26, %v19742_v32 }
 0x5c9   : > { %12169 = vst [vmem:[%s18491_s19 + $0x70] sm:$0xff] %v13552_v2  ;;  %12170 = vst [vmem:[%s18491_s19 + $0x78] sm:$0xff] %v13553_v16  ;;  %v11167_v59 = vsel %vm10613_vm6, %v13802_v34, %v10911_v57  ;;  %vm10616_vm9 = vcmp.ge.f32.partialorder %v13867_v31, 0.0  ;;  %v10914_v15 = vmul.f32 %v13867_v31, %v19745_v40  ;;  %vm10621_vm10 = vcmp.ge.f32.partialorder %v13804_v17, 0.0 }
 0x5ca   : > { %v11169_v46 = vsel %vm10615_vm7, %v13866_v18, %v10913_v12  ;;  %v11168_v5 = vsel %vm10614_vm8, %v13803_v26, %v10912_v49  ;;  %v10919_v29 = vmul.f32 %v13804_v17, %v19736_v24  ;;  %v13868_v6 = vadd.f32 %v10442_v9, %v19729_v14  ;;  %v9483_v13 = vpop.f32.mrb[76].mxu0 }
 0x5cb   : > { %v13556_v61 = vpack.c.bf16 %v11168_v5, %v11167_v59  ;;  %v11170_v0 = vsel %vm10616_vm9, %v13867_v31, %v10914_v15  ;;  %v13805_v63 = vadd.f32 %v9479_v62, %v19731_v4  ;;  %v13869_v48 = vadd.f32 %v10444_v51, %v19738_v23  ;;  %v10448_v36 = vpop.f32.mrb[76].mxu1  ;;  %v9485_v50 = vpop.f32.mrb[77].mxu0 }
 0x5cc   : > { %v13557_v41 = vpack.c.bf16 %v11170_v0, %v11169_v46  ;;  %v11175_v47 = vsel %vm10621_vm10, %v13804_v17, %v10919_v29  ;;  %vm10623_vm11 = vcmp.ge.f32.partialorder %v13868_v6, 0.0  ;;  %v10921_v39 = vmul.f32 %v13868_v6, %v19740_v45  ;;  %v10450_v21 = vpop.f32.mrb[77].mxu1  ;;  %v9487_v55 = vpop.f32.mrb[78].mxu0 }
 0x5cd   : > { %12173 = vst [vmem:[%s18491_s19 + $0x90] sm:$0xff] %v13556_v61  ;;  %vm10622_vm12 = vcmp.ge.f32.partialorder %v13805_v63, 0.0  ;;  %v10920_v54 = vmul.f32 %v13805_v63, %v19742_v32  ;;  %vm10624_vm13 = vcmp.ge.f32.partialorder %v13869_v48, 0.0  ;;  %v10922_v56 = vmul.f32 %v13869_v48, %v19745_v40  ;;  %v10452_v52 = vpop.f32.mrb[78].mxu1  ;;  %v9489_v19 = vpop.f32.mrb[79].mxu0 }
 0x5ce   : > { %12174 = vst [vmem:[%s18491_s19 + $0x98] sm:$0xff] %v13557_v41  ;;  %v11177_v3 = vsel %vm10623_vm11, %v13868_v6, %v10921_v39  ;;  %v13806_v58 = vadd.f32 %v9483_v13, %v19727_v44  ;;  %v13870_v10 = vadd.f32 %v10448_v36, %v19729_v14  ;;  %v13807_v25 = vadd.f32 %v9485_v50, %v19731_v4  ;;  %v10454_v53 = vpop.f32.mrb[79].mxu1 }
 0x5cf   : > { %v11176_v11 = vsel %vm10622_vm12, %v13805_v63, %v10920_v54  ;;  %v11178_v28 = vsel %vm10624_vm13, %v13869_v48, %v10922_v56  ;;  %v13871_v30 = vadd.f32 %v10450_v21, %v19738_v23  ;;  %v13808_v8 = vadd.f32 %v9487_v55, %v19727_v44 }
 0x5d0   : > { %v13560_v43 = vpack.c.bf16 %v11176_v11, %v11175_v47  ;;  %v13561_v42 = vpack.c.bf16 %v11178_v28, %v11177_v3  ;;  %vm10629_vm14 = vcmp.ge.f32.partialorder %v13806_v58, 0.0  ;;  %v10927_v20 = vmul.f32 %v13806_v58, %v19736_v24 }
 0x5d1   : > { %vm10631_vm15 = vcmp.ge.f32.partialorder %v13870_v10, 0.0  ;;  %v10929_v37 = vmul.f32 %v13870_v10, %v19740_v45  ;;  %vm10630_vm0 = vcmp.ge.f32.partialorder %v13807_v25, 0.0  ;;  %v10928_v7 = vmul.f32 %v13807_v25, %v19742_v32 }
 0x5d2   : > { %12177 = vst [vmem:[%s18491_s19 + $0xb0] sm:$0xff] %v13560_v43  ;;  %12178 = vst [vmem:[%s18491_s19 + $0xb8] sm:$0xff] %v13561_v42  ;;  %v11183_v60 = vsel %vm10629_vm14, %v13806_v58, %v10927_v20  ;;  %vm10632_vm1 = vcmp.ge.f32.partialorder %v13871_v30, 0.0  ;;  %v10930_v33 = vmul.f32 %v13871_v30, %v19745_v40  ;;  %vm10637_vm2 = vcmp.ge.f32.partialorder %v13808_v8, 0.0  ;;  %v9493_v22 = vpop.f32.mrb[80].mxu0 }
 0x5d3   : > { %v11185_v1 = vsel %vm10631_vm15, %v13870_v10, %v10929_v37  ;;  %v11184_v35 = vsel %vm10630_vm0, %v13807_v25, %v10928_v7  ;;  %v10935_v34 = vmul.f32 %v13808_v8, %v19736_v24  ;;  %v13872_v18 = vadd.f32 %v10452_v52, %v19729_v14  ;;  %v10458_v26 = vpop.f32.mrb[80].mxu1  ;;  %v9495_v9 = vpop.f32.mrb[81].mxu0 }
 0x5d4   : > { %v13564_v62 = vpack.c.bf16 %v11184_v35, %v11183_v60  ;;  %v11186_v38 = vsel %vm10632_vm1, %v13871_v30, %v10930_v33  ;;  %v13809_v27 = vadd.f32 %v9489_v19, %v19731_v4  ;;  %v13873_v31 = vadd.f32 %v10454_v53, %v19738_v23  ;;  %v10460_v17 = vpop.f32.mrb[81].mxu1  ;;  %v9497_v51 = vpop.f32.mrb[82].mxu0 }
 0x5d5   : > { %v13565_v2 = vpack.c.bf16 %v11186_v38, %v11185_v1  ;;  %v11191_v16 = vsel %vm10637_vm2, %v13808_v8, %v10935_v34  ;;  %vm10639_vm3 = vcmp.ge.f32.partialorder %v13872_v18, 0.0  ;;  %v10937_v57 = vmul.f32 %v13872_v18, %v19740_v45  ;;  %v10462_v12 = vpop.f32.mrb[82].mxu1  ;;  %v9499_v49 = vpop.f32.mrb[83].mxu0 }
 0x5d6   : > { %12181 = vst [vmem:[%s18491_s19 + $0xd0] sm:$0xff] %v13564_v62  ;;  %vm10638_vm4 = vcmp.ge.f32.partialorder %v13809_v27, 0.0  ;;  %v10936_v59 = vmul.f32 %v13809_v27, %v19742_v32  ;;  %vm10640_vm5 = vcmp.ge.f32.partialorder %v13873_v31, 0.0  ;;  %v10938_v15 = vmul.f32 %v13873_v31, %v19745_v40  ;;  %v10464_v46 = vpop.f32.mrb[83].mxu1 }
 0x5d7   : > { %12182 = vst [vmem:[%s18491_s19 + $0xd8] sm:$0xff] %v13565_v2  ;;  %v11193_v5 = vsel %vm10639_vm3, %v13872_v18, %v10937_v57  ;;  %v13810_v29 = vadd.f32 %v9493_v22, %v19727_v44  ;;  %v13874_v6 = vadd.f32 %v10458_v26, %v19729_v14  ;;  %v13811_v13 = vadd.f32 %v9495_v9, %v19731_v4 }
 0x5d8   : > { %v11192_v61 = vsel %vm10638_vm4, %v13809_v27, %v10936_v59  ;;  %v11194_v0 = vsel %vm10640_vm5, %v13873_v31, %v10938_v15  ;;  %v13875_v63 = vadd.f32 %v10460_v17, %v19738_v23  ;;  %v13812_v48 = vadd.f32 %v9497_v51, %v19727_v44 }
 0x5d9   : > { %v13568_v36 = vpack.c.bf16 %v11192_v61, %v11191_v16  ;;  %v13569_v50 = vpack.c.bf16 %v11194_v0, %v11193_v5  ;;  %vm10645_vm6 = vcmp.ge.f32.partialorder %v13810_v29, 0.0  ;;  %v10943_v41 = vmul.f32 %v13810_v29, %v19736_v24 }
 0x5da   : > { %vm10647_vm7 = vcmp.ge.f32.partialorder %v13874_v6, 0.0  ;;  %v10945_v47 = vmul.f32 %v13874_v6, %v19740_v45  ;;  %vm10646_vm8 = vcmp.ge.f32.partialorder %v13811_v13, 0.0  ;;  %v10944_v39 = vmul.f32 %v13811_v13, %v19742_v32  ;;  %v9503_v21 = vpop.f32.mrb[84].mxu0 }
 0x5db   : > { %12185 = vst [vmem:[%s18491_s19 + $0xf0] sm:$0xff] %v13568_v36  ;;  %12186 = vst [vmem:[%s18491_s19 + $0xf8] sm:$0xff] %v13569_v50  ;;  %v11199_v55 = vsel %vm10645_vm6, %v13810_v29, %v10943_v41  ;;  %vm10648_vm9 = vcmp.ge.f32.partialorder %v13875_v63, 0.0  ;;  %v10946_v54 = vmul.f32 %v13875_v63, %v19745_v40  ;;  %vm10653_vm10 = vcmp.ge.f32.partialorder %v13812_v48, 0.0  ;;  %v10468_v56 = vpop.f32.mrb[84].mxu1  ;;  %v9505_v52 = vpop.f32.mrb[85].mxu0 }
 0x5dc   : > { %v11201_v19 = vsel %vm10647_vm7, %v13874_v6, %v10945_v47  ;;  %v11200_v3 = vsel %vm10646_vm8, %v13811_v13, %v10944_v39  ;;  %v10951_v58 = vmul.f32 %v13812_v48, %v19736_v24  ;;  %v13876_v10 = vadd.f32 %v10462_v12, %v19729_v14  ;;  %v10470_v25 = vpop.f32.mrb[85].mxu1  ;;  %v9507_v53 = vpop.f32.mrb[86].mxu0 }
 0x5dd   : > { %v13572_v11 = vpack.c.bf16 %v11200_v3, %v11199_v55  ;;  %v11202_v28 = vsel %vm10648_vm9, %v13875_v63, %v10946_v54  ;;  %v13813_v30 = vadd.f32 %v9499_v49, %v19731_v4  ;;  %v13877_v8 = vadd.f32 %v10464_v46, %v19738_v23  ;;  %v10472_v43 = vpop.f32.mrb[86].mxu1  ;;  %v9509_v42 = vpop.f32.mrb[87].mxu0 }
 0x5de   : > { %v13573_v20 = vpack.c.bf16 %v11202_v28, %v11201_v19  ;;  %v11207_v37 = vsel %vm10653_vm10, %v13812_v48, %v10951_v58  ;;  %vm10655_vm11 = vcmp.ge.f32.partialorder %v13876_v10, 0.0  ;;  %v10953_v7 = vmul.f32 %v13876_v10, %v19740_v45  ;;  %v10474_v60 = vpop.f32.mrb[87].mxu1 }
 0x5df   : > { %12189 = vst [vmem:[%s18491_s19 + $0x110] sm:$0xff] %v13572_v11  ;;  %vm10654_vm12 = vcmp.ge.f32.partialorder %v13813_v30, 0.0  ;;  %v10952_v33 = vmul.f32 %v13813_v30, %v19742_v32  ;;  %vm10656_vm13 = vcmp.ge.f32.partialorder %v13877_v8, 0.0  ;;  %v10954_v22 = vmul.f32 %v13877_v8, %v19745_v40 }
 0x5e0   : > { %12190 = vst [vmem:[%s18491_s19 + $0x118] sm:$0xff] %v13573_v20  ;;  %v11209_v1 = vsel %vm10655_vm11, %v13876_v10, %v10953_v7  ;;  %v13814_v35 = vadd.f32 %v9503_v21, %v19727_v44  ;;  %v13878_v34 = vadd.f32 %v10468_v56, %v19729_v14  ;;  %v13815_v18 = vadd.f32 %v9505_v52, %v19731_v4 }
 0x5e1   : > { %v11208_v26 = vsel %vm10654_vm12, %v13813_v30, %v10952_v33  ;;  %v11210_v9 = vsel %vm10656_vm13, %v13877_v8, %v10954_v22  ;;  %v13879_v62 = vadd.f32 %v10470_v25, %v19738_v23  ;;  %v13816_v38 = vadd.f32 %v9507_v53, %v19727_v44 }
 0x5e2   : > { %v13576_v27 = vpack.c.bf16 %v11208_v26, %v11207_v37  ;;  %v13577_v31 = vpack.c.bf16 %v11210_v9, %v11209_v1  ;;  %vm10661_vm14 = vcmp.ge.f32.partialorder %v13814_v35, 0.0  ;;  %v10959_v17 = vmul.f32 %v13814_v35, %v19736_v24  ;;  %v9513_v51 = vpop.f32.mrb[88].mxu0 }
 0x5e3   : > { %vm10663_vm15 = vcmp.ge.f32.partialorder %v13878_v34, 0.0  ;;  %v10961_v2 = vmul.f32 %v13878_v34, %v19740_v45  ;;  %vm10662_vm0 = vcmp.ge.f32.partialorder %v13815_v18, 0.0  ;;  %v10960_v16 = vmul.f32 %v13815_v18, %v19742_v32  ;;  %v10478_v57 = vpop.f32.mrb[88].mxu1  ;;  %v9515_v12 = vpop.f32.mrb[89].mxu0 }
 0x5e4   : > { %12193 = vst [vmem:[%s18491_s19 + $0x130] sm:$0xff] %v13576_v27  ;;  %12194 = vst [vmem:[%s18491_s19 + $0x138] sm:$0xff] %v13577_v31  ;;  %v11215_v49 = vsel %vm10661_vm14, %v13814_v35, %v10959_v17  ;;  %vm10664_vm1 = vcmp.ge.f32.partialorder %v13879_v62, 0.0  ;;  %v10962_v59 = vmul.f32 %v13879_v62, %v19745_v40  ;;  %vm10669_vm2 = vcmp.ge.f32.partialorder %v13816_v38, 0.0  ;;  %v10480_v15 = vpop.f32.mrb[89].mxu1  ;;  %v9517_v46 = vpop.f32.mrb[90].mxu0 }
 0x5e5   : > { %v11217_v5 = vsel %vm10663_vm15, %v13878_v34, %v10961_v2  ;;  %v11216_v29 = vsel %vm10662_vm0, %v13815_v18, %v10960_v16  ;;  %v10967_v6 = vmul.f32 %v13816_v38, %v19736_v24  ;;  %v13880_v13 = vadd.f32 %v10472_v43, %v19729_v14  ;;  %v10482_v61 = vpop.f32.mrb[90].mxu1  ;;  %v9519_v0 = vpop.f32.mrb[91].mxu0 }
 0x5e6   : > { %v13580_v63 = vpack.c.bf16 %v11216_v29, %v11215_v49  ;;  %v11218_v48 = vsel %vm10664_vm1, %v13879_v62, %v10962_v59  ;;  %v13817_v36 = vadd.f32 %v9509_v42, %v19731_v4  ;;  %v13881_v50 = vadd.f32 %v10474_v60, %v19738_v23  ;;  %v10484_v41 = vpop.f32.mrb[91].mxu1 }
 0x5e7   : > { %v13581_v47 = vpack.c.bf16 %v11218_v48, %v11217_v5  ;;  %v11223_v39 = vsel %vm10669_vm2, %v13816_v38, %v10967_v6  ;;  %vm10671_vm3 = vcmp.ge.f32.partialorder %v13880_v13, 0.0  ;;  %v10969_v21 = vmul.f32 %v13880_v13, %v19740_v45 }
 0x5e8   : > { %12197 = vst [vmem:[%s18491_s19 + $0x150] sm:$0xff] %v13580_v63  ;;  %vm10670_vm4 = vcmp.ge.f32.partialorder %v13817_v36, 0.0  ;;  %v10968_v55 = vmul.f32 %v13817_v36, %v19742_v32  ;;  %vm10672_vm5 = vcmp.ge.f32.partialorder %v13881_v50, 0.0  ;;  %v10970_v54 = vmul.f32 %v13881_v50, %v19745_v40 }
 0x5e9   : > { %12198 = vst [vmem:[%s18491_s19 + $0x158] sm:$0xff] %v13581_v47  ;;  %v11225_v56 = vsel %vm10671_vm3, %v13880_v13, %v10969_v21  ;;  %v13818_v52 = vadd.f32 %v9513_v51, %v19727_v44  ;;  %v13882_v19 = vadd.f32 %v10478_v57, %v19729_v14  ;;  %v13819_v3 = vadd.f32 %v9515_v12, %v19731_v4 }
 0x5ea   : > { %v11224_v58 = vsel %vm10670_vm4, %v13817_v36, %v10968_v55  ;;  %v11226_v10 = vsel %vm10672_vm5, %v13881_v50, %v10970_v54  ;;  %v13883_v25 = vadd.f32 %v10480_v15, %v19738_v23  ;;  %v13820_v53 = vadd.f32 %v9517_v46, %v19727_v44  ;;  %v9523_v11 = vpop.f32.mrb[92].mxu0 }
 0x5eb   : > { %v13584_v28 = vpack.c.bf16 %v11224_v58, %v11223_v39  ;;  %v13585_v30 = vpack.c.bf16 %v11226_v10, %v11225_v56  ;;  %vm10677_vm6 = vcmp.ge.f32.partialorder %v13818_v52, 0.0  ;;  %v10975_v8 = vmul.f32 %v13818_v52, %v19736_v24  ;;  %v10488_v43 = vpop.f32.mrb[92].mxu1  ;;  %v9525_v42 = vpop.f32.mrb[93].mxu0 }
 0x5ec   : > { %vm10679_vm7 = vcmp.ge.f32.partialorder %v13882_v19, 0.0  ;;  %v10977_v20 = vmul.f32 %v13882_v19, %v19740_v45  ;;  %vm10678_vm8 = vcmp.ge.f32.partialorder %v13819_v3, 0.0  ;;  %v10976_v37 = vmul.f32 %v13819_v3, %v19742_v32  ;;  %v10490_v7 = vpop.f32.mrb[93].mxu1  ;;  %v9527_v60 = vpop.f32.mrb[94].mxu0 }
 0x5ed   : > { %12201 = vst [vmem:[%s18491_s19 + $0x170] sm:$0xff] %v13584_v28  ;;  %12202 = vst [vmem:[%s18491_s19 + $0x178] sm:$0xff] %v13585_v30  ;;  %v11231_v33 = vsel %vm10677_vm6, %v13818_v52, %v10975_v8  ;;  %vm10680_vm9 = vcmp.ge.f32.partialorder %v13883_v25, 0.0  ;;  %v10978_v22 = vmul.f32 %v13883_v25, %v19745_v40  ;;  %vm10685_vm10 = vcmp.ge.f32.partialorder %v13820_v53, 0.0  ;;  %v10492_v1 = vpop.f32.mrb[94].mxu1  ;;  %v9529_v35 = vpop.f32.mrb[95].mxu0 }
 0x5ee   : > { %v11233_v34 = vsel %vm10679_vm7, %v13882_v19, %v10977_v20  ;;  %v11232_v18 = vsel %vm10678_vm8, %v13819_v3, %v10976_v37  ;;  %v10983_v26 = vmul.f32 %v13820_v53, %v19736_v24  ;;  %v13884_v9 = vadd.f32 %v10482_v61, %v19729_v14  ;;  %v10494_v62 = vpop.f32.mrb[95].mxu1 }
 0x5ef   : > { %v13588_v38 = vpack.c.bf16 %v11232_v18, %v11231_v33  ;;  %v11234_v27 = vsel %vm10680_vm9, %v13883_v25, %v10978_v22  ;;  %v13821_v31 = vadd.f32 %v9519_v0, %v19731_v4  ;;  %v13885_v17 = vadd.f32 %v10484_v41, %v19738_v23 }
 0x5f0   : > { %v13589_v51 = vpack.c.bf16 %v11234_v27, %v11233_v34  ;;  %v11239_v2 = vsel %vm10685_vm10, %v13820_v53, %v10983_v26  ;;  %vm10687_vm11 = vcmp.ge.f32.partialorder %v13884_v9, 0.0  ;;  %v10985_v16 = vmul.f32 %v13884_v9, %v19740_v45 }
 0x5f1   : > { %12205 = vst [vmem:[%s18491_s19 + $0x190] sm:$0xff] %v13588_v38  ;;  %vm10686_vm12 = vcmp.ge.f32.partialorder %v13821_v31, 0.0  ;;  %v10984_v57 = vmul.f32 %v13821_v31, %v19742_v32  ;;  %vm10688_vm13 = vcmp.ge.f32.partialorder %v13885_v17, 0.0  ;;  %v10986_v12 = vmul.f32 %v13885_v17, %v19745_v40 }
 0x5f2   : > { %12206 = vst [vmem:[%s18491_s19 + $0x198] sm:$0xff] %v13589_v51  ;;  %v11241_v49 = vsel %vm10687_vm11, %v13884_v9, %v10985_v16  ;;  %v13822_v59 = vadd.f32 %v9523_v11, %v19727_v44  ;;  %v13886_v15 = vadd.f32 %v10488_v43, %v19729_v14  ;;  %v13823_v46 = vadd.f32 %v9525_v42, %v19731_v4  ;;  %v9533_v5 = vpop.f32.mrb[96].mxu0 }
 0x5f3   : > { %v11240_v29 = vsel %vm10686_vm12, %v13821_v31, %v10984_v57  ;;  %v11242_v6 = vsel %vm10688_vm13, %v13885_v17, %v10986_v12  ;;  %v13887_v13 = vadd.f32 %v10490_v7, %v19738_v23  ;;  %v13824_v61 = vadd.f32 %v9527_v60, %v19727_v44  ;;  %v10498_v0 = vpop.f32.mrb[96].mxu1  ;;  %v9535_v63 = vpop.f32.mrb[97].mxu0 }
 0x5f4   : > { %v13592_v48 = vpack.c.bf16 %v11240_v29, %v11239_v2  ;;  %v13593_v36 = vpack.c.bf16 %v11242_v6, %v11241_v49  ;;  %vm10693_vm14 = vcmp.ge.f32.partialorder %v13822_v59, 0.0  ;;  %v10991_v50 = vmul.f32 %v13822_v59, %v19736_v24  ;;  %v10500_v41 = vpop.f32.mrb[97].mxu1  ;;  %v9537_v47 = vpop.f32.mrb[98].mxu0 }
 0x5f5   : > { %vm10695_vm15 = vcmp.ge.f32.partialorder %v13886_v15, 0.0  ;;  %v10993_v39 = vmul.f32 %v13886_v15, %v19740_v45  ;;  %vm10694_vm0 = vcmp.ge.f32.partialorder %v13823_v46, 0.0  ;;  %v10992_v21 = vmul.f32 %v13823_v46, %v19742_v32  ;;  %v10502_v55 = vpop.f32.mrb[98].mxu1  ;;  %v19893_v54 = vpop.f32.mrb[99].mxu0 }
 0x5f6   : > { %12209 = vst [vmem:[%s18491_s19 + $0x1b0] sm:$0xff] %v13592_v48  ;;  %12210 = vst [vmem:[%s18491_s19 + $0x1b8] sm:$0xff] %v13593_v36  ;;  %v11247_v56 = vsel %vm10693_vm14, %v13822_v59, %v10991_v50  ;;  %vm10696_vm1 = vcmp.ge.f32.partialorder %v13887_v13, 0.0  ;;  %v10994_v52 = vmul.f32 %v13887_v13, %v19745_v40  ;;  %vm10701_vm2 = vcmp.ge.f32.partialorder %v13824_v61, 0.0  ;;  %v10504_v19 = vpop.f32.mrb[99].mxu1 }
 0x5f7   : > { %v11249_v3 = vsel %vm10695_vm15, %v13886_v15, %v10993_v39  ;;  %v11248_v58 = vsel %vm10694_vm0, %v13823_v46, %v10992_v21  ;;  %v10999_v10 = vmul.f32 %v13824_v61, %v19736_v24  ;;  %v13888_v25 = vadd.f32 %v10492_v1, %v19729_v14 }
 0x5f8   : > { %v13596_v53 = vpack.c.bf16 %v11248_v58, %v11247_v56  ;;  %v11250_v11 = vsel %vm10696_vm1, %v13887_v13, %v10994_v52  ;;  %v13825_v28 = vadd.f32 %v9529_v35, %v19731_v4  ;;  %v13889_v30 = vadd.f32 %v10494_v62, %v19738_v23 }
 0x5f9   : > { %v13597_v8 = vpack.c.bf16 %v11250_v11, %v11249_v3  ;;  %v11255_v43 = vsel %vm10701_vm2, %v13824_v61, %v10999_v10  ;;  %vm10703_vm3 = vcmp.ge.f32.partialorder %v13888_v25, 0.0  ;;  %v11001_v42 = vmul.f32 %v13888_v25, %v19740_v45 }
 0x5fa   : > { %12213 = vst [vmem:[%s18491_s19 + $0x1d0] sm:$0xff] %v13596_v53  ;;  %vm10702_vm4 = vcmp.ge.f32.partialorder %v13825_v28, 0.0  ;;  %v11000_v20 = vmul.f32 %v13825_v28, %v19742_v32  ;;  %vm10704_vm5 = vcmp.ge.f32.partialorder %v13889_v30, 0.0  ;;  %v11002_v37 = vmul.f32 %v13889_v30, %v19745_v40  ;;  %v9543_v7 = vpop.f32.mrb[100].mxu0 }
 0x5fb   : > { %12214 = vst [vmem:[%s18491_s19 + $0x1d8] sm:$0xff] %v13597_v8  ;;  %v11257_v60 = vsel %vm10703_vm3, %v13888_v25, %v11001_v42  ;;  %v13826_v33 = vadd.f32 %v9533_v5, %v19727_v44  ;;  %v13890_v22 = vadd.f32 %v10498_v0, %v19729_v14  ;;  %v13827_v1 = vadd.f32 %v9535_v63, %v19731_v4  ;;  %v10508_v35 = vpop.f32.mrb[100].mxu1  ;;  %v9545_v34 = vpop.f32.mrb[101].mxu0 }
 0x5fc   : > { %v11256_v18 = vsel %vm10702_vm4, %v13825_v28, %v11000_v20  ;;  %v11258_v26 = vsel %vm10704_vm5, %v13889_v30, %v11002_v37  ;;  %v13891_v9 = vadd.f32 %v10500_v41, %v19738_v23  ;;  %v13828_v62 = vadd.f32 %v9537_v47, %v19727_v44  ;;  %v10510_v38 = vpop.f32.mrb[101].mxu1  ;;  %v9547_v27 = vpop.f32.mrb[102].mxu0 }
 0x5fd   : > { %v13600_v31 = vpack.c.bf16 %v11256_v18, %v11255_v43  ;;  %v13601_v17 = vpack.c.bf16 %v11258_v26, %v11257_v60  ;;  %vm10709_vm6 = vcmp.ge.f32.partialorder %v13826_v33, 0.0  ;;  %v11007_v51 = vmul.f32 %v13826_v33, %v19736_v24  ;;  %v19913_v2 = vpop.f32.mrb[102].mxu1  ;;  %v19915_v16 = vpop.f32.mrb[103].mxu0 }
 0x5fe   : > { %vm10711_vm7 = vcmp.ge.f32.partialorder %v13890_v22, 0.0  ;;  %v11009_v57 = vmul.f32 %v13890_v22, %v19740_v45  ;;  %vm10710_vm8 = vcmp.ge.f32.partialorder %v13827_v1, 0.0  ;;  %v11008_v12 = vmul.f32 %v13827_v1, %v19742_v32  ;;  %v10514_v49 = vpop.f32.mrb[103].mxu1 }
 0x5ff   : > { %12217 = vst [vmem:[%s18491_s19 + $0x1f0] sm:$0xff] %v13600_v31  ;;  %12218 = vst [vmem:[%s18491_s19 + $0x1f8] sm:$0xff] %v13601_v17  ;;  %v11263_v59 = vsel %vm10709_vm6, %v13826_v33, %v11007_v51  ;;  %vm10712_vm9 = vcmp.ge.f32.partialorder %v13891_v9, 0.0  ;;  %v11010_v15 = vmul.f32 %v13891_v9, %v19745_v40  ;;  %vm10717_vm10 = vcmp.ge.f32.partialorder %v13828_v62, 0.0 }
 0x600   : > { %v11265_v46 = vsel %vm10711_vm7, %v13890_v22, %v11009_v57  ;;  %v11264_v5 = vsel %vm10710_vm8, %v13827_v1, %v11008_v12  ;;  %v11015_v29 = vmul.f32 %v13828_v62, %v19736_v24  ;;  %v13892_v6 = vadd.f32 %v10502_v55, %v19729_v14 }
 0x601   : > { %v13604_v13 = vpack.c.bf16 %v11264_v5, %v11263_v59  ;;  %v11266_v61 = vsel %vm10712_vm9, %v13891_v9, %v11010_v15  ;;  %v13829_v0 = vadd.f32 %v19893_v54, %v19731_v4  ;;  %v13893_v63 = vadd.f32 %v10504_v19, %v19738_v23 }
 0x602   : > { %v13605_v48 = vpack.c.bf16 %v11266_v61, %v11265_v46  ;;  %v11271_v36 = vsel %vm10717_vm10, %v13828_v62, %v11015_v29  ;;  %vm10719_vm11 = vcmp.ge.f32.partialorder %v13892_v6, 0.0  ;;  %v11017_v50 = vmul.f32 %v13892_v6, %v19740_v45  ;;  %v9553_v41 = vpop.f32.mrb[104].mxu0 }
 0x603   : > { %12221 = vst [vmem:[%s18491_s19 + $0x210] sm:$0xff] %v13604_v13  ;;  %vm10718_vm12 = vcmp.ge.f32.partialorder %v13829_v0, 0.0  ;;  %v11016_v47 = vmul.f32 %v13829_v0, %v19742_v32  ;;  %vm10720_vm13 = vcmp.ge.f32.partialorder %v13893_v63, 0.0  ;;  %v11018_v39 = vmul.f32 %v13893_v63, %v19745_v40  ;;  %v10518_v21 = vpop.f32.mrb[104].mxu1  ;;  %v9555_v55 = vpop.f32.mrb[105].mxu0 }
 0x604   : > { %12222 = vst [vmem:[%s18491_s19 + $0x218] sm:$0xff] %v13605_v48  ;;  %v11273_v56 = vsel %vm10719_vm11, %v13892_v6, %v11017_v50  ;;  %v13830_v54 = vadd.f32 %v9543_v7, %v19727_v44  ;;  %v13894_v52 = vadd.f32 %v10508_v35, %v19729_v14  ;;  %v13831_v19 = vadd.f32 %v9545_v34, %v19731_v4  ;;  %v10520_v3 = vpop.f32.mrb[105].mxu1  ;;  %v9557_v58 = vpop.f32.mrb[106].mxu0 }
 0x605   : > { %v11272_v10 = vsel %vm10718_vm12, %v13829_v0, %v11016_v47  ;;  %v11274_v25 = vsel %vm10720_vm13, %v13893_v63, %v11018_v39  ;;  %v13895_v53 = vadd.f32 %v10510_v38, %v19738_v23  ;;  %v13832_v11 = vadd.f32 %v9547_v27, %v19727_v44  ;;  %v19937_v28 = vpop.f32.mrb[106].mxu1  ;;  %v19939_v30 = vpop.f32.mrb[107].mxu0 }
 0x606   : > { %v13608_v8 = vpack.c.bf16 %v11272_v10, %v11271_v36  ;;  %v13609_v43 = vpack.c.bf16 %v11274_v25, %v11273_v56  ;;  %vm10725_vm14 = vcmp.ge.f32.partialorder %v13830_v54, 0.0  ;;  %v11023_v42 = vmul.f32 %v13830_v54, %v19736_v24  ;;  %v19942_v20 = vpop.f32.mrb[107].mxu1 }
 0x607   : > { %vm10727_vm15 = vcmp.ge.f32.partialorder %v13894_v52, 0.0  ;;  %v11025_v37 = vmul.f32 %v13894_v52, %v19740_v45  ;;  %vm10726_vm0 = vcmp.ge.f32.partialorder %v13831_v19, 0.0  ;;  %v11024_v7 = vmul.f32 %v13831_v19, %v19742_v32 }
 0x608   : > { %12225 = vst [vmem:[%s18491_s19 + $0x230] sm:$0xff] %v13608_v8  ;;  %12226 = vst [vmem:[%s18491_s19 + $0x238] sm:$0xff] %v13609_v43  ;;  %v11279_v60 = vsel %vm10725_vm14, %v13830_v54, %v11023_v42  ;;  %vm10728_vm1 = vcmp.ge.f32.partialorder %v13895_v53, 0.0  ;;  %v11026_v33 = vmul.f32 %v13895_v53, %v19745_v40  ;;  %vm10733_vm2 = vcmp.ge.f32.partialorder %v13832_v11, 0.0 }
 0x609   : > { %v11281_v22 = vsel %vm10727_vm15, %v13894_v52, %v11025_v37  ;;  %v11280_v1 = vsel %vm10726_vm0, %v13831_v19, %v11024_v7  ;;  %v11031_v35 = vmul.f32 %v13832_v11, %v19736_v24  ;;  %v13896_v34 = vadd.f32 %v19913_v2, %v19729_v14 }
 0x60a   : > { %v13612_v18 = vpack.c.bf16 %v11280_v1, %v11279_v60  ;;  %v11282_v26 = vsel %vm10728_vm1, %v13895_v53, %v11026_v33  ;;  %v13833_v9 = vadd.f32 %v19915_v16, %v19731_v4  ;;  %v13897_v62 = vadd.f32 %v10514_v49, %v19738_v23  ;;  %v19955_v38 = vpop.f32.mrb[108].mxu0 }
 0x60b   : > { %v13613_v27 = vpack.c.bf16 %v11282_v26, %v11281_v22  ;;  %v11287_v31 = vsel %vm10733_vm2, %v13832_v11, %v11031_v35  ;;  %vm10735_vm3 = vcmp.ge.f32.partialorder %v13896_v34, 0.0  ;;  %v11033_v17 = vmul.f32 %v13896_v34, %v19740_v45  ;;  %v10528_v51 = vpop.f32.mrb[108].mxu1  ;;  %v9565_v57 = vpop.f32.mrb[109].mxu0 }
 0x60c   : > { %12229 = vst [vmem:[%s18491_s19 + $0x250] sm:$0xff] %v13612_v18  ;;  %vm10734_vm4 = vcmp.ge.f32.partialorder %v13833_v9, 0.0  ;;  %v11032_v2 = vmul.f32 %v13833_v9, %v19742_v32  ;;  %vm10736_vm5 = vcmp.ge.f32.partialorder %v13897_v62, 0.0  ;;  %v11034_v12 = vmul.f32 %v13897_v62, %v19745_v40  ;;  %v10530_v16 = vpop.f32.mrb[109].mxu1  ;;  %v9567_v59 = vpop.f32.mrb[110].mxu0 }
 0x60d   : > { %12230 = vst [vmem:[%s18491_s19 + $0x258] sm:$0xff] %v13613_v27  ;;  %v11289_v49 = vsel %vm10735_vm3, %v13896_v34, %v11033_v17  ;;  %v13834_v15 = vadd.f32 %v9553_v41, %v19727_v44  ;;  %v13898_v46 = vadd.f32 %v10518_v21, %v19729_v14  ;;  %v13835_v5 = vadd.f32 %v9555_v55, %v19731_v4  ;;  %v19965_v29 = vpop.f32.mrb[110].mxu1  ;;  %v19967_v6 = vpop.f32.mrb[111].mxu0 }
 0x60e   : > { %v11288_v13 = vsel %vm10734_vm4, %v13833_v9, %v11032_v2  ;;  %v11290_v61 = vsel %vm10736_vm5, %v13897_v62, %v11034_v12  ;;  %v13899_v0 = vadd.f32 %v10520_v3, %v19738_v23  ;;  %v13836_v63 = vadd.f32 %v9557_v58, %v19727_v44  ;;  %v19971_v48 = vpop.f32.mrb[111].mxu1 }
 0x60f   : > { %v13616_v36 = vpack.c.bf16 %v11288_v13, %v11287_v31  ;;  %v13617_v50 = vpack.c.bf16 %v11290_v61, %v11289_v49  ;;  %vm10741_vm6 = vcmp.ge.f32.partialorder %v13834_v15, 0.0  ;;  %v11039_v41 = vmul.f32 %v13834_v15, %v19736_v24 }
 0x610   : > { %vm10743_vm7 = vcmp.ge.f32.partialorder %v13898_v46, 0.0  ;;  %v11041_v47 = vmul.f32 %v13898_v46, %v19740_v45  ;;  %vm10742_vm8 = vcmp.ge.f32.partialorder %v13835_v5, 0.0  ;;  %v11040_v39 = vmul.f32 %v13835_v5, %v19742_v32 }
 0x611   : > { %12233 = vst [vmem:[%s18491_s19 + $0x270] sm:$0xff] %v13616_v36  ;;  %12234 = vst [vmem:[%s18491_s19 + $0x278] sm:$0xff] %v13617_v50  ;;  %v11295_v21 = vsel %vm10741_vm6, %v13834_v15, %v11039_v41  ;;  %vm10744_vm9 = vcmp.ge.f32.partialorder %v13899_v0, 0.0  ;;  %v11042_v55 = vmul.f32 %v13899_v0, %v19745_v40  ;;  %vm10749_vm10 = vcmp.ge.f32.partialorder %v13836_v63, 0.0 }
 0x612   : > { %v11297_v56 = vsel %vm10743_vm7, %v13898_v46, %v11041_v47  ;;  %v11296_v54 = vsel %vm10742_vm8, %v13835_v5, %v11040_v39  ;;  %v11047_v52 = vmul.f32 %v13836_v63, %v19736_v24  ;;  %v13900_v19 = vadd.f32 %v19937_v28, %v19729_v14  ;;  %v19982_v3 = vpop.f32.mrb[112].mxu0 }
 0x613   : > { %v13620_v58 = vpack.c.bf16 %v11296_v54, %v11295_v21  ;;  %v11298_v10 = vsel %vm10744_vm9, %v13899_v0, %v11042_v55  ;;  %v13837_v25 = vadd.f32 %v19939_v30, %v19731_v4  ;;  %v13901_v53 = vadd.f32 %v19942_v20, %v19738_v23  ;;  %v19988_v11 = vpop.f32.mrb[112].mxu1  ;;  %v19990_v8 = vpop.f32.mrb[113].mxu0 }
 0x614   : > { %v13621_v43 = vpack.c.bf16 %v11298_v10, %v11297_v56  ;;  %v11303_v42 = vsel %vm10749_vm10, %v13836_v63, %v11047_v52  ;;  %vm10751_vm11 = vcmp.ge.f32.partialorder %v13900_v19, 0.0  ;;  %v11049_v28 = vmul.f32 %v13900_v19, %v19740_v45  ;;  %v19993_v37 = vpop.f32.mrb[113].mxu1  ;;  %v19995_v7 = vpop.f32.mrb[114].mxu0 }
 0x615   : > { %12237 = vst [vmem:[%s18491_s19 + $0x290] sm:$0xff] %v13620_v58  ;;  %vm10750_vm12 = vcmp.ge.f32.partialorder %v13837_v25, 0.0  ;;  %v11048_v30 = vmul.f32 %v13837_v25, %v19742_v32  ;;  %vm10752_vm13 = vcmp.ge.f32.partialorder %v13901_v53, 0.0  ;;  %v11050_v20 = vmul.f32 %v13901_v53, %v19745_v40  ;;  %v20000_v60 = vpop.f32.mrb[114].mxu1  ;;  %v20002_v33 = vpop.f32.mrb[115].mxu0 }
 0x616   : > { %12238 = vst [vmem:[%s18491_s19 + $0x298] sm:$0xff] %v13621_v43  ;;  %v11305_v22 = vsel %vm10751_vm11, %v13900_v19, %v11049_v28  ;;  %v13838_v1 = vadd.f32 %v19955_v38, %v19727_v44  ;;  %v13902_v35 = vadd.f32 %v10528_v51, %v19729_v14  ;;  %v13839_v34 = vadd.f32 %v9565_v57, %v19731_v4  ;;  %v20009_v18 = vpop.f32.mrb[115].mxu1 }
 0x617   : > { %v11304_v26 = vsel %vm10750_vm12, %v13837_v25, %v11048_v30  ;;  %v11306_v9 = vsel %vm10752_vm13, %v13901_v53, %v11050_v20  ;;  %v13903_v62 = vadd.f32 %v10530_v16, %v19738_v23  ;;  %v13840_v27 = vadd.f32 %v9567_v59, %v19727_v44 }
 0x618   : > { %v13624_v31 = vpack.c.bf16 %v11304_v26, %v11303_v42  ;;  %v13625_v17 = vpack.c.bf16 %v11306_v9, %v11305_v22  ;;  %vm10757_vm14 = vcmp.ge.f32.partialorder %v13838_v1, 0.0  ;;  %v11055_v2 = vmul.f32 %v13838_v1, %v19736_v24 }
 0x619   : > { %vm10759_vm15 = vcmp.ge.f32.partialorder %v13902_v35, 0.0  ;;  %v11057_v38 = vmul.f32 %v13902_v35, %v19740_v45  ;;  %vm10758_vm0 = vcmp.ge.f32.partialorder %v13839_v34, 0.0  ;;  %v11056_v51 = vmul.f32 %v13839_v34, %v19742_v32 }
 0x61a   : > { %12241 = vst [vmem:[%s18491_s19 + $0x2b0] sm:$0xff] %v13624_v31  ;;  %12242 = vst [vmem:[%s18491_s19 + $0x2b8] sm:$0xff] %v13625_v17  ;;  %v11311_v57 = vsel %vm10757_vm14, %v13838_v1, %v11055_v2  ;;  %vm10760_vm1 = vcmp.ge.f32.partialorder %v13903_v62, 0.0  ;;  %v11058_v12 = vmul.f32 %v13903_v62, %v19745_v40  ;;  %vm10765_vm2 = vcmp.ge.f32.partialorder %v13840_v27, 0.0  ;;  %v20019_v16 = vpop.f32.mrb[116].mxu0 }
 0x61b   : > { %v11313_v59 = vsel %vm10759_vm15, %v13902_v35, %v11057_v38  ;;  %v11312_v49 = vsel %vm10758_vm0, %v13839_v34, %v11056_v51  ;;  %v11063_v15 = vmul.f32 %v13840_v27, %v19736_v24  ;;  %v13904_v46 = vadd.f32 %v19965_v29, %v19729_v14  ;;  %v20024_v5 = vpop.f32.mrb[116].mxu1  ;;  %v20026_v13 = vpop.f32.mrb[117].mxu0 }
 0x61c   : > { %v13628_v61 = vpack.c.bf16 %v11312_v49, %v11311_v57  ;;  %v11314_v0 = vsel %vm10760_vm1, %v13903_v62, %v11058_v12  ;;  %v13841_v63 = vadd.f32 %v19967_v6, %v19731_v4  ;;  %v13905_v36 = vadd.f32 %v19971_v48, %v19738_v23  ;;  %v20032_v50 = vpop.f32.mrb[117].mxu1  ;;  %v20034_v41 = vpop.f32.mrb[118].mxu0 }
 0x61d   : > { %v13629_v47 = vpack.c.bf16 %v11314_v0, %v11313_v59  ;;  %v11319_v39 = vsel %vm10765_vm2, %v13840_v27, %v11063_v15  ;;  %vm10767_vm3 = vcmp.ge.f32.partialorder %v13904_v46, 0.0  ;;  %v11065_v29 = vmul.f32 %v13904_v46, %v19740_v45  ;;  %v20037_v21 = vpop.f32.mrb[118].mxu1  ;;  %v20039_v55 = vpop.f32.mrb[119].mxu0 }
 0x61e   : > { %12245 = vst [vmem:[%s18491_s19 + $0x2d0] sm:$0xff] %v13628_v61  ;;  %vm10766_vm4 = vcmp.ge.f32.partialorder %v13841_v63, 0.0  ;;  %v11064_v6 = vmul.f32 %v13841_v63, %v19742_v32  ;;  %vm10768_vm5 = vcmp.ge.f32.partialorder %v13905_v36, 0.0  ;;  %v11066_v48 = vmul.f32 %v13905_v36, %v19745_v40  ;;  %v20044_v56 = vpop.f32.mrb[119].mxu1 }
 0x61f   : > { %12246 = vst [vmem:[%s18491_s19 + $0x2d8] sm:$0xff] %v13629_v47  ;;  %v11321_v54 = vsel %vm10767_vm3, %v13904_v46, %v11065_v29  ;;  %v13842_v52 = vadd.f32 %v19982_v3, %v19727_v44  ;;  %v13906_v19 = vadd.f32 %v19988_v11, %v19729_v14  ;;  %v13843_v58 = vadd.f32 %v19990_v8, %v19731_v4 }
 0x620   : > { %v11320_v10 = vsel %vm10766_vm4, %v13841_v63, %v11064_v6  ;;  %v11322_v25 = vsel %vm10768_vm5, %v13905_v36, %v11066_v48  ;;  %v13907_v53 = vadd.f32 %v19993_v37, %v19738_v23  ;;  %v13844_v43 = vadd.f32 %v19995_v7, %v19727_v44 }
 0x621   : > { %v13632_v42 = vpack.c.bf16 %v11320_v10, %v11319_v39  ;;  %v13633_v28 = vpack.c.bf16 %v11322_v25, %v11321_v54  ;;  %vm10773_vm6 = vcmp.ge.f32.partialorder %v13842_v52, 0.0  ;;  %v11071_v3 = vmul.f32 %v13842_v52, %v19736_v24 }
 0x622   : > { %vm10775_vm7 = vcmp.ge.f32.partialorder %v13906_v19, 0.0  ;;  %v11073_v11 = vmul.f32 %v13906_v19, %v19740_v45  ;;  %vm10774_vm8 = vcmp.ge.f32.partialorder %v13843_v58, 0.0  ;;  %v11072_v30 = vmul.f32 %v13843_v58, %v19742_v32  ;;  %v20060_v8 = vpop.f32.mrb[120].mxu0 }
 0x623   : > { %12249 = vst [vmem:[%s18491_s19 + $0x2f0] sm:$0xff] %v13632_v42  ;;  %12250 = vst [vmem:[%s18491_s19 + $0x2f8] sm:$0xff] %v13633_v28  ;;  %v11327_v20 = vsel %vm10773_vm6, %v13842_v52, %v11071_v3  ;;  %vm10776_vm9 = vcmp.ge.f32.partialorder %v13907_v53, 0.0  ;;  %v11074_v37 = vmul.f32 %v13907_v53, %v19745_v40  ;;  %vm10781_vm10 = vcmp.ge.f32.partialorder %v13844_v43, 0.0  ;;  %v20065_v7 = vpop.f32.mrb[120].mxu1  ;;  %v20067_v22 = vpop.f32.mrb[121].mxu0 }
 0x624   : > { %v11329_v1 = vsel %vm10775_vm7, %v13906_v19, %v11073_v11  ;;  %v11328_v35 = vsel %vm10774_vm8, %v13843_v58, %v11072_v30  ;;  %v11079_v34 = vmul.f32 %v13844_v43, %v19736_v24  ;;  %v13908_v26 = vadd.f32 %v20000_v60, %v19729_v14  ;;  %v20072_v9 = vpop.f32.mrb[121].mxu1  ;;  %v20074_v62 = vpop.f32.mrb[122].mxu0 }
 0x625   : > { %v13636_v27 = vpack.c.bf16 %v11328_v35, %v11327_v20  ;;  %v11330_v31 = vsel %vm10776_vm9, %v13907_v53, %v11074_v37  ;;  %v13845_v17 = vadd.f32 %v20002_v33, %v19731_v4  ;;  %v13909_v2 = vadd.f32 %v20009_v18, %v19738_v23  ;;  %v20080_v38 = vpop.f32.mrb[122].mxu1  ;;  %v20082_v51 = vpop.f32.mrb[123].mxu0 }
 0x626   : > { %v13637_v57 = vpack.c.bf16 %v11330_v31, %v11329_v1  ;;  %v11335_v60 = vsel %vm10781_vm10, %v13844_v43, %v11079_v34  ;;  %vm10783_vm11 = vcmp.ge.f32.partialorder %v13908_v26, 0.0  ;;  %v11081_v12 = vmul.f32 %v13908_v26, %v19740_v45  ;;  %v20086_v59 = vpop.f32.mrb[123].mxu1 }
 0x627   : > { %12253 = vst [vmem:[%s18491_s19 + $0x310] sm:$0xff] %v13636_v27  ;;  %vm10782_vm12 = vcmp.ge.f32.partialorder %v13845_v17, 0.0  ;;  %v11080_v49 = vmul.f32 %v13845_v17, %v19742_v32  ;;  %vm10784_vm13 = vcmp.ge.f32.partialorder %v13909_v2, 0.0  ;;  %v11082_v33 = vmul.f32 %v13909_v2, %v19745_v40 }
 0x628   : > { %12254 = vst [vmem:[%s18491_s19 + $0x318] sm:$0xff] %v13637_v57  ;;  %v11337_v18 = vsel %vm10783_vm11, %v13908_v26, %v11081_v12  ;;  %v13846_v15 = vadd.f32 %v20019_v16, %v19727_v44  ;;  %v13910_v46 = vadd.f32 %v20024_v5, %v19729_v14  ;;  %v13847_v61 = vadd.f32 %v20026_v13, %v19731_v4 }
 0x629   : > { %v11336_v0 = vsel %vm10782_vm12, %v13845_v17, %v11080_v49  ;;  %v11338_v63 = vsel %vm10784_vm13, %v13909_v2, %v11082_v33  ;;  %v13911_v36 = vadd.f32 %v20032_v50, %v19738_v23  ;;  %v13848_v47 = vadd.f32 %v20034_v41, %v19727_v44 }
 0x62a   : > { %v13640_v39 = vpack.c.bf16 %v11336_v0, %v11335_v60  ;;  %v13641_v29 = vpack.c.bf16 %v11338_v63, %v11337_v18  ;;  %vm10789_vm14 = vcmp.ge.f32.partialorder %v13846_v15, 0.0  ;;  %v11087_v16 = vmul.f32 %v13846_v15, %v19736_v24  ;;  %v20103_v6 = vpop.f32.mrb[124].mxu0 }
 0x62b   : > { %vm10791_vm15 = vcmp.ge.f32.partialorder %v13910_v46, 0.0  ;;  %v11089_v5 = vmul.f32 %v13910_v46, %v19740_v45  ;;  %vm10790_vm0 = vcmp.ge.f32.partialorder %v13847_v61, 0.0  ;;  %v11088_v13 = vmul.f32 %v13847_v61, %v19742_v32  ;;  %v20107_v48 = vpop.f32.mrb[124].mxu1  ;;  %v20109_v54 = vpop.f32.mrb[125].mxu0 }
 0x62c   : > { %12257 = vst [vmem:[%s18491_s19 + $0x330] sm:$0xff] %v13640_v39  ;;  %12258 = vst [vmem:[%s18491_s19 + $0x338] sm:$0xff] %v13641_v29  ;;  %v11343_v50 = vsel %vm10789_vm14, %v13846_v15, %v11087_v16  ;;  %vm10792_vm1 = vcmp.ge.f32.partialorder %v13911_v36, 0.0  ;;  %v11090_v41 = vmul.f32 %v13911_v36, %v19745_v40  ;;  %vm10797_vm2 = vcmp.ge.f32.partialorder %v13848_v47, 0.0  ;;  %v20114_v52 = vpop.f32.mrb[125].mxu1  ;;  %v20116_v19 = vpop.f32.mrb[126].mxu0 }
 0x62d   : > { %v11345_v58 = vsel %vm10791_vm15, %v13910_v46, %v11089_v5  ;;  %v11344_v10 = vsel %vm10790_vm0, %v13847_v61, %v11088_v13  ;;  %v11095_v25 = vmul.f32 %v13848_v47, %v19736_v24  ;;  %v13912_v53 = vadd.f32 %v20037_v21, %v19729_v14  ;;  %v20121_v43 = vpop.f32.mrb[126].mxu1  ;;  %v20123_v42 = vpop.f32.mrb[127].mxu0 }
 0x62e   : > { %v13644_v28 = vpack.c.bf16 %v11344_v10, %v11343_v50  ;;  %v11346_v3 = vsel %vm10792_vm1, %v13911_v36, %v11090_v41  ;;  %v13849_v11 = vadd.f32 %v20039_v55, %v19731_v4  ;;  %v13913_v30 = vadd.f32 %v20044_v56, %v19738_v23  ;;  %v20129_v20 = vpop.f32.mrb[127].mxu1 }
 0x62f   : > { %v13645_v37 = vpack.c.bf16 %v11346_v3, %v11345_v58  ;;  %v11351_v1 = vsel %vm10797_vm2, %v13848_v47, %v11095_v25  ;;  %vm10799_vm3 = vcmp.ge.f32.partialorder %v13912_v53, 0.0  ;;  %v11097_v21 = vmul.f32 %v13912_v53, %v19740_v45 }
 0x630   : > { %12261 = vst [vmem:[%s18491_s19 + $0x350] sm:$0xff] %v13644_v28  ;;  %vm10798_vm4 = vcmp.ge.f32.partialorder %v13849_v11, 0.0  ;;  %v11096_v35 = vmul.f32 %v13849_v11, %v19742_v32  ;;  %vm10800_vm5 = vcmp.ge.f32.partialorder %v13913_v30, 0.0  ;;  %v11098_v34 = vmul.f32 %v13913_v30, %v19745_v40 }
 0x631   : > { %12262 = vst [vmem:[%s18491_s19 + $0x358] sm:$0xff] %v13645_v37  ;;  %v11353_v26 = vsel %vm10799_vm3, %v13912_v53, %v11097_v21  ;;  %v13850_v55 = vadd.f32 %v20060_v8, %v19727_v44  ;;  %v13914_v56 = vadd.f32 %v20065_v7, %v19729_v14  ;;  %v13851_v27 = vadd.f32 %v20067_v22, %v19731_v4 }
 0x632   : > { %v11352_v31 = vsel %vm10798_vm4, %v13849_v11, %v11096_v35  ;;  %v11354_v17 = vsel %vm10800_vm5, %v13913_v30, %v11098_v34  ;;  %v13915_v2 = vadd.f32 %v20072_v9, %v19738_v23  ;;  %v13852_v57 = vadd.f32 %v20074_v62, %v19727_v44 }
 0x633   : > { %v13648_v60 = vpack.c.bf16 %v11352_v31, %v11351_v1  ;;  %v13649_v12 = vpack.c.bf16 %v11354_v17, %v11353_v26  ;;  %vm10805_vm6 = vcmp.ge.f32.partialorder %v13850_v55, 0.0  ;;  %v11103_v8 = vmul.f32 %v13850_v55, %v19736_v24 }
 0x634   : > { %vm10807_vm7 = vcmp.ge.f32.partialorder %v13914_v56, 0.0  ;;  %v11105_v49 = vmul.f32 %v13914_v56, %v19740_v45  ;;  %vm10806_vm8 = vcmp.ge.f32.partialorder %v13851_v27, 0.0  ;;  %v11104_v7 = vmul.f32 %v13851_v27, %v19742_v32 }
 0x635   : > { %12265 = vst [vmem:[%s18491_s19 + $0x370] sm:$0xff] %v13648_v60  ;;  %12266 = vst [vmem:[%s18491_s19 + $0x378] sm:$0xff] %v13649_v12  ;;  %v11359_v22 = vsel %vm10805_vm6, %v13850_v55, %v11103_v8  ;;  %vm10808_vm9 = vcmp.ge.f32.partialorder %v13915_v2, 0.0  ;;  %v11106_v9 = vmul.f32 %v13915_v2, %v19745_v40  ;;  %vm10813_vm10 = vcmp.ge.f32.partialorder %v13852_v57, 0.0 }
 0x636   : > { %v11361_v62 = vsel %vm10807_vm7, %v13914_v56, %v11105_v49  ;;  %v11360_v33 = vsel %vm10806_vm8, %v13851_v27, %v11104_v7  ;;  %v11111_v18 = vmul.f32 %v13852_v57, %v19736_v24  ;;  %v13916_v15 = vadd.f32 %v20080_v38, %v19729_v14 }
 0x637   : > { %v13652_v46 = vpack.c.bf16 %v11360_v33, %v11359_v22  ;;  %v11362_v61 = vsel %vm10808_vm9, %v13915_v2, %v11106_v9  ;;  %v13853_v0 = vadd.f32 %v20082_v51, %v19731_v4  ;;  %v13917_v63 = vadd.f32 %v20086_v59, %v19738_v23 }
 0x638   : > { %v13653_v36 = vpack.c.bf16 %v11362_v61, %v11361_v62  ;;  %v11367_v47 = vsel %vm10813_vm10, %v13852_v57, %v11111_v18  ;;  %vm10815_vm11 = vcmp.ge.f32.partialorder %v13916_v15, 0.0  ;;  %v11113_v39 = vmul.f32 %v13916_v15, %v19740_v45 }
 0x639   : > { %12269 = vst [vmem:[%s18491_s19 + $0x390] sm:$0xff] %v13652_v46  ;;  %vm10814_vm12 = vcmp.ge.f32.partialorder %v13853_v0, 0.0  ;;  %v11112_v29 = vmul.f32 %v13853_v0, %v19742_v32  ;;  %vm10816_vm13 = vcmp.ge.f32.partialorder %v13917_v63, 0.0  ;;  %v11114_v38 = vmul.f32 %v13917_v63, %v19745_v40 }
 0x63a   : > { %12270 = vst [vmem:[%s18491_s19 + $0x398] sm:$0xff] %v13653_v36  ;;  %v11369_v16 = vsel %vm10815_vm11, %v13916_v15, %v11113_v39  ;;  %v13854_v51 = vadd.f32 %v20103_v6, %v19727_v44  ;;  %v13918_v59 = vadd.f32 %v20107_v48, %v19729_v14  ;;  %v13855_v5 = vadd.f32 %v20109_v54, %v19731_v4 }
 0x63b   : > { %v11368_v13 = vsel %vm10814_vm12, %v13853_v0, %v11112_v29  ;;  %v11370_v50 = vsel %vm10816_vm13, %v13917_v63, %v11114_v38  ;;  %v13919_v41 = vadd.f32 %v20114_v52, %v19738_v23  ;;  %v13856_v58 = vadd.f32 %v20116_v19, %v19727_v44 }
 0x63c   : > { %v13656_v10 = vpack.c.bf16 %v11368_v13, %v11367_v47  ;;  %v13657_v25 = vpack.c.bf16 %v11370_v50, %v11369_v16  ;;  %vm10821_vm14 = vcmp.ge.f32.partialorder %v13854_v51, 0.0  ;;  %v11119_v6 = vmul.f32 %v13854_v51, %v19736_v24 }
 0x63d   : > { %vm10823_vm15 = vcmp.ge.f32.partialorder %v13918_v59, 0.0  ;;  %v11121_v53 = vmul.f32 %v13918_v59, %v19740_v45  ;;  %vm10822_vm0 = vcmp.ge.f32.partialorder %v13855_v5, 0.0  ;;  %v11120_v48 = vmul.f32 %v13855_v5, %v19742_v32 }
 0x63e   : > { %12273 = vst [vmem:[%s18491_s19 + $0x3b0] sm:$0xff] %v13656_v10  ;;  %12274 = vst [vmem:[%s18491_s19 + $0x3b8] sm:$0xff] %v13657_v25  ;;  %v11375_v54 = vsel %vm10821_vm14, %v13854_v51, %v11119_v6  ;;  %vm10824_vm1 = vcmp.ge.f32.partialorder %v13919_v41, 0.0  ;;  %v11122_v52 = vmul.f32 %v13919_v41, %v19745_v40  ;;  %vm10829_vm2 = vcmp.ge.f32.partialorder %v13856_v58, 0.0 }
 0x63f   : > { %v11377_v44 = vsel %vm10823_vm15, %v13918_v59, %v11121_v53  ;;  %v11376_v19 = vsel %vm10822_vm0, %v13855_v5, %v11120_v48  ;;  %v11127_v28 = vmul.f32 %v13856_v58, %v19736_v24  ;;  %v13920_v3 = vadd.f32 %v20121_v43, %v19729_v14 }
 0x640   : > { %v13660_v11 = vpack.c.bf16 %v11376_v19, %v11375_v54  ;;  %v11378_v30 = vsel %vm10824_vm1, %v13919_v41, %v11122_v52  ;;  %v13857_v37 = vadd.f32 %v20123_v42, %v19731_v4  ;;  %v13921_v1 = vadd.f32 %v20129_v20, %v19738_v23 }
 0x641   : > { %v13661_v21 = vpack.c.bf16 %v11378_v30, %v11377_v44  ;;  %v11383_v35 = vsel %vm10829_vm2, %v13856_v58, %v11127_v28  ;;  %vm10831_vm3 = vcmp.ge.f32.partialorder %v13920_v3, 0.0  ;;  %v11129_v34 = vmul.f32 %v13920_v3, %v19740_v45 }
 0x642   : > { %12277 = vst [vmem:[%s18491_s19 + $0x3d0] sm:$0xff] %v13660_v11  ;;  %vm10830_vm4 = vcmp.ge.f32.partialorder %v13857_v37, 0.0  ;;  %v11128_v24 = vmul.f32 %v13857_v37, %v19742_v32  ;;  %vm10832_vm5 = vcmp.ge.f32.partialorder %v13921_v1, 0.0  ;;  %v11130_v14 = vmul.f32 %v13921_v1, %v19745_v40 }
 0x643   : > { %12278 = vst [vmem:[%s18491_s19 + $0x3d8] sm:$0xff] %v13661_v21  ;;  %v11385_v43 = vsel %vm10831_vm3, %v13920_v3, %v11129_v34 }
 0x644   : > { %v11384_v4 = vsel %vm10830_vm4, %v13857_v37, %v11128_v24  ;;  %v11386_v42 = vsel %vm10832_vm5, %v13921_v1, %v11130_v14 }
 0x645   : > { %v13664_v26 = vpack.c.bf16 %v11384_v4, %v11383_v35  ;;  %v13665_v23 = vpack.c.bf16 %v11386_v42, %v11385_v43 }
 0x647   : > { %12281 = vst [vmem:[%s18491_s19 + $0x3f0] sm:$0xff] %v13664_v26  ;;  %12282 = vst [vmem:[%s18491_s19 + $0x3f8] sm:$0xff] %v13665_v23 }
 0x648 PF: > { %s14_s17 = sadd.s32 1, %s15092_s17   ;;  %s20593_s15 = smov %s15088_s16 }
 0x649   : > { %p11_p5 = scmp.ge.s32.totalorder %s14_s17, 4   ;;  %s20594_s16 = smov %s20596_s18 }
 0x64b   :  { %13 = sbr.rel (!%p11_p5) target bundleno = 2 (0x2), region = 68 }

</bundles_post_ra>
